<compile_context>
chip_gen: v7x
topology: tpu7x:2x2x1
jax: 0.10.0
libtpu: 0.0.40
codegen_flags: <defaults>
</compile_context>

<pallas_src>
import jax
import jax.numpy as jnp
from jax.experimental import pallas as pl
from jax.experimental.pallas import tpu as pltpu


# ----------------------------------------------------------------------------
# Fused Pallas kernel: 1x1-conv stack + baseline head for one tile of samples.
# ----------------------------------------------------------------------------
def _impala_head_kernel(x_ref, w1_ref, b1_ref, w2_ref, b2_ref, w3_ref, b3_ref,
                        bw_ref, bb_ref, logits_ref, baseline_ref):
    """x_ref: (tile, cin*H*W) raw NCHW sample rows.

    logits_ref:   (tile, H*W*cell_disc)  core_output == policy logits (Identity)
    baseline_ref: (tile, 1)              nn.Linear(core_output_size, 1)
    """
    cdt = w1_ref.dtype                              # bf16 matmul operands
    rows = x_ref.shape[0]
    n_out = logits_ref.shape[1]

    # conv1 (1x1) + ReLU.  1/obs_high normalization already folded into w1.
    x = x_ref[...].astype(cdt)
    h1 = jnp.dot(x, w1_ref[...], preferred_element_type=jnp.float32) + b1_ref[...]
    h1 = jnp.maximum(h1, 0.0)                       # (tile, hw*hidden) f32

    # conv2: block-diagonal, chunked to the MXU width (one 256x256 tile reused
    # for every 256-lane column chunk of h), fused with the matching K-slice of
    # conv3 so the full-width h2 intermediate never materializes.
    w2 = w2_ref[...]                                # (g*hidden, g*hidden)
    b2 = b2_ref[...]                                # (1, g*hidden)
    cc = w2_ref.shape[0]                            # chunk width in lanes
    n_chunks = h1.shape[1] // cc
    acc = jnp.zeros((rows, n_out), jnp.float32) + b3_ref[...]
    for c in range(n_chunks):                       # static unroll (8 chunks)
        lo = c * cc
        h1c = h1[:, lo:lo + cc].astype(cdt)         # lane-aligned 256-wide view
        h2c = jnp.dot(h1c, w2, preferred_element_type=jnp.float32) + b2
        h2c = jnp.maximum(h2c, 0.0).astype(cdt)
        acc = acc + jnp.dot(h2c, w3_ref[lo:lo + cc, :],
                            preferred_element_type=jnp.float32)

    # conv3 output is the core_output row, already in torch's
    # flatten(permute(0, 2, 3, 1)) order -> lane-dense (tile, 128) store.
    logits_ref[...] = acc.astype(logits_ref.dtype)

    # Baseline head: VPU multiply + cross-lane (XLU) reduction, no N=1 MXU pass.
    baseline_ref[...] = (jnp.sum(acc * bw_ref[...], axis=-1, keepdims=True)
                         + bb_ref[...])


# ----------------------------------------------------------------------------
# pallas_call wrapper
# ----------------------------------------------------------------------------
def _pick_tile(tb, tile_rows):
    """Sample-axis tile: large for pipeline amortization, sublane-aligned, and
    capped so the 'parallel' grid has >= 2 steps when TB allows it (v7x has two
    TensorCores sharing that axis)."""
    tile = min(tile_rows, tb)
    if tb >= 16:
        half = -(-tb // 2)                  # cdiv(tb, 2)
        half = -(-half // 8) * 8            # round up to a sublane multiple
        tile = min(tile, half)
        tile = max(8, (tile // 8) * 8)
    return max(tile, 1)


def impala_head(x_rows, bp, *, tile_rows=512):
    """x_rows: (TB, cin*H*W) raw NCHW rows (native dtype).  bp: expanded params."""
    tb, k = x_rows.shape
    kmid = bp["w1"].shape[1]                       # hw*hidden
    cc = bp["w2"].shape[0]                         # conv2 chunk width (g*hidden)
    n_out = bp["w3"].shape[1]                      # hw*cell_disc (== 128 here)
    tile = _pick_tile(tb, tile_rows)               # sweep knob: 128/256/512
    grid = (pl.cdiv(tb, tile),)

    weights = (bp["w1"], bp["b1"], bp["w2"], bp["b2"],
               bp["w3"], bp["b3"], bp["bw"], bp["bb"])

    flops = 2 * tb * (k * kmid + kmid * cc + kmid * n_out + n_out)
    bytes_accessed = (x_rows.size * x_rows.dtype.itemsize
                      + tb * n_out * 4 + tb * 4
                      + sum(int(v.size) * v.dtype.itemsize for v in weights))

    def row_spec(width):
        return pl.BlockSpec((tile, width), lambda i: (i, 0))

    def build(single_buffer_weights):
        def const_spec(arr):                       # resident across grid steps
            r, c = arr.shape
            if single_buffer_weights:
                # Constant index_map -> one buffer suffices; default pipelining
                # would double-buffer every resident weight for no benefit.
                return pl.BlockSpec((r, c), lambda i: (0, 0),
                                    pipeline_mode=pl.Buffered(1))
            return pl.BlockSpec((r, c), lambda i: (0, 0))

        return pl.pallas_call(
            _impala_head_kernel,
            grid=grid,
            in_specs=[row_spec(k)] + [const_spec(w) for w in weights],
            out_specs=[row_spec(n_out), row_spec(1)],
            out_shape=[
                jax.ShapeDtypeStruct((tb, n_out), jnp.float32),
                jax.ShapeDtypeStruct((tb, 1), jnp.float32),
            ],
            compiler_params=pltpu.CompilerParams(
                dimension_semantics=("parallel",),
                # Right-sized: post-shrink working set is < 8 MiB; 32 MiB (== the
                # v6e/v7x scoped default) leaves headroom on v7x's 64 MiB physical
                # VMEM and covers larger tile_rows sweeps on v5e/v6e.
                vmem_limit_bytes=32 * 1024 * 1024,
            ),
            cost_estimate=pl.CostEstimate(flops=int(flops), transcendentals=0,
                                          bytes_accessed=int(bytes_accessed)),
        )

    try:
        return build(True)(x_rows, *weights)
    except Exception:
        # Some Pallas builds reject pipeline_mode=pl.Buffered(1); fall back to
        # default buffering (only ~1.7 MiB extra VMEM after the W2 shrink).
        return build(False)(x_rows, *weights)


# ----------------------------------------------------------------------------
# Parameter expansion: fold the 1x1-conv stack into per-sample dense GEMMs.
# ----------------------------------------------------------------------------
def expand_params(params, hw, obs_high, *, chunk_pixels=8):
    """W1_big[c*hw+p', p*hid+o]   = w1[c,o]/obs_high * d(p',p)        (256x2048)
       W2_blk[u*hid+q, v*hid+r]   = w2[q,r] * d(u,v),  u,v < g        (256x256,
           one block-diagonal tile reused for every g-pixel chunk of h)
       W3_big[p'*hid+q, p*cell+d] = w3[q,d] * d(p',p)                 (2048x128)
    so row @ W1_big, chunked @ W2_blk, chunked @ W3_big reproduces the 1x1 convs
    on an NCHW row and emits core_output in flatten(permute(0,2,3,1)) order."""
    w1, b1 = params["w1"], params["b1"]
    w2, b2 = params["w2"], params["b2"]
    w3, b3 = params["w3"], params["b3"]
    cin, hidden = w1.shape
    cell = w3.shape[1]

    g = min(chunk_pixels, hw)                      # pixels per conv2 chunk
    while hw % g:                                  # largest divisor of hw <= 8
        g -= 1

    eye_hw = jnp.eye(hw, dtype=jnp.float32)
    eye_g = jnp.eye(g, dtype=jnp.float32)

    w1n = w1 * (1.0 / obs_high)    # must equal observation_space.high.max()
    w1_big = (w1n[:, None, None, :] * eye_hw[None, :, :, None]
              ).reshape(cin * hw, hw * hidden)
    w2_blk = (eye_g[:, None, :, None] * w2[None, :, None, :]
              ).reshape(g * hidden, g * hidden)
    w3_big = (eye_hw[:, None, :, None] * w3[None, :, None, :]
              ).reshape(hw * hidden, hw * cell)

    return dict(
        w1=w1_big.astype(jnp.bfloat16),
        b1=jnp.tile(b1.reshape(1, hidden), (1, hw)).astype(jnp.float32),
        w2=w2_blk.astype(jnp.bfloat16),
        b2=jnp.tile(b2.reshape(1, hidden), (1, g)).astype(jnp.float32),
        w3=w3_big.astype(jnp.bfloat16),
        b3=jnp.tile(b3.reshape(1, cell), (1, hw)).astype(jnp.float32),
        bw=params["bw"].reshape(1, -1).astype(jnp.float32),   # row for VPU reduce
        bb=params["bb"].reshape(1, 1).astype(jnp.float32),
    )


# ----------------------------------------------------------------------------
# ImpalaNet forward (no LSTM, policy == Identity, eval-mode argmax action)
# ----------------------------------------------------------------------------
def impala_net_forward(big_params, inputs, current_action_size):
    frame = inputs["frame"]                        # (T, B, C0, C1, H, W)
    T, B, C0, C1, H, W = frame.shape
    tb = T * B
    # torch.flatten(x,0,1); torch.flatten(x,1,2) and trailing dims -> pure
    # metadata reshape, streamed in the frame's native dtype (the in-kernel cast
    # plus the 1/obs_high fold into W1 reproduce x.float()/high exactly).
    x_rows = frame.reshape(tb, C0 * C1 * H * W)

    policy_logits, baseline = impala_head(x_rows, big_params)   # (TB,128),(TB,1)
    num_actions = policy_logits.shape[1]           # policy = nn.Identity()

    # eval-mode action = argmax over the current action-space subset
    # (current_action_size must be a static Python int under jit).
    # TODO(synk): training-mode torch.multinomial sampling not implemented.
    action = jnp.argmax(policy_logits[:, :current_action_size], axis=1)

    out = dict(
        policy_logits=policy_logits.reshape(T, B, num_actions),
        baseline=baseline.reshape(T, B),
        action=action.reshape(T, B),
    )
    return out, tuple()


# ----------------------------------------------------------------------------
# Deterministic parameter init (shapes from __init__; synthetic weights)
# ----------------------------------------------------------------------------
def init_params(key, cin, hidden=32, cell_disc=2, core_output_size=None):
    ks = jax.random.split(key, 8)
    scale = 0.1
    return {
        "w1": scale * jax.random.normal(ks[0], (cin, hidden), jnp.float32),
        "b1": scale * jax.random.normal(ks[1], (1, hidden), jnp.float32),
        "w2": scale * jax.random.normal(ks[2], (hidden, hidden), jnp.float32),
        "b2": scale * jax.random.normal(ks[3], (1, hidden), jnp.float32),
        "w3": scale * jax.random.normal(ks[4], (hidden, cell_disc), jnp.float32),
        "b3": scale * jax.random.normal(ks[5], (1, cell_disc), jnp.float32),
        "bw": scale * jax.random.normal(ks[6], (core_output_size, 1), jnp.float32),
        "bb": scale * jax.random.normal(ks[7], (1, 1), jnp.float32),
    }


# Pure-XLA f32 reference of the original module's math (for a sanity check).
def reference_forward(params, frame, obs_high):
    T, B, C0, C1, H, W = frame.shape
    tb, cin, hw = T * B, C0 * C1, H * W
    x = frame.reshape(tb, cin, hw).astype(jnp.float32) / obs_high
    xp = jnp.transpose(x, (0, 2, 1)).reshape(tb * hw, cin)      # per-pixel rows
    h1 = jnp.maximum(xp @ params["w1"] + params["b1"], 0.0)
    h2 = jnp.maximum(h1 @ params["w2"] + params["b2"], 0.0)
    y = h2 @ params["w3"] + params["b3"]                        # (tb*hw, cell)
    core = y.reshape(tb, hw * params["w3"].shape[1])
    baseline = core @ params["bw"] + params["bb"]
    return core, baseline


# ----------------------------------------------------------------------------
# Main
# ----------------------------------------------------------------------------
if __name__ == "__main__":
    key = jax.random.PRNGKey(0)

    # observation_space.shape = (C0, C1, H, W) = (2, 2, 8, 8), high.max() = 255
    T, B = 2, 2
    C0, C1, H, W = 2, 2, 8, 8
    cin, hw = C0 * C1, H * W
    hidden, cell_disc = 32, 2
    output_size = hw * cell_disc                   # 128 == num_actions here
    current_action_size = output_size
    obs_high = 255.0

    k_frame, k_act, k_rew, k_params = jax.random.split(key, 4)
    frame = jax.random.uniform(k_frame, (T, B, C0, C1, H, W),
                               minval=0.0, maxval=obs_high, dtype=jnp.float32)
    last_action = jax.random.randint(k_act, (T, B), 0, output_size)
    reward = jax.random.normal(k_rew, (T, B), jnp.float32)
    # last_action / reward are only consumed when the cat-to-encoding flags are
    # True, which they are not in this module configuration.

    params = init_params(k_params, cin, hidden=hidden, cell_disc=cell_disc,
                         core_output_size=output_size)
    big_params = expand_params(params, hw, obs_high)

    inputs = {"frame": frame, "last_action": last_action, "reward": reward}
    out, core_state = impala_net_forward(big_params, inputs, current_action_size)
    jax.block_until_ready(out)

    assert out["policy_logits"].shape == (T, B, output_size)
    assert out["baseline"].shape == (T, B)
    assert out["action"].shape == (T, B)

    # Numerical sanity check vs the f32 reference (bf16 matmul operands -> loose
    # tolerance; keep the weights f32 if closer torch parity is ever required).
    ref_logits, ref_baseline = reference_forward(params, frame, obs_high)
    assert jnp.allclose(out["policy_logits"].reshape(T * B, -1), ref_logits,
                        rtol=1e-1, atol=1e-1)
    assert jnp.allclose(out["baseline"].reshape(T * B, 1), ref_baseline,
                        rtol=1e-1, atol=1e-1)

    print("KERNEL_OK")
</pallas_src>

<mosaic_0001>
module attributes {stable_mosaic.version = 11 : i64} {
  func.func @_impala_head_kernel(%arg0: i32, %arg1: memref<4x256xf32, #tpu.memory_space<vmem>>, %arg2: memref<256x2048xbf16, #tpu.memory_space<vmem>>, %arg3: memref<1x2048xf32, #tpu.memory_space<vmem>>, %arg4: memref<256x256xbf16, #tpu.memory_space<vmem>>, %arg5: memref<1x256xf32, #tpu.memory_space<vmem>>, %arg6: memref<2048x128xbf16, #tpu.memory_space<vmem>>, %arg7: memref<1x128xf32, #tpu.memory_space<vmem>>, %arg8: memref<1x128xf32, #tpu.memory_space<vmem>>, %arg9: memref<1x1xf32, #tpu.memory_space<vmem>>, %arg10: memref<4x128xf32, #tpu.memory_space<vmem>>, %arg11: memref<4x1xf32, #tpu.memory_space<vmem>>) attributes {dimension_semantics = [#tpu.dimension_semantics<parallel>], iteration_bounds = array<i64: 1>, scalar_prefetch = 0 : i64, scratch_operands = 0 : i64, tpu.core_type = #tpu.core_type<tc>, window_params = [{transform_indices = @transform_0, window_bounds = array<i64: 4, 256>}, {pipeline_mode = #tpu.pipeline_mode<synchronous>, transform_indices = @transform_1, window_bounds = array<i64: 256, 2048>}, {pipeline_mode = #tpu.pipeline_mode<synchronous>, transform_indices = @transform_2, window_bounds = array<i64: 1, 2048>}, {pipeline_mode = #tpu.pipeline_mode<synchronous>, transform_indices = @transform_3, window_bounds = array<i64: 256, 256>}, {pipeline_mode = #tpu.pipeline_mode<synchronous>, transform_indices = @transform_4, window_bounds = array<i64: 1, 256>}, {pipeline_mode = #tpu.pipeline_mode<synchronous>, transform_indices = @transform_5, window_bounds = array<i64: 2048, 128>}, {pipeline_mode = #tpu.pipeline_mode<synchronous>, transform_indices = @transform_6, window_bounds = array<i64: 1, 128>}, {pipeline_mode = #tpu.pipeline_mode<synchronous>, transform_indices = @transform_7, window_bounds = array<i64: 1, 128>}, {pipeline_mode = #tpu.pipeline_mode<synchronous>, transform_indices = @transform_8, window_bounds = array<i64: 1, 1>}, {transform_indices = @transform_9, window_bounds = array<i64: 4, 128>}, {transform_indices = @transform_10, window_bounds = array<i64: 4, 1>}]} {
    %c0 = arith.constant 0 : index
    %c0_0 = arith.constant 0 : index
    %0 = vector.load %arg1[%c0, %c0_0] : memref<4x256xf32, #tpu.memory_space<vmem>>, vector<4x256xf32>
    %1 = arith.truncf %0 : vector<4x256xf32> to vector<4x256xbf16>
    %c0_1 = arith.constant 0 : index
    %c0_2 = arith.constant 0 : index
    %2 = vector.load %arg2[%c0_1, %c0_2] : memref<256x2048xbf16, #tpu.memory_space<vmem>>, vector<256x2048xbf16>
    %cst = arith.constant dense<0.000000e+00> : vector<4x2048xf32>
    %3 = tpu.matmul %1, %2, %cst {dimension_numbers = #tpu.dot_dimension_numbers<[1], [0], [0], [1], [0, 0, 1, 1], [], []>} : vector<4x256xbf16>, vector<256x2048xbf16>, vector<4x2048xf32> -> vector<4x2048xf32>
    %c0_3 = arith.constant 0 : index
    %c0_4 = arith.constant 0 : index
    %4 = vector.load %arg3[%c0_3, %c0_4] : memref<1x2048xf32, #tpu.memory_space<vmem>>, vector<1x2048xf32>
    %5 = vector.broadcast %4 : vector<1x2048xf32> to vector<4x2048xf32>
    %6 = arith.addf %3, %5 : vector<4x2048xf32>
    %cst_5 = arith.constant 0.000000e+00 : f32
    %7 = vector.broadcast %cst_5 : f32 to vector<4x2048xf32>
    %8 = arith.maximumf %6, %7 : vector<4x2048xf32>
    %c0_6 = arith.constant 0 : index
    %c0_7 = arith.constant 0 : index
    %9 = vector.load %arg4[%c0_6, %c0_7] : memref<256x256xbf16, #tpu.memory_space<vmem>>, vector<256x256xbf16>
    %c0_8 = arith.constant 0 : index
    %c0_9 = arith.constant 0 : index
    %10 = vector.load %arg5[%c0_8, %c0_9] : memref<1x256xf32, #tpu.memory_space<vmem>>, vector<1x256xf32>
    %cst_10 = arith.constant 0.000000e+00 : f32
    %11 = vector.broadcast %cst_10 : f32 to vector<4x128xf32>
    %c0_11 = arith.constant 0 : index
    %c0_12 = arith.constant 0 : index
    %12 = vector.load %arg7[%c0_11, %c0_12] : memref<1x128xf32, #tpu.memory_space<vmem>>, vector<1x128xf32>
    %13 = vector.broadcast %12 : vector<1x128xf32> to vector<4x128xf32>
    %14 = arith.addf %11, %13 : vector<4x128xf32>
    %15 = vector.extract_strided_slice %8 {offsets = [0, 0], sizes = [4, 256], strides = [1, 1]} : vector<4x2048xf32> to vector<4x256xf32>
    %16 = arith.truncf %15 : vector<4x256xf32> to vector<4x256xbf16>
    %cst_13 = arith.constant dense<0.000000e+00> : vector<4x256xf32>
    %17 = tpu.matmul %16, %9, %cst_13 {dimension_numbers = #tpu.dot_dimension_numbers<[1], [0], [0], [1], [0, 0, 1, 1], [], []>} : vector<4x256xbf16>, vector<256x256xbf16>, vector<4x256xf32> -> vector<4x256xf32>
    %18 = vector.broadcast %10 : vector<1x256xf32> to vector<4x256xf32>
    %19 = arith.addf %17, %18 : vector<4x256xf32>
    %cst_14 = arith.constant 0.000000e+00 : f32
    %20 = vector.broadcast %cst_14 : f32 to vector<4x256xf32>
    %21 = arith.maximumf %19, %20 : vector<4x256xf32>
    %22 = arith.truncf %21 : vector<4x256xf32> to vector<4x256xbf16>
    %c0_15 = arith.constant 0 : index
    %c0_16 = arith.constant 0 : index
    %23 = vector.load %arg6[%c0_15, %c0_16] : memref<2048x128xbf16, #tpu.memory_space<vmem>>, vector<256x128xbf16>
    %cst_17 = arith.constant dense<0.000000e+00> : vector<4x128xf32>
    %24 = tpu.matmul %22, %23, %cst_17 {dimension_numbers = #tpu.dot_dimension_numbers<[1], [0], [0], [1], [0, 0, 1, 1], [], []>} : vector<4x256xbf16>, vector<256x128xbf16>, vector<4x128xf32> -> vector<4x128xf32>
    %25 = arith.addf %14, %24 : vector<4x128xf32>
    %26 = vector.extract_strided_slice %8 {offsets = [0, 256], sizes = [4, 256], strides = [1, 1]} : vector<4x2048xf32> to vector<4x256xf32>
    %27 = arith.truncf %26 : vector<4x256xf32> to vector<4x256xbf16>
    %cst_18 = arith.constant dense<0.000000e+00> : vector<4x256xf32>
    %28 = tpu.matmul %27, %9, %cst_18 {dimension_numbers = #tpu.dot_dimension_numbers<[1], [0], [0], [1], [0, 0, 1, 1], [], []>} : vector<4x256xbf16>, vector<256x256xbf16>, vector<4x256xf32> -> vector<4x256xf32>
    %29 = vector.broadcast %10 : vector<1x256xf32> to vector<4x256xf32>
    %30 = arith.addf %28, %29 : vector<4x256xf32>
    %cst_19 = arith.constant 0.000000e+00 : f32
    %31 = vector.broadcast %cst_19 : f32 to vector<4x256xf32>
    %32 = arith.maximumf %30, %31 : vector<4x256xf32>
    %33 = arith.truncf %32 : vector<4x256xf32> to vector<4x256xbf16>
    %c256 = arith.constant 256 : index
    %c0_20 = arith.constant 0 : index
    %34 = vector.load %arg6[%c256, %c0_20] : memref<2048x128xbf16, #tpu.memory_space<vmem>>, vector<256x128xbf16>
    %cst_21 = arith.constant dense<0.000000e+00> : vector<4x128xf32>
    %35 = tpu.matmul %33, %34, %cst_21 {dimension_numbers = #tpu.dot_dimension_numbers<[1], [0], [0], [1], [0, 0, 1, 1], [], []>} : vector<4x256xbf16>, vector<256x128xbf16>, vector<4x128xf32> -> vector<4x128xf32>
    %36 = arith.addf %25, %35 : vector<4x128xf32>
    %37 = vector.extract_strided_slice %8 {offsets = [0, 512], sizes = [4, 256], strides = [1, 1]} : vector<4x2048xf32> to vector<4x256xf32>
    %38 = arith.truncf %37 : vector<4x256xf32> to vector<4x256xbf16>
    %cst_22 = arith.constant dense<0.000000e+00> : vector<4x256xf32>
    %39 = tpu.matmul %38, %9, %cst_22 {dimension_numbers = #tpu.dot_dimension_numbers<[1], [0], [0], [1], [0, 0, 1, 1], [], []>} : vector<4x256xbf16>, vector<256x256xbf16>, vector<4x256xf32> -> vector<4x256xf32>
    %40 = vector.broadcast %10 : vector<1x256xf32> to vector<4x256xf32>
    %41 = arith.addf %39, %40 : vector<4x256xf32>
    %cst_23 = arith.constant 0.000000e+00 : f32
    %42 = vector.broadcast %cst_23 : f32 to vector<4x256xf32>
    %43 = arith.maximumf %41, %42 : vector<4x256xf32>
    %44 = arith.truncf %43 : vector<4x256xf32> to vector<4x256xbf16>
    %c512 = arith.constant 512 : index
    %c0_24 = arith.constant 0 : index
    %45 = vector.load %arg6[%c512, %c0_24] : memref<2048x128xbf16, #tpu.memory_space<vmem>>, vector<256x128xbf16>
    %cst_25 = arith.constant dense<0.000000e+00> : vector<4x128xf32>
    %46 = tpu.matmul %44, %45, %cst_25 {dimension_numbers = #tpu.dot_dimension_numbers<[1], [0], [0], [1], [0, 0, 1, 1], [], []>} : vector<4x256xbf16>, vector<256x128xbf16>, vector<4x128xf32> -> vector<4x128xf32>
    %47 = arith.addf %36, %46 : vector<4x128xf32>
    %48 = vector.extract_strided_slice %8 {offsets = [0, 768], sizes = [4, 256], strides = [1, 1]} : vector<4x2048xf32> to vector<4x256xf32>
    %49 = arith.truncf %48 : vector<4x256xf32> to vector<4x256xbf16>
    %cst_26 = arith.constant dense<0.000000e+00> : vector<4x256xf32>
    %50 = tpu.matmul %49, %9, %cst_26 {dimension_numbers = #tpu.dot_dimension_numbers<[1], [0], [0], [1], [0, 0, 1, 1], [], []>} : vector<4x256xbf16>, vector<256x256xbf16>, vector<4x256xf32> -> vector<4x256xf32>
    %51 = vector.broadcast %10 : vector<1x256xf32> to vector<4x256xf32>
    %52 = arith.addf %50, %51 : vector<4x256xf32>
    %cst_27 = arith.constant 0.000000e+00 : f32
    %53 = vector.broadcast %cst_27 : f32 to vector<4x256xf32>
    %54 = arith.maximumf %52, %53 : vector<4x256xf32>
    %55 = arith.truncf %54 : vector<4x256xf32> to vector<4x256xbf16>
    %c768 = arith.constant 768 : index
    %c0_28 = arith.constant 0 : index
    %56 = vector.load %arg6[%c768, %c0_28] : memref<2048x128xbf16, #tpu.memory_space<vmem>>, vector<256x128xbf16>
    %cst_29 = arith.constant dense<0.000000e+00> : vector<4x128xf32>
    %57 = tpu.matmul %55, %56, %cst_29 {dimension_numbers = #tpu.dot_dimension_numbers<[1], [0], [0], [1], [0, 0, 1, 1], [], []>} : vector<4x256xbf16>, vector<256x128xbf16>, vector<4x128xf32> -> vector<4x128xf32>
    %58 = arith.addf %47, %57 : vector<4x128xf32>
    %59 = vector.extract_strided_slice %8 {offsets = [0, 1024], sizes = [4, 256], strides = [1, 1]} : vector<4x2048xf32> to vector<4x256xf32>
    %60 = arith.truncf %59 : vector<4x256xf32> to vector<4x256xbf16>
    %cst_30 = arith.constant dense<0.000000e+00> : vector<4x256xf32>
    %61 = tpu.matmul %60, %9, %cst_30 {dimension_numbers = #tpu.dot_dimension_numbers<[1], [0], [0], [1], [0, 0, 1, 1], [], []>} : vector<4x256xbf16>, vector<256x256xbf16>, vector<4x256xf32> -> vector<4x256xf32>
    %62 = vector.broadcast %10 : vector<1x256xf32> to vector<4x256xf32>
    %63 = arith.addf %61, %62 : vector<4x256xf32>
    %cst_31 = arith.constant 0.000000e+00 : f32
    %64 = vector.broadcast %cst_31 : f32 to vector<4x256xf32>
    %65 = arith.maximumf %63, %64 : vector<4x256xf32>
    %66 = arith.truncf %65 : vector<4x256xf32> to vector<4x256xbf16>
    %c1024 = arith.constant 1024 : index
    %c0_32 = arith.constant 0 : index
    %67 = vector.load %arg6[%c1024, %c0_32] : memref<2048x128xbf16, #tpu.memory_space<vmem>>, vector<256x128xbf16>
    %cst_33 = arith.constant dense<0.000000e+00> : vector<4x128xf32>
    %68 = tpu.matmul %66, %67, %cst_33 {dimension_numbers = #tpu.dot_dimension_numbers<[1], [0], [0], [1], [0, 0, 1, 1], [], []>} : vector<4x256xbf16>, vector<256x128xbf16>, vector<4x128xf32> -> vector<4x128xf32>
    %69 = arith.addf %58, %68 : vector<4x128xf32>
    %70 = vector.extract_strided_slice %8 {offsets = [0, 1280], sizes = [4, 256], strides = [1, 1]} : vector<4x2048xf32> to vector<4x256xf32>
    %71 = arith.truncf %70 : vector<4x256xf32> to vector<4x256xbf16>
    %cst_34 = arith.constant dense<0.000000e+00> : vector<4x256xf32>
    %72 = tpu.matmul %71, %9, %cst_34 {dimension_numbers = #tpu.dot_dimension_numbers<[1], [0], [0], [1], [0, 0, 1, 1], [], []>} : vector<4x256xbf16>, vector<256x256xbf16>, vector<4x256xf32> -> vector<4x256xf32>
    %73 = vector.broadcast %10 : vector<1x256xf32> to vector<4x256xf32>
    %74 = arith.addf %72, %73 : vector<4x256xf32>
    %cst_35 = arith.constant 0.000000e+00 : f32
    %75 = vector.broadcast %cst_35 : f32 to vector<4x256xf32>
    %76 = arith.maximumf %74, %75 : vector<4x256xf32>
    %77 = arith.truncf %76 : vector<4x256xf32> to vector<4x256xbf16>
    %c1280 = arith.constant 1280 : index
    %c0_36 = arith.constant 0 : index
    %78 = vector.load %arg6[%c1280, %c0_36] : memref<2048x128xbf16, #tpu.memory_space<vmem>>, vector<256x128xbf16>
    %cst_37 = arith.constant dense<0.000000e+00> : vector<4x128xf32>
    %79 = tpu.matmul %77, %78, %cst_37 {dimension_numbers = #tpu.dot_dimension_numbers<[1], [0], [0], [1], [0, 0, 1, 1], [], []>} : vector<4x256xbf16>, vector<256x128xbf16>, vector<4x128xf32> -> vector<4x128xf32>
    %80 = arith.addf %69, %79 : vector<4x128xf32>
    %81 = vector.extract_strided_slice %8 {offsets = [0, 1536], sizes = [4, 256], strides = [1, 1]} : vector<4x2048xf32> to vector<4x256xf32>
    %82 = arith.truncf %81 : vector<4x256xf32> to vector<4x256xbf16>
    %cst_38 = arith.constant dense<0.000000e+00> : vector<4x256xf32>
    %83 = tpu.matmul %82, %9, %cst_38 {dimension_numbers = #tpu.dot_dimension_numbers<[1], [0], [0], [1], [0, 0, 1, 1], [], []>} : vector<4x256xbf16>, vector<256x256xbf16>, vector<4x256xf32> -> vector<4x256xf32>
    %84 = vector.broadcast %10 : vector<1x256xf32> to vector<4x256xf32>
    %85 = arith.addf %83, %84 : vector<4x256xf32>
    %cst_39 = arith.constant 0.000000e+00 : f32
    %86 = vector.broadcast %cst_39 : f32 to vector<4x256xf32>
    %87 = arith.maximumf %85, %86 : vector<4x256xf32>
    %88 = arith.truncf %87 : vector<4x256xf32> to vector<4x256xbf16>
    %c1536 = arith.constant 1536 : index
    %c0_40 = arith.constant 0 : index
    %89 = vector.load %arg6[%c1536, %c0_40] : memref<2048x128xbf16, #tpu.memory_space<vmem>>, vector<256x128xbf16>
    %cst_41 = arith.constant dense<0.000000e+00> : vector<4x128xf32>
    %90 = tpu.matmul %88, %89, %cst_41 {dimension_numbers = #tpu.dot_dimension_numbers<[1], [0], [0], [1], [0, 0, 1, 1], [], []>} : vector<4x256xbf16>, vector<256x128xbf16>, vector<4x128xf32> -> vector<4x128xf32>
    %91 = arith.addf %80, %90 : vector<4x128xf32>
    %92 = vector.extract_strided_slice %8 {offsets = [0, 1792], sizes = [4, 256], strides = [1, 1]} : vector<4x2048xf32> to vector<4x256xf32>
    %93 = arith.truncf %92 : vector<4x256xf32> to vector<4x256xbf16>
    %cst_42 = arith.constant dense<0.000000e+00> : vector<4x256xf32>
    %94 = tpu.matmul %93, %9, %cst_42 {dimension_numbers = #tpu.dot_dimension_numbers<[1], [0], [0], [1], [0, 0, 1, 1], [], []>} : vector<4x256xbf16>, vector<256x256xbf16>, vector<4x256xf32> -> vector<4x256xf32>
    %95 = vector.broadcast %10 : vector<1x256xf32> to vector<4x256xf32>
    %96 = arith.addf %94, %95 : vector<4x256xf32>
    %cst_43 = arith.constant 0.000000e+00 : f32
    %97 = vector.broadcast %cst_43 : f32 to vector<4x256xf32>
    %98 = arith.maximumf %96, %97 : vector<4x256xf32>
    %99 = arith.truncf %98 : vector<4x256xf32> to vector<4x256xbf16>
    %c1792 = arith.constant 1792 : index
    %c0_44 = arith.constant 0 : index
    %100 = vector.load %arg6[%c1792, %c0_44] : memref<2048x128xbf16, #tpu.memory_space<vmem>>, vector<256x128xbf16>
    %cst_45 = arith.constant dense<0.000000e+00> : vector<4x128xf32>
    %101 = tpu.matmul %99, %100, %cst_45 {dimension_numbers = #tpu.dot_dimension_numbers<[1], [0], [0], [1], [0, 0, 1, 1], [], []>} : vector<4x256xbf16>, vector<256x128xbf16>, vector<4x128xf32> -> vector<4x128xf32>
    %102 = arith.addf %91, %101 : vector<4x128xf32>
    %c0_46 = arith.constant 0 : index
    %c0_47 = arith.constant 0 : index
    %103 = vector.load %arg10[%c0_46, %c0_47] : memref<4x128xf32, #tpu.memory_space<vmem>>, vector<4x128xf32>
    tpu.vector_store %arg10[%c0_46, %c0_47], %102 {strides = array<i32>} : memref<4x128xf32, #tpu.memory_space<vmem>>, vector<4x128xf32>,
    %c0_48 = arith.constant 0 : index
    %c0_49 = arith.constant 0 : index
    %104 = vector.load %arg8[%c0_48, %c0_49] : memref<1x128xf32, #tpu.memory_space<vmem>>, vector<1x128xf32>
    %105 = vector.broadcast %104 : vector<1x128xf32> to vector<4x128xf32>
    %106 = arith.mulf %102, %105 : vector<4x128xf32>
    %cst_50 = arith.constant dense<0.000000e+00> : vector<4xf32>
    %107 = vector.multi_reduction <add>, %106, %cst_50 [1] : vector<4x128xf32> to vector<4xf32>
    %108 = vector.shape_cast %107 : vector<4xf32> to vector<4x1xf32>
    %c0_51 = arith.constant 0 : index
    %c0_52 = arith.constant 0 : index
    %109 = vector.load %arg9[%c0_51, %c0_52] : memref<1x1xf32, #tpu.memory_space<vmem>>, vector<1x1xf32>
    %110 = vector.broadcast %109 : vector<1x1xf32> to vector<4x1xf32>
    %111 = arith.addf %108, %110 : vector<4x1xf32>
    %c0_53 = arith.constant 0 : index
    %c0_54 = arith.constant 0 : index
    %112 = vector.load %arg11[%c0_53, %c0_54] : memref<4x1xf32, #tpu.memory_space<vmem>>, vector<4x1xf32>
    tpu.vector_store %arg11[%c0_53, %c0_54], %111 {strides = array<i32>} : memref<4x1xf32, #tpu.memory_space<vmem>>, vector<4x1xf32>,
    return
  }
  func.func @transform_0(%arg0: i32) -> (i32, i32) {
    %c0_i32 = arith.constant 0 : i32
    %c0_i32_0 = arith.constant 0 : i32
    return %arg0, %c0_i32 : i32, i32
  }
  func.func @transform_1(%arg0: i32) -> (i32, i32) {
    %c0_i32 = arith.constant 0 : i32
    %c0_i32_0 = arith.constant 0 : i32
    %c0_i32_1 = arith.constant 0 : i32
    return %c0_i32, %c0_i32_0 : i32, i32
  }
  func.func @transform_2(%arg0: i32) -> (i32, i32) {
    %c0_i32 = arith.constant 0 : i32
    %c0_i32_0 = arith.constant 0 : i32
    %c0_i32_1 = arith.constant 0 : i32
    return %c0_i32, %c0_i32_0 : i32, i32
  }
  func.func @transform_3(%arg0: i32) -> (i32, i32) {
    %c0_i32 = arith.constant 0 : i32
    %c0_i32_0 = arith.constant 0 : i32
    %c0_i32_1 = arith.constant 0 : i32
    return %c0_i32, %c0_i32_0 : i32, i32
  }
  func.func @transform_4(%arg0: i32) -> (i32, i32) {
    %c0_i32 = arith.constant 0 : i32
    %c0_i32_0 = arith.constant 0 : i32
    %c0_i32_1 = arith.constant 0 : i32
    return %c0_i32, %c0_i32_0 : i32, i32
  }
  func.func @transform_5(%arg0: i32) -> (i32, i32) {
    %c0_i32 = arith.constant 0 : i32
    %c0_i32_0 = arith.constant 0 : i32
    %c0_i32_1 = arith.constant 0 : i32
    return %c0_i32, %c0_i32_0 : i32, i32
  }
  func.func @transform_6(%arg0: i32) -> (i32, i32) {
    %c0_i32 = arith.constant 0 : i32
    %c0_i32_0 = arith.constant 0 : i32
    %c0_i32_1 = arith.constant 0 : i32
    return %c0_i32, %c0_i32_0 : i32, i32
  }
  func.func @transform_7(%arg0: i32) -> (i32, i32) {
    %c0_i32 = arith.constant 0 : i32
    %c0_i32_0 = arith.constant 0 : i32
    %c0_i32_1 = arith.constant 0 : i32
    return %c0_i32, %c0_i32_0 : i32, i32
  }
  func.func @transform_8(%arg0: i32) -> (i32, i32) {
    %c0_i32 = arith.constant 0 : i32
    %c0_i32_0 = arith.constant 0 : i32
    %c0_i32_1 = arith.constant 0 : i32
    return %c0_i32, %c0_i32_0 : i32, i32
  }
  func.func @transform_9(%arg0: i32) -> (i32, i32) {
    %c0_i32 = arith.constant 0 : i32
    %c0_i32_0 = arith.constant 0 : i32
    return %arg0, %c0_i32 : i32, i32
  }
  func.func @transform_10(%arg0: i32) -> (i32, i32) {
    %c0_i32 = arith.constant 0 : i32
    %c0_i32_0 = arith.constant 0 : i32
    return %arg0, %c0_i32 : i32, i32
  }
}

module attributes {stable_mosaic.version = 11 : i64} {
  func.func @_impala_head_kernel(%arg0: i32, %arg1: memref<4x256xf32, #tpu.memory_space<vmem>>, %arg2: memref<256x2048xbf16, #tpu.memory_space<vmem>>, %arg3: memref<1x2048xf32, #tpu.memory_space<vmem>>, %arg4: memref<256x256xbf16, #tpu.memory_space<vmem>>, %arg5: memref<1x256xf32, #tpu.memory_space<vmem>>, %arg6: memref<2048x128xbf16, #tpu.memory_space<vmem>>, %arg7: memref<1x128xf32, #tpu.memory_space<vmem>>, %arg8: memref<1x128xf32, #tpu.memory_space<vmem>>, %arg9: memref<1x1xf32, #tpu.memory_space<vmem>>, %arg10: memref<4x128xf32, #tpu.memory_space<vmem>>, %arg11: memref<4x1xf32, #tpu.memory_space<vmem>>) attributes {dimension_semantics = [#tpu.dimension_semantics<parallel>], iteration_bounds = array<i64: 1>, scalar_prefetch = 0 : i64, scratch_operands = 0 : i64, tpu.core_type = #tpu.core_type<tc>, window_params = [{transform_indices = @transform_0, window_bounds = array<i64: 4, 256>}, {pipeline_mode = #tpu.pipeline_mode<synchronous>, transform_indices = @transform_1, window_bounds = array<i64: 256, 2048>}, {pipeline_mode = #tpu.pipeline_mode<synchronous>, transform_indices = @transform_2, window_bounds = array<i64: 1, 2048>}, {pipeline_mode = #tpu.pipeline_mode<synchronous>, transform_indices = @transform_3, window_bounds = array<i64: 256, 256>}, {pipeline_mode = #tpu.pipeline_mode<synchronous>, transform_indices = @transform_4, window_bounds = array<i64: 1, 256>}, {pipeline_mode = #tpu.pipeline_mode<synchronous>, transform_indices = @transform_5, window_bounds = array<i64: 2048, 128>}, {pipeline_mode = #tpu.pipeline_mode<synchronous>, transform_indices = @transform_6, window_bounds = array<i64: 1, 128>}, {pipeline_mode = #tpu.pipeline_mode<synchronous>, transform_indices = @transform_7, window_bounds = array<i64: 1, 128>}, {pipeline_mode = #tpu.pipeline_mode<synchronous>, transform_indices = @transform_8, window_bounds = array<i64: 1, 1>}, {transform_indices = @transform_9, window_bounds = array<i64: 4, 128>}, {transform_indices = @transform_10, window_bounds = array<i64: 4, 1>}]} {
    %c0 = arith.constant 0 : index
    %c0_0 = arith.constant 0 : index
    %0 = vector.load %arg1[%c0, %c0_0] : memref<4x256xf32, #tpu.memory_space<vmem>>, vector<4x256xf32>
    %1 = arith.truncf %0 : vector<4x256xf32> to vector<4x256xbf16>
    %c0_1 = arith.constant 0 : index
    %c0_2 = arith.constant 0 : index
    %2 = vector.load %arg2[%c0_1, %c0_2] : memref<256x2048xbf16, #tpu.memory_space<vmem>>, vector<256x2048xbf16>
    %cst = arith.constant dense<0.000000e+00> : vector<4x2048xf32>
    %3 = tpu.matmul %1, %2, %cst {dimension_numbers = #tpu.dot_dimension_numbers<[1], [0], [0], [1], [0, 0, 1, 1], [], []>} : vector<4x256xbf16>, vector<256x2048xbf16>, vector<4x2048xf32> -> vector<4x2048xf32>
    %c0_3 = arith.constant 0 : index
    %c0_4 = arith.constant 0 : index
    %4 = vector.load %arg3[%c0_3, %c0_4] : memref<1x2048xf32, #tpu.memory_space<vmem>>, vector<1x2048xf32>
    %5 = vector.broadcast %4 : vector<1x2048xf32> to vector<4x2048xf32>
    %6 = arith.addf %3, %5 : vector<4x2048xf32>
    %cst_5 = arith.constant 0.000000e+00 : f32
    %7 = vector.broadcast %cst_5 : f32 to vector<4x2048xf32>
    %8 = arith.maximumf %6, %7 : vector<4x2048xf32>
    %c0_6 = arith.constant 0 : index
    %c0_7 = arith.constant 0 : index
    %9 = vector.load %arg4[%c0_6, %c0_7] : memref<256x256xbf16, #tpu.memory_space<vmem>>, vector<256x256xbf16>
    %c0_8 = arith.constant 0 : index
    %c0_9 = arith.constant 0 : index
    %10 = vector.load %arg5[%c0_8, %c0_9] : memref<1x256xf32, #tpu.memory_space<vmem>>, vector<1x256xf32>
    %cst_10 = arith.constant 0.000000e+00 : f32
    %11 = vector.broadcast %cst_10 : f32 to vector<4x128xf32>
    %c0_11 = arith.constant 0 : index
    %c0_12 = arith.constant 0 : index
    %12 = vector.load %arg7[%c0_11, %c0_12] : memref<1x128xf32, #tpu.memory_space<vmem>>, vector<1x128xf32>
    %13 = vector.broadcast %12 : vector<1x128xf32> to vector<4x128xf32>
    %14 = arith.addf %11, %13 : vector<4x128xf32>
    %15 = vector.extract_strided_slice %8 {offsets = [0, 0], sizes = [4, 256], strides = [1, 1]} : vector<4x2048xf32> to vector<4x256xf32>
    %16 = arith.truncf %15 : vector<4x256xf32> to vector<4x256xbf16>
    %cst_13 = arith.constant dense<0.000000e+00> : vector<4x256xf32>
    %17 = tpu.matmul %16, %9, %cst_13 {dimension_numbers = #tpu.dot_dimension_numbers<[1], [0], [0], [1], [0, 0, 1, 1], [], []>} : vector<4x256xbf16>, vector<256x256xbf16>, vector<4x256xf32> -> vector<4x256xf32>
    %18 = vector.broadcast %10 : vector<1x256xf32> to vector<4x256xf32>
    %19 = arith.addf %17, %18 : vector<4x256xf32>
    %cst_14 = arith.constant 0.000000e+00 : f32
    %20 = vector.broadcast %cst_14 : f32 to vector<4x256xf32>
    %21 = arith.maximumf %19, %20 : vector<4x256xf32>
    %22 = arith.truncf %21 : vector<4x256xf32> to vector<4x256xbf16>
    %c0_15 = arith.constant 0 : index
    %c0_16 = arith.constant 0 : index
    %23 = vector.load %arg6[%c0_15, %c0_16] : memref<2048x128xbf16, #tpu.memory_space<vmem>>, vector<256x128xbf16>
    %cst_17 = arith.constant dense<0.000000e+00> : vector<4x128xf32>
    %24 = tpu.matmul %22, %23, %cst_17 {dimension_numbers = #tpu.dot_dimension_numbers<[1], [0], [0], [1], [0, 0, 1, 1], [], []>} : vector<4x256xbf16>, vector<256x128xbf16>, vector<4x128xf32> -> vector<4x128xf32>
    %25 = arith.addf %14, %24 : vector<4x128xf32>
    %26 = vector.extract_strided_slice %8 {offsets = [0, 256], sizes = [4, 256], strides = [1, 1]} : vector<4x2048xf32> to vector<4x256xf32>
    %27 = arith.truncf %26 : vector<4x256xf32> to vector<4x256xbf16>
    %cst_18 = arith.constant dense<0.000000e+00> : vector<4x256xf32>
    %28 = tpu.matmul %27, %9, %cst_18 {dimension_numbers = #tpu.dot_dimension_numbers<[1], [0], [0], [1], [0, 0, 1, 1], [], []>} : vector<4x256xbf16>, vector<256x256xbf16>, vector<4x256xf32> -> vector<4x256xf32>
    %29 = vector.broadcast %10 : vector<1x256xf32> to vector<4x256xf32>
    %30 = arith.addf %28, %29 : vector<4x256xf32>
    %cst_19 = arith.constant 0.000000e+00 : f32
    %31 = vector.broadcast %cst_19 : f32 to vector<4x256xf32>
    %32 = arith.maximumf %30, %31 : vector<4x256xf32>
    %33 = arith.truncf %32 : vector<4x256xf32> to vector<4x256xbf16>
    %c256 = arith.constant 256 : index
    %c0_20 = arith.constant 0 : index
    %34 = vector.load %arg6[%c256, %c0_20] : memref<2048x128xbf16, #tpu.memory_space<vmem>>, vector<256x128xbf16>
    %cst_21 = arith.constant dense<0.000000e+00> : vector<4x128xf32>
    %35 = tpu.matmul %33, %34, %cst_21 {dimension_numbers = #tpu.dot_dimension_numbers<[1], [0], [0], [1], [0, 0, 1, 1], [], []>} : vector<4x256xbf16>, vector<256x128xbf16>, vector<4x128xf32> -> vector<4x128xf32>
    %36 = arith.addf %25, %35 : vector<4x128xf32>
    %37 = vector.extract_strided_slice %8 {offsets = [0, 512], sizes = [4, 256], strides = [1, 1]} : vector<4x2048xf32> to vector<4x256xf32>
    %38 = arith.truncf %37 : vector<4x256xf32> to vector<4x256xbf16>
    %cst_22 = arith.constant dense<0.000000e+00> : vector<4x256xf32>
    %39 = tpu.matmul %38, %9, %cst_22 {dimension_numbers = #tpu.dot_dimension_numbers<[1], [0], [0], [1], [0, 0, 1, 1], [], []>} : vector<4x256xbf16>, vector<256x256xbf16>, vector<4x256xf32> -> vector<4x256xf32>
    %40 = vector.broadcast %10 : vector<1x256xf32> to vector<4x256xf32>
    %41 = arith.addf %39, %40 : vector<4x256xf32>
    %cst_23 = arith.constant 0.000000e+00 : f32
    %42 = vector.broadcast %cst_23 : f32 to vector<4x256xf32>
    %43 = arith.maximumf %41, %42 : vector<4x256xf32>
    %44 = arith.truncf %43 : vector<4x256xf32> to vector<4x256xbf16>
    %c512 = arith.constant 512 : index
    %c0_24 = arith.constant 0 : index
    %45 = vector.load %arg6[%c512, %c0_24] : memref<2048x128xbf16, #tpu.memory_space<vmem>>, vector<256x128xbf16>
    %cst_25 = arith.constant dense<0.000000e+00> : vector<4x128xf32>
    %46 = tpu.matmul %44, %45, %cst_25 {dimension_numbers = #tpu.dot_dimension_numbers<[1], [0], [0], [1], [0, 0, 1, 1], [], []>} : vector<4x256xbf16>, vector<256x128xbf16>, vector<4x128xf32> -> vector<4x128xf32>
    %47 = arith.addf %36, %46 : vector<4x128xf32>
    %48 = vector.extract_strided_slice %8 {offsets = [0, 768], sizes = [4, 256], strides = [1, 1]} : vector<4x2048xf32> to vector<4x256xf32>
    %49 = arith.truncf %48 : vector<4x256xf32> to vector<4x256xbf16>
    %cst_26 = arith.constant dense<0.000000e+00> : vector<4x256xf32>
    %50 = tpu.matmul %49, %9, %cst_26 {dimension_numbers = #tpu.dot_dimension_numbers<[1], [0], [0], [1], [0, 0, 1, 1], [], []>} : vector<4x256xbf16>, vector<256x256xbf16>, vector<4x256xf32> -> vector<4x256xf32>
    %51 = vector.broadcast %10 : vector<1x256xf32> to vector<4x256xf32>
    %52 = arith.addf %50, %51 : vector<4x256xf32>
    %cst_27 = arith.constant 0.000000e+00 : f32
    %53 = vector.broadcast %cst_27 : f32 to vector<4x256xf32>
    %54 = arith.maximumf %52, %53 : vector<4x256xf32>
    %55 = arith.truncf %54 : vector<4x256xf32> to vector<4x256xbf16>
    %c768 = arith.constant 768 : index
    %c0_28 = arith.constant 0 : index
    %56 = vector.load %arg6[%c768, %c0_28] : memref<2048x128xbf16, #tpu.memory_space<vmem>>, vector<256x128xbf16>
    %cst_29 = arith.constant dense<0.000000e+00> : vector<4x128xf32>
    %57 = tpu.matmul %55, %56, %cst_29 {dimension_numbers = #tpu.dot_dimension_numbers<[1], [0], [0], [1], [0, 0, 1, 1], [], []>} : vector<4x256xbf16>, vector<256x128xbf16>, vector<4x128xf32> -> vector<4x128xf32>
    %58 = arith.addf %47, %57 : vector<4x128xf32>
    %59 = vector.extract_strided_slice %8 {offsets = [0, 1024], sizes = [4, 256], strides = [1, 1]} : vector<4x2048xf32> to vector<4x256xf32>
    %60 = arith.truncf %59 : vector<4x256xf32> to vector<4x256xbf16>
    %cst_30 = arith.constant dense<0.000000e+00> : vector<4x256xf32>
    %61 = tpu.matmul %60, %9, %cst_30 {dimension_numbers = #tpu.dot_dimension_numbers<[1], [0], [0], [1], [0, 0, 1, 1], [], []>} : vector<4x256xbf16>, vector<256x256xbf16>, vector<4x256xf32> -> vector<4x256xf32>
    %62 = vector.broadcast %10 : vector<1x256xf32> to vector<4x256xf32>
    %63 = arith.addf %61, %62 : vector<4x256xf32>
    %cst_31 = arith.constant 0.000000e+00 : f32
    %64 = vector.broadcast %cst_31 : f32 to vector<4x256xf32>
    %65 = arith.maximumf %63, %64 : vector<4x256xf32>
    %66 = arith.truncf %65 : vector<4x256xf32> to vector<4x256xbf16>
    %c1024 = arith.constant 1024 : index
    %c0_32 = arith.constant 0 : index
    %67 = vector.load %arg6[%c1024, %c0_32] : memref<2048x128xbf16, #tpu.memory_space<vmem>>, vector<256x128xbf16>
    %cst_33 = arith.constant dense<0.000000e+00> : vector<4x128xf32>
    %68 = tpu.matmul %66, %67, %cst_33 {dimension_numbers = #tpu.dot_dimension_numbers<[1], [0], [0], [1], [0, 0, 1, 1], [], []>} : vector<4x256xbf16>, vector<256x128xbf16>, vector<4x128xf32> -> vector<4x128xf32>
    %69 = arith.addf %58, %68 : vector<4x128xf32>
    %70 = vector.extract_strided_slice %8 {offsets = [0, 1280], sizes = [4, 256], strides = [1, 1]} : vector<4x2048xf32> to vector<4x256xf32>
    %71 = arith.truncf %70 : vector<4x256xf32> to vector<4x256xbf16>
    %cst_34 = arith.constant dense<0.000000e+00> : vector<4x256xf32>
    %72 = tpu.matmul %71, %9, %cst_34 {dimension_numbers = #tpu.dot_dimension_numbers<[1], [0], [0], [1], [0, 0, 1, 1], [], []>} : vector<4x256xbf16>, vector<256x256xbf16>, vector<4x256xf32> -> vector<4x256xf32>
    %73 = vector.broadcast %10 : vector<1x256xf32> to vector<4x256xf32>
    %74 = arith.addf %72, %73 : vector<4x256xf32>
    %cst_35 = arith.constant 0.000000e+00 : f32
    %75 = vector.broadcast %cst_35 : f32 to vector<4x256xf32>
    %76 = arith.maximumf %74, %75 : vector<4x256xf32>
    %77 = arith.truncf %76 : vector<4x256xf32> to vector<4x256xbf16>
    %c1280 = arith.constant 1280 : index
    %c0_36 = arith.constant 0 : index
    %78 = vector.load %arg6[%c1280, %c0_36] : memref<2048x128xbf16, #tpu.memory_space<vmem>>, vector<256x128xbf16>
    %cst_37 = arith.constant dense<0.000000e+00> : vector<4x128xf32>
    %79 = tpu.matmul %77, %78, %cst_37 {dimension_numbers = #tpu.dot_dimension_numbers<[1], [0], [0], [1], [0, 0, 1, 1], [], []>} : vector<4x256xbf16>, vector<256x128xbf16>, vector<4x128xf32> -> vector<4x128xf32>
    %80 = arith.addf %69, %79 : vector<4x128xf32>
    %81 = vector.extract_strided_slice %8 {offsets = [0, 1536], sizes = [4, 256], strides = [1, 1]} : vector<4x2048xf32> to vector<4x256xf32>
    %82 = arith.truncf %81 : vector<4x256xf32> to vector<4x256xbf16>
    %cst_38 = arith.constant dense<0.000000e+00> : vector<4x256xf32>
    %83 = tpu.matmul %82, %9, %cst_38 {dimension_numbers = #tpu.dot_dimension_numbers<[1], [0], [0], [1], [0, 0, 1, 1], [], []>} : vector<4x256xbf16>, vector<256x256xbf16>, vector<4x256xf32> -> vector<4x256xf32>
    %84 = vector.broadcast %10 : vector<1x256xf32> to vector<4x256xf32>
    %85 = arith.addf %83, %84 : vector<4x256xf32>
    %cst_39 = arith.constant 0.000000e+00 : f32
    %86 = vector.broadcast %cst_39 : f32 to vector<4x256xf32>
    %87 = arith.maximumf %85, %86 : vector<4x256xf32>
    %88 = arith.truncf %87 : vector<4x256xf32> to vector<4x256xbf16>
    %c1536 = arith.constant 1536 : index
    %c0_40 = arith.constant 0 : index
    %89 = vector.load %arg6[%c1536, %c0_40] : memref<2048x128xbf16, #tpu.memory_space<vmem>>, vector<256x128xbf16>
    %cst_41 = arith.constant dense<0.000000e+00> : vector<4x128xf32>
    %90 = tpu.matmul %88, %89, %cst_41 {dimension_numbers = #tpu.dot_dimension_numbers<[1], [0], [0], [1], [0, 0, 1, 1], [], []>} : vector<4x256xbf16>, vector<256x128xbf16>, vector<4x128xf32> -> vector<4x128xf32>
    %91 = arith.addf %80, %90 : vector<4x128xf32>
    %92 = vector.extract_strided_slice %8 {offsets = [0, 1792], sizes = [4, 256], strides = [1, 1]} : vector<4x2048xf32> to vector<4x256xf32>
    %93 = arith.truncf %92 : vector<4x256xf32> to vector<4x256xbf16>
    %cst_42 = arith.constant dense<0.000000e+00> : vector<4x256xf32>
    %94 = tpu.matmul %93, %9, %cst_42 {dimension_numbers = #tpu.dot_dimension_numbers<[1], [0], [0], [1], [0, 0, 1, 1], [], []>} : vector<4x256xbf16>, vector<256x256xbf16>, vector<4x256xf32> -> vector<4x256xf32>
    %95 = vector.broadcast %10 : vector<1x256xf32> to vector<4x256xf32>
    %96 = arith.addf %94, %95 : vector<4x256xf32>
    %cst_43 = arith.constant 0.000000e+00 : f32
    %97 = vector.broadcast %cst_43 : f32 to vector<4x256xf32>
    %98 = arith.maximumf %96, %97 : vector<4x256xf32>
    %99 = arith.truncf %98 : vector<4x256xf32> to vector<4x256xbf16>
    %c1792 = arith.constant 1792 : index
    %c0_44 = arith.constant 0 : index
    %100 = vector.load %arg6[%c1792, %c0_44] : memref<2048x128xbf16, #tpu.memory_space<vmem>>, vector<256x128xbf16>
    %cst_45 = arith.constant dense<0.000000e+00> : vector<4x128xf32>
    %101 = tpu.matmul %99, %100, %cst_45 {dimension_numbers = #tpu.dot_dimension_numbers<[1], [0], [0], [1], [0, 0, 1, 1], [], []>} : vector<4x256xbf16>, vector<256x128xbf16>, vector<4x128xf32> -> vector<4x128xf32>
    %102 = arith.addf %91, %101 : vector<4x128xf32>
    %c0_46 = arith.constant 0 : index
    %c0_47 = arith.constant 0 : index
    %103 = vector.load %arg10[%c0_46, %c0_47] : memref<4x128xf32, #tpu.memory_space<vmem>>, vector<4x128xf32>
    tpu.vector_store %arg10[%c0_46, %c0_47], %102 {strides = array<i32>} : memref<4x128xf32, #tpu.memory_space<vmem>>, vector<4x128xf32>,
    %c0_48 = arith.constant 0 : index
    %c0_49 = arith.constant 0 : index
    %104 = vector.load %arg8[%c0_48, %c0_49] : memref<1x128xf32, #tpu.memory_space<vmem>>, vector<1x128xf32>
    %105 = vector.broadcast %104 : vector<1x128xf32> to vector<4x128xf32>
    %106 = arith.mulf %102, %105 : vector<4x128xf32>
    %cst_50 = arith.constant dense<0.000000e+00> : vector<4xf32>
    %107 = vector.multi_reduction <add>, %106, %cst_50 [1] : vector<4x128xf32> to vector<4xf32>
    %108 = vector.shape_cast %107 : vector<4xf32> to vector<4x1xf32>
    %c0_51 = arith.constant 0 : index
    %c0_52 = arith.constant 0 : index
    %109 = vector.load %arg9[%c0_51, %c0_52] : memref<1x1xf32, #tpu.memory_space<vmem>>, vector<1x1xf32>
    %110 = vector.broadcast %109 : vector<1x1xf32> to vector<4x1xf32>
    %111 = arith.addf %108, %110 : vector<4x1xf32>
    %c0_53 = arith.constant 0 : index
    %c0_54 = arith.constant 0 : index
    %112 = vector.load %arg11[%c0_53, %c0_54] : memref<4x1xf32, #tpu.memory_space<vmem>>, vector<4x1xf32>
    tpu.vector_store %arg11[%c0_53, %c0_54], %111 {strides = array<i32>} : memref<4x1xf32, #tpu.memory_space<vmem>>, vector<4x1xf32>,
    return
  }
  func.func @transform_0(%arg0: i32) -> (i32, i32) {
    %c0_i32 = arith.constant 0 : i32
    %c0_i32_0 = arith.constant 0 : i32
    return %arg0, %c0_i32 : i32, i32
  }
  func.func @transform_1(%arg0: i32) -> (i32, i32) {
    %c0_i32 = arith.constant 0 : i32
    %c0_i32_0 = arith.constant 0 : i32
    %c0_i32_1 = arith.constant 0 : i32
    return %c0_i32, %c0_i32_0 : i32, i32
  }
  func.func @transform_2(%arg0: i32) -> (i32, i32) {
    %c0_i32 = arith.constant 0 : i32
    %c0_i32_0 = arith.constant 0 : i32
    %c0_i32_1 = arith.constant 0 : i32
    return %c0_i32, %c0_i32_0 : i32, i32
  }
  func.func @transform_3(%arg0: i32) -> (i32, i32) {
    %c0_i32 = arith.constant 0 : i32
    %c0_i32_0 = arith.constant 0 : i32
    %c0_i32_1 = arith.constant 0 : i32
    return %c0_i32, %c0_i32_0 : i32, i32
  }
  func.func @transform_4(%arg0: i32) -> (i32, i32) {
    %c0_i32 = arith.constant 0 : i32
    %c0_i32_0 = arith.constant 0 : i32
    %c0_i32_1 = arith.constant 0 : i32
    return %c0_i32, %c0_i32_0 : i32, i32
  }
  func.func @transform_5(%arg0: i32) -> (i32, i32) {
    %c0_i32 = arith.constant 0 : i32
    %c0_i32_0 = arith.constant 0 : i32
    %c0_i32_1 = arith.constant 0 : i32
    return %c0_i32, %c0_i32_0 : i32, i32
  }
  func.func @transform_6(%arg0: i32) -> (i32, i32) {
    %c0_i32 = arith.constant 0 : i32
    %c0_i32_0 = arith.constant 0 : i32
    %c0_i32_1 = arith.constant 0 : i32
    return %c0_i32, %c0_i32_0 : i32, i32
  }
  func.func @transform_7(%arg0: i32) -> (i32, i32) {
    %c0_i32 = arith.constant 0 : i32
    %c0_i32_0 = arith.constant 0 : i32
    %c0_i32_1 = arith.constant 0 : i32
    return %c0_i32, %c0_i32_0 : i32, i32
  }
  func.func @transform_8(%arg0: i32) -> (i32, i32) {
    %c0_i32 = arith.constant 0 : i32
    %c0_i32_0 = arith.constant 0 : i32
    %c0_i32_1 = arith.constant 0 : i32
    return %c0_i32, %c0_i32_0 : i32, i32
  }
  func.func @transform_9(%arg0: i32) -> (i32, i32) {
    %c0_i32 = arith.constant 0 : i32
    %c0_i32_0 = arith.constant 0 : i32
    return %arg0, %c0_i32 : i32, i32
  }
  func.func @transform_10(%arg0: i32) -> (i32, i32) {
    %c0_i32 = arith.constant 0 : i32
    %c0_i32_0 = arith.constant 0 : i32
    return %arg0, %c0_i32 : i32, i32
  }
}

</mosaic_0001>

<bundles_post_ra>
// kernel: tpu_custom_call.1
= control target key start
LH: loop header
LB: loop body
LE: loop exit
PB: predicated region body
PF: predicated region fallthrough
CT: control target
= control target key end

     0   :  { %s5721_s0 = inlined_call_operand.hbm [shape: f32[4,256], index: 0, kind: input, shape index: {}]   ;;  %s5722_s1 = inlined_call_operand.hbm [shape: bf16[256,2048], index: 1, kind: input, shape index: {}]   ;;  %s5723_s2 = inlined_call_operand.hbm [shape: f32[1,2048], index: 2, kind: input, shape index: {}]   ;;  %s5724_s3 = inlined_call_operand.hbm [shape: bf16[256,256], index: 3, kind: input, shape index: {}]   ;;  %s5725_s4 = inlined_call_operand.vmem [shape: f32[1,256], index: 4, kind: input, shape index: {}]   ;;  %s5726_s5 = inlined_call_operand.hbm [shape: bf16[2048,128], index: 5, kind: input, shape index: {}]   ;;  %s5727_s6 = inlined_call_operand.vmem [shape: f32[1,128], index: 6, kind: input, shape index: {}]   ;;  %s5728_s7 = inlined_call_operand.vmem [shape: f32[1,128], index: 7, kind: input, shape index: {}]   ;;  %s5729_s8 = inlined_call_operand.<no memory space> [shape: f32[1,1], index: 8, kind: input, shape index: {}]   ;;  %s5730_s9 = inlined_call_operand.hbm [shape: f32[4,128], index: 9, kind: output, shape index: {0}]   ;;  %s5731_s10 = inlined_call_operand.vmem [shape: f32[4,1], index: 10, kind: output, shape index: {1}]  }
   0x1   :  { %v16_v0 = vstv %s5729_s8 }
   0x2   :  { %17 = vst [vmem:[#allocation2] sm:$0x1] %v16_v0 }
   0x3   :  { %18 = vsyncpa [#allocation4], 0 }
   0x4   :  { %19 = vsyncpa [#allocation7], 0 }
   0x5   :  { %20 = vsyncpa [#allocation10], 0 }
   0x6   :  { %21 = vsyncpa [#allocation5], 0  ;;  %s5012_s15 = smov [#allocation6]   ;;  %s4872_s19 = scalar_lea.hbm %s5722_s1, 32768 }
   0x7   :  { %s37_s16 = sshll.u32 %s5012_s15, 4  ;;  %p4873_p0 = scmp.ne.s32.totalorder %s5722_s1, %s4872_s19  ;;  %s38_s16 = int_to_ptr.vmem [resolvable:$true] %s37_s16 }
   0x8   :  { %p4876_p1 = scmp.lt.u32.totalorder %s4872_s19, %s5722_s1 }
   0xa   :  { %p4878_p2 = pnand %p4876_p1, %p4873_p0 }
   0xc   :  { %4881 = shalt.err (!%p4878_p2)
}
   0xd   :  { %s4882_s8 = scalar_lea.vmem %s38_s16, 32768  ;;  %p4887_p4 = scmp.lt.s32.totalorder %s38_s16, %s38_s16 }
   0xe   :  { %p4883_p3 = scmp.ne.s32.totalorder %s38_s16, %s4882_s8  ;;  %p4888_p5 = scmp.lt.s32.totalorder %s4882_s8, %s4882_s8 }
  0x10   :  { %p4889_p6 = por %p4888_p5, %p4887_p4 }
  0x12   :  { %p4890_p7 = pnand %p4889_p6, %p4883_p3 }
  0x14   :  { %4893 = shalt.err (!%p4890_p7)
}
  0x15   :  { %s5013_s24 = smov 1024   ;;  %s5014_s25 = smov 64  }
  0x16   :  { %43 = dma.hbm_to_vmem [thread:$0]  %s5722_s1, 32768, %s38_s16, [#allocation7], %s5013_s24, %s5013_s24, %s5014_s25  }
  0x17   :  { %s5015_s28 = smov [#allocation9]   ;;  %s4894_s12 = scalar_lea.hbm %s5724_s3, 4096 }
  0x18   :  { %s59_s29 = sshll.u32 %s5015_s28, 4  ;;  %p4895_p8 = scmp.ne.s32.totalorder %s5724_s3, %s4894_s12  ;;  %s60_s29 = int_to_ptr.vmem [resolvable:$true] %s59_s29 }
  0x19   :  { %p4898_p9 = scmp.lt.u32.totalorder %s4894_s12, %s5724_s3 }
  0x1b   :  { %p4900_p10 = pnand %p4898_p9, %p4895_p8 }
  0x1d   :  { %4903 = shalt.err (!%p4900_p10)
}
  0x1e   :  { %s4904_s18 = scalar_lea.vmem %s60_s29, 4096  ;;  %p4909_p12 = scmp.lt.s32.totalorder %s60_s29, %s60_s29 }
  0x1f   :  { %p4905_p11 = scmp.ne.s32.totalorder %s60_s29, %s4904_s18  ;;  %p4910_p13 = scmp.lt.s32.totalorder %s4904_s18, %s4904_s18 }
  0x21   :  { %p4911_p0 = por %p4910_p13, %p4909_p12 }
  0x23   :  { %p4912_p1 = pnand %p4911_p0, %p4905_p11 }
  0x25   :  { %4915 = shalt.err (!%p4912_p1)
}
  0x26   :  { %s5016_s1 = smov 128   ;;  %s5017_s16 = smov 8  }
  0x27   :  { %65 = dma.hbm_to_vmem [thread:$0]  %s5724_s3, 4096, %s60_s29, [#allocation10], %s5016_s1, %s5016_s1, %s5017_s16  }
  0x28   :  { %s5018_s21 = smov [#allocation3]   ;;  %s5019_s23 = smov [#allocation8]  }
  0x29   :  { %s28_s22 = sshll.u32 %s5018_s21, 4  ;;  %s50_s8 = sshll.u32 %s5019_s23, 4  ;;  %s29_s22 = int_to_ptr.vmem [resolvable:$true] %s28_s22  ;;  %s51_s8 = int_to_ptr.vmem [resolvable:$true] %s50_s8 }
  0x2a   :  { %s4916_s27 = scalar_lea.hbm %s5721_s0, 128 }
  0x2b   :  { %p4917_p2 = scmp.ne.s32.totalorder %s5721_s0, %s4916_s27  ;;  %p4920_p3 = scmp.lt.u32.totalorder %s4916_s27, %s5721_s0 }
  0x2d   :  { %p4922_p4 = pnand %p4920_p3, %p4917_p2 }
  0x2f   :  { %4925 = shalt.err (!%p4922_p4)
}
  0x30   :  { %s4926_s3 = scalar_lea.vmem %s29_s22, 128  ;;  %p4931_p6 = scmp.lt.s32.totalorder %s29_s22, %s29_s22 }
  0x31   :  { %p4927_p5 = scmp.ne.s32.totalorder %s29_s22, %s4926_s3  ;;  %p4932_p7 = scmp.lt.s32.totalorder %s4926_s3, %s4926_s3 }
  0x33   :  { %p4933_p8 = por %p4932_p7, %p4931_p6 }
  0x35   :  { %p4934_p9 = pnand %p4933_p8, %p4927_p5 }
  0x37   :  { %4937 = shalt.err (!%p4934_p9)
}
  0x38   :  { %31 = dma.hbm_to_vmem [thread:$0]  %s5721_s0, 128, %s29_s22, [#allocation4]  }
  0x39   :  { %s4938_s17 = scalar_lea.hbm %s5723_s2, 256 }
  0x3a   :  { %p4939_p10 = scmp.ne.s32.totalorder %s5723_s2, %s4938_s17  ;;  %p4942_p11 = scmp.lt.u32.totalorder %s4938_s17, %s5723_s2 }
  0x3c   :  { %p4944_p12 = pnand %p4942_p11, %p4939_p10 }
  0x3e   :  { %4947 = shalt.err (!%p4944_p12)
}
  0x3f   :  { %s4948_s20 = scalar_lea.vmem %s51_s8, 256  ;;  %p4953_p0 = scmp.lt.s32.totalorder %s51_s8, %s51_s8 }
  0x40   :  { %p4949_p13 = scmp.ne.s32.totalorder %s51_s8, %s4948_s20  ;;  %p4954_p1 = scmp.lt.s32.totalorder %s4948_s20, %s4948_s20 }
  0x42   :  { %p4955_p2 = por %p4954_p1, %p4953_p0 }
  0x44   :  { %p4956_p3 = pnand %p4955_p2, %p4949_p13 }
  0x46   :  { %4959 = shalt.err (!%p4956_p3)
}
  0x47   :  { %53 = dma.hbm_to_vmem [thread:$0]  %s5723_s2, 256, %s51_s8, [#allocation7]  }
  0x48   :  { %s5020_s22 = smov [#allocation11]   ;;  %s4960_s27 = scalar_lea.hbm %s5726_s5, 16384 }
  0x49   :  { %s73_s23 = sshll.u32 %s5020_s22, 4  ;;  %p4961_p4 = scmp.ne.s32.totalorder %s5726_s5, %s4960_s27  ;;  %s74_s23 = int_to_ptr.vmem [resolvable:$true] %s73_s23 }
  0x4a   :  { %p4964_p5 = scmp.lt.u32.totalorder %s4960_s27, %s5726_s5 }
  0x4c   :  { %p4966_p6 = pnand %p4964_p5, %p4961_p4 }
  0x4e   :  { %4969 = shalt.err (!%p4966_p6)
}
  0x4f   :  { %s4970_s3 = scalar_lea.vmem %s74_s23, 16384  ;;  %p4975_p8 = scmp.lt.s32.totalorder %s74_s23, %s74_s23 }
  0x50   :  { %p4971_p7 = scmp.ne.s32.totalorder %s74_s23, %s4970_s3  ;;  %p4976_p9 = scmp.lt.s32.totalorder %s4970_s3, %s4970_s3 }
  0x52   :  { %p4977_p10 = por %p4976_p9, %p4975_p8 }
  0x54   :  { %p4978_p11 = pnand %p4977_p10, %p4971_p7 }
  0x56   :  { %4981 = shalt.err (!%p4978_p11)
}
  0x57   :  { %s5021_s2 = smov 4  }
  0x58   :  { %79 = dma.hbm_to_vmem [thread:$0]  %s5726_s5, 16384, %s74_s23, [#allocation10], %s5014_s25, %s5014_s25, %s5021_s2  }
  0x59   :  { %5004 = dma.done.wait [#allocation4], 128  }
  0x5a   :  { %5005 = vsyncadd [#allocation4], 4294967168 }
  0x5b   :  { %5006 = dma.done.wait [#allocation7], 33024  }
  0x5c   :  { %5007 = vsyncadd [#allocation7], 4294934272 }
  0x5d   :  { %5008 = dma.done.wait [#allocation10], 20480  }
  0x5e   :  { %5009 = vsyncadd [#allocation10], 4294946816  ;;  %v108_v1 = vld [vmem:[#allocation6] sm:$0xff]  ;;  %v5144_v18 = vld [vmem:[#allocation3] sm:$0xff]  ;;  %vm4021_vm0 = vcmask 1043456   ;;  %s5022_s15 = smov [#allocation12]  }
  0x5f   :  { %v116_v2 = vld [vmem:[#allocation6 + $0x40] sm:$0xff]  ;;  %v104_v19 = vcombine.high %v5144_v18, %v5144_v18  ;;  %s4041_s17 = sshll.u32 %s5022_s15, 4  ;;  %s4042_s17 = int_to_ptr.vmem [resolvable:$true] %s4041_s17 }
  0x60   :  { %v124_v3 = vld [vmem:[#allocation6 + $0x80] sm:$0xff]  ;;  %v4057_v4 = vcombine.high %v108_v1, %v116_v2  ;;  %v4056_v5 = vcombine.low %v108_v1, %v116_v2  ;;  %v110_v2 = vld [vmem:[#allocation6 + $0x10] sm:$0xff]  ;;  %s4982_s18 = scalar_lea.vmem %s4042_s17, 64  ;;  %p4987_p13 = scmp.lt.s32.totalorder %s4042_s17, %s4042_s17 }
  0x61   :  { %v132_v6 = vld [vmem:[#allocation6 + $0xc0] sm:$0xff]  ;;  %v5148_v22 = vpack.c.bf16 %v104_v19, %v104_v19  ;;  %p4983_p12 = scmp.ne.s32.totalorder %s4042_s17, %s4982_s18  ;;  %p4988_p0 = scmp.lt.s32.totalorder %s4982_s18, %s4982_s18 }
  0x62   :  { %v4073_v7 = vcombine.high %v124_v3, %v132_v6  ;;  %v140_v8 = vld [vmem:[#allocation6 + $0x100] sm:$0xff]  ;;  %1728 = vmatprep.subr.bf16.mxu0 %v4057_v4  ;;  %v4072_v10 = vcombine.low %v124_v3, %v132_v6  ;;  %v118_v3 = vld [vmem:[#allocation6 + $0x50] sm:$0xff] }
  0x63   :  { %v148_v9 = vld [vmem:[#allocation6 + $0x140] sm:$0xff]  ;;  %1729 = vmatpush1.bf16.msra.mxu0 %v4056_v5  ;;  %1760 = vmatprep.mubr.bf16.mxu0 %v5148_v22  ;;  %v126_v6 = vld [vmem:[#allocation6 + $0x90] sm:$0xff]  ;;  %p4989_p1 = por %p4988_p0, %p4987_p13 }
  0x64   :  { %1730 = vmatprep.subr.bf16.mxu0 %v4073_v7  ;;  %v4089_v11 = vcombine.high %v140_v8, %v148_v9  ;;  %v156_v12 = vld [vmem:[#allocation6 + $0x180] sm:$0xff]  ;;  %v4088_v14 = vcombine.low %v140_v8, %v148_v9  ;;  %1801 = vmatprep.mubr.bf16.mxu1 %v5148_v22  ;;  %v134_v7 = vld [vmem:[#allocation6 + $0xd0] sm:$0xff]  ;;  %v4061_v8 = vcombine.high %v110_v2, %v118_v3 }
  0x65   :  { %v164_v13 = vld [vmem:[#allocation6 + $0x1c0] sm:$0xff]  ;;  %v5154_v9 = vpack.c.bf16 %v5144_v18, %v5144_v18  ;;  %v174_v18 = vld [vmem:[#allocation6 + $0x210] sm:$0xff]  ;;  %p4990_p2 = pnand %p4989_p1, %p4983_p12 }
  0x66   :  { %v4105_v15 = vcombine.high %v156_v12, %v164_v13  ;;  %v172_v16 = vld [vmem:[#allocation6 + $0x200] sm:$0xff]  ;;  %v4104_v20 = vcombine.low %v156_v12, %v164_v13  ;;  %v150_v12 = vld [vmem:[#allocation6 + $0x150] sm:$0xff]  ;;  %v4077_v13 = vcombine.high %v126_v6, %v134_v7 }
  0x67   :  { %1731 = vmatpush1.bf16.msra.mxu0 %v4072_v10  ;;  %v180_v17 = vld [vmem:[#allocation6 + $0x240] sm:$0xff]  ;;  %v4060_v10 = vcombine.low %v110_v2, %v118_v3 }
  0x68   :  { %1732 = vmatprep.subr.bf16.mxu0 %v4089_v11  ;;  %v4121_v21 = vcombine.high %v172_v16, %v180_v17  ;;  %v188_v23 = vld [vmem:[#allocation6 + $0x280] sm:$0xff]  ;;  %v4120_v25 = vcombine.low %v172_v16, %v180_v17  ;;  %v142_v11 = vld [vmem:[#allocation6 + $0x110] sm:$0xff] }
  0x69   :  { %v196_v24 = vld [vmem:[#allocation6 + $0x2c0] sm:$0xff]  ;;  %v166_v16 = vld [vmem:[#allocation6 + $0x1d0] sm:$0xff]  ;;  %v4093_v17 = vcombine.high %v142_v11, %v150_v12  ;;  %v4092_v19 = vcombine.low %v142_v11, %v150_v12 }
  0x6a   :  { %v4137_v26 = vcombine.high %v188_v23, %v196_v24  ;;  %v204_v27 = vld [vmem:[#allocation6 + $0x300] sm:$0xff]  ;;  %v4136_v29 = vcombine.low %v188_v23, %v196_v24  ;;  %v190_v24 = vld [vmem:[#allocation6 + $0x290] sm:$0xff] }
  0x6b   :  { %1733 = vmatpush1.bf16.msra.mxu0 %v4088_v14  ;;  %v212_v28 = vld [vmem:[#allocation6 + $0x340] sm:$0xff]  ;;  %v4076_v14 = vcombine.low %v126_v6, %v134_v7  ;;  %v109_v7 = vld [vmem:[#allocation6 + $0x8] sm:$0xff] }
  0x6c   :  { %1734 = vmatprep.subr.bf16.mxu0 %v4105_v15  ;;  %v4153_v30 = vcombine.high %v204_v27, %v212_v28  ;;  %v220_v31 = vld [vmem:[#allocation6 + $0x380] sm:$0xff]  ;;  %v4152_v33 = vcombine.low %v204_v27, %v212_v28  ;;  %v158_v15 = vld [vmem:[#allocation6 + $0x190] sm:$0xff] }
  0x6d   :  { %v228_v32 = vld [vmem:[#allocation6 + $0x3c0] sm:$0xff]  ;;  %v4108_v23 = vcombine.low %v158_v15, %v166_v16  ;;  %v206_v28 = vld [vmem:[#allocation6 + $0x310] sm:$0xff] }
  0x6e   :  { %v4169_v34 = vcombine.high %v220_v31, %v228_v32  ;;  %v236_v35 = vld [vmem:[#allocation6 + $0x400] sm:$0xff]  ;;  %v4168_v37 = vcombine.low %v220_v31, %v228_v32  ;;  %v222_v32 = vld [vmem:[#allocation6 + $0x390] sm:$0xff] }
  0x6f   :  { %1735 = vmatpush1.bf16.msra.mxu0 %v4104_v20  ;;  %v244_v36 = vld [vmem:[#allocation6 + $0x440] sm:$0xff]  ;;  %v182_v20 = vld [vmem:[#allocation6 + $0x250] sm:$0xff] }
  0x70   :  { %1736 = vmatprep.subr.bf16.mxu0 %v4121_v21  ;;  %v252_v38 = vld [vmem:[#allocation6 + $0x480] sm:$0xff]  ;;  %v4185_v40 = vcombine.high %v236_v35, %v244_v36  ;;  %v4184_v41 = vcombine.low %v236_v35, %v244_v36  ;;  %v4109_v21 = vcombine.high %v158_v15, %v166_v16  ;;  %v4124_v27 = vcombine.low %v174_v18, %v182_v20  ;;  %v238_v36 = vld [vmem:[#allocation6 + $0x410] sm:$0xff]  ;;  %v125_v16 = vld [vmem:[#allocation6 + $0x88] sm:$0xff] }
  0x71   :  { %v260_v39 = vld [vmem:[#allocation6 + $0x4c0] sm:$0xff] }
  0x72   :  { %v268_v42 = vld [vmem:[#allocation6 + $0x500] sm:$0xff]  ;;  %v4201_v44 = vcombine.high %v252_v38, %v260_v39  ;;  %v4200_v45 = vcombine.low %v252_v38, %v260_v39 }
  0x73   :  { %1737 = vmatpush1.bf16.msra.mxu0 %v4120_v25  ;;  %v276_v43 = vld [vmem:[#allocation6 + $0x540] sm:$0xff]  ;;  %v198_v25 = vld [vmem:[#allocation6 + $0x2d0] sm:$0xff] }
  0x74   :  { %1738 = vmatprep.subr.bf16.mxu0 %v4137_v26  ;;  %v284_v46 = vld [vmem:[#allocation6 + $0x580] sm:$0xff]  ;;  %v4217_v48 = vcombine.high %v268_v42, %v276_v43  ;;  %v4216_v49 = vcombine.low %v268_v42, %v276_v43  ;;  %v4125_v26 = vcombine.high %v174_v18, %v182_v20  ;;  %v4140_v31 = vcombine.low %v190_v24, %v198_v25 }
  0x75   :  { %v292_v47 = vld [vmem:[#allocation6 + $0x5c0] sm:$0xff] }
  0x76   :  { %v300_v50 = vld [vmem:[#allocation6 + $0x600] sm:$0xff]  ;;  %v4233_v52 = vcombine.high %v284_v46, %v292_v47  ;;  %v4232_v53 = vcombine.low %v284_v46, %v292_v47 }
  0x77   :  { %1739 = vmatpush1.bf16.msra.mxu0 %v4136_v29  ;;  %v308_v51 = vld [vmem:[#allocation6 + $0x640] sm:$0xff]  ;;  %v214_v29 = vld [vmem:[#allocation6 + $0x350] sm:$0xff] }
  0x78   :  { %1740 = vmatprep.subr.bf16.mxu0 %v4153_v30  ;;  %v316_v54 = vld [vmem:[#allocation6 + $0x680] sm:$0xff]  ;;  %v4249_v56 = vcombine.high %v300_v50, %v308_v51  ;;  %v4248_v57 = vcombine.low %v300_v50, %v308_v51  ;;  %v4141_v30 = vcombine.high %v190_v24, %v198_v25  ;;  %v4156_v35 = vcombine.low %v206_v28, %v214_v29  ;;  %v141_v24 = vld [vmem:[#allocation6 + $0x108] sm:$0xff] }
  0x79   :  { %v324_v55 = vld [vmem:[#allocation6 + $0x6c0] sm:$0xff]  ;;  %v149_v25 = vld [vmem:[#allocation6 + $0x148] sm:$0xff] }
  0x7a   :  { %v332_v58 = vld [vmem:[#allocation6 + $0x700] sm:$0xff]  ;;  %v4265_v60 = vcombine.high %v316_v54, %v324_v55  ;;  %v4264_v61 = vcombine.low %v316_v54, %v324_v55 }
  0x7b   :  { %1741 = vmatpush1.bf16.msra.mxu0 %v4152_v33  ;;  %v340_v59 = vld [vmem:[#allocation6 + $0x740] sm:$0xff]  ;;  %v230_v33 = vld [vmem:[#allocation6 + $0x3d0] sm:$0xff] }
  0x7c   :  { %1742 = vmatprep.subr.bf16.mxu0 %v4169_v34  ;;  %v348_v62 = vld [vmem:[#allocation6 + $0x780] sm:$0xff]  ;;  %v4281_v0 = vcombine.high %v332_v58, %v340_v59  ;;  %v4280_v1 = vcombine.low %v332_v58, %v340_v59  ;;  %v4157_v34 = vcombine.high %v206_v28, %v214_v29  ;;  %v4173_v38 = vcombine.high %v222_v32, %v230_v33 }
  0x7d   :  { %v356_v63 = vld [vmem:[#allocation6 + $0x7c0] sm:$0xff]  ;;  %v4172_v39 = vcombine.low %v222_v32, %v230_v33  ;;  %v4090_v28 = vcombine.low %v141_v24, %v149_v25  ;;  %v157_v33 = vld [vmem:[#allocation6 + $0x188] sm:$0xff] }
  0x7e   :  { %v4297_v4 = vcombine.high %v348_v62, %v356_v63  ;;  %v4296_v5 = vcombine.low %v348_v62, %v356_v63  ;;  %v168_v32 = vld [vmem:[#allocation6 + $0x1e0] sm:$0xff] }
  0x7f   :  { %1743 = vmatpush1.bf16.msra.mxu0 %v4168_v37  ;;  %v246_v37 = vld [vmem:[#allocation6 + $0x450] sm:$0xff] }
  0x80   :  { %1744 = vmatprep.subr.bf16.mxu0 %v4185_v40  ;;  %v254_v40 = vld [vmem:[#allocation6 + $0x490] sm:$0xff]  ;;  %v4189_v42 = vcombine.high %v238_v36, %v246_v37  ;;  %v4188_v43 = vcombine.low %v238_v36, %v246_v37 }
  0x83   :  { %1745 = vmatpush1.bf16.msra.mxu0 %v4184_v41  ;;  %v262_v41 = vld [vmem:[#allocation6 + $0x4d0] sm:$0xff] }
  0x84   :  { %1746 = vmatprep.subr.bf16.mxu0 %v4201_v44  ;;  %v270_v44 = vld [vmem:[#allocation6 + $0x510] sm:$0xff]  ;;  %v4205_v46 = vcombine.high %v254_v40, %v262_v41  ;;  %v4204_v47 = vcombine.low %v254_v40, %v262_v41  ;;  %v184_v40 = vld [vmem:[#allocation6 + $0x260] sm:$0xff]  ;;  %v173_v41 = vld [vmem:[#allocation6 + $0x208] sm:$0xff] }
  0x87   :  { %1747 = vmatpush1.bf16.msra.mxu0 %v4200_v45  ;;  %v278_v45 = vld [vmem:[#allocation6 + $0x550] sm:$0xff] }
  0x88   :  { %1748 = vmatprep.subr.bf16.mxu0 %v4217_v48  ;;  %v286_v48 = vld [vmem:[#allocation6 + $0x590] sm:$0xff]  ;;  %v4221_v50 = vcombine.high %v270_v44, %v278_v45  ;;  %v4220_v51 = vcombine.low %v270_v44, %v278_v45 }
  0x8b   :  { %1749 = vmatpush1.bf16.msra.mxu0 %v4216_v49  ;;  %v294_v49 = vld [vmem:[#allocation6 + $0x5d0] sm:$0xff] }
  0x8c   :  { %1750 = vmatprep.subr.bf16.mxu0 %v4233_v52  ;;  %v302_v52 = vld [vmem:[#allocation6 + $0x610] sm:$0xff]  ;;  %v4237_v54 = vcombine.high %v286_v48, %v294_v49  ;;  %v4236_v55 = vcombine.low %v286_v48, %v294_v49  ;;  %v200_v48 = vld [vmem:[#allocation6 + $0x2e0] sm:$0xff]  ;;  %v189_v49 = vld [vmem:[#allocation6 + $0x288] sm:$0xff] }
  0x8f   :  { %1751 = vmatpush1.bf16.msra.mxu0 %v4232_v53  ;;  %v310_v53 = vld [vmem:[#allocation6 + $0x650] sm:$0xff] }
  0x90   :  { %1752 = vmatprep.subr.bf16.mxu0 %v4249_v56  ;;  %v318_v56 = vld [vmem:[#allocation6 + $0x690] sm:$0xff]  ;;  %v4253_v58 = vcombine.high %v302_v52, %v310_v53  ;;  %v4252_v59 = vcombine.low %v302_v52, %v310_v53 }
  0x93   :  { %1753 = vmatpush1.bf16.msra.mxu0 %v4248_v57  ;;  %v326_v57 = vld [vmem:[#allocation6 + $0x6d0] sm:$0xff] }
  0x94   :  { %1754 = vmatprep.subr.bf16.mxu0 %v4265_v60  ;;  %v334_v60 = vld [vmem:[#allocation6 + $0x710] sm:$0xff]  ;;  %v4269_v62 = vcombine.high %v318_v56, %v326_v57  ;;  %v4268_v63 = vcombine.low %v318_v56, %v326_v57  ;;  %v205_v56 = vld [vmem:[#allocation6 + $0x308] sm:$0xff] }
  0x95   :  { %v213_v57 = vld [vmem:[#allocation6 + $0x348] sm:$0xff] }
  0x97   :  { %1755 = vmatpush1.bf16.msra.mxu0 %v4264_v61  ;;  %v342_v61 = vld [vmem:[#allocation6 + $0x750] sm:$0xff] }
  0x98   :  { %1756 = vmatprep.subr.bf16.mxu0 %v4281_v0  ;;  %v350_v0 = vld [vmem:[#allocation6 + $0x790] sm:$0xff]  ;;  %v4285_v2 = vcombine.high %v334_v60, %v342_v61  ;;  %v4284_v3 = vcombine.low %v334_v60, %v342_v61  ;;  %v4154_v60 = vcombine.low %v205_v56, %v213_v57 }
  0x9b   :  { %1757 = vmatpush1.bf16.msra.mxu0 %v4280_v1  ;;  %v358_v1 = vld [vmem:[#allocation6 + $0x7d0] sm:$0xff] }
  0x9c   :  { %1758 = vmatprep.subr.bf16.mxu0 %v4297_v4  ;;  %v112_v4 = vld [vmem:[#allocation6 + $0x20] sm:$0xff]  ;;  %v4301_v6 = vcombine.high %v350_v0, %v358_v1  ;;  %v4300_v12 = vcombine.low %v350_v0, %v358_v1  ;;  %v229_v0 = vld [vmem:[#allocation6 + $0x3c8] sm:$0xff] }
  0x9d   :  { %v224_v1 = vld [vmem:[#allocation6 + $0x3a0] sm:$0xff] }
  0x9f   :  { %1759 = vmatpush1.bf16.msra.mxu0 %v4296_v5  ;;  %v120_v5 = vld [vmem:[#allocation6 + $0x60] sm:$0xff] }
  0xa0   :  { %1810 = vmatprep.subr.bf16.mxu0 %v4061_v8  ;;  %v117_v8 = vld [vmem:[#allocation6 + $0x48] sm:$0xff]  ;;  %v4065_v15 = vcombine.high %v112_v4, %v120_v5  ;;  %v4064_v20 = vcombine.low %v112_v4, %v120_v5 }
  0xa1   :  { %v4058_v11 = vcombine.low %v109_v7, %v117_v8 }
  0xa2   :  { %1761 = vmatmul.mubr.bf16.vlgmr.msra.gmra.mrb[0].mxu0 %v5154_v9 }
  0xa3   :  { %1811 = vmatpush1.bf16.msra.mxu0 %v4060_v10  ;;  %1842 = vmatprep.mubr.bf16.mxu0 %v5148_v22  ;;  %v4059_v10 = vcombine.high %v109_v7, %v117_v8  ;;  %v237_v7 = vld [vmem:[#allocation6 + $0x408] sm:$0xff]  ;;  %v240_v8 = vld [vmem:[#allocation6 + $0x420] sm:$0xff] }
  0xa4   :  { %1812 = vmatprep.subr.bf16.mxu0 %v4077_v13  ;;  %v128_v13 = vld [vmem:[#allocation6 + $0xa0] sm:$0xff] }
  0xa5   :  { %1769 = vmatprep.subr.bf16.mxu1 %v4059_v10  ;;  %v248_v10 = vld [vmem:[#allocation6 + $0x460] sm:$0xff] }
  0xa6   :  { %1770 = vmatpush1.bf16.msra.mxu1 %v4058_v11  ;;  %v245_v11 = vld [vmem:[#allocation6 + $0x448] sm:$0xff] }
  0xa7   :  { %1813 = vmatpush1.bf16.msra.mxu0 %v4076_v14  ;;  %v136_v14 = vld [vmem:[#allocation6 + $0xe0] sm:$0xff] }
  0xa8   :  { %1814 = vmatprep.subr.bf16.mxu0 %v4093_v17  ;;  %v133_v17 = vld [vmem:[#allocation6 + $0xc8] sm:$0xff]  ;;  %v4080_v29 = vcombine.low %v128_v13, %v136_v14 }
  0xa9   :  { %v4074_v18 = vcombine.low %v125_v16, %v133_v17 }
  0xab   :  { %1815 = vmatpush1.bf16.msra.mxu0 %v4092_v19  ;;  %v4075_v19 = vcombine.high %v125_v16, %v133_v17  ;;  %v253_v16 = vld [vmem:[#allocation6 + $0x488] sm:$0xff] }
  0xac   :  { %1816 = vmatprep.subr.bf16.mxu0 %v4109_v21  ;;  %v4081_v21 = vcombine.high %v128_v13, %v136_v14  ;;  %v4186_v13 = vcombine.low %v237_v7, %v245_v11  ;;  %v261_v17 = vld [vmem:[#allocation6 + $0x4c8] sm:$0xff] }
  0xad   :  { %1771 = vmatprep.subr.bf16.mxu1 %v4075_v19  ;;  %v256_v19 = vld [vmem:[#allocation6 + $0x4a0] sm:$0xff] }
  0xae   :  { %1772 = vmatpush1.bf16.msra.mxu1 %v4074_v18  ;;  %v264_v18 = vld [vmem:[#allocation6 + $0x4e0] sm:$0xff] }
  0xaf   :  { %1817 = vmatpush1.bf16.msra.mxu0 %v4108_v23  ;;  %v144_v23 = vld [vmem:[#allocation6 + $0x120] sm:$0xff] }
  0xb0   :  { %1818 = vmatprep.subr.bf16.mxu0 %v4125_v26  ;;  %v152_v26 = vld [vmem:[#allocation6 + $0x160] sm:$0xff] }
  0xb1   :  { %v4096_v37 = vcombine.low %v144_v23, %v152_v26 }
  0xb3   :  { %1819 = vmatpush1.bf16.msra.mxu0 %v4124_v27  ;;  %v4091_v27 = vcombine.high %v141_v24, %v149_v25  ;;  %v4209_v24 = vcombine.high %v256_v19, %v264_v18  ;;  %v269_v25 = vld [vmem:[#allocation6 + $0x508] sm:$0xff] }
  0xb4   :  { %1820 = vmatprep.subr.bf16.mxu0 %v4141_v30  ;;  %v160_v30 = vld [vmem:[#allocation6 + $0x1a0] sm:$0xff] }
  0xb5   :  { %1773 = vmatprep.subr.bf16.mxu1 %v4091_v27  ;;  %v4112_v45 = vcombine.low %v160_v30, %v168_v32  ;;  %v272_v27 = vld [vmem:[#allocation6 + $0x520] sm:$0xff] }
  0xb6   :  { %1774 = vmatpush1.bf16.msra.mxu1 %v4090_v28  ;;  %v280_v28 = vld [vmem:[#allocation6 + $0x560] sm:$0xff] }
  0xb7   :  { %1821 = vmatpush1.bf16.msra.mxu0 %v4140_v31  ;;  %v4097_v31 = vcombine.high %v144_v23, %v152_v26  ;;  %v4192_v23 = vcombine.low %v240_v8, %v248_v10  ;;  %v277_v26 = vld [vmem:[#allocation6 + $0x548] sm:$0xff] }
  0xb8   :  { %1822 = vmatprep.subr.bf16.mxu0 %v4157_v34  ;;  %v165_v34 = vld [vmem:[#allocation6 + $0x1c8] sm:$0xff] }
  0xb9   :  { %v4106_v36 = vcombine.low %v157_v33, %v165_v34 }
  0xbb   :  { %1823 = vmatpush1.bf16.msra.mxu0 %v4156_v35  ;;  %v4107_v35 = vcombine.high %v157_v33, %v165_v34  ;;  %v285_v33 = vld [vmem:[#allocation6 + $0x588] sm:$0xff] }
  0xbc   :  { %1824 = vmatprep.subr.bf16.mxu0 %v4173_v38  ;;  %v176_v38 = vld [vmem:[#allocation6 + $0x220] sm:$0xff]  ;;  %v293_v34 = vld [vmem:[#allocation6 + $0x5c8] sm:$0xff] }
  0xbd   :  { %1775 = vmatprep.subr.bf16.mxu1 %v4107_v35  ;;  %v4128_v53 = vcombine.low %v176_v38, %v184_v40  ;;  %v288_v35 = vld [vmem:[#allocation6 + $0x5a0] sm:$0xff] }
  0xbe   :  { %1776 = vmatpush1.bf16.msra.mxu1 %v4106_v36  ;;  %v296_v36 = vld [vmem:[#allocation6 + $0x5e0] sm:$0xff] }
  0xbf   :  { %1825 = vmatpush1.bf16.msra.mxu0 %v4172_v39  ;;  %v4113_v39 = vcombine.high %v160_v30, %v168_v32  ;;  %v4218_v30 = vcombine.low %v269_v25, %v277_v26  ;;  %v4225_v32 = vcombine.high %v272_v27, %v280_v28 }
  0xc0   :  { %1826 = vmatprep.subr.bf16.mxu0 %v4189_v42  ;;  %v181_v42 = vld [vmem:[#allocation6 + $0x248] sm:$0xff] }
  0xc1   :  { %v4122_v44 = vcombine.low %v173_v41, %v181_v42 }
  0xc3   :  { %1827 = vmatpush1.bf16.msra.mxu0 %v4188_v43  ;;  %v4123_v43 = vcombine.high %v173_v41, %v181_v42  ;;  %v301_v41 = vld [vmem:[#allocation6 + $0x608] sm:$0xff] }
  0xc4   :  { %1828 = vmatprep.subr.bf16.mxu0 %v4205_v46  ;;  %v192_v46 = vld [vmem:[#allocation6 + $0x2a0] sm:$0xff]  ;;  %v309_v42 = vld [vmem:[#allocation6 + $0x648] sm:$0xff] }
  0xc5   :  { %1777 = vmatprep.subr.bf16.mxu1 %v4123_v43  ;;  %v4144_v61 = vcombine.low %v192_v46, %v200_v48  ;;  %v304_v43 = vld [vmem:[#allocation6 + $0x620] sm:$0xff] }
  0xc6   :  { %1778 = vmatpush1.bf16.msra.mxu1 %v4122_v44  ;;  %v312_v44 = vld [vmem:[#allocation6 + $0x660] sm:$0xff] }
  0xc7   :  { %1829 = vmatpush1.bf16.msra.mxu0 %v4204_v47  ;;  %v4129_v47 = vcombine.high %v176_v38, %v184_v40  ;;  %v4234_v38 = vcombine.low %v285_v33, %v293_v34  ;;  %v4241_v40 = vcombine.high %v288_v35, %v296_v36 }
  0xc8   :  { %1830 = vmatprep.subr.bf16.mxu0 %v4221_v50  ;;  %v197_v50 = vld [vmem:[#allocation6 + $0x2c8] sm:$0xff] }
  0xc9   :  { %v4138_v52 = vcombine.low %v189_v49, %v197_v50 }
  0xcb   :  { %1831 = vmatpush1.bf16.msra.mxu0 %v4220_v51  ;;  %v4139_v51 = vcombine.high %v189_v49, %v197_v50  ;;  %v317_v49 = vld [vmem:[#allocation6 + $0x688] sm:$0xff] }
  0xcc   :  { %1832 = vmatprep.subr.bf16.mxu0 %v4237_v54  ;;  %v4145_v54 = vcombine.high %v192_v46, %v200_v48  ;;  %v4250_v46 = vcombine.low %v301_v41, %v309_v42  ;;  %v4257_v48 = vcombine.high %v304_v43, %v312_v44  ;;  %v325_v50 = vld [vmem:[#allocation6 + $0x6c8] sm:$0xff] }
  0xcd   :  { %1779 = vmatprep.subr.bf16.mxu1 %v4139_v51  ;;  %v320_v51 = vld [vmem:[#allocation6 + $0x6a0] sm:$0xff] }
  0xce   :  { %1780 = vmatpush1.bf16.msra.mxu1 %v4138_v52  ;;  %v328_v52 = vld [vmem:[#allocation6 + $0x6e0] sm:$0xff] }
  0xcf   :  { %1833 = vmatpush1.bf16.msra.mxu0 %v4236_v55  ;;  %v208_v55 = vld [vmem:[#allocation6 + $0x320] sm:$0xff] }
  0xd0   :  { %1834 = vmatprep.subr.bf16.mxu0 %v4253_v58  ;;  %v216_v58 = vld [vmem:[#allocation6 + $0x360] sm:$0xff] }
  0xd1   :  { %v4160_v5 = vcombine.low %v208_v55, %v216_v58 }
  0xd3   :  { %1835 = vmatpush1.bf16.msra.mxu0 %v4252_v59  ;;  %v4155_v59 = vcombine.high %v205_v56, %v213_v57  ;;  %v4273_v56 = vcombine.high %v320_v51, %v328_v52  ;;  %v333_v57 = vld [vmem:[#allocation6 + $0x708] sm:$0xff] }
  0xd4   :  { %1836 = vmatprep.subr.bf16.mxu0 %v4269_v62  ;;  %v4161_v62 = vcombine.high %v208_v55, %v216_v58  ;;  %v4256_v55 = vcombine.low %v304_v43, %v312_v44  ;;  %v341_v58 = vld [vmem:[#allocation6 + $0x748] sm:$0xff] }
  0xd5   :  { %1781 = vmatprep.subr.bf16.mxu1 %v4155_v59  ;;  %v336_v59 = vld [vmem:[#allocation6 + $0x720] sm:$0xff] }
  0xd6   :  { %1782 = vmatpush1.bf16.msra.mxu1 %v4154_v60  ;;  %v344_v60 = vld [vmem:[#allocation6 + $0x760] sm:$0xff] }
  0xd7   :  { %1837 = vmatpush1.bf16.msra.mxu0 %v4268_v63  ;;  %v221_v63 = vld [vmem:[#allocation6 + $0x388] sm:$0xff] }
  0xd8   :  { %1838 = vmatprep.subr.bf16.mxu0 %v4285_v2  ;;  %v232_v2 = vld [vmem:[#allocation6 + $0x3e0] sm:$0xff]  ;;  %v4170_v4 = vcombine.low %v221_v63, %v229_v0 }
  0xd9   :  { %v4176_v14 = vcombine.low %v224_v1, %v232_v2 }
  0xdb   :  { %1839 = vmatpush1.bf16.msra.mxu0 %v4284_v3  ;;  %v4171_v3 = vcombine.high %v221_v63, %v229_v0  ;;  %v4272_v63 = vcombine.low %v320_v51, %v328_v52  ;;  %v4289_v0 = vcombine.high %v336_v59, %v344_v60 }
  0xdc   :  { %1840 = vmatprep.subr.bf16.mxu0 %v4301_v6  ;;  %v4177_v6 = vcombine.high %v224_v1, %v232_v2  ;;  %v349_v1 = vld [vmem:[#allocation6 + $0x788] sm:$0xff] }
  0xdd   :  { %1783 = vmatprep.subr.bf16.mxu1 %v4171_v3  ;;  %v357_v2 = vld [vmem:[#allocation6 + $0x7c8] sm:$0xff]  ;;  %v352_v3 = vld [vmem:[#allocation6 + $0x7a0] sm:$0xff] }
  0xde   :  { %1784 = vmatpush1.bf16.msra.mxu1 %v4170_v4  ;;  %v360_v4 = vld [vmem:[#allocation6 + $0x7e0] sm:$0xff] }
  0xdf   :  { %1841 = vmatpush1.bf16.msra.mxu0 %v4300_v12  ;;  %v4187_v12 = vcombine.high %v237_v7, %v245_v11  ;;  %v4288_v7 = vcombine.low %v336_v59, %v344_v60  ;;  %v119_v11 = vld [vmem:[#allocation6 + $0x58] sm:$0xff] }
  0xe0   :  { %1892 = vmatprep.subr.bf16.mxu0 %v4065_v15  ;;  %v4193_v15 = vcombine.high %v240_v8, %v248_v10  ;;  %v4305_v8 = vcombine.high %v352_v3, %v360_v4  ;;  %v111_v10 = vld [vmem:[#allocation6 + $0x18] sm:$0xff] }
  0xe1   :  { %1785 = vmatprep.subr.bf16.mxu1 %v4187_v12  ;;  %v114_v12 = vld [vmem:[#allocation6 + $0x30] sm:$0xff] }
  0xe2   :  { %1843 = vmatmul.mubr.bf16.vlgmr.msra.gmra.mrb[4].mxu0 %v5154_v9  ;;  %1786 = vmatpush1.bf16.msra.mxu1 %v4186_v13  ;;  %v122_v13 = vld [vmem:[#allocation6 + $0x70] sm:$0xff] }
  0xe3   :  { %1893 = vmatpush1.bf16.msra.mxu0 %v4064_v20  ;;  %1924 = vmatprep.mubr.bf16.mxu0 %v5148_v22  ;;  %v4203_v20 = vcombine.high %v253_v16, %v261_v17 }
  0xe4   :  { %1894 = vmatprep.subr.bf16.mxu0 %v4081_v21  ;;  %v4202_v21 = vcombine.low %v253_v16, %v261_v17  ;;  %v4304_v16 = vcombine.low %v352_v3, %v360_v4  ;;  %v4069_v17 = vcombine.high %v114_v12, %v122_v13  ;;  %v223_v3 = vld [vmem:[#allocation6 + $0x398] sm:$0xff] }
  0xe5   :  { %1787 = vmatprep.subr.bf16.mxu1 %v4203_v20  ;;  %v130_v20 = vld [vmem:[#allocation6 + $0xb0] sm:$0xff]  ;;  %v231_v4 = vld [vmem:[#allocation6 + $0x3d8] sm:$0xff] }
  0xe6   :  { %1788 = vmatpush1.bf16.msra.mxu1 %v4202_v21  ;;  %v138_v21 = vld [vmem:[#allocation6 + $0xf0] sm:$0xff] }
  0xe7   :  { %1895 = vmatpush1.bf16.msra.mxu0 %v4080_v29  ;;  %v4219_v29 = vcombine.high %v269_v25, %v277_v26  ;;  %v4068_v25 = vcombine.low %v114_v12, %v122_v13  ;;  %v4085_v26 = vcombine.high %v130_v20, %v138_v21  ;;  %v239_v12 = vld [vmem:[#allocation6 + $0x418] sm:$0xff] }
  0xe8   :  { %1896 = vmatprep.subr.bf16.mxu0 %v4097_v31  ;;  %v4208_v31 = vcombine.low %v256_v19, %v264_v18  ;;  %v127_v19 = vld [vmem:[#allocation6 + $0x98] sm:$0xff] }
  0xe9   :  { %1789 = vmatprep.subr.bf16.mxu1 %v4219_v29  ;;  %v135_v18 = vld [vmem:[#allocation6 + $0xd8] sm:$0xff]  ;;  %v146_v29 = vld [vmem:[#allocation6 + $0x130] sm:$0xff] }
  0xea   :  { %1790 = vmatpush1.bf16.msra.mxu1 %v4218_v30  ;;  %v154_v30 = vld [vmem:[#allocation6 + $0x170] sm:$0xff]  ;;  %v247_v13 = vld [vmem:[#allocation6 + $0x458] sm:$0xff] }
  0xeb   :  { %1897 = vmatpush1.bf16.msra.mxu0 %v4096_v37  ;;  %v4235_v37 = vcombine.high %v285_v33, %v293_v34  ;;  %v159_v33 = vld [vmem:[#allocation6 + $0x198] sm:$0xff]  ;;  %v4100_v44 = vcombine.low %v146_v29, %v154_v30 }
  0xec   :  { %1898 = vmatprep.subr.bf16.mxu0 %v4113_v39  ;;  %v4224_v39 = vcombine.low %v272_v27, %v280_v28  ;;  %v143_v27 = vld [vmem:[#allocation6 + $0x118] sm:$0xff] }
  0xed   :  { %1791 = vmatprep.subr.bf16.mxu1 %v4235_v37  ;;  %v151_v28 = vld [vmem:[#allocation6 + $0x158] sm:$0xff] }
  0xee   :  { %1792 = vmatpush1.bf16.msra.mxu1 %v4234_v38  ;;  %v167_v34 = vld [vmem:[#allocation6 + $0x1d8] sm:$0xff] }
  0xef   :  { %1899 = vmatpush1.bf16.msra.mxu0 %v4112_v45  ;;  %v4251_v45 = vcombine.high %v301_v41, %v309_v42  ;;  %v175_v37 = vld [vmem:[#allocation6 + $0x218] sm:$0xff]  ;;  %v170_v41 = vld [vmem:[#allocation6 + $0x1f0] sm:$0xff]  ;;  %v4110_v42 = vcombine.low %v159_v33, %v167_v34 }
  0xf0   :  { %1900 = vmatprep.subr.bf16.mxu0 %v4129_v47  ;;  %v4240_v47 = vcombine.low %v288_v35, %v296_v36  ;;  %v4084_v35 = vcombine.low %v130_v20, %v138_v21  ;;  %v4111_v36 = vcombine.high %v159_v33, %v167_v34  ;;  %v183_v38 = vld [vmem:[#allocation6 + $0x258] sm:$0xff]  ;;  %v274_v34 = vld [vmem:[#allocation6 + $0x530] sm:$0xff] }
  0xf1   :  { %1793 = vmatprep.subr.bf16.mxu1 %v4251_v45  ;;  %v4127_v43 = vcombine.high %v175_v37, %v183_v38  ;;  %v191_v45 = vld [vmem:[#allocation6 + $0x298] sm:$0xff] }
  0xf2   :  { %1794 = vmatpush1.bf16.msra.mxu1 %v4250_v46  ;;  %v199_v46 = vld [vmem:[#allocation6 + $0x2d8] sm:$0xff] }
  0xf3   :  { %1901 = vmatpush1.bf16.msra.mxu0 %v4128_v53  ;;  %v4267_v53 = vcombine.high %v317_v49, %v325_v50  ;;  %v4143_v51 = vcombine.high %v191_v45, %v199_v46  ;;  %v263_v20 = vld [vmem:[#allocation6 + $0x4d8] sm:$0xff] }
  0xf4   :  { %1902 = vmatprep.subr.bf16.mxu0 %v4145_v54  ;;  %v4266_v54 = vcombine.low %v317_v49, %v325_v50  ;;  %v186_v49 = vld [vmem:[#allocation6 + $0x270] sm:$0xff]  ;;  %v4126_v50 = vcombine.low %v175_v37, %v183_v38  ;;  %v271_v21 = vld [vmem:[#allocation6 + $0x518] sm:$0xff] }
  0xf5   :  { %1795 = vmatprep.subr.bf16.mxu1 %v4267_v53  ;;  %v207_v53 = vld [vmem:[#allocation6 + $0x318] sm:$0xff] }
  0xf6   :  { %1796 = vmatpush1.bf16.msra.mxu1 %v4266_v54  ;;  %v215_v54 = vld [vmem:[#allocation6 + $0x358] sm:$0xff] }
  0xf7   :  { %1903 = vmatpush1.bf16.msra.mxu0 %v4144_v61  ;;  %v4283_v61 = vcombine.high %v333_v57, %v341_v58  ;;  %v4159_v59 = vcombine.high %v207_v53, %v215_v54 }
  0xf8   :  { %1904 = vmatprep.subr.bf16.mxu0 %v4161_v62  ;;  %v4282_v62 = vcombine.low %v333_v57, %v341_v58  ;;  %v202_v57 = vld [vmem:[#allocation6 + $0x2f0] sm:$0xff]  ;;  %v4142_v58 = vcombine.low %v191_v45, %v199_v46 }
  0xf9   :  { %1797 = vmatprep.subr.bf16.mxu1 %v4283_v61 }
  0xfa   :  { %1798 = vmatpush1.bf16.msra.mxu1 %v4282_v62  ;;  %v210_v62 = vld [vmem:[#allocation6 + $0x330] sm:$0xff] }
  0xfb   :  { %1905 = vmatpush1.bf16.msra.mxu0 %v4160_v5  ;;  %v4299_v5 = vcombine.high %v349_v1, %v357_v2 }
  0xfc   :  { %1906 = vmatprep.subr.bf16.mxu0 %v4177_v6  ;;  %v4298_v6 = vcombine.low %v349_v1, %v357_v2 }
  0xfd   :  { %1799 = vmatprep.subr.bf16.mxu1 %v4299_v5  ;;  %v226_v5 = vld [vmem:[#allocation6 + $0x3b0] sm:$0xff] }
  0xfe   :  { %1800 = vmatpush1.bf16.msra.mxu1 %v4298_v6  ;;  %v234_v6 = vld [vmem:[#allocation6 + $0x3f0] sm:$0xff] }
  0xff   :  { %1907 = vmatpush1.bf16.msra.mxu0 %v4176_v14  ;;  %v4062_v14 = vcombine.low %v111_v10, %v119_v11 }
 0x100   :  { %1908 = vmatprep.subr.bf16.mxu0 %v4193_v15  ;;  %v4063_v15 = vcombine.high %v111_v10, %v119_v11  ;;  %v4181_v11 = vcombine.high %v226_v5, %v234_v6 }
 0x101   :  { %1802 = vmatmul.mubr.bf16.vlgmr.msra.gmra.mrb[0].mxu1 %v5154_v9 }
 0x102   :  { %1851 = vmatprep.subr.bf16.mxu1 %v4063_v15  ;;  %1883 = vmatprep.mubr.bf16.mxu1 %v5148_v22  ;;  %v250_v15 = vld [vmem:[#allocation6 + $0x470] sm:$0xff] }
 0x103   :  { %1909 = vmatpush1.bf16.msra.mxu0 %v4192_v23  ;;  %1852 = vmatpush1.bf16.msra.mxu1 %v4062_v14  ;;  %v4078_v23 = vcombine.low %v127_v19, %v135_v18  ;;  %v242_v14 = vld [vmem:[#allocation6 + $0x430] sm:$0xff] }
 0x104   :  { %1910 = vmatprep.subr.bf16.mxu0 %v4209_v24  ;;  %v4079_v24 = vcombine.high %v127_v19, %v135_v18  ;;  %v4180_v19 = vcombine.low %v226_v5, %v234_v6  ;;  %v255_v18 = vld [vmem:[#allocation6 + $0x498] sm:$0xff] }
 0x106   :  { %1853 = vmatprep.subr.bf16.mxu1 %v4079_v24  ;;  %v4207_v24 = vcombine.high %v255_v18, %v263_v20 }
 0x107   :  { %1911 = vmatpush1.bf16.msra.mxu0 %v4208_v31  ;;  %1854 = vmatpush1.bf16.msra.mxu1 %v4078_v23  ;;  %v4095_v31 = vcombine.high %v143_v27, %v151_v28  ;;  %v4197_v23 = vcombine.high %v242_v14, %v250_v15 }
 0x108   :  { %1912 = vmatprep.subr.bf16.mxu0 %v4225_v32  ;;  %v4094_v32 = vcombine.low %v143_v27, %v151_v28  ;;  %v266_v27 = vld [vmem:[#allocation6 + $0x4f0] sm:$0xff]  ;;  %v4206_v28 = vcombine.low %v255_v18, %v263_v20 }
 0x109   :  { %1855 = vmatprep.subr.bf16.mxu1 %v4095_v31  ;;  %v287_v31 = vld [vmem:[#allocation6 + $0x598] sm:$0xff] }
 0x10b   :  { %1913 = vmatpush1.bf16.msra.mxu0 %v4224_v39  ;;  %v4101_v39 = vcombine.high %v146_v29, %v154_v30  ;;  %1856 = vmatpush1.bf16.msra.mxu1 %v4094_v32  ;;  %v4196_v30 = vcombine.low %v242_v14, %v250_v15  ;;  %v295_v32 = vld [vmem:[#allocation6 + $0x5d8] sm:$0xff] }
 0x10c   :  { %1914 = vmatprep.subr.bf16.mxu0 %v4241_v40  ;;  %v162_v40 = vld [vmem:[#allocation6 + $0x1b0] sm:$0xff]  ;;  %1857 = vmatprep.subr.bf16.mxu1 %v4111_v36  ;;  %v4239_v37 = vcombine.high %v287_v31, %v295_v32 }
 0x10d   :  { %v4116_v52 = vcombine.low %v162_v40, %v170_v41 }
 0x10f   :  { %1915 = vmatpush1.bf16.msra.mxu0 %v4240_v47  ;;  %v4117_v47 = vcombine.high %v162_v40, %v170_v41  ;;  %1858 = vmatpush1.bf16.msra.mxu1 %v4110_v42  ;;  %v311_v40 = vld [vmem:[#allocation6 + $0x658] sm:$0xff]  ;;  %v290_v42 = vld [vmem:[#allocation6 + $0x5b0] sm:$0xff] }
 0x110   :  { %1916 = vmatprep.subr.bf16.mxu0 %v4257_v48  ;;  %v178_v48 = vld [vmem:[#allocation6 + $0x230] sm:$0xff]  ;;  %1859 = vmatprep.subr.bf16.mxu1 %v4127_v43 }
 0x111   :  { %v4132_v60 = vcombine.low %v178_v48, %v186_v49  ;;  %v298_v43 = vld [vmem:[#allocation6 + $0x5f0] sm:$0xff] }
 0x113   :  { %1917 = vmatpush1.bf16.msra.mxu0 %v4256_v55  ;;  %v4133_v55 = vcombine.high %v178_v48, %v186_v49  ;;  %1860 = vmatpush1.bf16.msra.mxu1 %v4126_v50  ;;  %v327_v48 = vld [vmem:[#allocation6 + $0x6d8] sm:$0xff]  ;;  %v4245_v49 = vcombine.high %v290_v42, %v298_v43  ;;  %v306_v50 = vld [vmem:[#allocation6 + $0x630] sm:$0xff] }
 0x114   :  { %1918 = vmatprep.subr.bf16.mxu0 %v4273_v56  ;;  %v194_v56 = vld [vmem:[#allocation6 + $0x2b0] sm:$0xff]  ;;  %1861 = vmatprep.subr.bf16.mxu1 %v4143_v51 }
 0x115   :  { %v4149_v61 = vcombine.high %v194_v56, %v202_v57  ;;  %v4148_v1 = vcombine.low %v194_v56, %v202_v57  ;;  %v314_v51 = vld [vmem:[#allocation6 + $0x670] sm:$0xff]  ;;  %v343_v56 = vld [vmem:[#allocation6 + $0x758] sm:$0xff] }
 0x116   :  { %v4261_v57 = vcombine.high %v306_v50, %v314_v51 }
 0x117   :  { %1919 = vmatpush1.bf16.msra.mxu0 %v4272_v63  ;;  %v218_v63 = vld [vmem:[#allocation6 + $0x370] sm:$0xff]  ;;  %1862 = vmatpush1.bf16.msra.mxu1 %v4142_v58 }
 0x118   :  { %1920 = vmatprep.subr.bf16.mxu0 %v4289_v0  ;;  %v4158_v0 = vcombine.low %v207_v53, %v215_v54  ;;  %1863 = vmatprep.subr.bf16.mxu1 %v4159_v59  ;;  %v4165_v2 = vcombine.high %v210_v62, %v218_v63  ;;  %v4164_v10 = vcombine.low %v210_v62, %v218_v63  ;;  %v322_v58 = vld [vmem:[#allocation6 + $0x6b0] sm:$0xff]  ;;  %v351_v63 = vld [vmem:[#allocation6 + $0x798] sm:$0xff] }
 0x119   :  { %v4244_v54 = vcombine.low %v290_v42, %v298_v43  ;;  %v330_v59 = vld [vmem:[#allocation6 + $0x6f0] sm:$0xff]  ;;  %v4260_v62 = vcombine.low %v306_v50, %v314_v51  ;;  %v193_v42 = vld [vmem:[#allocation6 + $0x2a8] sm:$0xff] }
 0x11a   :  { %v4276_v6 = vcombine.low %v322_v58, %v330_v59  ;;  %v201_v43 = vld [vmem:[#allocation6 + $0x2e8] sm:$0xff]  ;;  %v5192_v51 = vld [vmem:[#allocation9 + $0x44] ss:$8 sps:$4 sm:$0xff]  }
 0x11b   :  { %1921 = vmatpush1.bf16.msra.mxu0 %v4288_v7  ;;  %1864 = vmatpush1.bf16.msra.mxu1 %v4158_v0  ;;  %v4175_v7 = vcombine.high %v223_v3, %v231_v4  ;;  %v359_v0 = vld [vmem:[#allocation6 + $0x7d8] sm:$0xff]  ;;  %v217_v50 = vld [vmem:[#allocation6 + $0x368] sm:$0xff] }
 0x11c   :  { %1922 = vmatprep.subr.bf16.mxu0 %v4305_v8  ;;  %v4174_v8 = vcombine.low %v223_v3, %v231_v4  ;;  %v346_v3 = vld [vmem:[#allocation6 + $0x770] sm:$0xff]  ;;  %v4303_v5 = vcombine.high %v351_v63, %v359_v0 }
 0x11d   :  { %1865 = vmatprep.subr.bf16.mxu1 %v4175_v7  ;;  %v113_v7 = vld [vmem:[#allocation6 + $0x28] sm:$0xff] }
 0x11f   :  { %1923 = vmatpush1.bf16.msra.mxu0 %v4304_v16  ;;  %1866 = vmatpush1.bf16.msra.mxu1 %v4174_v8  ;;  %v4191_v16 = vcombine.high %v239_v12, %v247_v13  ;;  %v121_v8 = vld [vmem:[#allocation6 + $0x68] sm:$0xff] }
 0x120   :  { %1974 = vmatprep.subr.bf16.mxu0 %v4069_v17  ;;  %v4190_v17 = vcombine.low %v239_v12, %v247_v13  ;;  %v362_v12 = vld [vmem:[#allocation6 + $0x7f0] sm:$0xff]  ;;  %v4302_v13 = vcombine.low %v351_v63, %v359_v0  ;;  %v4067_v14 = vcombine.high %v113_v7, %v121_v8  ;;  %v4066_v18 = vcombine.low %v113_v7, %v121_v8  ;;  %v233_v63 = vld [vmem:[#allocation6 + $0x3e8] sm:$0xff] }
 0x121   :  { %1867 = vmatprep.subr.bf16.mxu1 %v4191_v16  ;;  %v129_v16 = vld [vmem:[#allocation6 + $0xa8] sm:$0xff] }
 0x122   :  { %1925 = vmatmul.mubr.bf16.vlgmr.msra.gmra.mrb[8].mxu0 %v5154_v9  ;;  %v5219_v8 = vld [vmem:[#allocation9 + $0x74] ss:$8 sps:$4 sm:$0xff]  }
 0x123   :  { %1975 = vmatpush1.bf16.msra.mxu0 %v4068_v25  ;;  %2006 = vmatprep.mubr.bf16.mxu0 %v5148_v22  ;;  %v279_v25 = vld [vmem:[#allocation6 + $0x558] sm:$0xff] }
 0x124   :  { %1976 = vmatprep.subr.bf16.mxu0 %v4085_v26  ;;  %v258_v26 = vld [vmem:[#allocation6 + $0x4b0] sm:$0xff]  ;;  %1868 = vmatpush1.bf16.msra.mxu1 %v4190_v17  ;;  %v4223_v29 = vcombine.high %v271_v21, %v279_v25  ;;  %v4222_v36 = vcombine.low %v271_v21, %v279_v25  ;;  %v137_v17 = vld [vmem:[#allocation6 + $0xe8] sm:$0xff] }
 0x125   :  { %1869 = vmatprep.subr.bf16.mxu1 %v4207_v24  ;;  %v4213_v33 = vcombine.high %v258_v26, %v266_v27  ;;  %v4212_v38 = vcombine.low %v258_v26, %v266_v27  ;;  %v4083_v20 = vcombine.high %v129_v16, %v137_v17  ;;  %v153_v24 = vld [vmem:[#allocation6 + $0x168] sm:$0xff]  ;;  %v5164_v25 = vld [vmem:[#allocation9 + $0x4] ss:$8 sps:$4 sm:$0xff]   ;;  %v4082_v26 = vcombine.low %v129_v16, %v137_v17 }
 0x126   :  { %v257_v17 = vld [vmem:[#allocation6 + $0x4a8] sm:$0xff] }
 0x127   :  { %1977 = vmatpush1.bf16.msra.mxu0 %v4084_v35  ;;  %v282_v35 = vld [vmem:[#allocation6 + $0x570] sm:$0xff] }
 0x128   :  { %1978 = vmatprep.subr.bf16.mxu0 %v4101_v39  ;;  %1870 = vmatpush1.bf16.msra.mxu1 %v4206_v28  ;;  %v303_v39 = vld [vmem:[#allocation6 + $0x618] sm:$0xff]  ;;  %v4229_v41 = vcombine.high %v274_v34, %v282_v35  ;;  %v4228_v46 = vcombine.low %v274_v34, %v282_v35  ;;  %v5175_v34 = vld [vmem:[#allocation9 + $0x10] ss:$8 sps:$4 sm:$0xff]  }
 0x129   :  { %1871 = vmatprep.subr.bf16.mxu1 %v4223_v29  ;;  %v4255_v45 = vcombine.high %v303_v39, %v311_v40  ;;  %v5168_v28 = vld [vmem:[#allocation9] ss:$8 sps:$4 sm:$0xff]   ;;  %v161_v29 = vld [vmem:[#allocation6 + $0x1a8] sm:$0xff] }
 0x12a   :  { %v177_v35 = vld [vmem:[#allocation6 + $0x228] sm:$0xff] }
 0x12b   :  { %1979 = vmatpush1.bf16.msra.mxu0 %v4100_v44  ;;  %v4238_v44 = vcombine.low %v287_v31, %v295_v32  ;;  %v5171_v31 = vld [vmem:[#allocation9 + $0x14] ss:$8 sps:$4 sm:$0xff]  }
 0x12c   :  { %1980 = vmatprep.subr.bf16.mxu0 %v4117_v47  ;;  %1872 = vmatpush1.bf16.msra.mxu1 %v4222_v36  ;;  %v319_v47 = vld [vmem:[#allocation6 + $0x698] sm:$0xff]  ;;  %v185_v36 = vld [vmem:[#allocation6 + $0x268] sm:$0xff] }
 0x12d   :  { %1873 = vmatprep.subr.bf16.mxu1 %v4239_v37  ;;  %v4271_v53 = vcombine.high %v319_v47, %v327_v48  ;;  %v5178_v37 = vld [vmem:[#allocation9 + $0x24] ss:$8 sps:$4 sm:$0xff]  }
 0x12f   :  { %1981 = vmatpush1.bf16.msra.mxu0 %v4116_v52  ;;  %v4254_v52 = vcombine.low %v303_v39, %v311_v40  ;;  %v4131_v39 = vcombine.high %v177_v35, %v185_v36  ;;  %v5181_v40 = vld [vmem:[#allocation9 + $0x20] ss:$8 sps:$4 sm:$0xff]  }
 0x130   :  { %1982 = vmatprep.subr.bf16.mxu0 %v4133_v55  ;;  %1874 = vmatpush1.bf16.msra.mxu1 %v4238_v44  ;;  %v335_v55 = vld [vmem:[#allocation6 + $0x718] sm:$0xff]  ;;  %v5184_v44 = vld [vmem:[#allocation9 + $0x34] ss:$8 sps:$4 sm:$0xff]  }
 0x131   :  { %1875 = vmatprep.subr.bf16.mxu1 %v4255_v45  ;;  %v4286_v4 = vcombine.low %v335_v55, %v343_v56  ;;  %v4130_v45 = vcombine.low %v177_v35, %v185_v36  ;;  %v5234_v36 = vld [vmem:[#allocation9 + $0x90] ss:$8 sps:$4 sm:$0xff]  }
 0x133   :  { %1983 = vmatpush1.bf16.msra.mxu0 %v4132_v60  ;;  %v4270_v60 = vcombine.low %v319_v47, %v327_v48  ;;  %v5187_v47 = vld [vmem:[#allocation9 + $0x30] ss:$8 sps:$4 sm:$0xff]  }
 0x134   :  { %1984 = vmatprep.subr.bf16.mxu0 %v4149_v61  ;;  %1876 = vmatpush1.bf16.msra.mxu1 %v4254_v52  ;;  %v4287_v61 = vcombine.high %v335_v55, %v343_v56  ;;  %v4146_v52 = vcombine.low %v193_v42, %v201_v43  ;;  %v5201_v56 = vld [vmem:[#allocation8] sm:$0xff] }
 0x135   :  { %1877 = vmatprep.subr.bf16.mxu1 %v4271_v53 }
 0x137   :  { %1985 = vmatpush1.bf16.msra.mxu0 %v4148_v1  ;;  %v4277_v1 = vcombine.high %v322_v58, %v330_v59 }
 0x138   :  { %1986 = vmatprep.subr.bf16.mxu0 %v4165_v2  ;;  %v338_v2 = vld [vmem:[#allocation6 + $0x730] sm:$0xff]  ;;  %1878 = vmatpush1.bf16.msra.mxu1 %v4270_v60  ;;  %v5208_v60 = vld [vmem:[#allocation9 + $0x50] ss:$8 sps:$4 sm:$0xff]  }
 0x139   :  { %1879 = vmatprep.subr.bf16.mxu1 %v4287_v61  ;;  %v4292_v15 = vcombine.low %v338_v2, %v346_v3  ;;  %v5211_v61 = vld [vmem:[#allocation9 + $0x64] ss:$8 sps:$4 sm:$0xff]  }
 0x13b   :  { %1987 = vmatpush1.bf16.msra.mxu0 %v4164_v10  ;;  %v4293_v10 = vcombine.high %v338_v2, %v346_v3 }
 0x13c   :  { %1988 = vmatprep.subr.bf16.mxu0 %v4181_v11  ;;  %v354_v11 = vld [vmem:[#allocation6 + $0x7b0] sm:$0xff]  ;;  %1880 = vmatpush1.bf16.msra.mxu1 %v4286_v4 }
 0x13d   :  { %1881 = vmatprep.subr.bf16.mxu1 %v4303_v5  ;;  %v4308_v21 = vcombine.low %v354_v11, %v362_v12 }
 0x13f   :  { %1989 = vmatpush1.bf16.msra.mxu0 %v4180_v19  ;;  %v4309_v19 = vcombine.high %v354_v11, %v362_v12  ;;  %v249_v11 = vld [vmem:[#allocation6 + $0x468] sm:$0xff] }
 0x140   :  { %1990 = vmatprep.subr.bf16.mxu0 %v4197_v23  ;;  %1882 = vmatpush1.bf16.msra.mxu1 %v4302_v13  ;;  %v145_v23 = vld [vmem:[#allocation6 + $0x128] sm:$0xff] }
 0x141   :  { %1933 = vmatprep.subr.bf16.mxu1 %v4067_v14  ;;  %v4099_v27 = vcombine.high %v145_v23, %v153_v24  ;;  %v4098_v32 = vcombine.low %v145_v23, %v153_v24  ;;  %v5221_v14 = vld [vmem:[#allocation9 + $0x70] ss:$8 sps:$4 sm:$0xff]  }
 0x142   :  { %v281_v23 = vld [vmem:[#allocation6 + $0x568] sm:$0xff] }
 0x143   :  { %1991 = vmatpush1.bf16.msra.mxu0 %v4196_v30  ;;  %1884 = vmatmul.mubr.bf16.vlgmr.msra.gmra.mrb[4].mxu1 %v5154_v9  ;;  %v169_v30 = vld [vmem:[#allocation6 + $0x1e8] sm:$0xff] }
 0x144   :  { %1992 = vmatprep.subr.bf16.mxu0 %v4213_v33  ;;  %1934 = vmatpush1.bf16.msra.mxu1 %v4066_v18  ;;  %v4115_v33 = vcombine.high %v161_v29, %v169_v30  ;;  %v273_v18 = vld [vmem:[#allocation6 + $0x528] sm:$0xff] }
 0x145   :  { %1965 = vmatprep.mubr.bf16.mxu1 %v5148_v22  ;;  %1935 = vmatprep.subr.bf16.mxu1 %v4083_v20  ;;  %v5225_v20 = vld [vmem:[#allocation9 + $0x84] ss:$8 sps:$4 sm:$0xff]  }
 0x147   :  { %1993 = vmatpush1.bf16.msra.mxu0 %v4212_v38  ;;  %v4114_v38 = vcombine.low %v161_v29, %v169_v30  ;;  %v289_v29 = vld [vmem:[#allocation6 + $0x5a8] sm:$0xff] }
 0x148   :  { %1994 = vmatprep.subr.bf16.mxu0 %v4229_v41  ;;  %1936 = vmatpush1.bf16.msra.mxu1 %v4082_v26  ;;  %v368_v41 = vlaneseq  ;;  %v4227_v26 = vcombine.high %v273_v18, %v281_v23  ;;  %v297_v30 = vld [vmem:[#allocation6 + $0x5e8] sm:$0xff] }
 0x149   :  { %1937 = vmatprep.subr.bf16.mxu1 %v4099_v27  ;;  %v5228_v27 = vld [vmem:[#allocation9 + $0x80] ss:$8 sps:$4 sm:$0xff]   ;;  %v4243_v35 = vcombine.high %v289_v29, %v297_v30 }
 0x14a   :  { %v5189_v48 = vshrl.u32 %v368_v41, 7  ;;  %v5237_v41 = vld [vmem:[#allocation9 + $0xa4] ss:$8 sps:$4 sm:$0xff]  }
 0x14b   :  { %1995 = vmatpush1.bf16.msra.mxu0 %v4228_v46  ;;  %v4147_v46 = vcombine.high %v193_v42, %v201_v43  ;;  %v4242_v42 = vcombine.low %v289_v29, %v297_v30  ;;  %v5273_v30 = vld [vmem:[#allocation9 + $0xf4] ss:$8 sps:$4 sm:$0xff]  }
 0x14c   :  { %1996 = vmatprep.subr.bf16.mxu0 %v4245_v49  ;;  %1938 = vmatpush1.bf16.msra.mxu1 %v4098_v32  ;;  %v209_v49 = vld [vmem:[#allocation6 + $0x328] sm:$0xff]  ;;  %v5198_v55 = vsub.s32 1, %v5189_v48 }
 0x14d   :  { %1939 = vmatprep.subr.bf16.mxu1 %v4115_v33  ;;  %v4163_v53 = vcombine.high %v209_v49, %v217_v50  ;;  %v4162_v58 = vcombine.low %v209_v49, %v217_v50  ;;  %v5231_v32 = vld [vmem:[#allocation9 + $0x94] ss:$8 sps:$4 sm:$0xff]   ;;  %v4226_v33 = vcombine.low %v273_v18, %v281_v23  ;;  %v5269_v23 = vld [vmem:[#allocation9 + $0xe0] ss:$8 sps:$4 sm:$0xff]  }
 0x14e   :  { %v375_v59 = vrot.slane %v5201_v56, %v5198_v55  ;;  %v329_v49 = vld [vmem:[#allocation6 + $0x6e8] sm:$0xff] }
 0x14f   :  { %1997 = vmatpush1.bf16.msra.mxu0 %v4244_v54  ;;  %v5195_v54 = vld [vmem:[#allocation9 + $0x40] ss:$8 sps:$4 sm:$0xff]   ;;  %v5243_v50 = vld [vmem:[#allocation9 + $0xb4] ss:$8 sps:$4 sm:$0xff]  }
 0x150   :  { %1998 = vmatprep.subr.bf16.mxu0 %v4261_v57  ;;  %1940 = vmatpush1.bf16.msra.mxu1 %v4114_v38  ;;  %v5203_v57 = vld [vmem:[#allocation9 + $0x54] ss:$8 sps:$4 sm:$0xff]  }
 0x151   :  { %1941 = vmatprep.subr.bf16.mxu1 %v4131_v39  ;;  %v305_v38 = vld [vmem:[#allocation6 + $0x628] sm:$0xff] }
 0x152   :  { %v313_v39 = vld [vmem:[#allocation6 + $0x668] sm:$0xff] }
 0x153   :  { %1999 = vmatpush1.bf16.msra.mxu0 %v4260_v62  ;;  %v225_v62 = vld [vmem:[#allocation6 + $0x3a8] sm:$0xff]  ;;  %v4259_v43 = vcombine.high %v305_v38, %v313_v39 }
 0x154   :  { %2000 = vmatprep.subr.bf16.mxu0 %v4277_v1  ;;  %1942 = vmatpush1.bf16.msra.mxu1 %v4130_v45  ;;  %v4179_v1 = vcombine.high %v225_v62, %v233_v63  ;;  %v4178_v3 = vcombine.low %v225_v62, %v233_v63  ;;  %v5240_v45 = vld [vmem:[#allocation9 + $0xa0] ss:$8 sps:$4 sm:$0xff]   ;;  %v345_v62 = vld [vmem:[#allocation6 + $0x768] sm:$0xff]  ;;  %v5249_v63 = vld [vmem:[#allocation9 + $0xc4] ss:$8 sps:$4 sm:$0xff]  }
 0x155   :  { %1943 = vmatprep.subr.bf16.mxu1 %v4147_v46  ;;  %v321_v46 = vld [vmem:[#allocation6 + $0x6a8] sm:$0xff] }
 0x157   :  { %2001 = vmatpush1.bf16.msra.mxu0 %v4276_v6  ;;  %v5216_v6 = vld [vmem:[#allocation9 + $0x60] ss:$8 sps:$4 sm:$0xff]  }
 0x158   :  { %2002 = vmatprep.subr.bf16.mxu0 %v4293_v10  ;;  %1944 = vmatpush1.bf16.msra.mxu1 %v4146_v52  ;;  %v241_v10 = vld [vmem:[#allocation6 + $0x428] sm:$0xff]  ;;  %v4258_v52 = vcombine.low %v305_v38, %v313_v39  ;;  %v147_v39 = vld [vmem:[#allocation6 + $0x138] sm:$0xff] }
 0x159   :  { %1945 = vmatprep.subr.bf16.mxu1 %v4163_v53  ;;  %v4195_v13 = vcombine.high %v241_v10, %v249_v11  ;;  %v4275_v53 = vcombine.high %v321_v46, %v329_v49  ;;  %v5276_v38 = vld [vmem:[#allocation9 + $0xf0] ss:$8 sps:$4 sm:$0xff]  }
 0x15b   :  { %2003 = vmatpush1.bf16.msra.mxu0 %v4292_v15  ;;  %v4194_v15 = vcombine.low %v241_v10, %v249_v11  ;;  %v5258_v10 = vld [vmem:[#allocation9 + $0xd4] ss:$8 sps:$4 sm:$0xff]  }
 0x15c   :  { %2004 = vmatprep.subr.bf16.mxu0 %v4309_v19  ;;  %1946 = vmatpush1.bf16.msra.mxu1 %v4162_v58  ;;  %v265_v19 = vld [vmem:[#allocation6 + $0x4e8] sm:$0xff] }
 0x15d   :  { %1947 = vmatprep.subr.bf16.mxu1 %v4179_v1  ;;  %v4210_v24 = vcombine.low %v257_v17, %v265_v19  ;;  %v5246_v58 = vld [vmem:[#allocation9 + $0xb0] ss:$8 sps:$4 sm:$0xff]   ;;  %v4274_v1 = vcombine.low %v321_v46, %v329_v49  ;;  %v163_v49 = vld [vmem:[#allocation6 + $0x1b8] sm:$0xff] }
 0x15f   :  { %2005 = vmatpush1.bf16.msra.mxu0 %v4308_v21  ;;  %v4211_v21 = vcombine.high %v257_v17, %v265_v19  ;;  %v5266_v19 = vld [vmem:[#allocation9 + $0xe4] ss:$8 sps:$4 sm:$0xff]  }
 0x160   :  { %2286 = vmatprep.subr.bf16.mxu0 %v5164_v25  ;;  %1948 = vmatpush1.bf16.msra.mxu1 %v4178_v3  ;;  %v5252_v3 = vld [vmem:[#allocation9 + $0xc0] ss:$8 sps:$4 sm:$0xff]  }
 0x161   :  { %1949 = vmatprep.subr.bf16.mxu1 %v4195_v13  ;;  %v5261_v13 = vld [vmem:[#allocation9 + $0xd0] ss:$8 sps:$4 sm:$0xff]  }
 0x162   :  { %2007 = vmatmul.mubr.bf16.vlgmr.msra.gmra.mrb[12].mxu0 %v5154_v9 }
 0x163   :  { %2287 = vmatpush1.bf16.msra.mxu0 %v5168_v28 }
 0x164   :  { %2288 = vmatprep.subr.bf16.mxu0 %v5171_v31  ;;  %1950 = vmatpush1.bf16.msra.mxu1 %v4194_v15  ;;  %v115_v15 = vld [vmem:[#allocation6 + $0x38] sm:$0xff] }
 0x165   :  { %1951 = vmatprep.subr.bf16.mxu1 %v4211_v21 }
 0x167   :  { %2289 = vmatpush1.bf16.msra.mxu0 %v5175_v34 }
 0x168   :  { %2290 = vmatprep.subr.bf16.mxu0 %v5178_v37  ;;  %1952 = vmatpush1.bf16.msra.mxu1 %v4210_v24  ;;  %v131_v24 = vld [vmem:[#allocation6 + $0xb8] sm:$0xff] }
 0x169   :  { %1953 = vmatprep.subr.bf16.mxu1 %v4227_v26  ;;  %v139_v26 = vld [vmem:[#allocation6 + $0xf8] sm:$0xff] }
 0x16b   :  { %2291 = vmatpush1.bf16.msra.mxu0 %v5181_v40 }
 0x16c   :  { %2292 = vmatprep.subr.bf16.mxu0 %v5184_v44  ;;  %1954 = vmatpush1.bf16.msra.mxu1 %v4226_v33 }
 0x16d   :  { %1955 = vmatprep.subr.bf16.mxu1 %v4243_v35  ;;  %v4087_v35 = vcombine.high %v131_v24, %v139_v26 }
 0x16f   :  { %2293 = vmatpush1.bf16.msra.mxu0 %v5187_v47 }
 0x170   :  { %2294 = vmatprep.subr.bf16.mxu0 %v5192_v51  ;;  %1956 = vmatpush1.bf16.msra.mxu1 %v4242_v42  ;;  %v155_v42 = vld [vmem:[#allocation6 + $0x178] sm:$0xff] }
 0x171   :  { %1957 = vmatprep.subr.bf16.mxu1 %v4259_v43  ;;  %v4103_v46 = vcombine.high %v147_v39, %v155_v42 }
 0x173   :  { %2295 = vmatpush1.bf16.msra.mxu0 %v5195_v54 }
 0x174   :  { %2296 = vmatprep.subr.bf16.mxu0 %v5203_v57  ;;  %1958 = vmatpush1.bf16.msra.mxu1 %v4258_v52  ;;  %v171_v52 = vld [vmem:[#allocation6 + $0x1f8] sm:$0xff] }
 0x175   :  { %v5213_v0 = vpop.f32.mrb[0].mxu0  ;;  %1959 = vmatprep.subr.bf16.mxu1 %v4275_v53 }
 0x176   :  { %v1764_v2 = vpop.f32.mrb[1].mxu0 }
 0x177   :  { %v1765_v4 = vadd.f32 %v1764_v2, %v375_v59  ;;  %v1766_v5 = vpop.f32.mrb[2].mxu0  ;;  %2297 = vmatpush1.bf16.msra.mxu0 %v5208_v60  ;;  %v337_v59 = vld [vmem:[#allocation6 + $0x728] sm:$0xff] }
 0x178   :  { %v1767_v7 = vpop.f32.mrb[3].mxu0  ;;  %2298 = vmatprep.subr.bf16.mxu0 %v5211_v61  ;;  %v4291_v2 = vcombine.high %v337_v59, %v345_v62  ;;  %v361_v5 = vld [vmem:[#allocation6 + $0x7e8] sm:$0xff]  ;;  %1960 = vmatpush1.bf16.msra.mxu1 %v4274_v1  ;;  %v4290_v11 = vcombine.low %v337_v59, %v345_v62  ;;  %v4102_v59 = vcombine.low %v147_v39, %v155_v42  ;;  %v179_v1 = vld [vmem:[#allocation6 + $0x238] sm:$0xff] }
 0x179   :  { %v2057_v12 = vmax.f32 %v1765_v4, 0.0  ;;  %v353_v4 = vld [vmem:[#allocation6 + $0x7a8] sm:$0xff]  ;;  %v5255_v7 = vsub.s32 0, %v5189_v48  ;;  %v4119_v62 = vcombine.high %v163_v49, %v171_v52 }
 0x17a   :  { %1961 = vmatprep.subr.bf16.mxu1 %v4291_v2  ;;  %v4306_v18 = vcombine.low %v353_v4, %v361_v5  ;;  %v187_v2 = vld [vmem:[#allocation6 + $0x278] sm:$0xff] }
 0x17b   :  { %v2114_v16 = vpack.c.bf16 %v2057_v12, %v2057_v12  ;;  %2299 = vmatpush1.bf16.msra.mxu0 %v5216_v6  ;;  %v4307_v12 = vcombine.high %v353_v4, %v361_v5  ;;  %v371_v17 = vrot.slane %v5201_v56, %v5255_v7  ;;  %v4118_v4 = vcombine.low %v163_v49, %v171_v52  ;;  %v251_v49 = vld [vmem:[#allocation6 + $0x478] sm:$0xff] }
 0x17c   :  { %2300 = vmatprep.subr.bf16.mxu0 %v5219_v8  ;;  %1962 = vmatpush1.bf16.msra.mxu1 %v4290_v11  ;;  %v4135_v5 = vcombine.high %v179_v1, %v187_v2  ;;  %v195_v11 = vld [vmem:[#allocation6 + $0x2b8] sm:$0xff] }
 0x17d   :  { %2318 = vmatprep.mubr.bf16.mxu0 %v2114_v16  ;;  %v123_v16 = vld [vmem:[#allocation6 + $0x78] sm:$0xff]  ;;  %1963 = vmatprep.subr.bf16.mxu1 %v4307_v12  ;;  %v1763_v29 = vadd.f32 %v5213_v0, %v371_v17  ;;  %v4086_v0 = vcombine.low %v131_v24, %v139_v26  ;;  %v4134_v12 = vcombine.low %v179_v1, %v187_v2 }
 0x17e   :  { %v4071_v21 = vcombine.high %v115_v15, %v123_v16  ;;  %v4070_v33 = vcombine.low %v115_v15, %v123_v16  ;;  %v211_v16 = vld [vmem:[#allocation6 + $0x338] sm:$0xff] }
 0x17f   :  { %2301 = vmatpush1.bf16.msra.mxu0 %v5221_v14  ;;  %v2056_v43 = vmax.f32 %v1763_v29, 0.0  ;;  %v219_v17 = vld [vmem:[#allocation6 + $0x378] sm:$0xff] }
 0x180   :  { %2302 = vmatprep.subr.bf16.mxu0 %v5225_v20  ;;  %1964 = vmatpush1.bf16.msra.mxu1 %v4306_v18  ;;  %v4166_v24 = vcombine.low %v211_v16, %v219_v17  ;;  %v227_v26 = vld [vmem:[#allocation6 + $0x3b8] sm:$0xff] }
 0x181   :  { %2015 = vmatprep.subr.bf16.mxu1 %v4071_v21  ;;  %v2113_v53 = vpack.c.bf16 %v2056_v43, %v2056_v43  ;;  %v4167_v21 = vcombine.high %v211_v16, %v219_v17  ;;  %v235_v29 = vld [vmem:[#allocation6 + $0x3f8] sm:$0xff] }
 0x182   :  { %v4182_v42 = vcombine.low %v227_v26, %v235_v29  ;;  %v275_v1 = vld [vmem:[#allocation6 + $0x538] sm:$0xff] }
 0x183   :  { %2303 = vmatpush1.bf16.msra.mxu0 %v5228_v27  ;;  %1966 = vmatmul.mubr.bf16.vlgmr.msra.gmra.mrb[8].mxu1 %v5154_v9  ;;  %v307_v17 = vld [vmem:[#allocation6 + $0x638] sm:$0xff] }
 0x184   :  { %2304 = vmatprep.subr.bf16.mxu0 %v5231_v32  ;;  %2016 = vmatpush1.bf16.msra.mxu1 %v4070_v33 }
 0x185   :  { %2047 = vmatprep.mubr.bf16.mxu1 %v5148_v22  ;;  %2017 = vmatprep.subr.bf16.mxu1 %v4087_v35  ;;  %v203_v22 = vld [vmem:[#allocation6 + $0x2f8] sm:$0xff]  ;;  %v4183_v35 = vcombine.high %v227_v26, %v235_v29 }
 0x186   :  { %v4151_v15 = vcombine.high %v195_v11, %v203_v22  ;;  %v4150_v18 = vcombine.low %v195_v11, %v203_v22  ;;  %v291_v22 = vld [vmem:[#allocation6 + $0x5b8] sm:$0xff] }
 0x187   :  { %2305 = vmatpush1.bf16.msra.mxu0 %v5234_v36  ;;  %v323_v26 = vld [vmem:[#allocation6 + $0x6b8] sm:$0xff] }
 0x188   :  { %2306 = vmatprep.subr.bf16.mxu0 %v5237_v41  ;;  %2018 = vmatpush1.bf16.msra.mxu1 %v4086_v0  ;;  %v331_v29 = vld [vmem:[#allocation6 + $0x6f8] sm:$0xff] }
 0x189   :  { %2019 = vmatprep.subr.bf16.mxu1 %v4103_v46  ;;  %v243_v46 = vld [vmem:[#allocation6 + $0x438] sm:$0xff] }
 0x18a   :  { %v4199_v52 = vcombine.high %v243_v46, %v251_v49 }
 0x18b   :  { %2307 = vmatpush1.bf16.msra.mxu0 %v5240_v45 }
 0x18c   :  { %2308 = vmatprep.subr.bf16.mxu0 %v5243_v50  ;;  %2020 = vmatpush1.bf16.msra.mxu1 %v4102_v59  ;;  %v259_v59 = vld [vmem:[#allocation6 + $0x4b8] sm:$0xff] }
 0x18d   :  { %2021 = vmatprep.subr.bf16.mxu1 %v4119_v62  ;;  %v267_v62 = vld [vmem:[#allocation6 + $0x4f8] sm:$0xff] }
 0x18e   :  { %v4215_v2 = vcombine.high %v259_v59, %v267_v62 }
 0x18f   :  { %2309 = vmatpush1.bf16.msra.mxu0 %v5246_v58 }
 0x190   :  { %2310 = vmatprep.subr.bf16.mxu0 %v5249_v63  ;;  %2022 = vmatpush1.bf16.msra.mxu1 %v4118_v4  ;;  %v283_v4 = vld [vmem:[#allocation6 + $0x578] sm:$0xff] }
 0x191   :  { %2023 = vmatprep.subr.bf16.mxu1 %v4135_v5  ;;  %v4214_v5 = vcombine.low %v259_v59, %v267_v62  ;;  %v4231_v11 = vcombine.high %v275_v1, %v283_v4 }
 0x193   :  { %2311 = vmatpush1.bf16.msra.mxu0 %v5252_v3 }
 0x194   :  { %2312 = vmatprep.subr.bf16.mxu0 %v5258_v10  ;;  %2024 = vmatpush1.bf16.msra.mxu1 %v4134_v12  ;;  %v299_v12 = vld [vmem:[#allocation6 + $0x5f8] sm:$0xff] }
 0x195   :  { %2025 = vmatprep.subr.bf16.mxu1 %v4151_v15  ;;  %v4230_v15 = vcombine.low %v275_v1, %v283_v4  ;;  %v4247_v16 = vcombine.high %v291_v22, %v299_v12  ;;  %v4712_v4 = vld [vmem:[#allocation11] sm:$0xff]  }
 0x197   :  { %2313 = vmatpush1.bf16.msra.mxu0 %v5261_v13 }
 0x198   :  { %2314 = vmatprep.subr.bf16.mxu0 %v5266_v19  ;;  %2026 = vmatpush1.bf16.msra.mxu1 %v4150_v18  ;;  %v315_v18 = vld [vmem:[#allocation6 + $0x678] sm:$0xff] }
 0x199   :  { %2027 = vmatprep.subr.bf16.mxu1 %v4167_v21  ;;  %v4246_v21 = vcombine.low %v291_v22, %v299_v12  ;;  %v4715_v22 = vld [vmem:[#allocation11 + $0x50] sm:$0xff]  }
 0x19a   :  { %v4716_v12 = vld [vmem:[#allocation11 + $0x10] sm:$0xff]  }
 0x19b   :  { %2315 = vmatpush1.bf16.msra.mxu0 %v5269_v23 }
 0x19c   :  { %2316 = vmatprep.subr.bf16.mxu0 %v5273_v30  ;;  %2028 = vmatpush1.bf16.msra.mxu1 %v4166_v24  ;;  %v4263_v24 = vcombine.high %v307_v17, %v315_v18 }
 0x19d   :  { %2029 = vmatprep.subr.bf16.mxu1 %v4183_v35  ;;  %v4262_v35 = vcombine.low %v307_v17, %v315_v18  ;;  %v4719_v17 = vld [vmem:[#allocation11 + $0x60] sm:$0xff]  }
 0x19e   :  { %v4720_v18 = vld [vmem:[#allocation11 + $0x20] sm:$0xff]  }
 0x19f   :  { %2317 = vmatpush1.bf16.msra.mxu0 %v5276_v38 }
 0x1a0   :  { %2030 = vmatpush1.bf16.msra.mxu1 %v4182_v42  ;;  %v4279_v42 = vcombine.high %v323_v26, %v331_v29 }
 0x1a1   :  { %2031 = vmatprep.subr.bf16.mxu1 %v4199_v52  ;;  %v355_v52 = vld [vmem:[#allocation6 + $0x7b8] sm:$0xff] }
 0x1a2   :  { %2319 = vmatmul.mubr.bf16.vlgmr.msra.gmra.mrb[16].mxu0 %v2113_v53  ;;  %v4198_v53 = vcombine.low %v243_v46, %v251_v49  ;;  %v4278_v46 = vcombine.low %v323_v26, %v331_v29 }
 0x1a4   :  { %2032 = vmatpush1.bf16.msra.mxu1 %v4198_v53  ;;  %v363_v53 = vld [vmem:[#allocation6 + $0x7f8] sm:$0xff] }
 0x1a5   :  { %2033 = vmatprep.subr.bf16.mxu1 %v4215_v2  ;;  %v4311_v62 = vcombine.high %v355_v52, %v363_v53  ;;  %v4310_v1 = vcombine.low %v355_v52, %v363_v53  ;;  %v4711_v2 = vld [vmem:[#allocation11 + $0x40] sm:$0xff]   ;;  %v4725_v52 = vld [vmem:[#allocation11 + $0x78] sm:$0xff]  }
 0x1a8   :  { %2034 = vmatpush1.bf16.msra.mxu1 %v4214_v5  ;;  %v4713_v5 = vld [vmem:[#allocation11 + $0x48] sm:$0xff]  }
 0x1a9   :  { %2035 = vmatprep.subr.bf16.mxu1 %v4231_v11  ;;  %v4714_v11 = vld [vmem:[#allocation11 + $0x8] sm:$0xff]  }
 0x1ac   :  { %2036 = vmatpush1.bf16.msra.mxu1 %v4230_v15  ;;  %v4717_v15 = vld [vmem:[#allocation11 + $0x58] sm:$0xff]  }
 0x1ad   :  { %2037 = vmatprep.subr.bf16.mxu1 %v4247_v16  ;;  %v4718_v16 = vld [vmem:[#allocation11 + $0x18] sm:$0xff]  }
 0x1b0   :  { %2038 = vmatpush1.bf16.msra.mxu1 %v4246_v21  ;;  %v4721_v21 = vld [vmem:[#allocation11 + $0x68] sm:$0xff]  }
 0x1b1   :  { %2039 = vmatprep.subr.bf16.mxu1 %v4263_v24  ;;  %v4722_v24 = vld [vmem:[#allocation11 + $0x28] sm:$0xff]  }
 0x1b4   :  { %2040 = vmatpush1.bf16.msra.mxu1 %v4262_v35 }
 0x1b5   :  { %v5282_v33 = vpop.f32.mrb[4].mxu0  ;;  %2041 = vmatprep.subr.bf16.mxu1 %v4279_v42  ;;  %v4723_v42 = vld [vmem:[#allocation11 + $0x70] sm:$0xff]  }
 0x1b6   :  { %v5284_v39 = vpop.f32.mrb[5].mxu0 }
 0x1b7   :  { %v1848_v43 = vpop.f32.mrb[6].mxu0 }
 0x1b8   :  { %v1849_v0 = vpop.f32.mrb[7].mxu0  ;;  %v339_v43 = vld [vmem:[#allocation6 + $0x738] sm:$0xff]  ;;  %2042 = vmatpush1.bf16.msra.mxu1 %v4278_v46 }
 0x1b9   :  { %v347_v0 = vld [vmem:[#allocation6 + $0x778] sm:$0xff] }
 0x1ba   :  { %v4295_v49 = vcombine.high %v339_v43, %v347_v0  ;;  %v4294_v59 = vcombine.low %v339_v43, %v347_v0  ;;  %v4724_v43 = vld [vmem:[#allocation11 + $0x30] sm:$0xff]  }
 0x1bc   :  { %2043 = vmatprep.subr.bf16.mxu1 %v4295_v49 }
 0x1bd   :  { %2044 = vmatpush1.bf16.msra.mxu1 %v4294_v59  ;;  %v4726_v59 = vld [vmem:[#allocation11 + $0x38] sm:$0xff]  }
 0x1be   :  { %2045 = vmatprep.subr.bf16.mxu1 %v4311_v62 }
 0x1c1   :  { %2046 = vmatpush1.bf16.msra.mxu1 %v4310_v1 }
 0x1c2   :  { %4475 = vmatprep.subr.bf16.mxu1 %v4711_v2 }
 0x1c4   :  { %2048 = vmatmul.mubr.bf16.vlgmr.msra.gmra.mrb[12].mxu1 %v5154_v9 }
 0x1c5   :  { %4476 = vmatpush3.bf16.msra.mxu1 %v4712_v4 }
 0x1c6   :  { %4477 = vmatprep.subr.bf16.mxu1 %v4713_v5 }
 0x1c9   :  { %4478 = vmatpush3.bf16.msra.mxu1 %v4714_v11 }
 0x1ca   :  { %4479 = vmatprep.subr.bf16.mxu1 %v4715_v22 }
 0x1cd   :  { %4480 = vmatpush3.bf16.msra.mxu1 %v4716_v12 }
 0x1ce   :  { %4481 = vmatprep.subr.bf16.mxu1 %v4717_v15  ;;  %v5732_v15 = vsub.s32 3, %v5189_v48 }
 0x1d1   :  { %4482 = vmatpush3.bf16.msra.mxu1 %v4718_v16  ;;  %v2104_v16 = vld [vmem:[%s5725_s4] sm:$0x3] }
 0x1d2   :  { %4483 = vmatprep.subr.bf16.mxu1 %v4719_v17 }
 0x1d4   :  { %v5287_v9 = vpop.f32.mrb[0].mxu1 }
 0x1d5   :  { %4484 = vmatpush3.bf16.msra.mxu1 %v4720_v18  ;;  %v1805_v26 = vpop.f32.mrb[1].mxu1 }
 0x1d6   :  { %4485 = vmatprep.subr.bf16.mxu1 %v4721_v21  ;;  %v1807_v29 = vpop.f32.mrb[2].mxu1  ;;  %v383_v21 = vrot.slane %v5201_v56, %v5732_v15 }
 0x1d7   :  { %v1808_v35 = vpop.f32.mrb[3].mxu1  ;;  %v5314_v29 = vrot.slane %v2104_v16, %v5255_v7 }
 0x1d9   :  { %4486 = vmatpush3.bf16.msra.mxu1 %v4722_v24 }
 0x1da   :  { %4487 = vmatprep.subr.bf16.mxu1 %v4723_v42  ;;  %v5317_v42 = vrot.slane %v2104_v16, %v5198_v55 }
 0x1dd   :  { %4488 = vmatpush3.bf16.msra.mxu1 %v4724_v43  ;;  %v1806_v43 = vadd.f32 %v1805_v26, %v383_v21  ;;  %v5734_v26 = vsub.s32 6, %v5189_v48 }
 0x1de   :  { %4489 = vmatprep.subr.bf16.mxu1 %v4725_v52 }
 0x1e1   :  { %4490 = vmatpush3.bf16.msra.mxu1 %v4726_v59 }
 0x1e2   :  { %2502 = vmatprep.subr.bf16.mxu1 %v5164_v25 }
 0x1f5   :  { %v5289_v0 = vpop.f32.mrb[8].mxu0 }
 0x1f6   :  { %v5291_v46 = vpop.f32.mrb[9].mxu0 }
 0x1f7   :  { %v1930_v49 = vpop.f32.mrb[10].mxu0 }
 0x1f8   :  { %v1931_v53 = vpop.f32.mrb[11].mxu0 }
 0x216   :  { %v5294_v62 = vpop.f32.mrb[4].mxu1 }
 0x217   :  { %v5296_v1 = vpop.f32.mrb[5].mxu1 }
 0x218   :  { %v1889_v2 = vpop.f32.mrb[6].mxu1 }
 0x219   :  { %v1890_v4 = vpop.f32.mrb[7].mxu1 }
 0x235   :  { %v5298_v5 = vpop.f32.mrb[12].mxu0 }
 0x236   :  { %5736 = vst [vmem:[#allocation17_spill] sm:$0xff] %v5298_v5  ;;  %v5300_v11 = vpop.f32.mrb[13].mxu0 }
 0x237   :  { %5737 = vst [vmem:[#allocation18_spill] sm:$0xff] %v5300_v11  ;;  %v2012_v22 = vpop.f32.mrb[14].mxu0 }
 0x238   :  { %v2013_v12 = vpop.f32.mrb[15].mxu0 }
 0x239   :  { %v2059_v12 = vmax.f32 %v1806_v43, 0.0 }
 0x23b   :  { %v2501_v11 = vpack.c.bf16 %v2059_v12, %v2059_v12 }
 0x256   :  { %v5306_v17 = vpop.f32.mrb[8].mxu1 }
 0x257   :  { %v5308_v18 = vpop.f32.mrb[9].mxu1 }
 0x258   :  { %v1971_v24 = vpop.f32.mrb[10].mxu1 }
 0x259   :  { %v1972_v35 = vpop.f32.mrb[11].mxu1 }
 0x275   :  { %v2320_v49 = vpop.f32.mrb[16].mxu0 }
 0x276   :  { %v2321_v52 = vadd.f32 %v2320_v49, %v5314_v29  ;;  %v2322_v53 = vpop.f32.mrb[17].mxu0 }
 0x277   :  { %v2323_v59 = vadd.f32 %v2322_v53, %v5317_v42  ;;  %v2324_v2 = vpop.f32.mrb[18].mxu0 }
 0x278   :  { %v2327_v4 = vmax.f32 %v2321_v52, 0.0  ;;  %v2325_v22 = vpop.f32.mrb[19].mxu0 }
 0x279   :  { %v2328_v15 = vmax.f32 %v2323_v59, 0.0 }
 0x27a   :  { %v2329_v5 = vpack.c.bf16 %v2327_v4, %v2327_v4 }
 0x27b   :  { %v2330_v24 = vpack.c.bf16 %v2328_v15, %v2328_v15  ;;  %v5733_v15 = vsub.s32 2, %v5189_v48 }
 0x27d   :  { %2491 = vmatprep.mubr.bf16.mxu1 %v2330_v24  ;;  %v379_v43 = vrot.slane %v5201_v56, %v5733_v15  ;;  %v4727_v24 = vld [vmem:[#allocation11 + $0xc0] sm:$0xff]  }
 0x27e   :  { %2492 = vmatmul.mubr.bf16.vlgmr.msra.gmra.mrb[16].mxu1 %v2329_v5  ;;  %v5344_v5 = vld [vmem:[#allocation8 + $0x8] sm:$0xff]  ;;  %4497 = vmatprep.subr.bf16.mxu0 %v4727_v24  ;;  %v4739_v24 = vld [vmem:[#allocation11 + $0xf0] sm:$0xff]  }
 0x27f   :  { %2503 = vmatpush1.bf16.msra.mxu1 %v5168_v28  ;;  %2534 = vmatprep.mubr.bf16.mxu1 %v2501_v11  ;;  %v5735_v11 = vsub.s32 7, %v5189_v48  ;;  %v427_v16 = vrot.slane %v5344_v5, %v5734_v26  ;;  %v1804_v4 = vadd.f32 %v5287_v9, %v379_v43  ;;  %v4732_v9 = vld [vmem:[#allocation11 + $0x90] sm:$0xff]   ;;  %v4733_v43 = vld [vmem:[#allocation11 + $0xd8] sm:$0xff]  }
 0x280   :  { %2504 = vmatprep.subr.bf16.mxu1 %v5171_v31 }
 0x281   :  { %v431_v21 = vrot.slane %v5344_v5, %v5735_v11  ;;  %v2058_v22 = vmax.f32 %v1804_v4, 0.0  ;;  %v4736_v4 = vld [vmem:[#allocation11 + $0xa0] sm:$0xff]  }
 0x283   :  { %2505 = vmatpush1.bf16.msra.mxu1 %v5175_v34  ;;  %v2500_v12 = vpack.c.bf16 %v2058_v22, %v2058_v22  ;;  %v4737_v22 = vld [vmem:[#allocation11 + $0xe8] sm:$0xff]  }
 0x284   :  { %2506 = vmatprep.subr.bf16.mxu1 %v5178_v37 }
 0x287   :  { %2507 = vmatpush1.bf16.msra.mxu1 %v5181_v40 }
 0x288   :  { %2508 = vmatprep.subr.bf16.mxu1 %v5184_v44 }
 0x28b   :  { %2509 = vmatpush1.bf16.msra.mxu1 %v5187_v47 }
 0x28c   :  { %2510 = vmatprep.subr.bf16.mxu1 %v5192_v51 }
 0x28f   :  { %2511 = vmatpush1.bf16.msra.mxu1 %v5195_v54 }
 0x290   :  { %2512 = vmatprep.subr.bf16.mxu1 %v5203_v57 }
 0x293   :  { %2513 = vmatpush1.bf16.msra.mxu1 %v5208_v60 }
 0x294   :  { %2514 = vmatprep.subr.bf16.mxu1 %v5211_v61 }
 0x297   :  { %2515 = vmatpush1.bf16.msra.mxu1 %v5216_v6  ;;  %v2049_v35 = vpop.f32.mrb[12].mxu1 }
 0x298   :  { %2516 = vmatprep.subr.bf16.mxu1 %v5219_v8  ;;  %v5361_v49 = vadd.f32 %v2049_v35, %v427_v16  ;;  %v2051_v52 = vpop.f32.mrb[13].mxu1  ;;  %v4728_v16 = vld [vmem:[#allocation11 + $0x80] sm:$0xff]   ;;  %v4730_v35 = vld [vmem:[#allocation11 + $0x88] sm:$0xff]  }
 0x299   :  { %v5363_v53 = vadd.f32 %v2051_v52, %v431_v21  ;;  %v2053_v59 = vpop.f32.mrb[14].mxu1  ;;  %v4729_v21 = vld [vmem:[#allocation11 + $0xc8] sm:$0xff]   ;;  %4498 = vmatpush3.bf16.msra.mxu0 %v4728_v16  ;;  %v4731_v52 = vld [vmem:[#allocation11 + $0xd0] sm:$0xff]  }
 0x29a   :  { %v2054_v2 = vpop.f32.mrb[15].mxu1  ;;  %4499 = vmatprep.subr.bf16.mxu0 %v4729_v21  ;;  %v4734_v59 = vld [vmem:[#allocation11 + $0x98] sm:$0xff]   ;;  %v4740_v16 = vld [vmem:[#allocation11 + $0xb0] sm:$0xff]  }
 0x29b   :  { %2517 = vmatpush1.bf16.msra.mxu1 %v5221_v14  ;;  %v4735_v2 = vld [vmem:[#allocation11 + $0xe0] sm:$0xff]   ;;  %v4741_v21 = vld [vmem:[#allocation11 + $0xf8] sm:$0xff]  }
 0x29c   :  { %2518 = vmatprep.subr.bf16.mxu1 %v5225_v20 }
 0x29d   :  { %4500 = vmatpush3.bf16.msra.mxu0 %v4730_v35  ;;  %v4742_v35 = vld [vmem:[#allocation11 + $0xb8] sm:$0xff]  }
 0x29e   :  { %4501 = vmatprep.subr.bf16.mxu0 %v4731_v52 }
 0x29f   :  { %2519 = vmatpush1.bf16.msra.mxu1 %v5228_v27 }
 0x2a0   :  { %2520 = vmatprep.subr.bf16.mxu1 %v5231_v32 }
 0x2a1   :  { %4502 = vmatpush3.bf16.msra.mxu0 %v4732_v9 }
 0x2a2   :  { %4503 = vmatprep.subr.bf16.mxu0 %v4733_v43 }
 0x2a3   :  { %2521 = vmatpush1.bf16.msra.mxu1 %v5234_v36 }
 0x2a4   :  { %2522 = vmatprep.subr.bf16.mxu1 %v5237_v41 }
 0x2a5   :  { %4504 = vmatpush3.bf16.msra.mxu0 %v4734_v59 }
 0x2a6   :  { %4505 = vmatprep.subr.bf16.mxu0 %v4735_v2 }
 0x2a7   :  { %2523 = vmatpush1.bf16.msra.mxu1 %v5240_v45 }
 0x2a8   :  { %2524 = vmatprep.subr.bf16.mxu1 %v5243_v50 }
 0x2a9   :  { %4506 = vmatpush3.bf16.msra.mxu0 %v4736_v4  ;;  %v390_v4 = vsub.s32 5, %v5189_v48 }
 0x2aa   :  { %4507 = vmatprep.subr.bf16.mxu0 %v4737_v22 }
 0x2ab   :  { %2525 = vmatpush1.bf16.msra.mxu1 %v5246_v58  ;;  %v391_v22 = vrot.slane %v5201_v56, %v390_v4 }
 0x2ac   :  { %2526 = vmatprep.subr.bf16.mxu1 %v5249_v63 }
 0x2af   :  { %2527 = vmatpush1.bf16.msra.mxu1 %v5252_v3 }
 0x2b0   :  { %2528 = vmatprep.subr.bf16.mxu1 %v5258_v10 }
 0x2b3   :  { %2529 = vmatpush1.bf16.msra.mxu1 %v5261_v13 }
 0x2b4   :  { %2530 = vmatprep.subr.bf16.mxu1 %v5266_v19 }
 0x2b7   :  { %2531 = vmatpush1.bf16.msra.mxu1 %v5269_v23 }
 0x2b8   :  { %2532 = vmatprep.subr.bf16.mxu1 %v5273_v30 }
 0x2bb   :  { %2533 = vmatpush1.bf16.msra.mxu1 %v5276_v38 }
 0x2be   :  { %2535 = vmatmul.mubr.bf16.vlgmr.msra.gmra.mrb[20].mxu1 %v2500_v12  ;;  %v4738_v12 = vld [vmem:[#allocation11 + $0xa8] sm:$0xff]  }
 0x2bf   :  { %4508 = vmatpush3.bf16.msra.mxu0 %v4738_v12  ;;  %v1847_v12 = vadd.f32 %v5284_v39, %v391_v22  ;;  %v4745_v39 = vld [vmem:[#allocation11 + $0x148] sm:$0xff]   ;;  %v4750_v22 = vld [vmem:[#allocation11 + $0x118] sm:$0xff]  }
 0x2c0   :  { %4509 = vmatprep.subr.bf16.mxu0 %v4739_v24 }
 0x2c3   :  { %4510 = vmatpush3.bf16.msra.mxu0 %v4740_v16 }
 0x2c4   :  { %4511 = vmatprep.subr.bf16.mxu0 %v4741_v21 }
 0x2c7   :  { %4512 = vmatpush3.bf16.msra.mxu0 %v4742_v35 }
 0x2c8   :  { %2718 = vmatprep.subr.bf16.mxu0 %v5164_v25 }
 0x351   :  { %v4491_v52 = vpop.f32.mrb[16].mxu1 }
 0x352   :  { %v4492_v9 = vpop.f32.mrb[17].mxu1 }
 0x353   :  { %v5372_v43 = vadd.f32 %v4492_v9, %v4491_v52  ;;  %v4494_v59 = vpop.f32.mrb[18].mxu1  ;;  %v2061_v9 = vmax.f32 %v1847_v12, 0.0  ;;  %v4751_v12 = vld [vmem:[#allocation11 + $0x160] sm:$0xff]  }
 0x354   :  { %v4495_v2 = vpop.f32.mrb[19].mxu1 }
 0x355   :  { %v2717_v11 = vpack.c.bf16 %v2061_v9, %v2061_v9  ;;  %v4758_v9 = vld [vmem:[#allocation11 + $0x138] sm:$0xff]  }
 0x391   :  { %v2536_v24 = vpop.f32.mrb[20].mxu1 }
 0x392   :  { %v2537_v16 = vadd.f32 %v2536_v24, %v5314_v29  ;;  %v2538_v21 = vpop.f32.mrb[21].mxu1  ;;  %v4752_v24 = vld [vmem:[#allocation11 + $0x120] sm:$0xff]  }
 0x393   :  { %v2539_v25 = vadd.f32 %v2538_v21, %v5317_v42  ;;  %v2540_v35 = vpop.f32.mrb[22].mxu1  ;;  %v4754_v21 = vld [vmem:[#allocation11 + $0x128] sm:$0xff]  }
 0x394   :  { %v2543_v15 = vmax.f32 %v2537_v16, 0.0  ;;  %v2541_v52 = vpop.f32.mrb[23].mxu1  ;;  %v4753_v16 = vld [vmem:[#allocation11 + $0x168] sm:$0xff]   ;;  %v4756_v35 = vld [vmem:[#allocation11 + $0x130] sm:$0xff]  }
 0x395   :  { %v2544_v59 = vmax.f32 %v2539_v25, 0.0  ;;  %v4755_v25 = vld [vmem:[#allocation11 + $0x170] sm:$0xff]   ;;  %v4757_v52 = vld [vmem:[#allocation11 + $0x178] sm:$0xff]  }
 0x396   :  { %v2545_v26 = vpack.c.bf16 %v2543_v15, %v2543_v15  ;;  %v4749_v15 = vld [vmem:[#allocation11 + $0x158] sm:$0xff]  }
 0x397   :  { %v2546_v2 = vpack.c.bf16 %v2544_v59, %v2544_v59  ;;  %v5417_v59 = vld [vmem:[#allocation9 + $0x4] ss:$8 sps:$4 sm:$0xff]  }
 0x399   :  { %2707 = vmatprep.mubr.bf16.mxu0 %v2546_v2  ;;  %v4312_v2 = vld [vmem:[%s5727_s6] ss:$0 sm:$0xff] }
 0x39a   :  { %2708 = vmatmul.mubr.bf16.vlgmr.msra.gmra.mrb[20].mxu0 %v2545_v26  ;;  %v4746_v26 = vld [vmem:[#allocation11 + $0x108] sm:$0xff]  }
 0x39b   :  { %2719 = vmatpush1.bf16.msra.mxu0 %v5168_v28  ;;  %2750 = vmatprep.mubr.bf16.mxu0 %v2717_v11  ;;  %v386_v28 = vsub.s32 4, %v5189_v48  ;;  %v4747_v11 = vld [vmem:[#allocation11 + $0x150] sm:$0xff]  }
 0x39c   :  { %2720 = vmatprep.subr.bf16.mxu0 %v5171_v31 }
 0x39d   :  { %v387_v31 = vrot.slane %v5201_v56, %v386_v28 }
 0x39f   :  { %2721 = vmatpush1.bf16.msra.mxu0 %v5175_v34  ;;  %v1845_v34 = vadd.f32 %v5282_v33, %v387_v31  ;;  %v4748_v33 = vld [vmem:[#allocation11 + $0x110] sm:$0xff]  }
 0x3a0   :  { %2722 = vmatprep.subr.bf16.mxu0 %v5178_v37 }
 0x3a1   :  { %v2060_v37 = vmax.f32 %v1845_v34, 0.0 }
 0x3a3   :  { %2723 = vmatpush1.bf16.msra.mxu0 %v5181_v40  ;;  %v2716_v40 = vpack.c.bf16 %v2060_v37, %v2060_v37  ;;  %v2499_v37 = vadd.f32 %v5372_v43, %v4312_v2 }
 0x3a4   :  { %2724 = vmatprep.subr.bf16.mxu0 %v5184_v44  ;;  %v4743_v44 = vld [vmem:[#allocation11 + $0x140] sm:$0xff]  }
 0x3a5   :  { %4519 = vmatprep.subr.bf16.mxu1 %v4743_v44 }
 0x3a7   :  { %2725 = vmatpush1.bf16.msra.mxu0 %v5187_v47  ;;  %v4744_v47 = vld [vmem:[#allocation11 + $0x100] sm:$0xff]  }
 0x3a8   :  { %2726 = vmatprep.subr.bf16.mxu0 %v5192_v51  ;;  %4520 = vmatpush3.bf16.msra.mxu1 %v4744_v47 }
 0x3a9   :  { %4521 = vmatprep.subr.bf16.mxu1 %v4745_v39 }
 0x3ab   :  { %2727 = vmatpush1.bf16.msra.mxu0 %v5195_v54 }
 0x3ac   :  { %2728 = vmatprep.subr.bf16.mxu0 %v5203_v57  ;;  %4522 = vmatpush3.bf16.msra.mxu1 %v4746_v26  ;;  %v5738_v26 = vsub.s32 7, %v5189_v48 }
 0x3ad   :  { %4523 = vmatprep.subr.bf16.mxu1 %v4747_v11 }
 0x3ae   :  { %v399_v11 = vrot.slane %v5201_v56, %v5738_v26  ;;  %v5435_v56 = vld [vmem:[#allocation9 + $0x14] ss:$8 sps:$4 sm:$0xff]  }
 0x3af   :  { %2729 = vmatpush1.bf16.msra.mxu0 %v5208_v60 }
 0x3b0   :  { %2730 = vmatprep.subr.bf16.mxu0 %v5211_v61  ;;  %4524 = vmatpush3.bf16.msra.mxu1 %v4748_v33  ;;  %v1888_v33 = vadd.f32 %v5296_v1, %v399_v11  ;;  %v5438_v1 = vld [vmem:[#allocation9 + $0x10] ss:$8 sps:$4 sm:$0xff]  }
 0x3b1   :  { %4525 = vmatprep.subr.bf16.mxu1 %v4749_v15 }
 0x3b3   :  { %2731 = vmatpush1.bf16.msra.mxu0 %v5216_v6 }
 0x3b4   :  { %2732 = vmatprep.subr.bf16.mxu0 %v5219_v8  ;;  %4526 = vmatpush3.bf16.msra.mxu1 %v4750_v22 }
 0x3b5   :  { %4527 = vmatprep.subr.bf16.mxu1 %v4751_v12 }
 0x3b7   :  { %2733 = vmatpush1.bf16.msra.mxu0 %v5221_v14 }
 0x3b8   :  { %2734 = vmatprep.subr.bf16.mxu0 %v5225_v20  ;;  %4528 = vmatpush3.bf16.msra.mxu1 %v4752_v24 }
 0x3b9   :  { %4529 = vmatprep.subr.bf16.mxu1 %v4753_v16 }
 0x3bb   :  { %2735 = vmatpush1.bf16.msra.mxu0 %v5228_v27 }
 0x3bc   :  { %2736 = vmatprep.subr.bf16.mxu0 %v5231_v32  ;;  %4530 = vmatpush3.bf16.msra.mxu1 %v4754_v21 }
 0x3bd   :  { %4531 = vmatprep.subr.bf16.mxu1 %v4755_v25  ;;  %v2063_v25 = vmax.f32 %v1888_v33, 0.0 }
 0x3bf   :  { %2737 = vmatpush1.bf16.msra.mxu0 %v5234_v36  ;;  %v2933_v2 = vpack.c.bf16 %v2063_v25, %v2063_v25 }
 0x3c0   :  { %2738 = vmatprep.subr.bf16.mxu0 %v5237_v41  ;;  %4532 = vmatpush3.bf16.msra.mxu1 %v4756_v35 }
 0x3c1   :  { %4533 = vmatprep.subr.bf16.mxu1 %v4757_v52 }
 0x3c3   :  { %2739 = vmatpush1.bf16.msra.mxu0 %v5240_v45 }
 0x3c4   :  { %2740 = vmatprep.subr.bf16.mxu0 %v5243_v50  ;;  %4534 = vmatpush3.bf16.msra.mxu1 %v4758_v9 }
 0x3c5   :  { %2934 = vmatprep.subr.bf16.mxu1 %v5417_v59 }
 0x3c7   :  { %2741 = vmatpush1.bf16.msra.mxu0 %v5246_v58 }
 0x3c8   :  { %2742 = vmatprep.subr.bf16.mxu0 %v5249_v63 }
 0x3cb   :  { %2743 = vmatpush1.bf16.msra.mxu0 %v5252_v3 }
 0x3cc   :  { %2744 = vmatprep.subr.bf16.mxu0 %v5258_v10 }
 0x3cf   :  { %2745 = vmatpush1.bf16.msra.mxu0 %v5261_v13 }
 0x3d0   :  { %2746 = vmatprep.subr.bf16.mxu0 %v5266_v19 }
 0x3d3   :  { %2747 = vmatpush1.bf16.msra.mxu0 %v5269_v23 }
 0x3d4   :  { %2748 = vmatprep.subr.bf16.mxu0 %v5273_v30 }
 0x3d7   :  { %2749 = vmatpush1.bf16.msra.mxu0 %v5276_v38 }
 0x3da   :  { %2751 = vmatmul.mubr.bf16.vlgmr.msra.gmra.mrb[24].mxu0 %v2716_v40 }
 0x46d   :  { %v4513_v31 = vpop.f32.mrb[20].mxu0 }
 0x46e   :  { %v4514_v34 = vpop.f32.mrb[21].mxu0 }
 0x46f   :  { %v4515_v40 = vadd.f32 %v4514_v34, %v4513_v31  ;;  %v4516_v44 = vpop.f32.mrb[22].mxu0  ;;  %v5432_v31 = vld [vmem:[#allocation9] ss:$8 sps:$4 sm:$0xff]   ;;  %v5441_v34 = vld [vmem:[#allocation9 + $0x24] ss:$8 sps:$4 sm:$0xff]  }
 0x470   :  { %v4517_v47 = vpop.f32.mrb[23].mxu0  ;;  %v5450_v44 = vld [vmem:[#allocation9 + $0x30] ss:$8 sps:$4 sm:$0xff]  }
 0x471   :  { %v5424_v39 = vadd.f32 %v4515_v40, %v2499_v37  ;;  %v5444_v37 = vld [vmem:[#allocation9 + $0x20] ss:$8 sps:$4 sm:$0xff]   ;;  %v5447_v40 = vld [vmem:[#allocation9 + $0x34] ss:$8 sps:$4 sm:$0xff]  }
 0x4ad   :  { %v2752_v15 = vpop.f32.mrb[24].mxu0 }
 0x4ae   :  { %v2753_v22 = vadd.f32 %v2752_v15, %v5314_v29  ;;  %v2754_v12 = vpop.f32.mrb[25].mxu0 }
 0x4af   :  { %v2755_v24 = vadd.f32 %v2754_v12, %v5317_v42  ;;  %v2756_v16 = vpop.f32.mrb[26].mxu0  ;;  %v407_v12 = vrot.slane %v5344_v5, %v5198_v55  ;;  %v5496_v55 = vld [vmem:[#allocation9 + $0x44] ss:$8 sps:$4 sm:$0xff]  }
 0x4b0   :  { %v2759_v21 = vmax.f32 %v2753_v22, 0.0  ;;  %v2757_v43 = vpop.f32.mrb[27].mxu0 }
 0x4b1   :  { %v2760_v35 = vmax.f32 %v2755_v24, 0.0  ;;  %v1929_v24 = vadd.f32 %v5291_v46, %v407_v12  ;;  %v5499_v46 = vld [vmem:[#allocation9 + $0x40] ss:$8 sps:$4 sm:$0xff]  }
 0x4b2   :  { %v2761_v9 = vpack.c.bf16 %v2759_v21, %v2759_v21  ;;  %v4777_v12 = vld [vmem:[#allocation11 + $0x248] sm:$0xff]  }
 0x4b3   :  { %v2762_v52 = vpack.c.bf16 %v2760_v35, %v2760_v35 }
 0x4b5   :  { %2923 = vmatprep.mubr.bf16.mxu1 %v2762_v52 }
 0x4b6   :  { %2924 = vmatmul.mubr.bf16.vlgmr.msra.gmra.mrb[24].mxu1 %v2761_v9 }
 0x4b7   :  { %2935 = vmatpush1.bf16.msra.mxu1 %v5432_v31  ;;  %2966 = vmatprep.mubr.bf16.mxu1 %v2933_v2  ;;  %v2065_v2 = vmax.f32 %v1929_v24, 0.0  ;;  %v4778_v24 = vld [vmem:[#allocation11 + $0x208] sm:$0xff]  }
 0x4b8   :  { %2936 = vmatprep.subr.bf16.mxu1 %v5435_v56 }
 0x4bb   :  { %2937 = vmatpush1.bf16.msra.mxu1 %v5438_v1 }
 0x4bc   :  { %2938 = vmatprep.subr.bf16.mxu1 %v5441_v34 }
 0x4bf   :  { %2939 = vmatpush1.bf16.msra.mxu1 %v5444_v37 }
 0x4c0   :  { %2940 = vmatprep.subr.bf16.mxu1 %v5447_v40 }
 0x4c3   :  { %2941 = vmatpush1.bf16.msra.mxu1 %v5450_v44 }
 0x4c4   :  { %2942 = vmatprep.subr.bf16.mxu1 %v5192_v51  ;;  %v4847_v51 = vld [vmem:[#allocation8] sm:$0xff] }
 0x4c7   :  { %2943 = vmatpush1.bf16.msra.mxu1 %v5195_v54  ;;  %v5739_v54 = vsub.s32 6, %v5189_v48 }
 0x4c8   :  { %2944 = vmatprep.subr.bf16.mxu1 %v5203_v57 }
 0x4c9   :  { %v395_v57 = vrot.slane %v4847_v51, %v5739_v54 }
 0x4cb   :  { %2945 = vmatpush1.bf16.msra.mxu1 %v5208_v60  ;;  %v1886_v60 = vadd.f32 %v5294_v62, %v395_v57  ;;  %v4774_v62 = vld [vmem:[#allocation11 + $0x1b8] sm:$0xff]  }
 0x4cc   :  { %2946 = vmatprep.subr.bf16.mxu1 %v5211_v61 }
 0x4cd   :  { %v2062_v61 = vmax.f32 %v1886_v60, 0.0  ;;  %v5502_v60 = vld [vmem:[#allocation9 + $0x54] ss:$8 sps:$4 sm:$0xff]  }
 0x4cf   :  { %2947 = vmatpush1.bf16.msra.mxu1 %v5216_v6  ;;  %v2932_v6 = vpack.c.bf16 %v2062_v61, %v2062_v61  ;;  %v5505_v61 = vld [vmem:[#allocation9 + $0x50] ss:$8 sps:$4 sm:$0xff]  }
 0x4d0   :  { %2948 = vmatprep.subr.bf16.mxu1 %v5219_v8  ;;  %v4759_v8 = vld [vmem:[#allocation11 + $0x1c0] sm:$0xff]  }
 0x4d1   :  { %4541 = vmatprep.subr.bf16.mxu0 %v4759_v8  ;;  %v5511_v8 = vld [vmem:[#allocation9 + $0x60] ss:$8 sps:$4 sm:$0xff]  }
 0x4d3   :  { %2949 = vmatpush1.bf16.msra.mxu1 %v5221_v14  ;;  %v4760_v14 = vld [vmem:[#allocation11 + $0x180] sm:$0xff]  }
 0x4d4   :  { %2950 = vmatprep.subr.bf16.mxu1 %v5225_v20  ;;  %v4761_v20 = vld [vmem:[#allocation11 + $0x1c8] sm:$0xff]   ;;  %4542 = vmatpush3.bf16.msra.mxu0 %v4760_v14  ;;  %v5514_v14 = vld [vmem:[#allocation9 + $0x74] ss:$8 sps:$4 sm:$0xff]  }
 0x4d5   :  { %4543 = vmatprep.subr.bf16.mxu0 %v4761_v20  ;;  %v5517_v20 = vld [vmem:[#allocation9 + $0x70] ss:$8 sps:$4 sm:$0xff]  }
 0x4d7   :  { %2951 = vmatpush1.bf16.msra.mxu1 %v5228_v27  ;;  %v4762_v27 = vld [vmem:[#allocation11 + $0x188] sm:$0xff]  }
 0x4d8   :  { %2952 = vmatprep.subr.bf16.mxu1 %v5231_v32  ;;  %v4763_v32 = vld [vmem:[#allocation11 + $0x1d0] sm:$0xff]   ;;  %4544 = vmatpush3.bf16.msra.mxu0 %v4762_v27  ;;  %v5520_v27 = vld [vmem:[#allocation9 + $0x84] ss:$8 sps:$4 sm:$0xff]  }
 0x4d9   :  { %4545 = vmatprep.subr.bf16.mxu0 %v4763_v32  ;;  %v5523_v32 = vld [vmem:[#allocation9 + $0x80] ss:$8 sps:$4 sm:$0xff]  }
 0x4db   :  { %2953 = vmatpush1.bf16.msra.mxu1 %v5234_v36  ;;  %v4764_v36 = vld [vmem:[#allocation11 + $0x190] sm:$0xff]  }
 0x4dc   :  { %2954 = vmatprep.subr.bf16.mxu1 %v5237_v41  ;;  %v4765_v41 = vld [vmem:[#allocation11 + $0x1d8] sm:$0xff]   ;;  %4546 = vmatpush3.bf16.msra.mxu0 %v4764_v36 }
 0x4dd   :  { %4547 = vmatprep.subr.bf16.mxu0 %v4765_v41  ;;  %v5526_v36 = vld [vmem:[#allocation9 + $0x94] ss:$8 sps:$4 sm:$0xff]   ;;  %v5529_v41 = vld [vmem:[#allocation9 + $0x90] ss:$8 sps:$4 sm:$0xff]  }
 0x4df   :  { %2955 = vmatpush1.bf16.msra.mxu1 %v5240_v45  ;;  %v4766_v45 = vld [vmem:[#allocation11 + $0x198] sm:$0xff]  }
 0x4e0   :  { %2956 = vmatprep.subr.bf16.mxu1 %v5243_v50  ;;  %v4767_v50 = vld [vmem:[#allocation11 + $0x1e0] sm:$0xff]   ;;  %4548 = vmatpush3.bf16.msra.mxu0 %v4766_v45 }
 0x4e1   :  { %4549 = vmatprep.subr.bf16.mxu0 %v4767_v50  ;;  %v5532_v45 = vld [vmem:[#allocation9 + $0xa4] ss:$8 sps:$4 sm:$0xff]   ;;  %v5535_v50 = vld [vmem:[#allocation9 + $0xa0] ss:$8 sps:$4 sm:$0xff]  }
 0x4e3   :  { %2957 = vmatpush1.bf16.msra.mxu1 %v5246_v58  ;;  %v4768_v58 = vld [vmem:[#allocation11 + $0x1a0] sm:$0xff]  }
 0x4e4   :  { %2958 = vmatprep.subr.bf16.mxu1 %v5249_v63  ;;  %v4769_v63 = vld [vmem:[#allocation11 + $0x1e8] sm:$0xff]   ;;  %4550 = vmatpush3.bf16.msra.mxu0 %v4768_v58  ;;  %v5538_v58 = vld [vmem:[#allocation9 + $0xb4] ss:$8 sps:$4 sm:$0xff]  }
 0x4e5   :  { %4551 = vmatprep.subr.bf16.mxu0 %v4769_v63  ;;  %v5541_v63 = vld [vmem:[#allocation9 + $0xb0] ss:$8 sps:$4 sm:$0xff]  }
 0x4e7   :  { %2959 = vmatpush1.bf16.msra.mxu1 %v5252_v3  ;;  %v4770_v3 = vld [vmem:[#allocation11 + $0x1a8] sm:$0xff]  }
 0x4e8   :  { %2960 = vmatprep.subr.bf16.mxu1 %v5258_v10  ;;  %4552 = vmatpush3.bf16.msra.mxu0 %v4770_v3  ;;  %v4771_v10 = vld [vmem:[#allocation11 + $0x1f0] sm:$0xff]   ;;  %v5544_v3 = vld [vmem:[#allocation9 + $0xc4] ss:$8 sps:$4 sm:$0xff]  }
 0x4e9   :  { %4553 = vmatprep.subr.bf16.mxu0 %v4771_v10  ;;  %v5547_v10 = vld [vmem:[#allocation9 + $0xc0] ss:$8 sps:$4 sm:$0xff]  }
 0x4eb   :  { %2961 = vmatpush1.bf16.msra.mxu1 %v5261_v13  ;;  %v4772_v13 = vld [vmem:[#allocation11 + $0x1b0] sm:$0xff]  }
 0x4ec   :  { %2962 = vmatprep.subr.bf16.mxu1 %v5266_v19  ;;  %4554 = vmatpush3.bf16.msra.mxu0 %v4772_v13  ;;  %v4773_v19 = vld [vmem:[#allocation11 + $0x1f8] sm:$0xff]   ;;  %v403_v13 = vrot.slane %v5344_v5, %v5255_v7 }
 0x4ed   :  { %4555 = vmatprep.subr.bf16.mxu0 %v4773_v19  ;;  %v5552_v19 = vld [vmem:[#allocation9 + $0xd4] ss:$8 sps:$4 sm:$0xff]  }
 0x4ef   :  { %2963 = vmatpush1.bf16.msra.mxu1 %v5269_v23 }
 0x4f0   :  { %2964 = vmatprep.subr.bf16.mxu1 %v5273_v30  ;;  %4556 = vmatpush3.bf16.msra.mxu0 %v4774_v62  ;;  %v5555_v62 = vld [vmem:[#allocation9 + $0xd0] ss:$8 sps:$4 sm:$0xff]  }
 0x4f1   :  { %3150 = vmatprep.subr.bf16.mxu0 %v5417_v59 }
 0x4f3   :  { %2965 = vmatpush1.bf16.msra.mxu1 %v5276_v38 }
 0x4f6   :  { %2967 = vmatmul.mubr.bf16.vlgmr.msra.gmra.mrb[28].mxu1 %v2932_v6  ;;  %v5508_v6 = vld [vmem:[#allocation9 + $0x64] ss:$8 sps:$4 sm:$0xff]  }
 0x589   :  { %v4535_v47 = vpop.f32.mrb[24].mxu1 }
 0x58a   :  { %v4536_v26 = vpop.f32.mrb[25].mxu1 }
 0x58b   :  { %v4537_v11 = vadd.f32 %v4536_v26, %v4535_v47  ;;  %v4538_v33 = vpop.f32.mrb[26].mxu1  ;;  %v1927_v47 = vadd.f32 %v5289_v0, %v403_v13  ;;  %v5559_v26 = vld [vmem:[#allocation9 + $0xe4] ss:$8 sps:$4 sm:$0xff]   ;;  %v4779_v0 = vld [vmem:[#allocation11 + $0x250] sm:$0xff]  }
 0x58c   :  { %v4539_v15 = vpop.f32.mrb[27].mxu1  ;;  %v4775_v33 = vld [vmem:[#allocation11 + $0x240] sm:$0xff]  }
 0x58d   :  { %v5482_v22 = vadd.f32 %v4537_v11, %v5424_v39  ;;  %v3149_v39 = vpack.c.bf16 %v2065_v2, %v2065_v2  ;;  %v2064_v11 = vmax.f32 %v1927_v47, 0.0  ;;  %v4776_v15 = vld [vmem:[#allocation11 + $0x200] sm:$0xff]   ;;  %4563 = vmatprep.subr.bf16.mxu1 %v4775_v33  ;;  %v4790_v2 = vld [vmem:[#allocation11 + $0x238] sm:$0xff]  }
 0x58e   :  { %4564 = vmatpush3.bf16.msra.mxu1 %v4776_v15 }
 0x58f   :  { %v3148_v7 = vpack.c.bf16 %v2064_v11, %v2064_v11  ;;  %4565 = vmatprep.subr.bf16.mxu1 %v4777_v12  ;;  %v5740_v11 = vsub.s32 3, %v5189_v48 }
 0x592   :  { %4566 = vmatpush3.bf16.msra.mxu1 %v4778_v24 }
 0x593   :  { %4567 = vmatprep.subr.bf16.mxu1 %v4779_v0 }
 0x5c9   :  { %v2968_v16 = vpop.f32.mrb[28].mxu1 }
 0x5ca   :  { %v2969_v21 = vadd.f32 %v2968_v16, %v5314_v29  ;;  %v2970_v43 = vpop.f32.mrb[29].mxu1  ;;  %v4780_v16 = vld [vmem:[#allocation11 + $0x210] sm:$0xff]  }
 0x5cb   :  { %v2971_v25 = vadd.f32 %v2970_v43, %v5317_v42  ;;  %v2972_v35 = vpop.f32.mrb[30].mxu1  ;;  %4568 = vmatpush3.bf16.msra.mxu1 %v4780_v16  ;;  %v4785_v43 = vld [vmem:[#allocation11 + $0x268] sm:$0xff]  }
 0x5cc   :  { %v2975_v52 = vmax.f32 %v2969_v21, 0.0  ;;  %v2973_v9 = vpop.f32.mrb[31].mxu1  ;;  %v4781_v21 = vld [vmem:[#allocation11 + $0x258] sm:$0xff]   ;;  %v4787_v35 = vld [vmem:[#allocation11 + $0x270] sm:$0xff]  }
 0x5cd   :  { %v2976_v51 = vmax.f32 %v2971_v25, 0.0  ;;  %4569 = vmatprep.subr.bf16.mxu1 %v4781_v21  ;;  %v4786_v25 = vld [vmem:[#allocation11 + $0x228] sm:$0xff]   ;;  %v4789_v9 = vld [vmem:[#allocation11 + $0x278] sm:$0xff]  }
 0x5ce   :  { %v2977_v57 = vpack.c.bf16 %v2975_v52, %v2975_v52  ;;  %v4788_v52 = vld [vmem:[#allocation11 + $0x230] sm:$0xff]  }
 0x5cf   :  { %v2978_v54 = vpack.c.bf16 %v2976_v51, %v2976_v51 }
 0x5d1   :  { %3139 = vmatprep.mubr.bf16.mxu0 %v2978_v54 }
 0x5d2   :  { %3140 = vmatmul.mubr.bf16.vlgmr.msra.gmra.mrb[28].mxu0 %v2977_v57 }
 0x5d3   :  { %3151 = vmatpush1.bf16.msra.mxu0 %v5432_v31  ;;  %3182 = vmatprep.mubr.bf16.mxu0 %v3149_v39 }
 0x5d4   :  { %3152 = vmatprep.subr.bf16.mxu0 %v5435_v56 }
 0x5d7   :  { %3153 = vmatpush1.bf16.msra.mxu0 %v5438_v1 }
 0x5d8   :  { %3154 = vmatprep.subr.bf16.mxu0 %v5441_v34 }
 0x5db   :  { %3155 = vmatpush1.bf16.msra.mxu0 %v5444_v37 }
 0x5dc   :  { %3156 = vmatprep.subr.bf16.mxu0 %v5447_v40 }
 0x5df   :  { %3157 = vmatpush1.bf16.msra.mxu0 %v5450_v44 }
 0x5e0   :  { %3158 = vmatprep.subr.bf16.mxu0 %v5496_v55 }
 0x5e3   :  { %3159 = vmatpush1.bf16.msra.mxu0 %v5499_v46 }
 0x5e4   :  { %3160 = vmatprep.subr.bf16.mxu0 %v5502_v60 }
 0x5e7   :  { %3161 = vmatpush1.bf16.msra.mxu0 %v5505_v61 }
 0x5e8   :  { %3162 = vmatprep.subr.bf16.mxu0 %v5508_v6 }
 0x5eb   :  { %3163 = vmatpush1.bf16.msra.mxu0 %v5511_v8 }
 0x5ec   :  { %3164 = vmatprep.subr.bf16.mxu0 %v5514_v14 }
 0x5ef   :  { %3165 = vmatpush1.bf16.msra.mxu0 %v5517_v20 }
 0x5f0   :  { %3166 = vmatprep.subr.bf16.mxu0 %v5520_v27 }
 0x5f3   :  { %3167 = vmatpush1.bf16.msra.mxu0 %v5523_v32 }
 0x5f4   :  { %3168 = vmatprep.subr.bf16.mxu0 %v5526_v36 }
 0x5f7   :  { %3169 = vmatpush1.bf16.msra.mxu0 %v5529_v41 }
 0x5f8   :  { %3170 = vmatprep.subr.bf16.mxu0 %v5532_v45 }
 0x5fb   :  { %3171 = vmatpush1.bf16.msra.mxu0 %v5535_v50 }
 0x5fc   :  { %3172 = vmatprep.subr.bf16.mxu0 %v5538_v58 }
 0x5ff   :  { %3173 = vmatpush1.bf16.msra.mxu0 %v5541_v63 }
 0x600   :  { %3174 = vmatprep.subr.bf16.mxu0 %v5544_v3 }
 0x603   :  { %3175 = vmatpush1.bf16.msra.mxu0 %v5547_v10 }
 0x604   :  { %3176 = vmatprep.subr.bf16.mxu0 %v5552_v19 }
 0x607   :  { %3177 = vmatpush1.bf16.msra.mxu0 %v5555_v62 }
 0x608   :  { %3178 = vmatprep.subr.bf16.mxu0 %v5559_v26 }
 0x60b   :  { %3179 = vmatpush1.bf16.msra.mxu0 %v5269_v23  ;;  %v4782_v23 = vld [vmem:[#allocation11 + $0x218] sm:$0xff]  }
 0x60c   :  { %3180 = vmatprep.subr.bf16.mxu0 %v5273_v30  ;;  %v4783_v30 = vld [vmem:[#allocation11 + $0x260] sm:$0xff]   ;;  %4570 = vmatpush3.bf16.msra.mxu1 %v4782_v23 }
 0x60d   :  { %4571 = vmatprep.subr.bf16.mxu1 %v4783_v30 }
 0x60f   :  { %3181 = vmatpush1.bf16.msra.mxu0 %v5276_v38  ;;  %v4784_v38 = vld [vmem:[#allocation11 + $0x220] sm:$0xff]  }
 0x610   :  { %4572 = vmatpush3.bf16.msra.mxu1 %v4784_v38 }
 0x611   :  { %4573 = vmatprep.subr.bf16.mxu1 %v4785_v43 }
 0x612   :  { %3183 = vmatmul.mubr.bf16.vlgmr.msra.gmra.mrb[32].mxu0 %v3148_v7  ;;  %v415_v7 = vrot.slane %v5344_v5, %v5740_v11  ;;  %v4794_v11 = vld [vmem:[#allocation11 + $0x288] sm:$0xff]  }
 0x614   :  { %4574 = vmatpush3.bf16.msra.mxu1 %v4786_v25  ;;  %v1970_v33 = vadd.f32 %v5308_v18, %v415_v7  ;;  %v5741_v18 = vsub.s32 2, %v5189_v48  ;;  %v4795_v7 = vld [vmem:[#allocation11 + $0x2d0] sm:$0xff]   ;;  %v4807_v48 = vld [vmem:[#allocation11 + $0x340] sm:$0xff]  }
 0x615   :  { %4575 = vmatprep.subr.bf16.mxu1 %v4787_v35 }
 0x616   :  { %v2067_v30 = vmax.f32 %v1970_v33, 0.0  ;;  %v411_v35 = vrot.slane %v5344_v5, %v5741_v18  ;;  %v4796_v33 = vld [vmem:[#allocation11 + $0x290] sm:$0xff]  }
 0x618   :  { %4576 = vmatpush3.bf16.msra.mxu1 %v4788_v52  ;;  %v3365_v25 = vpack.c.bf16 %v2067_v30, %v2067_v30  ;;  %v1968_v52 = vadd.f32 %v5306_v17, %v411_v35  ;;  %v4793_v17 = vld [vmem:[#allocation11 + $0x2c8] sm:$0xff]   ;;  %v4804_v30 = vld [vmem:[#allocation11 + $0x2b0] sm:$0xff]  }
 0x619   :  { %4577 = vmatprep.subr.bf16.mxu1 %v4789_v9  ;;  %v5607_v9 = vld [vmem:[#allocation9 + $0xe0] ss:$8 sps:$4 sm:$0xff]  }
 0x61c   :  { %4578 = vmatpush3.bf16.msra.mxu1 %v4790_v2  ;;  %v2066_v2 = vmax.f32 %v1968_v52, 0.0 }
 0x61d   :  { %3366 = vmatprep.subr.bf16.mxu1 %v5417_v59 }
 0x6a5   :  { %v4557_v51 = vpop.f32.mrb[28].mxu0 }
 0x6a6   :  { %v4558_v54 = vpop.f32.mrb[29].mxu0 }
 0x6a7   :  { %v4559_v57 = vadd.f32 %v4558_v54, %v4557_v51  ;;  %v4560_v39 = vpop.f32.mrb[30].mxu0  ;;  %v5610_v51 = vld [vmem:[#allocation9 + $0xf4] ss:$8 sps:$4 sm:$0xff]   ;;  %v5613_v54 = vld [vmem:[#allocation9 + $0xf0] ss:$8 sps:$4 sm:$0xff]  }
 0x6a8   :  { %v4561_v13 = vpop.f32.mrb[31].mxu0  ;;  %v4791_v39 = vld [vmem:[#allocation11 + $0x2c0] sm:$0xff]  }
 0x6a9   :  { %v5567_v47 = vadd.f32 %v4559_v57, %v5482_v22  ;;  %v3364_v57 = vpack.c.bf16 %v2066_v2, %v2066_v2  ;;  %v4792_v13 = vld [vmem:[#allocation11 + $0x280] sm:$0xff]   ;;  %4585 = vmatprep.subr.bf16.mxu0 %v4791_v39  ;;  %v5742_v39 = vld [vmem:[#allocation18_spill] sm:$0xff] }
 0x6aa   :  { %4586 = vmatpush3.bf16.msra.mxu0 %v4792_v13 }
 0x6ab   :  { %4587 = vmatprep.subr.bf16.mxu0 %v4793_v17 }
 0x6ae   :  { %4588 = vmatpush3.bf16.msra.mxu0 %v4794_v11 }
 0x6af   :  { %4589 = vmatprep.subr.bf16.mxu0 %v4795_v7 }
 0x6b2   :  { %4590 = vmatpush3.bf16.msra.mxu0 %v4796_v33 }
 0x6e5   :  { %v3184_v15 = vpop.f32.mrb[32].mxu0 }
 0x6e6   :  { %v3185_v12 = vadd.f32 %v3184_v15, %v5314_v29  ;;  %v3186_v24 = vpop.f32.mrb[33].mxu0  ;;  %v4797_v15 = vld [vmem:[#allocation11 + $0x2d8] sm:$0xff]  }
 0x6e7   :  { %v3187_v0 = vadd.f32 %v3186_v24, %v5317_v42  ;;  %v3188_v16 = vpop.f32.mrb[34].mxu0  ;;  %4591 = vmatprep.subr.bf16.mxu0 %v4797_v15  ;;  %v4799_v24 = vld [vmem:[#allocation11 + $0x2e0] sm:$0xff]  }
 0x6e8   :  { %v3191_v21 = vmax.f32 %v3185_v12, 0.0  ;;  %v3189_v23 = vpop.f32.mrb[35].mxu0  ;;  %v4798_v12 = vld [vmem:[#allocation11 + $0x298] sm:$0xff]   ;;  %v4801_v16 = vld [vmem:[#allocation11 + $0x2e8] sm:$0xff]  }
 0x6e9   :  { %v3192_v38 = vmax.f32 %v3187_v0, 0.0  ;;  %4592 = vmatpush3.bf16.msra.mxu0 %v4798_v12  ;;  %v4800_v0 = vld [vmem:[#allocation11 + $0x2a0] sm:$0xff]   ;;  %v4803_v23 = vld [vmem:[#allocation11 + $0x2f0] sm:$0xff]  }
 0x6ea   :  { %v3193_v22 = vpack.c.bf16 %v3191_v21, %v3191_v21  ;;  %4593 = vmatprep.subr.bf16.mxu0 %v4799_v24  ;;  %v4802_v21 = vld [vmem:[#allocation11 + $0x2a8] sm:$0xff]  }
 0x6eb   :  { %v3194_v43 = vpack.c.bf16 %v3192_v38, %v3192_v38  ;;  %v4805_v38 = vld [vmem:[#allocation11 + $0x2f8] sm:$0xff]  }
 0x6ed   :  { %3355 = vmatprep.mubr.bf16.mxu1 %v3194_v43  ;;  %4594 = vmatpush3.bf16.msra.mxu0 %v4800_v0  ;;  %v4806_v43 = vld [vmem:[#allocation11 + $0x2b8] sm:$0xff]  }
 0x6ee   :  { %3356 = vmatmul.mubr.bf16.vlgmr.msra.gmra.mrb[32].mxu1 %v3193_v22  ;;  %4595 = vmatprep.subr.bf16.mxu0 %v4801_v16 }
 0x6ef   :  { %3367 = vmatpush1.bf16.msra.mxu1 %v5432_v31  ;;  %3398 = vmatprep.mubr.bf16.mxu1 %v3365_v25 }
 0x6f0   :  { %3368 = vmatprep.subr.bf16.mxu1 %v5435_v56 }
 0x6f1   :  { %4596 = vmatpush3.bf16.msra.mxu0 %v4802_v21 }
 0x6f2   :  { %4597 = vmatprep.subr.bf16.mxu0 %v4803_v23 }
 0x6f3   :  { %3369 = vmatpush1.bf16.msra.mxu1 %v5438_v1 }
 0x6f4   :  { %3370 = vmatprep.subr.bf16.mxu1 %v5441_v34 }
 0x6f5   :  { %4598 = vmatpush3.bf16.msra.mxu0 %v4804_v30  ;;  %v5743_v30 = vld [vmem:[#allocation17_spill] sm:$0xff] }
 0x6f6   :  { %4599 = vmatprep.subr.bf16.mxu0 %v4805_v38 }
 0x6f7   :  { %3371 = vmatpush1.bf16.msra.mxu1 %v5444_v37 }
 0x6f8   :  { %3372 = vmatprep.subr.bf16.mxu1 %v5447_v40 }
 0x6f9   :  { %4600 = vmatpush3.bf16.msra.mxu0 %v4806_v43 }
 0x6fa   :  { %3582 = vmatprep.subr.bf16.mxu0 %v5417_v59 }
 0x6fb   :  { %3373 = vmatpush1.bf16.msra.mxu1 %v5450_v44 }
 0x6fc   :  { %3374 = vmatprep.subr.bf16.mxu1 %v5496_v55 }
 0x6ff   :  { %3375 = vmatpush1.bf16.msra.mxu1 %v5499_v46 }
 0x700   :  { %3376 = vmatprep.subr.bf16.mxu1 %v5502_v60 }
 0x703   :  { %3377 = vmatpush1.bf16.msra.mxu1 %v5505_v61 }
 0x704   :  { %3378 = vmatprep.subr.bf16.mxu1 %v5508_v6 }
 0x707   :  { %3379 = vmatpush1.bf16.msra.mxu1 %v5511_v8 }
 0x708   :  { %3380 = vmatprep.subr.bf16.mxu1 %v5514_v14 }
 0x70b   :  { %3381 = vmatpush1.bf16.msra.mxu1 %v5517_v20 }
 0x70c   :  { %3382 = vmatprep.subr.bf16.mxu1 %v5520_v27 }
 0x70f   :  { %3383 = vmatpush1.bf16.msra.mxu1 %v5523_v32 }
 0x710   :  { %3384 = vmatprep.subr.bf16.mxu1 %v5526_v36 }
 0x713   :  { %3385 = vmatpush1.bf16.msra.mxu1 %v5529_v41 }
 0x714   :  { %3386 = vmatprep.subr.bf16.mxu1 %v5532_v45 }
 0x717   :  { %3387 = vmatpush1.bf16.msra.mxu1 %v5535_v50 }
 0x718   :  { %3388 = vmatprep.subr.bf16.mxu1 %v5538_v58 }
 0x71b   :  { %3389 = vmatpush1.bf16.msra.mxu1 %v5541_v63 }
 0x71c   :  { %3390 = vmatprep.subr.bf16.mxu1 %v5544_v3 }
 0x71f   :  { %3391 = vmatpush1.bf16.msra.mxu1 %v5547_v10 }
 0x720   :  { %3392 = vmatprep.subr.bf16.mxu1 %v5552_v19 }
 0x723   :  { %3393 = vmatpush1.bf16.msra.mxu1 %v5555_v62 }
 0x724   :  { %3394 = vmatprep.subr.bf16.mxu1 %v5559_v26 }
 0x727   :  { %3395 = vmatpush1.bf16.msra.mxu1 %v5607_v9 }
 0x728   :  { %3396 = vmatprep.subr.bf16.mxu1 %v5610_v51 }
 0x72b   :  { %3397 = vmatpush1.bf16.msra.mxu1 %v5613_v54 }
 0x72c   :  { %4607 = vmatprep.subr.bf16.mxu1 %v4807_v48 }
 0x72e   :  { %3399 = vmatmul.mubr.bf16.vlgmr.msra.gmra.mrb[36].mxu1 %v3364_v57  ;;  %v423_v57 = vrot.slane %v5344_v5, %v390_v4  ;;  %v419_v4 = vrot.slane %v5344_v5, %v386_v28  ;;  %v4809_v5 = vld [vmem:[#allocation11 + $0x348] sm:$0xff]  }
 0x72f   :  { %v4810_v28 = vld [vmem:[#allocation11 + $0x308] sm:$0xff]  }
 0x730   :  { %v2011_v13 = vadd.f32 %v5742_v39, %v423_v57  ;;  %v2009_v38 = vadd.f32 %v5743_v30, %v419_v4  ;;  %v4814_v57 = vld [vmem:[#allocation11 + $0x318] sm:$0xff]   ;;  %v4815_v39 = vld [vmem:[#allocation11 + $0x360] sm:$0xff]  }
 0x732   :  { %v2069_v0 = vmax.f32 %v2011_v13, 0.0  ;;  %v2068_v43 = vmax.f32 %v2009_v38, 0.0  ;;  %v4816_v13 = vld [vmem:[#allocation11 + $0x320] sm:$0xff]  }
 0x734   :  { %v3581_v23 = vpack.c.bf16 %v2069_v0, %v2069_v0 }
 0x7c1   :  { %v4579_v22 = vpop.f32.mrb[32].mxu1 }
 0x7c2   :  { %v4580_v25 = vpop.f32.mrb[33].mxu1 }
 0x7c3   :  { %v4581_v18 = vadd.f32 %v4580_v25, %v4579_v22  ;;  %v4582_v35 = vpop.f32.mrb[34].mxu1  ;;  %v3580_v22 = vpack.c.bf16 %v2068_v43, %v2068_v43  ;;  %v4808_v25 = vld [vmem:[#allocation11 + $0x300] sm:$0xff]  }
 0x7c4   :  { %v4583_v52 = vpop.f32.mrb[35].mxu1  ;;  %4608 = vmatpush3.bf16.msra.mxu1 %v4808_v25  ;;  %v4812_v35 = vld [vmem:[#allocation11 + $0x310] sm:$0xff]  }
 0x7c5   :  { %v5618_v2 = vadd.f32 %v4581_v18, %v5567_v47  ;;  %4609 = vmatprep.subr.bf16.mxu1 %v4809_v5  ;;  %v4811_v18 = vld [vmem:[#allocation11 + $0x350] sm:$0xff]   ;;  %v4813_v52 = vld [vmem:[#allocation11 + $0x358] sm:$0xff]   ;;  %v2071_v5 = vmax.f32 %v5363_v53, 0.0  ;;  %v2070_v53 = vmax.f32 %v5361_v49, 0.0 }
 0x7c6   :  { %v4830_v49 = vld [vmem:[#allocation11 + $0x398] sm:$0xff]  }
 0x7c8   :  { %4610 = vmatpush3.bf16.msra.mxu1 %v4810_v28 }
 0x7c9   :  { %4611 = vmatprep.subr.bf16.mxu1 %v4811_v18 }
 0x7cc   :  { %4612 = vmatpush3.bf16.msra.mxu1 %v4812_v35  ;;  %v3797_v35 = vpack.c.bf16 %v2071_v5, %v2071_v5 }
 0x7cd   :  { %4613 = vmatprep.subr.bf16.mxu1 %v4813_v52 }
 0x7d0   :  { %4614 = vmatpush3.bf16.msra.mxu1 %v4814_v57 }
 0x7d1   :  { %4615 = vmatprep.subr.bf16.mxu1 %v4815_v39 }
 0x7d4   :  { %4616 = vmatpush3.bf16.msra.mxu1 %v4816_v13 }
 0x801   :  { %v3400_v17 = vpop.f32.mrb[36].mxu1 }
 0x802   :  { %v3401_v11 = vadd.f32 %v3400_v17, %v5314_v29  ;;  %v3402_v7 = vpop.f32.mrb[37].mxu1  ;;  %v4817_v17 = vld [vmem:[#allocation11 + $0x368] sm:$0xff]  }
 0x803   :  { %v3403_v33 = vadd.f32 %v3402_v7, %v5317_v42  ;;  %v3404_v15 = vpop.f32.mrb[38].mxu1  ;;  %4617 = vmatprep.subr.bf16.mxu1 %v4817_v17  ;;  %v4819_v7 = vld [vmem:[#allocation11 + $0x370] sm:$0xff]  }
 0x804   :  { %v3407_v12 = vmax.f32 %v3401_v11, 0.0  ;;  %v3405_v24 = vpop.f32.mrb[39].mxu1  ;;  %v4818_v11 = vld [vmem:[#allocation11 + $0x328] sm:$0xff]   ;;  %v4821_v15 = vld [vmem:[#allocation11 + $0x378] sm:$0xff]  }
 0x805   :  { %v3408_v16 = vmax.f32 %v3403_v33, 0.0  ;;  %4618 = vmatpush3.bf16.msra.mxu1 %v4818_v11  ;;  %v4820_v33 = vld [vmem:[#allocation11 + $0x330] sm:$0xff]  }
 0x806   :  { %v3409_v47 = vpack.c.bf16 %v3407_v12, %v3407_v12  ;;  %4619 = vmatprep.subr.bf16.mxu1 %v4819_v7  ;;  %v4822_v12 = vld [vmem:[#allocation11 + $0x338] sm:$0xff]  }
 0x807   :  { %v3410_v21 = vpack.c.bf16 %v3408_v16, %v3408_v16 }
 0x809   :  { %3571 = vmatprep.mubr.bf16.mxu0 %v3410_v21  ;;  %4620 = vmatpush3.bf16.msra.mxu1 %v4820_v33 }
 0x80a   :  { %3572 = vmatmul.mubr.bf16.vlgmr.msra.gmra.mrb[36].mxu0 %v3409_v47  ;;  %4621 = vmatprep.subr.bf16.mxu1 %v4821_v15 }
 0x80b   :  { %3583 = vmatpush1.bf16.msra.mxu0 %v5432_v31  ;;  %3614 = vmatprep.mubr.bf16.mxu0 %v3581_v23 }
 0x80c   :  { %3584 = vmatprep.subr.bf16.mxu0 %v5435_v56 }
 0x80d   :  { %4622 = vmatpush3.bf16.msra.mxu1 %v4822_v12 }
 0x80e   :  { %3798 = vmatprep.subr.bf16.mxu1 %v5417_v59 }
 0x80f   :  { %3585 = vmatpush1.bf16.msra.mxu0 %v5438_v1 }
 0x810   :  { %3586 = vmatprep.subr.bf16.mxu0 %v5441_v34 }
 0x813   :  { %3587 = vmatpush1.bf16.msra.mxu0 %v5444_v37 }
 0x814   :  { %3588 = vmatprep.subr.bf16.mxu0 %v5447_v40 }
 0x817   :  { %3589 = vmatpush1.bf16.msra.mxu0 %v5450_v44 }
 0x818   :  { %3590 = vmatprep.subr.bf16.mxu0 %v5496_v55 }
 0x81b   :  { %3591 = vmatpush1.bf16.msra.mxu0 %v5499_v46 }
 0x81c   :  { %3592 = vmatprep.subr.bf16.mxu0 %v5502_v60 }
 0x81f   :  { %3593 = vmatpush1.bf16.msra.mxu0 %v5505_v61 }
 0x820   :  { %3594 = vmatprep.subr.bf16.mxu0 %v5508_v6 }
 0x823   :  { %3595 = vmatpush1.bf16.msra.mxu0 %v5511_v8 }
 0x824   :  { %3596 = vmatprep.subr.bf16.mxu0 %v5514_v14 }
 0x827   :  { %3597 = vmatpush1.bf16.msra.mxu0 %v5517_v20 }
 0x828   :  { %3598 = vmatprep.subr.bf16.mxu0 %v5520_v27 }
 0x82b   :  { %3599 = vmatpush1.bf16.msra.mxu0 %v5523_v32 }
 0x82c   :  { %3600 = vmatprep.subr.bf16.mxu0 %v5526_v36 }
 0x82f   :  { %3601 = vmatpush1.bf16.msra.mxu0 %v5529_v41 }
 0x830   :  { %3602 = vmatprep.subr.bf16.mxu0 %v5532_v45 }
 0x833   :  { %3603 = vmatpush1.bf16.msra.mxu0 %v5535_v50 }
 0x834   :  { %3604 = vmatprep.subr.bf16.mxu0 %v5538_v58 }
 0x837   :  { %3605 = vmatpush1.bf16.msra.mxu0 %v5541_v63 }
 0x838   :  { %3606 = vmatprep.subr.bf16.mxu0 %v5544_v3 }
 0x83b   :  { %3607 = vmatpush1.bf16.msra.mxu0 %v5547_v10 }
 0x83c   :  { %3608 = vmatprep.subr.bf16.mxu0 %v5552_v19 }
 0x83f   :  { %3609 = vmatpush1.bf16.msra.mxu0 %v5555_v62 }
 0x840   :  { %3610 = vmatprep.subr.bf16.mxu0 %v5559_v26 }
 0x843   :  { %3611 = vmatpush1.bf16.msra.mxu0 %v5607_v9 }
 0x844   :  { %3612 = vmatprep.subr.bf16.mxu0 %v5610_v51 }
 0x847   :  { %3613 = vmatpush1.bf16.msra.mxu0 %v5613_v54 }
 0x84a   :  { %3615 = vmatmul.mubr.bf16.vlgmr.msra.gmra.mrb[40].mxu0 %v3580_v22 }
 0x8dd   :  { %v4601_v24 = vpop.f32.mrb[36].mxu0 }
 0x8de   :  { %v4602_v0 = vpop.f32.mrb[37].mxu0 }
 0x8df   :  { %v4603_v16 = vadd.f32 %v4602_v0, %v4601_v24  ;;  %v4604_v21 = vpop.f32.mrb[38].mxu0 }
 0x8e0   :  { %v4605_v47 = vpop.f32.mrb[39].mxu0 }
 0x8e1   :  { %v5663_v23 = vadd.f32 %v4603_v16, %v5618_v2 }
 0x91d   :  { %v3616_v4 = vpop.f32.mrb[40].mxu0 }
 0x91e   :  { %v3617_v30 = vadd.f32 %v3616_v4, %v5314_v29  ;;  %v3618_v38 = vpop.f32.mrb[41].mxu0 }
 0x91f   :  { %v3619_v43 = vadd.f32 %v3618_v38, %v5317_v42  ;;  %v3620_v22 = vpop.f32.mrb[42].mxu0 }
 0x920   :  { %v3623_v48 = vmax.f32 %v3617_v30, 0.0  ;;  %v3621_v25 = vpop.f32.mrb[43].mxu0 }
 0x921   :  { %v3624_v59 = vmax.f32 %v3619_v43, 0.0 }
 0x922   :  { %v3625_v18 = vpack.c.bf16 %v3623_v48, %v3623_v48 }
 0x923   :  { %v3626_v28 = vpack.c.bf16 %v3624_v59, %v3624_v59 }
 0x925   :  { %3787 = vmatprep.mubr.bf16.mxu1 %v3626_v28 }
 0x926   :  { %3788 = vmatmul.mubr.bf16.vlgmr.msra.gmra.mrb[40].mxu1 %v3625_v18 }
 0x927   :  { %3799 = vmatpush1.bf16.msra.mxu1 %v5432_v31  ;;  %3830 = vmatprep.mubr.bf16.mxu1 %v3797_v35  ;;  %v3796_v31 = vpack.c.bf16 %v2070_v53, %v2070_v53 }
 0x928   :  { %3800 = vmatprep.subr.bf16.mxu1 %v5435_v56  ;;  %v4823_v56 = vld [vmem:[#allocation11 + $0x3c0] sm:$0xff]  }
 0x929   :  { %4629 = vmatprep.subr.bf16.mxu0 %v4823_v56 }
 0x92b   :  { %3801 = vmatpush1.bf16.msra.mxu1 %v5438_v1  ;;  %v4824_v1 = vld [vmem:[#allocation11 + $0x380] sm:$0xff]  }
 0x92c   :  { %3802 = vmatprep.subr.bf16.mxu1 %v5441_v34  ;;  %v4825_v34 = vld [vmem:[#allocation11 + $0x3c8] sm:$0xff]   ;;  %4630 = vmatpush3.bf16.msra.mxu0 %v4824_v1 }
 0x92d   :  { %4631 = vmatprep.subr.bf16.mxu0 %v4825_v34 }
 0x92f   :  { %3803 = vmatpush1.bf16.msra.mxu1 %v5444_v37  ;;  %v4826_v37 = vld [vmem:[#allocation11 + $0x388] sm:$0xff]  }
 0x930   :  { %3804 = vmatprep.subr.bf16.mxu1 %v5447_v40  ;;  %v4827_v40 = vld [vmem:[#allocation11 + $0x3d0] sm:$0xff]   ;;  %4632 = vmatpush3.bf16.msra.mxu0 %v4826_v37 }
 0x931   :  { %4633 = vmatprep.subr.bf16.mxu0 %v4827_v40 }
 0x933   :  { %3805 = vmatpush1.bf16.msra.mxu1 %v5450_v44  ;;  %v4828_v44 = vld [vmem:[#allocation11 + $0x390] sm:$0xff]  }
 0x934   :  { %3806 = vmatprep.subr.bf16.mxu1 %v5496_v55  ;;  %v4829_v55 = vld [vmem:[#allocation11 + $0x3d8] sm:$0xff]   ;;  %4634 = vmatpush3.bf16.msra.mxu0 %v4828_v44 }
 0x935   :  { %4635 = vmatprep.subr.bf16.mxu0 %v4829_v55 }
 0x937   :  { %3807 = vmatpush1.bf16.msra.mxu1 %v5499_v46  ;;  %v4831_v46 = vld [vmem:[#allocation11 + $0x3e0] sm:$0xff]  }
 0x938   :  { %3808 = vmatprep.subr.bf16.mxu1 %v5502_v60  ;;  %4636 = vmatpush3.bf16.msra.mxu0 %v4830_v49  ;;  %v4832_v60 = vld [vmem:[#allocation11 + $0x3a0] sm:$0xff]  }
 0x939   :  { %4637 = vmatprep.subr.bf16.mxu0 %v4831_v46 }
 0x93b   :  { %3809 = vmatpush1.bf16.msra.mxu1 %v5505_v61  ;;  %v4833_v61 = vld [vmem:[#allocation11 + $0x3e8] sm:$0xff]  }
 0x93c   :  { %3810 = vmatprep.subr.bf16.mxu1 %v5508_v6  ;;  %4638 = vmatpush3.bf16.msra.mxu0 %v4832_v60  ;;  %v4834_v6 = vld [vmem:[#allocation11 + $0x3a8] sm:$0xff]  }
 0x93d   :  { %4639 = vmatprep.subr.bf16.mxu0 %v4833_v61 }
 0x93f   :  { %3811 = vmatpush1.bf16.msra.mxu1 %v5511_v8  ;;  %v4835_v8 = vld [vmem:[#allocation11 + $0x3f0] sm:$0xff]  }
 0x940   :  { %3812 = vmatprep.subr.bf16.mxu1 %v5514_v14  ;;  %4640 = vmatpush3.bf16.msra.mxu0 %v4834_v6  ;;  %v4836_v14 = vld [vmem:[#allocation11 + $0x3b0] sm:$0xff]  }
 0x941   :  { %4641 = vmatprep.subr.bf16.mxu0 %v4835_v8 }
 0x943   :  { %3813 = vmatpush1.bf16.msra.mxu1 %v5517_v20  ;;  %v4837_v20 = vld [vmem:[#allocation11 + $0x3f8] sm:$0xff]  }
 0x944   :  { %3814 = vmatprep.subr.bf16.mxu1 %v5520_v27  ;;  %4642 = vmatpush3.bf16.msra.mxu0 %v4836_v14  ;;  %v4838_v27 = vld [vmem:[#allocation11 + $0x3b8] sm:$0xff]  }
 0x945   :  { %4643 = vmatprep.subr.bf16.mxu0 %v4837_v20 }
 0x947   :  { %3815 = vmatpush1.bf16.msra.mxu1 %v5523_v32 }
 0x948   :  { %3816 = vmatprep.subr.bf16.mxu1 %v5526_v36  ;;  %4644 = vmatpush3.bf16.msra.mxu0 %v4838_v27 }
 0x94b   :  { %3817 = vmatpush1.bf16.msra.mxu1 %v5529_v41 }
 0x94c   :  { %3818 = vmatprep.subr.bf16.mxu1 %v5532_v45 }
 0x94f   :  { %3819 = vmatpush1.bf16.msra.mxu1 %v5535_v50 }
 0x950   :  { %3820 = vmatprep.subr.bf16.mxu1 %v5538_v58 }
 0x953   :  { %3821 = vmatpush1.bf16.msra.mxu1 %v5541_v63 }
 0x954   :  { %3822 = vmatprep.subr.bf16.mxu1 %v5544_v3 }
 0x957   :  { %3823 = vmatpush1.bf16.msra.mxu1 %v5547_v10 }
 0x958   :  { %3824 = vmatprep.subr.bf16.mxu1 %v5552_v19 }
 0x95b   :  { %3825 = vmatpush1.bf16.msra.mxu1 %v5555_v62 }
 0x95c   :  { %3826 = vmatprep.subr.bf16.mxu1 %v5559_v26 }
 0x95f   :  { %3827 = vmatpush1.bf16.msra.mxu1 %v5607_v9 }
 0x960   :  { %3828 = vmatprep.subr.bf16.mxu1 %v5610_v51 }
 0x963   :  { %3829 = vmatpush1.bf16.msra.mxu1 %v5613_v54 }
 0x966   :  { %3831 = vmatmul.mubr.bf16.vlgmr.msra.gmra.mrb[44].mxu1 %v3796_v31 }
 0x9f9   :  { %v4623_v32 = vpop.f32.mrb[40].mxu1 }
 0x9fa   :  { %v4624_v36 = vpop.f32.mrb[41].mxu1 }
 0x9fb   :  { %v4625_v41 = vadd.f32 %v4624_v36, %v4623_v32  ;;  %v4626_v45 = vpop.f32.mrb[42].mxu1 }
 0x9fc   :  { %v4627_v50 = vpop.f32.mrb[43].mxu1 }
 0x9fd   :  { %v3795_v58 = vadd.f32 %v4625_v41, %v5663_v23 }
 0xa39   :  { %v3832_v63 = vpop.f32.mrb[44].mxu1 }
 0xa3a   :  { %v3833_v3 = vadd.f32 %v3832_v63, %v5314_v29  ;;  %v3834_v10 = vpop.f32.mrb[45].mxu1  ;;  %v4473_v29 = vld [vmem:[%s5728_s7] ss:$0 sm:$0xff] }
 0xa3b   :  { %v3835_v19 = vadd.f32 %v3834_v10, %v5317_v42  ;;  %v3836_v62 = vpop.f32.mrb[46].mxu1 }
 0xa3c   :  { %v3839_v26 = vmax.f32 %v3833_v3, 0.0  ;;  %v3837_v9 = vpop.f32.mrb[47].mxu1 }
 0xa3d   :  { %v3840_v51 = vmax.f32 %v3835_v19, 0.0 }
 0xa3e   :  { %v3841_v2 = vpack.c.bf16 %v3839_v26, %v3839_v26 }
 0xa3f   :  { %v3842_v54 = vpack.c.bf16 %v3840_v51, %v3840_v51 }
 0xa41   :  { %4003 = vmatprep.mubr.bf16.mxu0 %v3842_v54 }
 0xa42   :  { %4004 = vmatmul.mubr.bf16.vlgmr.msra.gmra.mrb[44].mxu0 %v3841_v2 }
 0xb15   :  { %v4645_v52 = vpop.f32.mrb[44].mxu0 }
 0xb16   :  { %v4646_v57 = vpop.f32.mrb[45].mxu0 }
 0xb17   :  { %v4647_v39 = vadd.f32 %v4646_v57, %v4645_v52  ;;  %v4648_v13 = vpop.f32.mrb[46].mxu0 }
 0xb18   :  { %v4649_v17 = vpop.f32.mrb[47].mxu0 }
 0xb19   :  { %v4011_v11 = vadd.f32 %v4647_v39, %v3795_v58 }
 0xb1b   :  { %4012 = vst [vmem:[#allocation12] sm:$0xf] %v4011_v11  ;;  %v4020_v42 = vmul.f32 %v4473_v29, %v4011_v11 }
 0xb1d   :  { %v4022_v7 = vsel %vm4021_vm0, %v4020_v42, 0.0 }
 0xb1e   :  { %4023 = vadd.xlane.f32.xlu0 %v4022_v7 }
 0xb1f   :  { %4993 = shalt.err (!%p4990_p2)
}
 0xb20   :  { %s4994_s7 = scalar_lea.hbm %s5730_s9, 64 }
 0xb21   :  { %p4995_p3 = scmp.ne.s32.totalorder %s5730_s9, %s4994_s7  ;;  %p4998_p4 = scmp.lt.u32.totalorder %s4994_s7, %s5730_s9 }
 0xb23   :  { %p5000_p5 = pnand %p4998_p4, %p4995_p3 }
 0xb25   :  { %5003 = shalt.err (!%p5000_p5)
}
 0xb26   :  { %4044 = dma.vmem_to_hbm [thread:$0]  %s4042_s17, 64, %s5730_s9, [#allocation5]   ;;  %v4474_v33 = vld [vmem:[#allocation2] ss:$0 sm:$0xff]  ;;  %vm4033_vm1 = vcmask 3072  }
 0xbab   :  { %v4024_v15 = vpop.xlane.xlu0 %4023 }
 0xbac   :  { %v4032_v12 = vadd.f32 %v4474_v33, %v4024_v15 }
 0xbae   :  { %4034 = vst.msk [vmem:[%s5731_s10] sm:$0xf] %vm4033_vm1, %v4032_v12 }
 0xbaf   :  { %5010 = dma.done.wait [#allocation5], 64  }
 0xbb0   :  { %5011 = vsyncadd [#allocation5], 4294967232 }
 0xbb1   :  { %4052 = vsyncpa [#allocation4], 1 }
 0xbb2   :  { %4053 = vsyncpa [#allocation7], 1 }
 0xbb3   :  { %4054 = vsyncpa [#allocation10], 1 }
 0xbb4   :  { %4055 = vsyncpa [#allocation5], 1 }

// kernel: tpu_custom_call.1
= control target key start
LH: loop header
LB: loop body
LE: loop exit
PB: predicated region body
PF: predicated region fallthrough
CT: control target
= control target key end

     0   :  { %s5721_s0 = inlined_call_operand.hbm [shape: f32[4,256], index: 0, kind: input, shape index: {}]   ;;  %s5722_s1 = inlined_call_operand.hbm [shape: bf16[256,2048], index: 1, kind: input, shape index: {}]   ;;  %s5723_s2 = inlined_call_operand.hbm [shape: f32[1,2048], index: 2, kind: input, shape index: {}]   ;;  %s5724_s3 = inlined_call_operand.hbm [shape: bf16[256,256], index: 3, kind: input, shape index: {}]   ;;  %s5725_s4 = inlined_call_operand.vmem [shape: f32[1,256], index: 4, kind: input, shape index: {}]   ;;  %s5726_s5 = inlined_call_operand.hbm [shape: bf16[2048,128], index: 5, kind: input, shape index: {}]   ;;  %s5727_s6 = inlined_call_operand.vmem [shape: f32[1,128], index: 6, kind: input, shape index: {}]   ;;  %s5728_s7 = inlined_call_operand.vmem [shape: f32[1,128], index: 7, kind: input, shape index: {}]   ;;  %s5729_s8 = inlined_call_operand.<no memory space> [shape: f32[1,1], index: 8, kind: input, shape index: {}]   ;;  %s5730_s9 = inlined_call_operand.hbm [shape: f32[4,128], index: 9, kind: output, shape index: {0}]   ;;  %s5731_s10 = inlined_call_operand.vmem [shape: f32[4,1], index: 10, kind: output, shape index: {1}]  }
   0x1   :  { %v16_v0 = vstv %s5729_s8 }
   0x2   :  { %17 = vst [vmem:[#allocation2] sm:$0x1] %v16_v0 }
   0x3   :  { %18 = vsyncpa [#allocation4], 0 }
   0x4   :  { %19 = vsyncpa [#allocation7], 0 }
   0x5   :  { %20 = vsyncpa [#allocation10], 0 }
   0x6   :  { %21 = vsyncpa [#allocation5], 0  ;;  %s5012_s15 = smov [#allocation6]   ;;  %s4872_s19 = scalar_lea.hbm %s5722_s1, 32768 }
   0x7   :  { %s37_s16 = sshll.u32 %s5012_s15, 4  ;;  %p4873_p0 = scmp.ne.s32.totalorder %s5722_s1, %s4872_s19  ;;  %s38_s16 = int_to_ptr.vmem [resolvable:$true] %s37_s16 }
   0x8   :  { %p4876_p1 = scmp.lt.u32.totalorder %s4872_s19, %s5722_s1 }
   0xa   :  { %p4878_p2 = pnand %p4876_p1, %p4873_p0 }
   0xc   :  { %4881 = shalt.err (!%p4878_p2)
}
   0xd   :  { %s4882_s8 = scalar_lea.vmem %s38_s16, 32768  ;;  %p4887_p4 = scmp.lt.s32.totalorder %s38_s16, %s38_s16 }
   0xe   :  { %p4883_p3 = scmp.ne.s32.totalorder %s38_s16, %s4882_s8  ;;  %p4888_p5 = scmp.lt.s32.totalorder %s4882_s8, %s4882_s8 }
  0x10   :  { %p4889_p6 = por %p4888_p5, %p4887_p4 }
  0x12   :  { %p4890_p7 = pnand %p4889_p6, %p4883_p3 }
  0x14   :  { %4893 = shalt.err (!%p4890_p7)
}
  0x15   :  { %s5013_s24 = smov 1024   ;;  %s5014_s25 = smov 64  }
  0x16   :  { %43 = dma.hbm_to_vmem [thread:$0]  %s5722_s1, 32768, %s38_s16, [#allocation7], %s5013_s24, %s5013_s24, %s5014_s25  }
  0x17   :  { %s5015_s28 = smov [#allocation9]   ;;  %s4894_s12 = scalar_lea.hbm %s5724_s3, 4096 }
  0x18   :  { %s59_s29 = sshll.u32 %s5015_s28, 4  ;;  %p4895_p8 = scmp.ne.s32.totalorder %s5724_s3, %s4894_s12  ;;  %s60_s29 = int_to_ptr.vmem [resolvable:$true] %s59_s29 }
  0x19   :  { %p4898_p9 = scmp.lt.u32.totalorder %s4894_s12, %s5724_s3 }
  0x1b   :  { %p4900_p10 = pnand %p4898_p9, %p4895_p8 }
  0x1d   :  { %4903 = shalt.err (!%p4900_p10)
}
  0x1e   :  { %s4904_s18 = scalar_lea.vmem %s60_s29, 4096  ;;  %p4909_p12 = scmp.lt.s32.totalorder %s60_s29, %s60_s29 }
  0x1f   :  { %p4905_p11 = scmp.ne.s32.totalorder %s60_s29, %s4904_s18  ;;  %p4910_p13 = scmp.lt.s32.totalorder %s4904_s18, %s4904_s18 }
  0x21   :  { %p4911_p0 = por %p4910_p13, %p4909_p12 }
  0x23   :  { %p4912_p1 = pnand %p4911_p0, %p4905_p11 }
  0x25   :  { %4915 = shalt.err (!%p4912_p1)
}
  0x26   :  { %s5016_s1 = smov 128   ;;  %s5017_s16 = smov 8  }
  0x27   :  { %65 = dma.hbm_to_vmem [thread:$0]  %s5724_s3, 4096, %s60_s29, [#allocation10], %s5016_s1, %s5016_s1, %s5017_s16  }
  0x28   :  { %s5018_s21 = smov [#allocation3]   ;;  %s5019_s23 = smov [#allocation8]  }
  0x29   :  { %s28_s22 = sshll.u32 %s5018_s21, 4  ;;  %s50_s8 = sshll.u32 %s5019_s23, 4  ;;  %s29_s22 = int_to_ptr.vmem [resolvable:$true] %s28_s22  ;;  %s51_s8 = int_to_ptr.vmem [resolvable:$true] %s50_s8 }
  0x2a   :  { %s4916_s27 = scalar_lea.hbm %s5721_s0, 128 }
  0x2b   :  { %p4917_p2 = scmp.ne.s32.totalorder %s5721_s0, %s4916_s27  ;;  %p4920_p3 = scmp.lt.u32.totalorder %s4916_s27, %s5721_s0 }
  0x2d   :  { %p4922_p4 = pnand %p4920_p3, %p4917_p2 }
  0x2f   :  { %4925 = shalt.err (!%p4922_p4)
}
  0x30   :  { %s4926_s3 = scalar_lea.vmem %s29_s22, 128  ;;  %p4931_p6 = scmp.lt.s32.totalorder %s29_s22, %s29_s22 }
  0x31   :  { %p4927_p5 = scmp.ne.s32.totalorder %s29_s22, %s4926_s3  ;;  %p4932_p7 = scmp.lt.s32.totalorder %s4926_s3, %s4926_s3 }
  0x33   :  { %p4933_p8 = por %p4932_p7, %p4931_p6 }
  0x35   :  { %p4934_p9 = pnand %p4933_p8, %p4927_p5 }
  0x37   :  { %4937 = shalt.err (!%p4934_p9)
}
  0x38   :  { %31 = dma.hbm_to_vmem [thread:$0]  %s5721_s0, 128, %s29_s22, [#allocation4]  }
  0x39   :  { %s4938_s17 = scalar_lea.hbm %s5723_s2, 256 }
  0x3a   :  { %p4939_p10 = scmp.ne.s32.totalorder %s5723_s2, %s4938_s17  ;;  %p4942_p11 = scmp.lt.u32.totalorder %s4938_s17, %s5723_s2 }
  0x3c   :  { %p4944_p12 = pnand %p4942_p11, %p4939_p10 }
  0x3e   :  { %4947 = shalt.err (!%p4944_p12)
}
  0x3f   :  { %s4948_s20 = scalar_lea.vmem %s51_s8, 256  ;;  %p4953_p0 = scmp.lt.s32.totalorder %s51_s8, %s51_s8 }
  0x40   :  { %p4949_p13 = scmp.ne.s32.totalorder %s51_s8, %s4948_s20  ;;  %p4954_p1 = scmp.lt.s32.totalorder %s4948_s20, %s4948_s20 }
  0x42   :  { %p4955_p2 = por %p4954_p1, %p4953_p0 }
  0x44   :  { %p4956_p3 = pnand %p4955_p2, %p4949_p13 }
  0x46   :  { %4959 = shalt.err (!%p4956_p3)
}
  0x47   :  { %53 = dma.hbm_to_vmem [thread:$0]  %s5723_s2, 256, %s51_s8, [#allocation7]  }
  0x48   :  { %s5020_s22 = smov [#allocation11]   ;;  %s4960_s27 = scalar_lea.hbm %s5726_s5, 16384 }
  0x49   :  { %s73_s23 = sshll.u32 %s5020_s22, 4  ;;  %p4961_p4 = scmp.ne.s32.totalorder %s5726_s5, %s4960_s27  ;;  %s74_s23 = int_to_ptr.vmem [resolvable:$true] %s73_s23 }
  0x4a   :  { %p4964_p5 = scmp.lt.u32.totalorder %s4960_s27, %s5726_s5 }
  0x4c   :  { %p4966_p6 = pnand %p4964_p5, %p4961_p4 }
  0x4e   :  { %4969 = shalt.err (!%p4966_p6)
}
  0x4f   :  { %s4970_s3 = scalar_lea.vmem %s74_s23, 16384  ;;  %p4975_p8 = scmp.lt.s32.totalorder %s74_s23, %s74_s23 }
  0x50   :  { %p4971_p7 = scmp.ne.s32.totalorder %s74_s23, %s4970_s3  ;;  %p4976_p9 = scmp.lt.s32.totalorder %s4970_s3, %s4970_s3 }
  0x52   :  { %p4977_p10 = por %p4976_p9, %p4975_p8 }
  0x54   :  { %p4978_p11 = pnand %p4977_p10, %p4971_p7 }
  0x56   :  { %4981 = shalt.err (!%p4978_p11)
}
  0x57   :  { %s5021_s2 = smov 4  }
  0x58   :  { %79 = dma.hbm_to_vmem [thread:$0]  %s5726_s5, 16384, %s74_s23, [#allocation10], %s5014_s25, %s5014_s25, %s5021_s2  }
  0x59   :  { %5004 = dma.done.wait [#allocation4], 128  }
  0x5a   :  { %5005 = vsyncadd [#allocation4], 4294967168 }
  0x5b   :  { %5006 = dma.done.wait [#allocation7], 33024  }
  0x5c   :  { %5007 = vsyncadd [#allocation7], 4294934272 }
  0x5d   :  { %5008 = dma.done.wait [#allocation10], 20480  }
  0x5e   :  { %5009 = vsyncadd [#allocation10], 4294946816  ;;  %v108_v1 = vld [vmem:[#allocation6] sm:$0xff]  ;;  %v5144_v18 = vld [vmem:[#allocation3] sm:$0xff]  ;;  %vm4021_vm0 = vcmask 1043456   ;;  %s5022_s15 = smov [#allocation12]  }
  0x5f   :  { %v116_v2 = vld [vmem:[#allocation6 + $0x40] sm:$0xff]  ;;  %v104_v19 = vcombine.high %v5144_v18, %v5144_v18  ;;  %s4041_s17 = sshll.u32 %s5022_s15, 4  ;;  %s4042_s17 = int_to_ptr.vmem [resolvable:$true] %s4041_s17 }
  0x60   :  { %v124_v3 = vld [vmem:[#allocation6 + $0x80] sm:$0xff]  ;;  %v4057_v4 = vcombine.high %v108_v1, %v116_v2  ;;  %v4056_v5 = vcombine.low %v108_v1, %v116_v2  ;;  %v110_v2 = vld [vmem:[#allocation6 + $0x10] sm:$0xff]  ;;  %s4982_s18 = scalar_lea.vmem %s4042_s17, 64  ;;  %p4987_p13 = scmp.lt.s32.totalorder %s4042_s17, %s4042_s17 }
  0x61   :  { %v132_v6 = vld [vmem:[#allocation6 + $0xc0] sm:$0xff]  ;;  %v5148_v22 = vpack.c.bf16 %v104_v19, %v104_v19  ;;  %p4983_p12 = scmp.ne.s32.totalorder %s4042_s17, %s4982_s18  ;;  %p4988_p0 = scmp.lt.s32.totalorder %s4982_s18, %s4982_s18 }
  0x62   :  { %v4073_v7 = vcombine.high %v124_v3, %v132_v6  ;;  %v140_v8 = vld [vmem:[#allocation6 + $0x100] sm:$0xff]  ;;  %1728 = vmatprep.subr.bf16.mxu0 %v4057_v4  ;;  %v4072_v10 = vcombine.low %v124_v3, %v132_v6  ;;  %v118_v3 = vld [vmem:[#allocation6 + $0x50] sm:$0xff] }
  0x63   :  { %v148_v9 = vld [vmem:[#allocation6 + $0x140] sm:$0xff]  ;;  %1729 = vmatpush1.bf16.msra.mxu0 %v4056_v5  ;;  %1760 = vmatprep.mubr.bf16.mxu0 %v5148_v22  ;;  %v126_v6 = vld [vmem:[#allocation6 + $0x90] sm:$0xff]  ;;  %p4989_p1 = por %p4988_p0, %p4987_p13 }
  0x64   :  { %1730 = vmatprep.subr.bf16.mxu0 %v4073_v7  ;;  %v4089_v11 = vcombine.high %v140_v8, %v148_v9  ;;  %v156_v12 = vld [vmem:[#allocation6 + $0x180] sm:$0xff]  ;;  %v4088_v14 = vcombine.low %v140_v8, %v148_v9  ;;  %1801 = vmatprep.mubr.bf16.mxu1 %v5148_v22  ;;  %v134_v7 = vld [vmem:[#allocation6 + $0xd0] sm:$0xff]  ;;  %v4061_v8 = vcombine.high %v110_v2, %v118_v3 }
  0x65   :  { %v164_v13 = vld [vmem:[#allocation6 + $0x1c0] sm:$0xff]  ;;  %v5154_v9 = vpack.c.bf16 %v5144_v18, %v5144_v18  ;;  %v174_v18 = vld [vmem:[#allocation6 + $0x210] sm:$0xff]  ;;  %p4990_p2 = pnand %p4989_p1, %p4983_p12 }
  0x66   :  { %v4105_v15 = vcombine.high %v156_v12, %v164_v13  ;;  %v172_v16 = vld [vmem:[#allocation6 + $0x200] sm:$0xff]  ;;  %v4104_v20 = vcombine.low %v156_v12, %v164_v13  ;;  %v150_v12 = vld [vmem:[#allocation6 + $0x150] sm:$0xff]  ;;  %v4077_v13 = vcombine.high %v126_v6, %v134_v7 }
  0x67   :  { %1731 = vmatpush1.bf16.msra.mxu0 %v4072_v10  ;;  %v180_v17 = vld [vmem:[#allocation6 + $0x240] sm:$0xff]  ;;  %v4060_v10 = vcombine.low %v110_v2, %v118_v3 }
  0x68   :  { %1732 = vmatprep.subr.bf16.mxu0 %v4089_v11  ;;  %v4121_v21 = vcombine.high %v172_v16, %v180_v17  ;;  %v188_v23 = vld [vmem:[#allocation6 + $0x280] sm:$0xff]  ;;  %v4120_v25 = vcombine.low %v172_v16, %v180_v17  ;;  %v142_v11 = vld [vmem:[#allocation6 + $0x110] sm:$0xff] }
  0x69   :  { %v196_v24 = vld [vmem:[#allocation6 + $0x2c0] sm:$0xff]  ;;  %v166_v16 = vld [vmem:[#allocation6 + $0x1d0] sm:$0xff]  ;;  %v4093_v17 = vcombine.high %v142_v11, %v150_v12  ;;  %v4092_v19 = vcombine.low %v142_v11, %v150_v12 }
  0x6a   :  { %v4137_v26 = vcombine.high %v188_v23, %v196_v24  ;;  %v204_v27 = vld [vmem:[#allocation6 + $0x300] sm:$0xff]  ;;  %v4136_v29 = vcombine.low %v188_v23, %v196_v24  ;;  %v190_v24 = vld [vmem:[#allocation6 + $0x290] sm:$0xff] }
  0x6b   :  { %1733 = vmatpush1.bf16.msra.mxu0 %v4088_v14  ;;  %v212_v28 = vld [vmem:[#allocation6 + $0x340] sm:$0xff]  ;;  %v4076_v14 = vcombine.low %v126_v6, %v134_v7  ;;  %v109_v7 = vld [vmem:[#allocation6 + $0x8] sm:$0xff] }
  0x6c   :  { %1734 = vmatprep.subr.bf16.mxu0 %v4105_v15  ;;  %v4153_v30 = vcombine.high %v204_v27, %v212_v28  ;;  %v220_v31 = vld [vmem:[#allocation6 + $0x380] sm:$0xff]  ;;  %v4152_v33 = vcombine.low %v204_v27, %v212_v28  ;;  %v158_v15 = vld [vmem:[#allocation6 + $0x190] sm:$0xff] }
  0x6d   :  { %v228_v32 = vld [vmem:[#allocation6 + $0x3c0] sm:$0xff]  ;;  %v4108_v23 = vcombine.low %v158_v15, %v166_v16  ;;  %v206_v28 = vld [vmem:[#allocation6 + $0x310] sm:$0xff] }
  0x6e   :  { %v4169_v34 = vcombine.high %v220_v31, %v228_v32  ;;  %v236_v35 = vld [vmem:[#allocation6 + $0x400] sm:$0xff]  ;;  %v4168_v37 = vcombine.low %v220_v31, %v228_v32  ;;  %v222_v32 = vld [vmem:[#allocation6 + $0x390] sm:$0xff] }
  0x6f   :  { %1735 = vmatpush1.bf16.msra.mxu0 %v4104_v20  ;;  %v244_v36 = vld [vmem:[#allocation6 + $0x440] sm:$0xff]  ;;  %v182_v20 = vld [vmem:[#allocation6 + $0x250] sm:$0xff] }
  0x70   :  { %1736 = vmatprep.subr.bf16.mxu0 %v4121_v21  ;;  %v252_v38 = vld [vmem:[#allocation6 + $0x480] sm:$0xff]  ;;  %v4185_v40 = vcombine.high %v236_v35, %v244_v36  ;;  %v4184_v41 = vcombine.low %v236_v35, %v244_v36  ;;  %v4109_v21 = vcombine.high %v158_v15, %v166_v16  ;;  %v4124_v27 = vcombine.low %v174_v18, %v182_v20  ;;  %v238_v36 = vld [vmem:[#allocation6 + $0x410] sm:$0xff]  ;;  %v125_v16 = vld [vmem:[#allocation6 + $0x88] sm:$0xff] }
  0x71   :  { %v260_v39 = vld [vmem:[#allocation6 + $0x4c0] sm:$0xff] }
  0x72   :  { %v268_v42 = vld [vmem:[#allocation6 + $0x500] sm:$0xff]  ;;  %v4201_v44 = vcombine.high %v252_v38, %v260_v39  ;;  %v4200_v45 = vcombine.low %v252_v38, %v260_v39 }
  0x73   :  { %1737 = vmatpush1.bf16.msra.mxu0 %v4120_v25  ;;  %v276_v43 = vld [vmem:[#allocation6 + $0x540] sm:$0xff]  ;;  %v198_v25 = vld [vmem:[#allocation6 + $0x2d0] sm:$0xff] }
  0x74   :  { %1738 = vmatprep.subr.bf16.mxu0 %v4137_v26  ;;  %v284_v46 = vld [vmem:[#allocation6 + $0x580] sm:$0xff]  ;;  %v4217_v48 = vcombine.high %v268_v42, %v276_v43  ;;  %v4216_v49 = vcombine.low %v268_v42, %v276_v43  ;;  %v4125_v26 = vcombine.high %v174_v18, %v182_v20  ;;  %v4140_v31 = vcombine.low %v190_v24, %v198_v25 }
  0x75   :  { %v292_v47 = vld [vmem:[#allocation6 + $0x5c0] sm:$0xff] }
  0x76   :  { %v300_v50 = vld [vmem:[#allocation6 + $0x600] sm:$0xff]  ;;  %v4233_v52 = vcombine.high %v284_v46, %v292_v47  ;;  %v4232_v53 = vcombine.low %v284_v46, %v292_v47 }
  0x77   :  { %1739 = vmatpush1.bf16.msra.mxu0 %v4136_v29  ;;  %v308_v51 = vld [vmem:[#allocation6 + $0x640] sm:$0xff]  ;;  %v214_v29 = vld [vmem:[#allocation6 + $0x350] sm:$0xff] }
  0x78   :  { %1740 = vmatprep.subr.bf16.mxu0 %v4153_v30  ;;  %v316_v54 = vld [vmem:[#allocation6 + $0x680] sm:$0xff]  ;;  %v4249_v56 = vcombine.high %v300_v50, %v308_v51  ;;  %v4248_v57 = vcombine.low %v300_v50, %v308_v51  ;;  %v4141_v30 = vcombine.high %v190_v24, %v198_v25  ;;  %v4156_v35 = vcombine.low %v206_v28, %v214_v29  ;;  %v141_v24 = vld [vmem:[#allocation6 + $0x108] sm:$0xff] }
  0x79   :  { %v324_v55 = vld [vmem:[#allocation6 + $0x6c0] sm:$0xff]  ;;  %v149_v25 = vld [vmem:[#allocation6 + $0x148] sm:$0xff] }
  0x7a   :  { %v332_v58 = vld [vmem:[#allocation6 + $0x700] sm:$0xff]  ;;  %v4265_v60 = vcombine.high %v316_v54, %v324_v55  ;;  %v4264_v61 = vcombine.low %v316_v54, %v324_v55 }
  0x7b   :  { %1741 = vmatpush1.bf16.msra.mxu0 %v4152_v33  ;;  %v340_v59 = vld [vmem:[#allocation6 + $0x740] sm:$0xff]  ;;  %v230_v33 = vld [vmem:[#allocation6 + $0x3d0] sm:$0xff] }
  0x7c   :  { %1742 = vmatprep.subr.bf16.mxu0 %v4169_v34  ;;  %v348_v62 = vld [vmem:[#allocation6 + $0x780] sm:$0xff]  ;;  %v4281_v0 = vcombine.high %v332_v58, %v340_v59  ;;  %v4280_v1 = vcombine.low %v332_v58, %v340_v59  ;;  %v4157_v34 = vcombine.high %v206_v28, %v214_v29  ;;  %v4173_v38 = vcombine.high %v222_v32, %v230_v33 }
  0x7d   :  { %v356_v63 = vld [vmem:[#allocation6 + $0x7c0] sm:$0xff]  ;;  %v4172_v39 = vcombine.low %v222_v32, %v230_v33  ;;  %v4090_v28 = vcombine.low %v141_v24, %v149_v25  ;;  %v157_v33 = vld [vmem:[#allocation6 + $0x188] sm:$0xff] }
  0x7e   :  { %v4297_v4 = vcombine.high %v348_v62, %v356_v63  ;;  %v4296_v5 = vcombine.low %v348_v62, %v356_v63  ;;  %v168_v32 = vld [vmem:[#allocation6 + $0x1e0] sm:$0xff] }
  0x7f   :  { %1743 = vmatpush1.bf16.msra.mxu0 %v4168_v37  ;;  %v246_v37 = vld [vmem:[#allocation6 + $0x450] sm:$0xff] }
  0x80   :  { %1744 = vmatprep.subr.bf16.mxu0 %v4185_v40  ;;  %v254_v40 = vld [vmem:[#allocation6 + $0x490] sm:$0xff]  ;;  %v4189_v42 = vcombine.high %v238_v36, %v246_v37  ;;  %v4188_v43 = vcombine.low %v238_v36, %v246_v37 }
  0x83   :  { %1745 = vmatpush1.bf16.msra.mxu0 %v4184_v41  ;;  %v262_v41 = vld [vmem:[#allocation6 + $0x4d0] sm:$0xff] }
  0x84   :  { %1746 = vmatprep.subr.bf16.mxu0 %v4201_v44  ;;  %v270_v44 = vld [vmem:[#allocation6 + $0x510] sm:$0xff]  ;;  %v4205_v46 = vcombine.high %v254_v40, %v262_v41  ;;  %v4204_v47 = vcombine.low %v254_v40, %v262_v41  ;;  %v184_v40 = vld [vmem:[#allocation6 + $0x260] sm:$0xff]  ;;  %v173_v41 = vld [vmem:[#allocation6 + $0x208] sm:$0xff] }
  0x87   :  { %1747 = vmatpush1.bf16.msra.mxu0 %v4200_v45  ;;  %v278_v45 = vld [vmem:[#allocation6 + $0x550] sm:$0xff] }
  0x88   :  { %1748 = vmatprep.subr.bf16.mxu0 %v4217_v48  ;;  %v286_v48 = vld [vmem:[#allocation6 + $0x590] sm:$0xff]  ;;  %v4221_v50 = vcombine.high %v270_v44, %v278_v45  ;;  %v4220_v51 = vcombine.low %v270_v44, %v278_v45 }
  0x8b   :  { %1749 = vmatpush1.bf16.msra.mxu0 %v4216_v49  ;;  %v294_v49 = vld [vmem:[#allocation6 + $0x5d0] sm:$0xff] }
  0x8c   :  { %1750 = vmatprep.subr.bf16.mxu0 %v4233_v52  ;;  %v302_v52 = vld [vmem:[#allocation6 + $0x610] sm:$0xff]  ;;  %v4237_v54 = vcombine.high %v286_v48, %v294_v49  ;;  %v4236_v55 = vcombine.low %v286_v48, %v294_v49  ;;  %v200_v48 = vld [vmem:[#allocation6 + $0x2e0] sm:$0xff]  ;;  %v189_v49 = vld [vmem:[#allocation6 + $0x288] sm:$0xff] }
  0x8f   :  { %1751 = vmatpush1.bf16.msra.mxu0 %v4232_v53  ;;  %v310_v53 = vld [vmem:[#allocation6 + $0x650] sm:$0xff] }
  0x90   :  { %1752 = vmatprep.subr.bf16.mxu0 %v4249_v56  ;;  %v318_v56 = vld [vmem:[#allocation6 + $0x690] sm:$0xff]  ;;  %v4253_v58 = vcombine.high %v302_v52, %v310_v53  ;;  %v4252_v59 = vcombine.low %v302_v52, %v310_v53 }
  0x93   :  { %1753 = vmatpush1.bf16.msra.mxu0 %v4248_v57  ;;  %v326_v57 = vld [vmem:[#allocation6 + $0x6d0] sm:$0xff] }
  0x94   :  { %1754 = vmatprep.subr.bf16.mxu0 %v4265_v60  ;;  %v334_v60 = vld [vmem:[#allocation6 + $0x710] sm:$0xff]  ;;  %v4269_v62 = vcombine.high %v318_v56, %v326_v57  ;;  %v4268_v63 = vcombine.low %v318_v56, %v326_v57  ;;  %v205_v56 = vld [vmem:[#allocation6 + $0x308] sm:$0xff] }
  0x95   :  { %v213_v57 = vld [vmem:[#allocation6 + $0x348] sm:$0xff] }
  0x97   :  { %1755 = vmatpush1.bf16.msra.mxu0 %v4264_v61  ;;  %v342_v61 = vld [vmem:[#allocation6 + $0x750] sm:$0xff] }
  0x98   :  { %1756 = vmatprep.subr.bf16.mxu0 %v4281_v0  ;;  %v350_v0 = vld [vmem:[#allocation6 + $0x790] sm:$0xff]  ;;  %v4285_v2 = vcombine.high %v334_v60, %v342_v61  ;;  %v4284_v3 = vcombine.low %v334_v60, %v342_v61  ;;  %v4154_v60 = vcombine.low %v205_v56, %v213_v57 }
  0x9b   :  { %1757 = vmatpush1.bf16.msra.mxu0 %v4280_v1  ;;  %v358_v1 = vld [vmem:[#allocation6 + $0x7d0] sm:$0xff] }
  0x9c   :  { %1758 = vmatprep.subr.bf16.mxu0 %v4297_v4  ;;  %v112_v4 = vld [vmem:[#allocation6 + $0x20] sm:$0xff]  ;;  %v4301_v6 = vcombine.high %v350_v0, %v358_v1  ;;  %v4300_v12 = vcombine.low %v350_v0, %v358_v1  ;;  %v229_v0 = vld [vmem:[#allocation6 + $0x3c8] sm:$0xff] }
  0x9d   :  { %v224_v1 = vld [vmem:[#allocation6 + $0x3a0] sm:$0xff] }
  0x9f   :  { %1759 = vmatpush1.bf16.msra.mxu0 %v4296_v5  ;;  %v120_v5 = vld [vmem:[#allocation6 + $0x60] sm:$0xff] }
  0xa0   :  { %1810 = vmatprep.subr.bf16.mxu0 %v4061_v8  ;;  %v117_v8 = vld [vmem:[#allocation6 + $0x48] sm:$0xff]  ;;  %v4065_v15 = vcombine.high %v112_v4, %v120_v5  ;;  %v4064_v20 = vcombine.low %v112_v4, %v120_v5 }
  0xa1   :  { %v4058_v11 = vcombine.low %v109_v7, %v117_v8 }
  0xa2   :  { %1761 = vmatmul.mubr.bf16.vlgmr.msra.gmra.mrb[0].mxu0 %v5154_v9 }
  0xa3   :  { %1811 = vmatpush1.bf16.msra.mxu0 %v4060_v10  ;;  %1842 = vmatprep.mubr.bf16.mxu0 %v5148_v22  ;;  %v4059_v10 = vcombine.high %v109_v7, %v117_v8  ;;  %v237_v7 = vld [vmem:[#allocation6 + $0x408] sm:$0xff]  ;;  %v240_v8 = vld [vmem:[#allocation6 + $0x420] sm:$0xff] }
  0xa4   :  { %1812 = vmatprep.subr.bf16.mxu0 %v4077_v13  ;;  %v128_v13 = vld [vmem:[#allocation6 + $0xa0] sm:$0xff] }
  0xa5   :  { %1769 = vmatprep.subr.bf16.mxu1 %v4059_v10  ;;  %v248_v10 = vld [vmem:[#allocation6 + $0x460] sm:$0xff] }
  0xa6   :  { %1770 = vmatpush1.bf16.msra.mxu1 %v4058_v11  ;;  %v245_v11 = vld [vmem:[#allocation6 + $0x448] sm:$0xff] }
  0xa7   :  { %1813 = vmatpush1.bf16.msra.mxu0 %v4076_v14  ;;  %v136_v14 = vld [vmem:[#allocation6 + $0xe0] sm:$0xff] }
  0xa8   :  { %1814 = vmatprep.subr.bf16.mxu0 %v4093_v17  ;;  %v133_v17 = vld [vmem:[#allocation6 + $0xc8] sm:$0xff]  ;;  %v4080_v29 = vcombine.low %v128_v13, %v136_v14 }
  0xa9   :  { %v4074_v18 = vcombine.low %v125_v16, %v133_v17 }
  0xab   :  { %1815 = vmatpush1.bf16.msra.mxu0 %v4092_v19  ;;  %v4075_v19 = vcombine.high %v125_v16, %v133_v17  ;;  %v253_v16 = vld [vmem:[#allocation6 + $0x488] sm:$0xff] }
  0xac   :  { %1816 = vmatprep.subr.bf16.mxu0 %v4109_v21  ;;  %v4081_v21 = vcombine.high %v128_v13, %v136_v14  ;;  %v4186_v13 = vcombine.low %v237_v7, %v245_v11  ;;  %v261_v17 = vld [vmem:[#allocation6 + $0x4c8] sm:$0xff] }
  0xad   :  { %1771 = vmatprep.subr.bf16.mxu1 %v4075_v19  ;;  %v256_v19 = vld [vmem:[#allocation6 + $0x4a0] sm:$0xff] }
  0xae   :  { %1772 = vmatpush1.bf16.msra.mxu1 %v4074_v18  ;;  %v264_v18 = vld [vmem:[#allocation6 + $0x4e0] sm:$0xff] }
  0xaf   :  { %1817 = vmatpush1.bf16.msra.mxu0 %v4108_v23  ;;  %v144_v23 = vld [vmem:[#allocation6 + $0x120] sm:$0xff] }
  0xb0   :  { %1818 = vmatprep.subr.bf16.mxu0 %v4125_v26  ;;  %v152_v26 = vld [vmem:[#allocation6 + $0x160] sm:$0xff] }
  0xb1   :  { %v4096_v37 = vcombine.low %v144_v23, %v152_v26 }
  0xb3   :  { %1819 = vmatpush1.bf16.msra.mxu0 %v4124_v27  ;;  %v4091_v27 = vcombine.high %v141_v24, %v149_v25  ;;  %v4209_v24 = vcombine.high %v256_v19, %v264_v18  ;;  %v269_v25 = vld [vmem:[#allocation6 + $0x508] sm:$0xff] }
  0xb4   :  { %1820 = vmatprep.subr.bf16.mxu0 %v4141_v30  ;;  %v160_v30 = vld [vmem:[#allocation6 + $0x1a0] sm:$0xff] }
  0xb5   :  { %1773 = vmatprep.subr.bf16.mxu1 %v4091_v27  ;;  %v4112_v45 = vcombine.low %v160_v30, %v168_v32  ;;  %v272_v27 = vld [vmem:[#allocation6 + $0x520] sm:$0xff] }
  0xb6   :  { %1774 = vmatpush1.bf16.msra.mxu1 %v4090_v28  ;;  %v280_v28 = vld [vmem:[#allocation6 + $0x560] sm:$0xff] }
  0xb7   :  { %1821 = vmatpush1.bf16.msra.mxu0 %v4140_v31  ;;  %v4097_v31 = vcombine.high %v144_v23, %v152_v26  ;;  %v4192_v23 = vcombine.low %v240_v8, %v248_v10  ;;  %v277_v26 = vld [vmem:[#allocation6 + $0x548] sm:$0xff] }
  0xb8   :  { %1822 = vmatprep.subr.bf16.mxu0 %v4157_v34  ;;  %v165_v34 = vld [vmem:[#allocation6 + $0x1c8] sm:$0xff] }
  0xb9   :  { %v4106_v36 = vcombine.low %v157_v33, %v165_v34 }
  0xbb   :  { %1823 = vmatpush1.bf16.msra.mxu0 %v4156_v35  ;;  %v4107_v35 = vcombine.high %v157_v33, %v165_v34  ;;  %v285_v33 = vld [vmem:[#allocation6 + $0x588] sm:$0xff] }
  0xbc   :  { %1824 = vmatprep.subr.bf16.mxu0 %v4173_v38  ;;  %v176_v38 = vld [vmem:[#allocation6 + $0x220] sm:$0xff]  ;;  %v293_v34 = vld [vmem:[#allocation6 + $0x5c8] sm:$0xff] }
  0xbd   :  { %1775 = vmatprep.subr.bf16.mxu1 %v4107_v35  ;;  %v4128_v53 = vcombine.low %v176_v38, %v184_v40  ;;  %v288_v35 = vld [vmem:[#allocation6 + $0x5a0] sm:$0xff] }
  0xbe   :  { %1776 = vmatpush1.bf16.msra.mxu1 %v4106_v36  ;;  %v296_v36 = vld [vmem:[#allocation6 + $0x5e0] sm:$0xff] }
  0xbf   :  { %1825 = vmatpush1.bf16.msra.mxu0 %v4172_v39  ;;  %v4113_v39 = vcombine.high %v160_v30, %v168_v32  ;;  %v4218_v30 = vcombine.low %v269_v25, %v277_v26  ;;  %v4225_v32 = vcombine.high %v272_v27, %v280_v28 }
  0xc0   :  { %1826 = vmatprep.subr.bf16.mxu0 %v4189_v42  ;;  %v181_v42 = vld [vmem:[#allocation6 + $0x248] sm:$0xff] }
  0xc1   :  { %v4122_v44 = vcombine.low %v173_v41, %v181_v42 }
  0xc3   :  { %1827 = vmatpush1.bf16.msra.mxu0 %v4188_v43  ;;  %v4123_v43 = vcombine.high %v173_v41, %v181_v42  ;;  %v301_v41 = vld [vmem:[#allocation6 + $0x608] sm:$0xff] }
  0xc4   :  { %1828 = vmatprep.subr.bf16.mxu0 %v4205_v46  ;;  %v192_v46 = vld [vmem:[#allocation6 + $0x2a0] sm:$0xff]  ;;  %v309_v42 = vld [vmem:[#allocation6 + $0x648] sm:$0xff] }
  0xc5   :  { %1777 = vmatprep.subr.bf16.mxu1 %v4123_v43  ;;  %v4144_v61 = vcombine.low %v192_v46, %v200_v48  ;;  %v304_v43 = vld [vmem:[#allocation6 + $0x620] sm:$0xff] }
  0xc6   :  { %1778 = vmatpush1.bf16.msra.mxu1 %v4122_v44  ;;  %v312_v44 = vld [vmem:[#allocation6 + $0x660] sm:$0xff] }
  0xc7   :  { %1829 = vmatpush1.bf16.msra.mxu0 %v4204_v47  ;;  %v4129_v47 = vcombine.high %v176_v38, %v184_v40  ;;  %v4234_v38 = vcombine.low %v285_v33, %v293_v34  ;;  %v4241_v40 = vcombine.high %v288_v35, %v296_v36 }
  0xc8   :  { %1830 = vmatprep.subr.bf16.mxu0 %v4221_v50  ;;  %v197_v50 = vld [vmem:[#allocation6 + $0x2c8] sm:$0xff] }
  0xc9   :  { %v4138_v52 = vcombine.low %v189_v49, %v197_v50 }
  0xcb   :  { %1831 = vmatpush1.bf16.msra.mxu0 %v4220_v51  ;;  %v4139_v51 = vcombine.high %v189_v49, %v197_v50  ;;  %v317_v49 = vld [vmem:[#allocation6 + $0x688] sm:$0xff] }
  0xcc   :  { %1832 = vmatprep.subr.bf16.mxu0 %v4237_v54  ;;  %v4145_v54 = vcombine.high %v192_v46, %v200_v48  ;;  %v4250_v46 = vcombine.low %v301_v41, %v309_v42  ;;  %v4257_v48 = vcombine.high %v304_v43, %v312_v44  ;;  %v325_v50 = vld [vmem:[#allocation6 + $0x6c8] sm:$0xff] }
  0xcd   :  { %1779 = vmatprep.subr.bf16.mxu1 %v4139_v51  ;;  %v320_v51 = vld [vmem:[#allocation6 + $0x6a0] sm:$0xff] }
  0xce   :  { %1780 = vmatpush1.bf16.msra.mxu1 %v4138_v52  ;;  %v328_v52 = vld [vmem:[#allocation6 + $0x6e0] sm:$0xff] }
  0xcf   :  { %1833 = vmatpush1.bf16.msra.mxu0 %v4236_v55  ;;  %v208_v55 = vld [vmem:[#allocation6 + $0x320] sm:$0xff] }
  0xd0   :  { %1834 = vmatprep.subr.bf16.mxu0 %v4253_v58  ;;  %v216_v58 = vld [vmem:[#allocation6 + $0x360] sm:$0xff] }
  0xd1   :  { %v4160_v5 = vcombine.low %v208_v55, %v216_v58 }
  0xd3   :  { %1835 = vmatpush1.bf16.msra.mxu0 %v4252_v59  ;;  %v4155_v59 = vcombine.high %v205_v56, %v213_v57  ;;  %v4273_v56 = vcombine.high %v320_v51, %v328_v52  ;;  %v333_v57 = vld [vmem:[#allocation6 + $0x708] sm:$0xff] }
  0xd4   :  { %1836 = vmatprep.subr.bf16.mxu0 %v4269_v62  ;;  %v4161_v62 = vcombine.high %v208_v55, %v216_v58  ;;  %v4256_v55 = vcombine.low %v304_v43, %v312_v44  ;;  %v341_v58 = vld [vmem:[#allocation6 + $0x748] sm:$0xff] }
  0xd5   :  { %1781 = vmatprep.subr.bf16.mxu1 %v4155_v59  ;;  %v336_v59 = vld [vmem:[#allocation6 + $0x720] sm:$0xff] }
  0xd6   :  { %1782 = vmatpush1.bf16.msra.mxu1 %v4154_v60  ;;  %v344_v60 = vld [vmem:[#allocation6 + $0x760] sm:$0xff] }
  0xd7   :  { %1837 = vmatpush1.bf16.msra.mxu0 %v4268_v63  ;;  %v221_v63 = vld [vmem:[#allocation6 + $0x388] sm:$0xff] }
  0xd8   :  { %1838 = vmatprep.subr.bf16.mxu0 %v4285_v2  ;;  %v232_v2 = vld [vmem:[#allocation6 + $0x3e0] sm:$0xff]  ;;  %v4170_v4 = vcombine.low %v221_v63, %v229_v0 }
  0xd9   :  { %v4176_v14 = vcombine.low %v224_v1, %v232_v2 }
  0xdb   :  { %1839 = vmatpush1.bf16.msra.mxu0 %v4284_v3  ;;  %v4171_v3 = vcombine.high %v221_v63, %v229_v0  ;;  %v4272_v63 = vcombine.low %v320_v51, %v328_v52  ;;  %v4289_v0 = vcombine.high %v336_v59, %v344_v60 }
  0xdc   :  { %1840 = vmatprep.subr.bf16.mxu0 %v4301_v6  ;;  %v4177_v6 = vcombine.high %v224_v1, %v232_v2  ;;  %v349_v1 = vld [vmem:[#allocation6 + $0x788] sm:$0xff] }
  0xdd   :  { %1783 = vmatprep.subr.bf16.mxu1 %v4171_v3  ;;  %v357_v2 = vld [vmem:[#allocation6 + $0x7c8] sm:$0xff]  ;;  %v352_v3 = vld [vmem:[#allocation6 + $0x7a0] sm:$0xff] }
  0xde   :  { %1784 = vmatpush1.bf16.msra.mxu1 %v4170_v4  ;;  %v360_v4 = vld [vmem:[#allocation6 + $0x7e0] sm:$0xff] }
  0xdf   :  { %1841 = vmatpush1.bf16.msra.mxu0 %v4300_v12  ;;  %v4187_v12 = vcombine.high %v237_v7, %v245_v11  ;;  %v4288_v7 = vcombine.low %v336_v59, %v344_v60  ;;  %v119_v11 = vld [vmem:[#allocation6 + $0x58] sm:$0xff] }
  0xe0   :  { %1892 = vmatprep.subr.bf16.mxu0 %v4065_v15  ;;  %v4193_v15 = vcombine.high %v240_v8, %v248_v10  ;;  %v4305_v8 = vcombine.high %v352_v3, %v360_v4  ;;  %v111_v10 = vld [vmem:[#allocation6 + $0x18] sm:$0xff] }
  0xe1   :  { %1785 = vmatprep.subr.bf16.mxu1 %v4187_v12  ;;  %v114_v12 = vld [vmem:[#allocation6 + $0x30] sm:$0xff] }
  0xe2   :  { %1843 = vmatmul.mubr.bf16.vlgmr.msra.gmra.mrb[4].mxu0 %v5154_v9  ;;  %1786 = vmatpush1.bf16.msra.mxu1 %v4186_v13  ;;  %v122_v13 = vld [vmem:[#allocation6 + $0x70] sm:$0xff] }
  0xe3   :  { %1893 = vmatpush1.bf16.msra.mxu0 %v4064_v20  ;;  %1924 = vmatprep.mubr.bf16.mxu0 %v5148_v22  ;;  %v4203_v20 = vcombine.high %v253_v16, %v261_v17 }
  0xe4   :  { %1894 = vmatprep.subr.bf16.mxu0 %v4081_v21  ;;  %v4202_v21 = vcombine.low %v253_v16, %v261_v17  ;;  %v4304_v16 = vcombine.low %v352_v3, %v360_v4  ;;  %v4069_v17 = vcombine.high %v114_v12, %v122_v13  ;;  %v223_v3 = vld [vmem:[#allocation6 + $0x398] sm:$0xff] }
  0xe5   :  { %1787 = vmatprep.subr.bf16.mxu1 %v4203_v20  ;;  %v130_v20 = vld [vmem:[#allocation6 + $0xb0] sm:$0xff]  ;;  %v231_v4 = vld [vmem:[#allocation6 + $0x3d8] sm:$0xff] }
  0xe6   :  { %1788 = vmatpush1.bf16.msra.mxu1 %v4202_v21  ;;  %v138_v21 = vld [vmem:[#allocation6 + $0xf0] sm:$0xff] }
  0xe7   :  { %1895 = vmatpush1.bf16.msra.mxu0 %v4080_v29  ;;  %v4219_v29 = vcombine.high %v269_v25, %v277_v26  ;;  %v4068_v25 = vcombine.low %v114_v12, %v122_v13  ;;  %v4085_v26 = vcombine.high %v130_v20, %v138_v21  ;;  %v239_v12 = vld [vmem:[#allocation6 + $0x418] sm:$0xff] }
  0xe8   :  { %1896 = vmatprep.subr.bf16.mxu0 %v4097_v31  ;;  %v4208_v31 = vcombine.low %v256_v19, %v264_v18  ;;  %v127_v19 = vld [vmem:[#allocation6 + $0x98] sm:$0xff] }
  0xe9   :  { %1789 = vmatprep.subr.bf16.mxu1 %v4219_v29  ;;  %v135_v18 = vld [vmem:[#allocation6 + $0xd8] sm:$0xff]  ;;  %v146_v29 = vld [vmem:[#allocation6 + $0x130] sm:$0xff] }
  0xea   :  { %1790 = vmatpush1.bf16.msra.mxu1 %v4218_v30  ;;  %v154_v30 = vld [vmem:[#allocation6 + $0x170] sm:$0xff]  ;;  %v247_v13 = vld [vmem:[#allocation6 + $0x458] sm:$0xff] }
  0xeb   :  { %1897 = vmatpush1.bf16.msra.mxu0 %v4096_v37  ;;  %v4235_v37 = vcombine.high %v285_v33, %v293_v34  ;;  %v159_v33 = vld [vmem:[#allocation6 + $0x198] sm:$0xff]  ;;  %v4100_v44 = vcombine.low %v146_v29, %v154_v30 }
  0xec   :  { %1898 = vmatprep.subr.bf16.mxu0 %v4113_v39  ;;  %v4224_v39 = vcombine.low %v272_v27, %v280_v28  ;;  %v143_v27 = vld [vmem:[#allocation6 + $0x118] sm:$0xff] }
  0xed   :  { %1791 = vmatprep.subr.bf16.mxu1 %v4235_v37  ;;  %v151_v28 = vld [vmem:[#allocation6 + $0x158] sm:$0xff] }
  0xee   :  { %1792 = vmatpush1.bf16.msra.mxu1 %v4234_v38  ;;  %v167_v34 = vld [vmem:[#allocation6 + $0x1d8] sm:$0xff] }
  0xef   :  { %1899 = vmatpush1.bf16.msra.mxu0 %v4112_v45  ;;  %v4251_v45 = vcombine.high %v301_v41, %v309_v42  ;;  %v175_v37 = vld [vmem:[#allocation6 + $0x218] sm:$0xff]  ;;  %v170_v41 = vld [vmem:[#allocation6 + $0x1f0] sm:$0xff]  ;;  %v4110_v42 = vcombine.low %v159_v33, %v167_v34 }
  0xf0   :  { %1900 = vmatprep.subr.bf16.mxu0 %v4129_v47  ;;  %v4240_v47 = vcombine.low %v288_v35, %v296_v36  ;;  %v4084_v35 = vcombine.low %v130_v20, %v138_v21  ;;  %v4111_v36 = vcombine.high %v159_v33, %v167_v34  ;;  %v183_v38 = vld [vmem:[#allocation6 + $0x258] sm:$0xff]  ;;  %v274_v34 = vld [vmem:[#allocation6 + $0x530] sm:$0xff] }
  0xf1   :  { %1793 = vmatprep.subr.bf16.mxu1 %v4251_v45  ;;  %v4127_v43 = vcombine.high %v175_v37, %v183_v38  ;;  %v191_v45 = vld [vmem:[#allocation6 + $0x298] sm:$0xff] }
  0xf2   :  { %1794 = vmatpush1.bf16.msra.mxu1 %v4250_v46  ;;  %v199_v46 = vld [vmem:[#allocation6 + $0x2d8] sm:$0xff] }
  0xf3   :  { %1901 = vmatpush1.bf16.msra.mxu0 %v4128_v53  ;;  %v4267_v53 = vcombine.high %v317_v49, %v325_v50  ;;  %v4143_v51 = vcombine.high %v191_v45, %v199_v46  ;;  %v263_v20 = vld [vmem:[#allocation6 + $0x4d8] sm:$0xff] }
  0xf4   :  { %1902 = vmatprep.subr.bf16.mxu0 %v4145_v54  ;;  %v4266_v54 = vcombine.low %v317_v49, %v325_v50  ;;  %v186_v49 = vld [vmem:[#allocation6 + $0x270] sm:$0xff]  ;;  %v4126_v50 = vcombine.low %v175_v37, %v183_v38  ;;  %v271_v21 = vld [vmem:[#allocation6 + $0x518] sm:$0xff] }
  0xf5   :  { %1795 = vmatprep.subr.bf16.mxu1 %v4267_v53  ;;  %v207_v53 = vld [vmem:[#allocation6 + $0x318] sm:$0xff] }
  0xf6   :  { %1796 = vmatpush1.bf16.msra.mxu1 %v4266_v54  ;;  %v215_v54 = vld [vmem:[#allocation6 + $0x358] sm:$0xff] }
  0xf7   :  { %1903 = vmatpush1.bf16.msra.mxu0 %v4144_v61  ;;  %v4283_v61 = vcombine.high %v333_v57, %v341_v58  ;;  %v4159_v59 = vcombine.high %v207_v53, %v215_v54 }
  0xf8   :  { %1904 = vmatprep.subr.bf16.mxu0 %v4161_v62  ;;  %v4282_v62 = vcombine.low %v333_v57, %v341_v58  ;;  %v202_v57 = vld [vmem:[#allocation6 + $0x2f0] sm:$0xff]  ;;  %v4142_v58 = vcombine.low %v191_v45, %v199_v46 }
  0xf9   :  { %1797 = vmatprep.subr.bf16.mxu1 %v4283_v61 }
  0xfa   :  { %1798 = vmatpush1.bf16.msra.mxu1 %v4282_v62  ;;  %v210_v62 = vld [vmem:[#allocation6 + $0x330] sm:$0xff] }
  0xfb   :  { %1905 = vmatpush1.bf16.msra.mxu0 %v4160_v5  ;;  %v4299_v5 = vcombine.high %v349_v1, %v357_v2 }
  0xfc   :  { %1906 = vmatprep.subr.bf16.mxu0 %v4177_v6  ;;  %v4298_v6 = vcombine.low %v349_v1, %v357_v2 }
  0xfd   :  { %1799 = vmatprep.subr.bf16.mxu1 %v4299_v5  ;;  %v226_v5 = vld [vmem:[#allocation6 + $0x3b0] sm:$0xff] }
  0xfe   :  { %1800 = vmatpush1.bf16.msra.mxu1 %v4298_v6  ;;  %v234_v6 = vld [vmem:[#allocation6 + $0x3f0] sm:$0xff] }
  0xff   :  { %1907 = vmatpush1.bf16.msra.mxu0 %v4176_v14  ;;  %v4062_v14 = vcombine.low %v111_v10, %v119_v11 }
 0x100   :  { %1908 = vmatprep.subr.bf16.mxu0 %v4193_v15  ;;  %v4063_v15 = vcombine.high %v111_v10, %v119_v11  ;;  %v4181_v11 = vcombine.high %v226_v5, %v234_v6 }
 0x101   :  { %1802 = vmatmul.mubr.bf16.vlgmr.msra.gmra.mrb[0].mxu1 %v5154_v9 }
 0x102   :  { %1851 = vmatprep.subr.bf16.mxu1 %v4063_v15  ;;  %1883 = vmatprep.mubr.bf16.mxu1 %v5148_v22  ;;  %v250_v15 = vld [vmem:[#allocation6 + $0x470] sm:$0xff] }
 0x103   :  { %1909 = vmatpush1.bf16.msra.mxu0 %v4192_v23  ;;  %1852 = vmatpush1.bf16.msra.mxu1 %v4062_v14  ;;  %v4078_v23 = vcombine.low %v127_v19, %v135_v18  ;;  %v242_v14 = vld [vmem:[#allocation6 + $0x430] sm:$0xff] }
 0x104   :  { %1910 = vmatprep.subr.bf16.mxu0 %v4209_v24  ;;  %v4079_v24 = vcombine.high %v127_v19, %v135_v18  ;;  %v4180_v19 = vcombine.low %v226_v5, %v234_v6  ;;  %v255_v18 = vld [vmem:[#allocation6 + $0x498] sm:$0xff] }
 0x106   :  { %1853 = vmatprep.subr.bf16.mxu1 %v4079_v24  ;;  %v4207_v24 = vcombine.high %v255_v18, %v263_v20 }
 0x107   :  { %1911 = vmatpush1.bf16.msra.mxu0 %v4208_v31  ;;  %1854 = vmatpush1.bf16.msra.mxu1 %v4078_v23  ;;  %v4095_v31 = vcombine.high %v143_v27, %v151_v28  ;;  %v4197_v23 = vcombine.high %v242_v14, %v250_v15 }
 0x108   :  { %1912 = vmatprep.subr.bf16.mxu0 %v4225_v32  ;;  %v4094_v32 = vcombine.low %v143_v27, %v151_v28  ;;  %v266_v27 = vld [vmem:[#allocation6 + $0x4f0] sm:$0xff]  ;;  %v4206_v28 = vcombine.low %v255_v18, %v263_v20 }
 0x109   :  { %1855 = vmatprep.subr.bf16.mxu1 %v4095_v31  ;;  %v287_v31 = vld [vmem:[#allocation6 + $0x598] sm:$0xff] }
 0x10b   :  { %1913 = vmatpush1.bf16.msra.mxu0 %v4224_v39  ;;  %v4101_v39 = vcombine.high %v146_v29, %v154_v30  ;;  %1856 = vmatpush1.bf16.msra.mxu1 %v4094_v32  ;;  %v4196_v30 = vcombine.low %v242_v14, %v250_v15  ;;  %v295_v32 = vld [vmem:[#allocation6 + $0x5d8] sm:$0xff] }
 0x10c   :  { %1914 = vmatprep.subr.bf16.mxu0 %v4241_v40  ;;  %v162_v40 = vld [vmem:[#allocation6 + $0x1b0] sm:$0xff]  ;;  %1857 = vmatprep.subr.bf16.mxu1 %v4111_v36  ;;  %v4239_v37 = vcombine.high %v287_v31, %v295_v32 }
 0x10d   :  { %v4116_v52 = vcombine.low %v162_v40, %v170_v41 }
 0x10f   :  { %1915 = vmatpush1.bf16.msra.mxu0 %v4240_v47  ;;  %v4117_v47 = vcombine.high %v162_v40, %v170_v41  ;;  %1858 = vmatpush1.bf16.msra.mxu1 %v4110_v42  ;;  %v311_v40 = vld [vmem:[#allocation6 + $0x658] sm:$0xff]  ;;  %v290_v42 = vld [vmem:[#allocation6 + $0x5b0] sm:$0xff] }
 0x110   :  { %1916 = vmatprep.subr.bf16.mxu0 %v4257_v48  ;;  %v178_v48 = vld [vmem:[#allocation6 + $0x230] sm:$0xff]  ;;  %1859 = vmatprep.subr.bf16.mxu1 %v4127_v43 }
 0x111   :  { %v4132_v60 = vcombine.low %v178_v48, %v186_v49  ;;  %v298_v43 = vld [vmem:[#allocation6 + $0x5f0] sm:$0xff] }
 0x113   :  { %1917 = vmatpush1.bf16.msra.mxu0 %v4256_v55  ;;  %v4133_v55 = vcombine.high %v178_v48, %v186_v49  ;;  %1860 = vmatpush1.bf16.msra.mxu1 %v4126_v50  ;;  %v327_v48 = vld [vmem:[#allocation6 + $0x6d8] sm:$0xff]  ;;  %v4245_v49 = vcombine.high %v290_v42, %v298_v43  ;;  %v306_v50 = vld [vmem:[#allocation6 + $0x630] sm:$0xff] }
 0x114   :  { %1918 = vmatprep.subr.bf16.mxu0 %v4273_v56  ;;  %v194_v56 = vld [vmem:[#allocation6 + $0x2b0] sm:$0xff]  ;;  %1861 = vmatprep.subr.bf16.mxu1 %v4143_v51 }
 0x115   :  { %v4149_v61 = vcombine.high %v194_v56, %v202_v57  ;;  %v4148_v1 = vcombine.low %v194_v56, %v202_v57  ;;  %v314_v51 = vld [vmem:[#allocation6 + $0x670] sm:$0xff]  ;;  %v343_v56 = vld [vmem:[#allocation6 + $0x758] sm:$0xff] }
 0x116   :  { %v4261_v57 = vcombine.high %v306_v50, %v314_v51 }
 0x117   :  { %1919 = vmatpush1.bf16.msra.mxu0 %v4272_v63  ;;  %v218_v63 = vld [vmem:[#allocation6 + $0x370] sm:$0xff]  ;;  %1862 = vmatpush1.bf16.msra.mxu1 %v4142_v58 }
 0x118   :  { %1920 = vmatprep.subr.bf16.mxu0 %v4289_v0  ;;  %v4158_v0 = vcombine.low %v207_v53, %v215_v54  ;;  %1863 = vmatprep.subr.bf16.mxu1 %v4159_v59  ;;  %v4165_v2 = vcombine.high %v210_v62, %v218_v63  ;;  %v4164_v10 = vcombine.low %v210_v62, %v218_v63  ;;  %v322_v58 = vld [vmem:[#allocation6 + $0x6b0] sm:$0xff]  ;;  %v351_v63 = vld [vmem:[#allocation6 + $0x798] sm:$0xff] }
 0x119   :  { %v4244_v54 = vcombine.low %v290_v42, %v298_v43  ;;  %v330_v59 = vld [vmem:[#allocation6 + $0x6f0] sm:$0xff]  ;;  %v4260_v62 = vcombine.low %v306_v50, %v314_v51  ;;  %v193_v42 = vld [vmem:[#allocation6 + $0x2a8] sm:$0xff] }
 0x11a   :  { %v4276_v6 = vcombine.low %v322_v58, %v330_v59  ;;  %v201_v43 = vld [vmem:[#allocation6 + $0x2e8] sm:$0xff]  ;;  %v5192_v51 = vld [vmem:[#allocation9 + $0x44] ss:$8 sps:$4 sm:$0xff]  }
 0x11b   :  { %1921 = vmatpush1.bf16.msra.mxu0 %v4288_v7  ;;  %1864 = vmatpush1.bf16.msra.mxu1 %v4158_v0  ;;  %v4175_v7 = vcombine.high %v223_v3, %v231_v4  ;;  %v359_v0 = vld [vmem:[#allocation6 + $0x7d8] sm:$0xff]  ;;  %v217_v50 = vld [vmem:[#allocation6 + $0x368] sm:$0xff] }
 0x11c   :  { %1922 = vmatprep.subr.bf16.mxu0 %v4305_v8  ;;  %v4174_v8 = vcombine.low %v223_v3, %v231_v4  ;;  %v346_v3 = vld [vmem:[#allocation6 + $0x770] sm:$0xff]  ;;  %v4303_v5 = vcombine.high %v351_v63, %v359_v0 }
 0x11d   :  { %1865 = vmatprep.subr.bf16.mxu1 %v4175_v7  ;;  %v113_v7 = vld [vmem:[#allocation6 + $0x28] sm:$0xff] }
 0x11f   :  { %1923 = vmatpush1.bf16.msra.mxu0 %v4304_v16  ;;  %1866 = vmatpush1.bf16.msra.mxu1 %v4174_v8  ;;  %v4191_v16 = vcombine.high %v239_v12, %v247_v13  ;;  %v121_v8 = vld [vmem:[#allocation6 + $0x68] sm:$0xff] }
 0x120   :  { %1974 = vmatprep.subr.bf16.mxu0 %v4069_v17  ;;  %v4190_v17 = vcombine.low %v239_v12, %v247_v13  ;;  %v362_v12 = vld [vmem:[#allocation6 + $0x7f0] sm:$0xff]  ;;  %v4302_v13 = vcombine.low %v351_v63, %v359_v0  ;;  %v4067_v14 = vcombine.high %v113_v7, %v121_v8  ;;  %v4066_v18 = vcombine.low %v113_v7, %v121_v8  ;;  %v233_v63 = vld [vmem:[#allocation6 + $0x3e8] sm:$0xff] }
 0x121   :  { %1867 = vmatprep.subr.bf16.mxu1 %v4191_v16  ;;  %v129_v16 = vld [vmem:[#allocation6 + $0xa8] sm:$0xff] }
 0x122   :  { %1925 = vmatmul.mubr.bf16.vlgmr.msra.gmra.mrb[8].mxu0 %v5154_v9  ;;  %v5219_v8 = vld [vmem:[#allocation9 + $0x74] ss:$8 sps:$4 sm:$0xff]  }
 0x123   :  { %1975 = vmatpush1.bf16.msra.mxu0 %v4068_v25  ;;  %2006 = vmatprep.mubr.bf16.mxu0 %v5148_v22  ;;  %v279_v25 = vld [vmem:[#allocation6 + $0x558] sm:$0xff] }
 0x124   :  { %1976 = vmatprep.subr.bf16.mxu0 %v4085_v26  ;;  %v258_v26 = vld [vmem:[#allocation6 + $0x4b0] sm:$0xff]  ;;  %1868 = vmatpush1.bf16.msra.mxu1 %v4190_v17  ;;  %v4223_v29 = vcombine.high %v271_v21, %v279_v25  ;;  %v4222_v36 = vcombine.low %v271_v21, %v279_v25  ;;  %v137_v17 = vld [vmem:[#allocation6 + $0xe8] sm:$0xff] }
 0x125   :  { %1869 = vmatprep.subr.bf16.mxu1 %v4207_v24  ;;  %v4213_v33 = vcombine.high %v258_v26, %v266_v27  ;;  %v4212_v38 = vcombine.low %v258_v26, %v266_v27  ;;  %v4083_v20 = vcombine.high %v129_v16, %v137_v17  ;;  %v153_v24 = vld [vmem:[#allocation6 + $0x168] sm:$0xff]  ;;  %v5164_v25 = vld [vmem:[#allocation9 + $0x4] ss:$8 sps:$4 sm:$0xff]   ;;  %v4082_v26 = vcombine.low %v129_v16, %v137_v17 }
 0x126   :  { %v257_v17 = vld [vmem:[#allocation6 + $0x4a8] sm:$0xff] }
 0x127   :  { %1977 = vmatpush1.bf16.msra.mxu0 %v4084_v35  ;;  %v282_v35 = vld [vmem:[#allocation6 + $0x570] sm:$0xff] }
 0x128   :  { %1978 = vmatprep.subr.bf16.mxu0 %v4101_v39  ;;  %1870 = vmatpush1.bf16.msra.mxu1 %v4206_v28  ;;  %v303_v39 = vld [vmem:[#allocation6 + $0x618] sm:$0xff]  ;;  %v4229_v41 = vcombine.high %v274_v34, %v282_v35  ;;  %v4228_v46 = vcombine.low %v274_v34, %v282_v35  ;;  %v5175_v34 = vld [vmem:[#allocation9 + $0x10] ss:$8 sps:$4 sm:$0xff]  }
 0x129   :  { %1871 = vmatprep.subr.bf16.mxu1 %v4223_v29  ;;  %v4255_v45 = vcombine.high %v303_v39, %v311_v40  ;;  %v5168_v28 = vld [vmem:[#allocation9] ss:$8 sps:$4 sm:$0xff]   ;;  %v161_v29 = vld [vmem:[#allocation6 + $0x1a8] sm:$0xff] }
 0x12a   :  { %v177_v35 = vld [vmem:[#allocation6 + $0x228] sm:$0xff] }
 0x12b   :  { %1979 = vmatpush1.bf16.msra.mxu0 %v4100_v44  ;;  %v4238_v44 = vcombine.low %v287_v31, %v295_v32  ;;  %v5171_v31 = vld [vmem:[#allocation9 + $0x14] ss:$8 sps:$4 sm:$0xff]  }
 0x12c   :  { %1980 = vmatprep.subr.bf16.mxu0 %v4117_v47  ;;  %1872 = vmatpush1.bf16.msra.mxu1 %v4222_v36  ;;  %v319_v47 = vld [vmem:[#allocation6 + $0x698] sm:$0xff]  ;;  %v185_v36 = vld [vmem:[#allocation6 + $0x268] sm:$0xff] }
 0x12d   :  { %1873 = vmatprep.subr.bf16.mxu1 %v4239_v37  ;;  %v4271_v53 = vcombine.high %v319_v47, %v327_v48  ;;  %v5178_v37 = vld [vmem:[#allocation9 + $0x24] ss:$8 sps:$4 sm:$0xff]  }
 0x12f   :  { %1981 = vmatpush1.bf16.msra.mxu0 %v4116_v52  ;;  %v4254_v52 = vcombine.low %v303_v39, %v311_v40  ;;  %v4131_v39 = vcombine.high %v177_v35, %v185_v36  ;;  %v5181_v40 = vld [vmem:[#allocation9 + $0x20] ss:$8 sps:$4 sm:$0xff]  }
 0x130   :  { %1982 = vmatprep.subr.bf16.mxu0 %v4133_v55  ;;  %1874 = vmatpush1.bf16.msra.mxu1 %v4238_v44  ;;  %v335_v55 = vld [vmem:[#allocation6 + $0x718] sm:$0xff]  ;;  %v5184_v44 = vld [vmem:[#allocation9 + $0x34] ss:$8 sps:$4 sm:$0xff]  }
 0x131   :  { %1875 = vmatprep.subr.bf16.mxu1 %v4255_v45  ;;  %v4286_v4 = vcombine.low %v335_v55, %v343_v56  ;;  %v4130_v45 = vcombine.low %v177_v35, %v185_v36  ;;  %v5234_v36 = vld [vmem:[#allocation9 + $0x90] ss:$8 sps:$4 sm:$0xff]  }
 0x133   :  { %1983 = vmatpush1.bf16.msra.mxu0 %v4132_v60  ;;  %v4270_v60 = vcombine.low %v319_v47, %v327_v48  ;;  %v5187_v47 = vld [vmem:[#allocation9 + $0x30] ss:$8 sps:$4 sm:$0xff]  }
 0x134   :  { %1984 = vmatprep.subr.bf16.mxu0 %v4149_v61  ;;  %1876 = vmatpush1.bf16.msra.mxu1 %v4254_v52  ;;  %v4287_v61 = vcombine.high %v335_v55, %v343_v56  ;;  %v4146_v52 = vcombine.low %v193_v42, %v201_v43  ;;  %v5201_v56 = vld [vmem:[#allocation8] sm:$0xff] }
 0x135   :  { %1877 = vmatprep.subr.bf16.mxu1 %v4271_v53 }
 0x137   :  { %1985 = vmatpush1.bf16.msra.mxu0 %v4148_v1  ;;  %v4277_v1 = vcombine.high %v322_v58, %v330_v59 }
 0x138   :  { %1986 = vmatprep.subr.bf16.mxu0 %v4165_v2  ;;  %v338_v2 = vld [vmem:[#allocation6 + $0x730] sm:$0xff]  ;;  %1878 = vmatpush1.bf16.msra.mxu1 %v4270_v60  ;;  %v5208_v60 = vld [vmem:[#allocation9 + $0x50] ss:$8 sps:$4 sm:$0xff]  }
 0x139   :  { %1879 = vmatprep.subr.bf16.mxu1 %v4287_v61  ;;  %v4292_v15 = vcombine.low %v338_v2, %v346_v3  ;;  %v5211_v61 = vld [vmem:[#allocation9 + $0x64] ss:$8 sps:$4 sm:$0xff]  }
 0x13b   :  { %1987 = vmatpush1.bf16.msra.mxu0 %v4164_v10  ;;  %v4293_v10 = vcombine.high %v338_v2, %v346_v3 }
 0x13c   :  { %1988 = vmatprep.subr.bf16.mxu0 %v4181_v11  ;;  %v354_v11 = vld [vmem:[#allocation6 + $0x7b0] sm:$0xff]  ;;  %1880 = vmatpush1.bf16.msra.mxu1 %v4286_v4 }
 0x13d   :  { %1881 = vmatprep.subr.bf16.mxu1 %v4303_v5  ;;  %v4308_v21 = vcombine.low %v354_v11, %v362_v12 }
 0x13f   :  { %1989 = vmatpush1.bf16.msra.mxu0 %v4180_v19  ;;  %v4309_v19 = vcombine.high %v354_v11, %v362_v12  ;;  %v249_v11 = vld [vmem:[#allocation6 + $0x468] sm:$0xff] }
 0x140   :  { %1990 = vmatprep.subr.bf16.mxu0 %v4197_v23  ;;  %1882 = vmatpush1.bf16.msra.mxu1 %v4302_v13  ;;  %v145_v23 = vld [vmem:[#allocation6 + $0x128] sm:$0xff] }
 0x141   :  { %1933 = vmatprep.subr.bf16.mxu1 %v4067_v14  ;;  %v4099_v27 = vcombine.high %v145_v23, %v153_v24  ;;  %v4098_v32 = vcombine.low %v145_v23, %v153_v24  ;;  %v5221_v14 = vld [vmem:[#allocation9 + $0x70] ss:$8 sps:$4 sm:$0xff]  }
 0x142   :  { %v281_v23 = vld [vmem:[#allocation6 + $0x568] sm:$0xff] }
 0x143   :  { %1991 = vmatpush1.bf16.msra.mxu0 %v4196_v30  ;;  %1884 = vmatmul.mubr.bf16.vlgmr.msra.gmra.mrb[4].mxu1 %v5154_v9  ;;  %v169_v30 = vld [vmem:[#allocation6 + $0x1e8] sm:$0xff] }
 0x144   :  { %1992 = vmatprep.subr.bf16.mxu0 %v4213_v33  ;;  %1934 = vmatpush1.bf16.msra.mxu1 %v4066_v18  ;;  %v4115_v33 = vcombine.high %v161_v29, %v169_v30  ;;  %v273_v18 = vld [vmem:[#allocation6 + $0x528] sm:$0xff] }
 0x145   :  { %1965 = vmatprep.mubr.bf16.mxu1 %v5148_v22  ;;  %1935 = vmatprep.subr.bf16.mxu1 %v4083_v20  ;;  %v5225_v20 = vld [vmem:[#allocation9 + $0x84] ss:$8 sps:$4 sm:$0xff]  }
 0x147   :  { %1993 = vmatpush1.bf16.msra.mxu0 %v4212_v38  ;;  %v4114_v38 = vcombine.low %v161_v29, %v169_v30  ;;  %v289_v29 = vld [vmem:[#allocation6 + $0x5a8] sm:$0xff] }
 0x148   :  { %1994 = vmatprep.subr.bf16.mxu0 %v4229_v41  ;;  %1936 = vmatpush1.bf16.msra.mxu1 %v4082_v26  ;;  %v368_v41 = vlaneseq  ;;  %v4227_v26 = vcombine.high %v273_v18, %v281_v23  ;;  %v297_v30 = vld [vmem:[#allocation6 + $0x5e8] sm:$0xff] }
 0x149   :  { %1937 = vmatprep.subr.bf16.mxu1 %v4099_v27  ;;  %v5228_v27 = vld [vmem:[#allocation9 + $0x80] ss:$8 sps:$4 sm:$0xff]   ;;  %v4243_v35 = vcombine.high %v289_v29, %v297_v30 }
 0x14a   :  { %v5189_v48 = vshrl.u32 %v368_v41, 7  ;;  %v5237_v41 = vld [vmem:[#allocation9 + $0xa4] ss:$8 sps:$4 sm:$0xff]  }
 0x14b   :  { %1995 = vmatpush1.bf16.msra.mxu0 %v4228_v46  ;;  %v4147_v46 = vcombine.high %v193_v42, %v201_v43  ;;  %v4242_v42 = vcombine.low %v289_v29, %v297_v30  ;;  %v5273_v30 = vld [vmem:[#allocation9 + $0xf4] ss:$8 sps:$4 sm:$0xff]  }
 0x14c   :  { %1996 = vmatprep.subr.bf16.mxu0 %v4245_v49  ;;  %1938 = vmatpush1.bf16.msra.mxu1 %v4098_v32  ;;  %v209_v49 = vld [vmem:[#allocation6 + $0x328] sm:$0xff]  ;;  %v5198_v55 = vsub.s32 1, %v5189_v48 }
 0x14d   :  { %1939 = vmatprep.subr.bf16.mxu1 %v4115_v33  ;;  %v4163_v53 = vcombine.high %v209_v49, %v217_v50  ;;  %v4162_v58 = vcombine.low %v209_v49, %v217_v50  ;;  %v5231_v32 = vld [vmem:[#allocation9 + $0x94] ss:$8 sps:$4 sm:$0xff]   ;;  %v4226_v33 = vcombine.low %v273_v18, %v281_v23  ;;  %v5269_v23 = vld [vmem:[#allocation9 + $0xe0] ss:$8 sps:$4 sm:$0xff]  }
 0x14e   :  { %v375_v59 = vrot.slane %v5201_v56, %v5198_v55  ;;  %v329_v49 = vld [vmem:[#allocation6 + $0x6e8] sm:$0xff] }
 0x14f   :  { %1997 = vmatpush1.bf16.msra.mxu0 %v4244_v54  ;;  %v5195_v54 = vld [vmem:[#allocation9 + $0x40] ss:$8 sps:$4 sm:$0xff]   ;;  %v5243_v50 = vld [vmem:[#allocation9 + $0xb4] ss:$8 sps:$4 sm:$0xff]  }
 0x150   :  { %1998 = vmatprep.subr.bf16.mxu0 %v4261_v57  ;;  %1940 = vmatpush1.bf16.msra.mxu1 %v4114_v38  ;;  %v5203_v57 = vld [vmem:[#allocation9 + $0x54] ss:$8 sps:$4 sm:$0xff]  }
 0x151   :  { %1941 = vmatprep.subr.bf16.mxu1 %v4131_v39  ;;  %v305_v38 = vld [vmem:[#allocation6 + $0x628] sm:$0xff] }
 0x152   :  { %v313_v39 = vld [vmem:[#allocation6 + $0x668] sm:$0xff] }
 0x153   :  { %1999 = vmatpush1.bf16.msra.mxu0 %v4260_v62  ;;  %v225_v62 = vld [vmem:[#allocation6 + $0x3a8] sm:$0xff]  ;;  %v4259_v43 = vcombine.high %v305_v38, %v313_v39 }
 0x154   :  { %2000 = vmatprep.subr.bf16.mxu0 %v4277_v1  ;;  %1942 = vmatpush1.bf16.msra.mxu1 %v4130_v45  ;;  %v4179_v1 = vcombine.high %v225_v62, %v233_v63  ;;  %v4178_v3 = vcombine.low %v225_v62, %v233_v63  ;;  %v5240_v45 = vld [vmem:[#allocation9 + $0xa0] ss:$8 sps:$4 sm:$0xff]   ;;  %v345_v62 = vld [vmem:[#allocation6 + $0x768] sm:$0xff]  ;;  %v5249_v63 = vld [vmem:[#allocation9 + $0xc4] ss:$8 sps:$4 sm:$0xff]  }
 0x155   :  { %1943 = vmatprep.subr.bf16.mxu1 %v4147_v46  ;;  %v321_v46 = vld [vmem:[#allocation6 + $0x6a8] sm:$0xff] }
 0x157   :  { %2001 = vmatpush1.bf16.msra.mxu0 %v4276_v6  ;;  %v5216_v6 = vld [vmem:[#allocation9 + $0x60] ss:$8 sps:$4 sm:$0xff]  }
 0x158   :  { %2002 = vmatprep.subr.bf16.mxu0 %v4293_v10  ;;  %1944 = vmatpush1.bf16.msra.mxu1 %v4146_v52  ;;  %v241_v10 = vld [vmem:[#allocation6 + $0x428] sm:$0xff]  ;;  %v4258_v52 = vcombine.low %v305_v38, %v313_v39  ;;  %v147_v39 = vld [vmem:[#allocation6 + $0x138] sm:$0xff] }
 0x159   :  { %1945 = vmatprep.subr.bf16.mxu1 %v4163_v53  ;;  %v4195_v13 = vcombine.high %v241_v10, %v249_v11  ;;  %v4275_v53 = vcombine.high %v321_v46, %v329_v49  ;;  %v5276_v38 = vld [vmem:[#allocation9 + $0xf0] ss:$8 sps:$4 sm:$0xff]  }
 0x15b   :  { %2003 = vmatpush1.bf16.msra.mxu0 %v4292_v15  ;;  %v4194_v15 = vcombine.low %v241_v10, %v249_v11  ;;  %v5258_v10 = vld [vmem:[#allocation9 + $0xd4] ss:$8 sps:$4 sm:$0xff]  }
 0x15c   :  { %2004 = vmatprep.subr.bf16.mxu0 %v4309_v19  ;;  %1946 = vmatpush1.bf16.msra.mxu1 %v4162_v58  ;;  %v265_v19 = vld [vmem:[#allocation6 + $0x4e8] sm:$0xff] }
 0x15d   :  { %1947 = vmatprep.subr.bf16.mxu1 %v4179_v1  ;;  %v4210_v24 = vcombine.low %v257_v17, %v265_v19  ;;  %v5246_v58 = vld [vmem:[#allocation9 + $0xb0] ss:$8 sps:$4 sm:$0xff]   ;;  %v4274_v1 = vcombine.low %v321_v46, %v329_v49  ;;  %v163_v49 = vld [vmem:[#allocation6 + $0x1b8] sm:$0xff] }
 0x15f   :  { %2005 = vmatpush1.bf16.msra.mxu0 %v4308_v21  ;;  %v4211_v21 = vcombine.high %v257_v17, %v265_v19  ;;  %v5266_v19 = vld [vmem:[#allocation9 + $0xe4] ss:$8 sps:$4 sm:$0xff]  }
 0x160   :  { %2286 = vmatprep.subr.bf16.mxu0 %v5164_v25  ;;  %1948 = vmatpush1.bf16.msra.mxu1 %v4178_v3  ;;  %v5252_v3 = vld [vmem:[#allocation9 + $0xc0] ss:$8 sps:$4 sm:$0xff]  }
 0x161   :  { %1949 = vmatprep.subr.bf16.mxu1 %v4195_v13  ;;  %v5261_v13 = vld [vmem:[#allocation9 + $0xd0] ss:$8 sps:$4 sm:$0xff]  }
 0x162   :  { %2007 = vmatmul.mubr.bf16.vlgmr.msra.gmra.mrb[12].mxu0 %v5154_v9 }
 0x163   :  { %2287 = vmatpush1.bf16.msra.mxu0 %v5168_v28 }
 0x164   :  { %2288 = vmatprep.subr.bf16.mxu0 %v5171_v31  ;;  %1950 = vmatpush1.bf16.msra.mxu1 %v4194_v15  ;;  %v115_v15 = vld [vmem:[#allocation6 + $0x38] sm:$0xff] }
 0x165   :  { %1951 = vmatprep.subr.bf16.mxu1 %v4211_v21 }
 0x167   :  { %2289 = vmatpush1.bf16.msra.mxu0 %v5175_v34 }
 0x168   :  { %2290 = vmatprep.subr.bf16.mxu0 %v5178_v37  ;;  %1952 = vmatpush1.bf16.msra.mxu1 %v4210_v24  ;;  %v131_v24 = vld [vmem:[#allocation6 + $0xb8] sm:$0xff] }
 0x169   :  { %1953 = vmatprep.subr.bf16.mxu1 %v4227_v26  ;;  %v139_v26 = vld [vmem:[#allocation6 + $0xf8] sm:$0xff] }
 0x16b   :  { %2291 = vmatpush1.bf16.msra.mxu0 %v5181_v40 }
 0x16c   :  { %2292 = vmatprep.subr.bf16.mxu0 %v5184_v44  ;;  %1954 = vmatpush1.bf16.msra.mxu1 %v4226_v33 }
 0x16d   :  { %1955 = vmatprep.subr.bf16.mxu1 %v4243_v35  ;;  %v4087_v35 = vcombine.high %v131_v24, %v139_v26 }
 0x16f   :  { %2293 = vmatpush1.bf16.msra.mxu0 %v5187_v47 }
 0x170   :  { %2294 = vmatprep.subr.bf16.mxu0 %v5192_v51  ;;  %1956 = vmatpush1.bf16.msra.mxu1 %v4242_v42  ;;  %v155_v42 = vld [vmem:[#allocation6 + $0x178] sm:$0xff] }
 0x171   :  { %1957 = vmatprep.subr.bf16.mxu1 %v4259_v43  ;;  %v4103_v46 = vcombine.high %v147_v39, %v155_v42 }
 0x173   :  { %2295 = vmatpush1.bf16.msra.mxu0 %v5195_v54 }
 0x174   :  { %2296 = vmatprep.subr.bf16.mxu0 %v5203_v57  ;;  %1958 = vmatpush1.bf16.msra.mxu1 %v4258_v52  ;;  %v171_v52 = vld [vmem:[#allocation6 + $0x1f8] sm:$0xff] }
 0x175   :  { %v5213_v0 = vpop.f32.mrb[0].mxu0  ;;  %1959 = vmatprep.subr.bf16.mxu1 %v4275_v53 }
 0x176   :  { %v1764_v2 = vpop.f32.mrb[1].mxu0 }
 0x177   :  { %v1765_v4 = vadd.f32 %v1764_v2, %v375_v59  ;;  %v1766_v5 = vpop.f32.mrb[2].mxu0  ;;  %2297 = vmatpush1.bf16.msra.mxu0 %v5208_v60  ;;  %v337_v59 = vld [vmem:[#allocation6 + $0x728] sm:$0xff] }
 0x178   :  { %v1767_v7 = vpop.f32.mrb[3].mxu0  ;;  %2298 = vmatprep.subr.bf16.mxu0 %v5211_v61  ;;  %v4291_v2 = vcombine.high %v337_v59, %v345_v62  ;;  %v361_v5 = vld [vmem:[#allocation6 + $0x7e8] sm:$0xff]  ;;  %1960 = vmatpush1.bf16.msra.mxu1 %v4274_v1  ;;  %v4290_v11 = vcombine.low %v337_v59, %v345_v62  ;;  %v4102_v59 = vcombine.low %v147_v39, %v155_v42  ;;  %v179_v1 = vld [vmem:[#allocation6 + $0x238] sm:$0xff] }
 0x179   :  { %v2057_v12 = vmax.f32 %v1765_v4, 0.0  ;;  %v353_v4 = vld [vmem:[#allocation6 + $0x7a8] sm:$0xff]  ;;  %v5255_v7 = vsub.s32 0, %v5189_v48  ;;  %v4119_v62 = vcombine.high %v163_v49, %v171_v52 }
 0x17a   :  { %1961 = vmatprep.subr.bf16.mxu1 %v4291_v2  ;;  %v4306_v18 = vcombine.low %v353_v4, %v361_v5  ;;  %v187_v2 = vld [vmem:[#allocation6 + $0x278] sm:$0xff] }
 0x17b   :  { %v2114_v16 = vpack.c.bf16 %v2057_v12, %v2057_v12  ;;  %2299 = vmatpush1.bf16.msra.mxu0 %v5216_v6  ;;  %v4307_v12 = vcombine.high %v353_v4, %v361_v5  ;;  %v371_v17 = vrot.slane %v5201_v56, %v5255_v7  ;;  %v4118_v4 = vcombine.low %v163_v49, %v171_v52  ;;  %v251_v49 = vld [vmem:[#allocation6 + $0x478] sm:$0xff] }
 0x17c   :  { %2300 = vmatprep.subr.bf16.mxu0 %v5219_v8  ;;  %1962 = vmatpush1.bf16.msra.mxu1 %v4290_v11  ;;  %v4135_v5 = vcombine.high %v179_v1, %v187_v2  ;;  %v195_v11 = vld [vmem:[#allocation6 + $0x2b8] sm:$0xff] }
 0x17d   :  { %2318 = vmatprep.mubr.bf16.mxu0 %v2114_v16  ;;  %v123_v16 = vld [vmem:[#allocation6 + $0x78] sm:$0xff]  ;;  %1963 = vmatprep.subr.bf16.mxu1 %v4307_v12  ;;  %v1763_v29 = vadd.f32 %v5213_v0, %v371_v17  ;;  %v4086_v0 = vcombine.low %v131_v24, %v139_v26  ;;  %v4134_v12 = vcombine.low %v179_v1, %v187_v2 }
 0x17e   :  { %v4071_v21 = vcombine.high %v115_v15, %v123_v16  ;;  %v4070_v33 = vcombine.low %v115_v15, %v123_v16  ;;  %v211_v16 = vld [vmem:[#allocation6 + $0x338] sm:$0xff] }
 0x17f   :  { %2301 = vmatpush1.bf16.msra.mxu0 %v5221_v14  ;;  %v2056_v43 = vmax.f32 %v1763_v29, 0.0  ;;  %v219_v17 = vld [vmem:[#allocation6 + $0x378] sm:$0xff] }
 0x180   :  { %2302 = vmatprep.subr.bf16.mxu0 %v5225_v20  ;;  %1964 = vmatpush1.bf16.msra.mxu1 %v4306_v18  ;;  %v4166_v24 = vcombine.low %v211_v16, %v219_v17  ;;  %v227_v26 = vld [vmem:[#allocation6 + $0x3b8] sm:$0xff] }
 0x181   :  { %2015 = vmatprep.subr.bf16.mxu1 %v4071_v21  ;;  %v2113_v53 = vpack.c.bf16 %v2056_v43, %v2056_v43  ;;  %v4167_v21 = vcombine.high %v211_v16, %v219_v17  ;;  %v235_v29 = vld [vmem:[#allocation6 + $0x3f8] sm:$0xff] }
 0x182   :  { %v4182_v42 = vcombine.low %v227_v26, %v235_v29  ;;  %v275_v1 = vld [vmem:[#allocation6 + $0x538] sm:$0xff] }
 0x183   :  { %2303 = vmatpush1.bf16.msra.mxu0 %v5228_v27  ;;  %1966 = vmatmul.mubr.bf16.vlgmr.msra.gmra.mrb[8].mxu1 %v5154_v9  ;;  %v307_v17 = vld [vmem:[#allocation6 + $0x638] sm:$0xff] }
 0x184   :  { %2304 = vmatprep.subr.bf16.mxu0 %v5231_v32  ;;  %2016 = vmatpush1.bf16.msra.mxu1 %v4070_v33 }
 0x185   :  { %2047 = vmatprep.mubr.bf16.mxu1 %v5148_v22  ;;  %2017 = vmatprep.subr.bf16.mxu1 %v4087_v35  ;;  %v203_v22 = vld [vmem:[#allocation6 + $0x2f8] sm:$0xff]  ;;  %v4183_v35 = vcombine.high %v227_v26, %v235_v29 }
 0x186   :  { %v4151_v15 = vcombine.high %v195_v11, %v203_v22  ;;  %v4150_v18 = vcombine.low %v195_v11, %v203_v22  ;;  %v291_v22 = vld [vmem:[#allocation6 + $0x5b8] sm:$0xff] }
 0x187   :  { %2305 = vmatpush1.bf16.msra.mxu0 %v5234_v36  ;;  %v323_v26 = vld [vmem:[#allocation6 + $0x6b8] sm:$0xff] }
 0x188   :  { %2306 = vmatprep.subr.bf16.mxu0 %v5237_v41  ;;  %2018 = vmatpush1.bf16.msra.mxu1 %v4086_v0  ;;  %v331_v29 = vld [vmem:[#allocation6 + $0x6f8] sm:$0xff] }
 0x189   :  { %2019 = vmatprep.subr.bf16.mxu1 %v4103_v46  ;;  %v243_v46 = vld [vmem:[#allocation6 + $0x438] sm:$0xff] }
 0x18a   :  { %v4199_v52 = vcombine.high %v243_v46, %v251_v49 }
 0x18b   :  { %2307 = vmatpush1.bf16.msra.mxu0 %v5240_v45 }
 0x18c   :  { %2308 = vmatprep.subr.bf16.mxu0 %v5243_v50  ;;  %2020 = vmatpush1.bf16.msra.mxu1 %v4102_v59  ;;  %v259_v59 = vld [vmem:[#allocation6 + $0x4b8] sm:$0xff] }
 0x18d   :  { %2021 = vmatprep.subr.bf16.mxu1 %v4119_v62  ;;  %v267_v62 = vld [vmem:[#allocation6 + $0x4f8] sm:$0xff] }
 0x18e   :  { %v4215_v2 = vcombine.high %v259_v59, %v267_v62 }
 0x18f   :  { %2309 = vmatpush1.bf16.msra.mxu0 %v5246_v58 }
 0x190   :  { %2310 = vmatprep.subr.bf16.mxu0 %v5249_v63  ;;  %2022 = vmatpush1.bf16.msra.mxu1 %v4118_v4  ;;  %v283_v4 = vld [vmem:[#allocation6 + $0x578] sm:$0xff] }
 0x191   :  { %2023 = vmatprep.subr.bf16.mxu1 %v4135_v5  ;;  %v4214_v5 = vcombine.low %v259_v59, %v267_v62  ;;  %v4231_v11 = vcombine.high %v275_v1, %v283_v4 }
 0x193   :  { %2311 = vmatpush1.bf16.msra.mxu0 %v5252_v3 }
 0x194   :  { %2312 = vmatprep.subr.bf16.mxu0 %v5258_v10  ;;  %2024 = vmatpush1.bf16.msra.mxu1 %v4134_v12  ;;  %v299_v12 = vld [vmem:[#allocation6 + $0x5f8] sm:$0xff] }
 0x195   :  { %2025 = vmatprep.subr.bf16.mxu1 %v4151_v15  ;;  %v4230_v15 = vcombine.low %v275_v1, %v283_v4  ;;  %v4247_v16 = vcombine.high %v291_v22, %v299_v12  ;;  %v4712_v4 = vld [vmem:[#allocation11] sm:$0xff]  }
 0x197   :  { %2313 = vmatpush1.bf16.msra.mxu0 %v5261_v13 }
 0x198   :  { %2314 = vmatprep.subr.bf16.mxu0 %v5266_v19  ;;  %2026 = vmatpush1.bf16.msra.mxu1 %v4150_v18  ;;  %v315_v18 = vld [vmem:[#allocation6 + $0x678] sm:$0xff] }
 0x199   :  { %2027 = vmatprep.subr.bf16.mxu1 %v4167_v21  ;;  %v4246_v21 = vcombine.low %v291_v22, %v299_v12  ;;  %v4715_v22 = vld [vmem:[#allocation11 + $0x50] sm:$0xff]  }
 0x19a   :  { %v4716_v12 = vld [vmem:[#allocation11 + $0x10] sm:$0xff]  }
 0x19b   :  { %2315 = vmatpush1.bf16.msra.mxu0 %v5269_v23 }
 0x19c   :  { %2316 = vmatprep.subr.bf16.mxu0 %v5273_v30  ;;  %2028 = vmatpush1.bf16.msra.mxu1 %v4166_v24  ;;  %v4263_v24 = vcombine.high %v307_v17, %v315_v18 }
 0x19d   :  { %2029 = vmatprep.subr.bf16.mxu1 %v4183_v35  ;;  %v4262_v35 = vcombine.low %v307_v17, %v315_v18  ;;  %v4719_v17 = vld [vmem:[#allocation11 + $0x60] sm:$0xff]  }
 0x19e   :  { %v4720_v18 = vld [vmem:[#allocation11 + $0x20] sm:$0xff]  }
 0x19f   :  { %2317 = vmatpush1.bf16.msra.mxu0 %v5276_v38 }
 0x1a0   :  { %2030 = vmatpush1.bf16.msra.mxu1 %v4182_v42  ;;  %v4279_v42 = vcombine.high %v323_v26, %v331_v29 }
 0x1a1   :  { %2031 = vmatprep.subr.bf16.mxu1 %v4199_v52  ;;  %v355_v52 = vld [vmem:[#allocation6 + $0x7b8] sm:$0xff] }
 0x1a2   :  { %2319 = vmatmul.mubr.bf16.vlgmr.msra.gmra.mrb[16].mxu0 %v2113_v53  ;;  %v4198_v53 = vcombine.low %v243_v46, %v251_v49  ;;  %v4278_v46 = vcombine.low %v323_v26, %v331_v29 }
 0x1a4   :  { %2032 = vmatpush1.bf16.msra.mxu1 %v4198_v53  ;;  %v363_v53 = vld [vmem:[#allocation6 + $0x7f8] sm:$0xff] }
 0x1a5   :  { %2033 = vmatprep.subr.bf16.mxu1 %v4215_v2  ;;  %v4311_v62 = vcombine.high %v355_v52, %v363_v53  ;;  %v4310_v1 = vcombine.low %v355_v52, %v363_v53  ;;  %v4711_v2 = vld [vmem:[#allocation11 + $0x40] sm:$0xff]   ;;  %v4725_v52 = vld [vmem:[#allocation11 + $0x78] sm:$0xff]  }
 0x1a8   :  { %2034 = vmatpush1.bf16.msra.mxu1 %v4214_v5  ;;  %v4713_v5 = vld [vmem:[#allocation11 + $0x48] sm:$0xff]  }
 0x1a9   :  { %2035 = vmatprep.subr.bf16.mxu1 %v4231_v11  ;;  %v4714_v11 = vld [vmem:[#allocation11 + $0x8] sm:$0xff]  }
 0x1ac   :  { %2036 = vmatpush1.bf16.msra.mxu1 %v4230_v15  ;;  %v4717_v15 = vld [vmem:[#allocation11 + $0x58] sm:$0xff]  }
 0x1ad   :  { %2037 = vmatprep.subr.bf16.mxu1 %v4247_v16  ;;  %v4718_v16 = vld [vmem:[#allocation11 + $0x18] sm:$0xff]  }
 0x1b0   :  { %2038 = vmatpush1.bf16.msra.mxu1 %v4246_v21  ;;  %v4721_v21 = vld [vmem:[#allocation11 + $0x68] sm:$0xff]  }
 0x1b1   :  { %2039 = vmatprep.subr.bf16.mxu1 %v4263_v24  ;;  %v4722_v24 = vld [vmem:[#allocation11 + $0x28] sm:$0xff]  }
 0x1b4   :  { %2040 = vmatpush1.bf16.msra.mxu1 %v4262_v35 }
 0x1b5   :  { %v5282_v33 = vpop.f32.mrb[4].mxu0  ;;  %2041 = vmatprep.subr.bf16.mxu1 %v4279_v42  ;;  %v4723_v42 = vld [vmem:[#allocation11 + $0x70] sm:$0xff]  }
 0x1b6   :  { %v5284_v39 = vpop.f32.mrb[5].mxu0 }
 0x1b7   :  { %v1848_v43 = vpop.f32.mrb[6].mxu0 }
 0x1b8   :  { %v1849_v0 = vpop.f32.mrb[7].mxu0  ;;  %v339_v43 = vld [vmem:[#allocation6 + $0x738] sm:$0xff]  ;;  %2042 = vmatpush1.bf16.msra.mxu1 %v4278_v46 }
 0x1b9   :  { %v347_v0 = vld [vmem:[#allocation6 + $0x778] sm:$0xff] }
 0x1ba   :  { %v4295_v49 = vcombine.high %v339_v43, %v347_v0  ;;  %v4294_v59 = vcombine.low %v339_v43, %v347_v0  ;;  %v4724_v43 = vld [vmem:[#allocation11 + $0x30] sm:$0xff]  }
 0x1bc   :  { %2043 = vmatprep.subr.bf16.mxu1 %v4295_v49 }
 0x1bd   :  { %2044 = vmatpush1.bf16.msra.mxu1 %v4294_v59  ;;  %v4726_v59 = vld [vmem:[#allocation11 + $0x38] sm:$0xff]  }
 0x1be   :  { %2045 = vmatprep.subr.bf16.mxu1 %v4311_v62 }
 0x1c1   :  { %2046 = vmatpush1.bf16.msra.mxu1 %v4310_v1 }
 0x1c2   :  { %4475 = vmatprep.subr.bf16.mxu1 %v4711_v2 }
 0x1c4   :  { %2048 = vmatmul.mubr.bf16.vlgmr.msra.gmra.mrb[12].mxu1 %v5154_v9 }
 0x1c5   :  { %4476 = vmatpush3.bf16.msra.mxu1 %v4712_v4 }
 0x1c6   :  { %4477 = vmatprep.subr.bf16.mxu1 %v4713_v5 }
 0x1c9   :  { %4478 = vmatpush3.bf16.msra.mxu1 %v4714_v11 }
 0x1ca   :  { %4479 = vmatprep.subr.bf16.mxu1 %v4715_v22 }
 0x1cd   :  { %4480 = vmatpush3.bf16.msra.mxu1 %v4716_v12 }
 0x1ce   :  { %4481 = vmatprep.subr.bf16.mxu1 %v4717_v15  ;;  %v5732_v15 = vsub.s32 3, %v5189_v48 }
 0x1d1   :  { %4482 = vmatpush3.bf16.msra.mxu1 %v4718_v16  ;;  %v2104_v16 = vld [vmem:[%s5725_s4] sm:$0x3] }
 0x1d2   :  { %4483 = vmatprep.subr.bf16.mxu1 %v4719_v17 }
 0x1d4   :  { %v5287_v9 = vpop.f32.mrb[0].mxu1 }
 0x1d5   :  { %4484 = vmatpush3.bf16.msra.mxu1 %v4720_v18  ;;  %v1805_v26 = vpop.f32.mrb[1].mxu1 }
 0x1d6   :  { %4485 = vmatprep.subr.bf16.mxu1 %v4721_v21  ;;  %v1807_v29 = vpop.f32.mrb[2].mxu1  ;;  %v383_v21 = vrot.slane %v5201_v56, %v5732_v15 }
 0x1d7   :  { %v1808_v35 = vpop.f32.mrb[3].mxu1  ;;  %v5314_v29 = vrot.slane %v2104_v16, %v5255_v7 }
 0x1d9   :  { %4486 = vmatpush3.bf16.msra.mxu1 %v4722_v24 }
 0x1da   :  { %4487 = vmatprep.subr.bf16.mxu1 %v4723_v42  ;;  %v5317_v42 = vrot.slane %v2104_v16, %v5198_v55 }
 0x1dd   :  { %4488 = vmatpush3.bf16.msra.mxu1 %v4724_v43  ;;  %v1806_v43 = vadd.f32 %v1805_v26, %v383_v21  ;;  %v5734_v26 = vsub.s32 6, %v5189_v48 }
 0x1de   :  { %4489 = vmatprep.subr.bf16.mxu1 %v4725_v52 }
 0x1e1   :  { %4490 = vmatpush3.bf16.msra.mxu1 %v4726_v59 }
 0x1e2   :  { %2502 = vmatprep.subr.bf16.mxu1 %v5164_v25 }
 0x1f5   :  { %v5289_v0 = vpop.f32.mrb[8].mxu0 }
 0x1f6   :  { %v5291_v46 = vpop.f32.mrb[9].mxu0 }
 0x1f7   :  { %v1930_v49 = vpop.f32.mrb[10].mxu0 }
 0x1f8   :  { %v1931_v53 = vpop.f32.mrb[11].mxu0 }
 0x216   :  { %v5294_v62 = vpop.f32.mrb[4].mxu1 }
 0x217   :  { %v5296_v1 = vpop.f32.mrb[5].mxu1 }
 0x218   :  { %v1889_v2 = vpop.f32.mrb[6].mxu1 }
 0x219   :  { %v1890_v4 = vpop.f32.mrb[7].mxu1 }
 0x235   :  { %v5298_v5 = vpop.f32.mrb[12].mxu0 }
 0x236   :  { %5736 = vst [vmem:[#allocation17_spill] sm:$0xff] %v5298_v5  ;;  %v5300_v11 = vpop.f32.mrb[13].mxu0 }
 0x237   :  { %5737 = vst [vmem:[#allocation18_spill] sm:$0xff] %v5300_v11  ;;  %v2012_v22 = vpop.f32.mrb[14].mxu0 }
 0x238   :  { %v2013_v12 = vpop.f32.mrb[15].mxu0 }
 0x239   :  { %v2059_v12 = vmax.f32 %v1806_v43, 0.0 }
 0x23b   :  { %v2501_v11 = vpack.c.bf16 %v2059_v12, %v2059_v12 }
 0x256   :  { %v5306_v17 = vpop.f32.mrb[8].mxu1 }
 0x257   :  { %v5308_v18 = vpop.f32.mrb[9].mxu1 }
 0x258   :  { %v1971_v24 = vpop.f32.mrb[10].mxu1 }
 0x259   :  { %v1972_v35 = vpop.f32.mrb[11].mxu1 }
 0x275   :  { %v2320_v49 = vpop.f32.mrb[16].mxu0 }
 0x276   :  { %v2321_v52 = vadd.f32 %v2320_v49, %v5314_v29  ;;  %v2322_v53 = vpop.f32.mrb[17].mxu0 }
 0x277   :  { %v2323_v59 = vadd.f32 %v2322_v53, %v5317_v42  ;;  %v2324_v2 = vpop.f32.mrb[18].mxu0 }
 0x278   :  { %v2327_v4 = vmax.f32 %v2321_v52, 0.0  ;;  %v2325_v22 = vpop.f32.mrb[19].mxu0 }
 0x279   :  { %v2328_v15 = vmax.f32 %v2323_v59, 0.0 }
 0x27a   :  { %v2329_v5 = vpack.c.bf16 %v2327_v4, %v2327_v4 }
 0x27b   :  { %v2330_v24 = vpack.c.bf16 %v2328_v15, %v2328_v15  ;;  %v5733_v15 = vsub.s32 2, %v5189_v48 }
 0x27d   :  { %2491 = vmatprep.mubr.bf16.mxu1 %v2330_v24  ;;  %v379_v43 = vrot.slane %v5201_v56, %v5733_v15  ;;  %v4727_v24 = vld [vmem:[#allocation11 + $0xc0] sm:$0xff]  }
 0x27e   :  { %2492 = vmatmul.mubr.bf16.vlgmr.msra.gmra.mrb[16].mxu1 %v2329_v5  ;;  %v5344_v5 = vld [vmem:[#allocation8 + $0x8] sm:$0xff]  ;;  %4497 = vmatprep.subr.bf16.mxu0 %v4727_v24  ;;  %v4739_v24 = vld [vmem:[#allocation11 + $0xf0] sm:$0xff]  }
 0x27f   :  { %2503 = vmatpush1.bf16.msra.mxu1 %v5168_v28  ;;  %2534 = vmatprep.mubr.bf16.mxu1 %v2501_v11  ;;  %v5735_v11 = vsub.s32 7, %v5189_v48  ;;  %v427_v16 = vrot.slane %v5344_v5, %v5734_v26  ;;  %v1804_v4 = vadd.f32 %v5287_v9, %v379_v43  ;;  %v4732_v9 = vld [vmem:[#allocation11 + $0x90] sm:$0xff]   ;;  %v4733_v43 = vld [vmem:[#allocation11 + $0xd8] sm:$0xff]  }
 0x280   :  { %2504 = vmatprep.subr.bf16.mxu1 %v5171_v31 }
 0x281   :  { %v431_v21 = vrot.slane %v5344_v5, %v5735_v11  ;;  %v2058_v22 = vmax.f32 %v1804_v4, 0.0  ;;  %v4736_v4 = vld [vmem:[#allocation11 + $0xa0] sm:$0xff]  }
 0x283   :  { %2505 = vmatpush1.bf16.msra.mxu1 %v5175_v34  ;;  %v2500_v12 = vpack.c.bf16 %v2058_v22, %v2058_v22  ;;  %v4737_v22 = vld [vmem:[#allocation11 + $0xe8] sm:$0xff]  }
 0x284   :  { %2506 = vmatprep.subr.bf16.mxu1 %v5178_v37 }
 0x287   :  { %2507 = vmatpush1.bf16.msra.mxu1 %v5181_v40 }
 0x288   :  { %2508 = vmatprep.subr.bf16.mxu1 %v5184_v44 }
 0x28b   :  { %2509 = vmatpush1.bf16.msra.mxu1 %v5187_v47 }
 0x28c   :  { %2510 = vmatprep.subr.bf16.mxu1 %v5192_v51 }
 0x28f   :  { %2511 = vmatpush1.bf16.msra.mxu1 %v5195_v54 }
 0x290   :  { %2512 = vmatprep.subr.bf16.mxu1 %v5203_v57 }
 0x293   :  { %2513 = vmatpush1.bf16.msra.mxu1 %v5208_v60 }
 0x294   :  { %2514 = vmatprep.subr.bf16.mxu1 %v5211_v61 }
 0x297   :  { %2515 = vmatpush1.bf16.msra.mxu1 %v5216_v6  ;;  %v2049_v35 = vpop.f32.mrb[12].mxu1 }
 0x298   :  { %2516 = vmatprep.subr.bf16.mxu1 %v5219_v8  ;;  %v5361_v49 = vadd.f32 %v2049_v35, %v427_v16  ;;  %v2051_v52 = vpop.f32.mrb[13].mxu1  ;;  %v4728_v16 = vld [vmem:[#allocation11 + $0x80] sm:$0xff]   ;;  %v4730_v35 = vld [vmem:[#allocation11 + $0x88] sm:$0xff]  }
 0x299   :  { %v5363_v53 = vadd.f32 %v2051_v52, %v431_v21  ;;  %v2053_v59 = vpop.f32.mrb[14].mxu1  ;;  %v4729_v21 = vld [vmem:[#allocation11 + $0xc8] sm:$0xff]   ;;  %4498 = vmatpush3.bf16.msra.mxu0 %v4728_v16  ;;  %v4731_v52 = vld [vmem:[#allocation11 + $0xd0] sm:$0xff]  }
 0x29a   :  { %v2054_v2 = vpop.f32.mrb[15].mxu1  ;;  %4499 = vmatprep.subr.bf16.mxu0 %v4729_v21  ;;  %v4734_v59 = vld [vmem:[#allocation11 + $0x98] sm:$0xff]   ;;  %v4740_v16 = vld [vmem:[#allocation11 + $0xb0] sm:$0xff]  }
 0x29b   :  { %2517 = vmatpush1.bf16.msra.mxu1 %v5221_v14  ;;  %v4735_v2 = vld [vmem:[#allocation11 + $0xe0] sm:$0xff]   ;;  %v4741_v21 = vld [vmem:[#allocation11 + $0xf8] sm:$0xff]  }
 0x29c   :  { %2518 = vmatprep.subr.bf16.mxu1 %v5225_v20 }
 0x29d   :  { %4500 = vmatpush3.bf16.msra.mxu0 %v4730_v35  ;;  %v4742_v35 = vld [vmem:[#allocation11 + $0xb8] sm:$0xff]  }
 0x29e   :  { %4501 = vmatprep.subr.bf16.mxu0 %v4731_v52 }
 0x29f   :  { %2519 = vmatpush1.bf16.msra.mxu1 %v5228_v27 }
 0x2a0   :  { %2520 = vmatprep.subr.bf16.mxu1 %v5231_v32 }
 0x2a1   :  { %4502 = vmatpush3.bf16.msra.mxu0 %v4732_v9 }
 0x2a2   :  { %4503 = vmatprep.subr.bf16.mxu0 %v4733_v43 }
 0x2a3   :  { %2521 = vmatpush1.bf16.msra.mxu1 %v5234_v36 }
 0x2a4   :  { %2522 = vmatprep.subr.bf16.mxu1 %v5237_v41 }
 0x2a5   :  { %4504 = vmatpush3.bf16.msra.mxu0 %v4734_v59 }
 0x2a6   :  { %4505 = vmatprep.subr.bf16.mxu0 %v4735_v2 }
 0x2a7   :  { %2523 = vmatpush1.bf16.msra.mxu1 %v5240_v45 }
 0x2a8   :  { %2524 = vmatprep.subr.bf16.mxu1 %v5243_v50 }
 0x2a9   :  { %4506 = vmatpush3.bf16.msra.mxu0 %v4736_v4  ;;  %v390_v4 = vsub.s32 5, %v5189_v48 }
 0x2aa   :  { %4507 = vmatprep.subr.bf16.mxu0 %v4737_v22 }
 0x2ab   :  { %2525 = vmatpush1.bf16.msra.mxu1 %v5246_v58  ;;  %v391_v22 = vrot.slane %v5201_v56, %v390_v4 }
 0x2ac   :  { %2526 = vmatprep.subr.bf16.mxu1 %v5249_v63 }
 0x2af   :  { %2527 = vmatpush1.bf16.msra.mxu1 %v5252_v3 }
 0x2b0   :  { %2528 = vmatprep.subr.bf16.mxu1 %v5258_v10 }
 0x2b3   :  { %2529 = vmatpush1.bf16.msra.mxu1 %v5261_v13 }
 0x2b4   :  { %2530 = vmatprep.subr.bf16.mxu1 %v5266_v19 }
 0x2b7   :  { %2531 = vmatpush1.bf16.msra.mxu1 %v5269_v23 }
 0x2b8   :  { %2532 = vmatprep.subr.bf16.mxu1 %v5273_v30 }
 0x2bb   :  { %2533 = vmatpush1.bf16.msra.mxu1 %v5276_v38 }
 0x2be   :  { %2535 = vmatmul.mubr.bf16.vlgmr.msra.gmra.mrb[20].mxu1 %v2500_v12  ;;  %v4738_v12 = vld [vmem:[#allocation11 + $0xa8] sm:$0xff]  }
 0x2bf   :  { %4508 = vmatpush3.bf16.msra.mxu0 %v4738_v12  ;;  %v1847_v12 = vadd.f32 %v5284_v39, %v391_v22  ;;  %v4745_v39 = vld [vmem:[#allocation11 + $0x148] sm:$0xff]   ;;  %v4750_v22 = vld [vmem:[#allocation11 + $0x118] sm:$0xff]  }
 0x2c0   :  { %4509 = vmatprep.subr.bf16.mxu0 %v4739_v24 }
 0x2c3   :  { %4510 = vmatpush3.bf16.msra.mxu0 %v4740_v16 }
 0x2c4   :  { %4511 = vmatprep.subr.bf16.mxu0 %v4741_v21 }
 0x2c7   :  { %4512 = vmatpush3.bf16.msra.mxu0 %v4742_v35 }
 0x2c8   :  { %2718 = vmatprep.subr.bf16.mxu0 %v5164_v25 }
 0x351   :  { %v4491_v52 = vpop.f32.mrb[16].mxu1 }
 0x352   :  { %v4492_v9 = vpop.f32.mrb[17].mxu1 }
 0x353   :  { %v5372_v43 = vadd.f32 %v4492_v9, %v4491_v52  ;;  %v4494_v59 = vpop.f32.mrb[18].mxu1  ;;  %v2061_v9 = vmax.f32 %v1847_v12, 0.0  ;;  %v4751_v12 = vld [vmem:[#allocation11 + $0x160] sm:$0xff]  }
 0x354   :  { %v4495_v2 = vpop.f32.mrb[19].mxu1 }
 0x355   :  { %v2717_v11 = vpack.c.bf16 %v2061_v9, %v2061_v9  ;;  %v4758_v9 = vld [vmem:[#allocation11 + $0x138] sm:$0xff]  }
 0x391   :  { %v2536_v24 = vpop.f32.mrb[20].mxu1 }
 0x392   :  { %v2537_v16 = vadd.f32 %v2536_v24, %v5314_v29  ;;  %v2538_v21 = vpop.f32.mrb[21].mxu1  ;;  %v4752_v24 = vld [vmem:[#allocation11 + $0x120] sm:$0xff]  }
 0x393   :  { %v2539_v25 = vadd.f32 %v2538_v21, %v5317_v42  ;;  %v2540_v35 = vpop.f32.mrb[22].mxu1  ;;  %v4754_v21 = vld [vmem:[#allocation11 + $0x128] sm:$0xff]  }
 0x394   :  { %v2543_v15 = vmax.f32 %v2537_v16, 0.0  ;;  %v2541_v52 = vpop.f32.mrb[23].mxu1  ;;  %v4753_v16 = vld [vmem:[#allocation11 + $0x168] sm:$0xff]   ;;  %v4756_v35 = vld [vmem:[#allocation11 + $0x130] sm:$0xff]  }
 0x395   :  { %v2544_v59 = vmax.f32 %v2539_v25, 0.0  ;;  %v4755_v25 = vld [vmem:[#allocation11 + $0x170] sm:$0xff]   ;;  %v4757_v52 = vld [vmem:[#allocation11 + $0x178] sm:$0xff]  }
 0x396   :  { %v2545_v26 = vpack.c.bf16 %v2543_v15, %v2543_v15  ;;  %v4749_v15 = vld [vmem:[#allocation11 + $0x158] sm:$0xff]  }
 0x397   :  { %v2546_v2 = vpack.c.bf16 %v2544_v59, %v2544_v59  ;;  %v5417_v59 = vld [vmem:[#allocation9 + $0x4] ss:$8 sps:$4 sm:$0xff]  }
 0x399   :  { %2707 = vmatprep.mubr.bf16.mxu0 %v2546_v2  ;;  %v4312_v2 = vld [vmem:[%s5727_s6] ss:$0 sm:$0xff] }
 0x39a   :  { %2708 = vmatmul.mubr.bf16.vlgmr.msra.gmra.mrb[20].mxu0 %v2545_v26  ;;  %v4746_v26 = vld [vmem:[#allocation11 + $0x108] sm:$0xff]  }
 0x39b   :  { %2719 = vmatpush1.bf16.msra.mxu0 %v5168_v28  ;;  %2750 = vmatprep.mubr.bf16.mxu0 %v2717_v11  ;;  %v386_v28 = vsub.s32 4, %v5189_v48  ;;  %v4747_v11 = vld [vmem:[#allocation11 + $0x150] sm:$0xff]  }
 0x39c   :  { %2720 = vmatprep.subr.bf16.mxu0 %v5171_v31 }
 0x39d   :  { %v387_v31 = vrot.slane %v5201_v56, %v386_v28 }
 0x39f   :  { %2721 = vmatpush1.bf16.msra.mxu0 %v5175_v34  ;;  %v1845_v34 = vadd.f32 %v5282_v33, %v387_v31  ;;  %v4748_v33 = vld [vmem:[#allocation11 + $0x110] sm:$0xff]  }
 0x3a0   :  { %2722 = vmatprep.subr.bf16.mxu0 %v5178_v37 }
 0x3a1   :  { %v2060_v37 = vmax.f32 %v1845_v34, 0.0 }
 0x3a3   :  { %2723 = vmatpush1.bf16.msra.mxu0 %v5181_v40  ;;  %v2716_v40 = vpack.c.bf16 %v2060_v37, %v2060_v37  ;;  %v2499_v37 = vadd.f32 %v5372_v43, %v4312_v2 }
 0x3a4   :  { %2724 = vmatprep.subr.bf16.mxu0 %v5184_v44  ;;  %v4743_v44 = vld [vmem:[#allocation11 + $0x140] sm:$0xff]  }
 0x3a5   :  { %4519 = vmatprep.subr.bf16.mxu1 %v4743_v44 }
 0x3a7   :  { %2725 = vmatpush1.bf16.msra.mxu0 %v5187_v47  ;;  %v4744_v47 = vld [vmem:[#allocation11 + $0x100] sm:$0xff]  }
 0x3a8   :  { %2726 = vmatprep.subr.bf16.mxu0 %v5192_v51  ;;  %4520 = vmatpush3.bf16.msra.mxu1 %v4744_v47 }
 0x3a9   :  { %4521 = vmatprep.subr.bf16.mxu1 %v4745_v39 }
 0x3ab   :  { %2727 = vmatpush1.bf16.msra.mxu0 %v5195_v54 }
 0x3ac   :  { %2728 = vmatprep.subr.bf16.mxu0 %v5203_v57  ;;  %4522 = vmatpush3.bf16.msra.mxu1 %v4746_v26  ;;  %v5738_v26 = vsub.s32 7, %v5189_v48 }
 0x3ad   :  { %4523 = vmatprep.subr.bf16.mxu1 %v4747_v11 }
 0x3ae   :  { %v399_v11 = vrot.slane %v5201_v56, %v5738_v26  ;;  %v5435_v56 = vld [vmem:[#allocation9 + $0x14] ss:$8 sps:$4 sm:$0xff]  }
 0x3af   :  { %2729 = vmatpush1.bf16.msra.mxu0 %v5208_v60 }
 0x3b0   :  { %2730 = vmatprep.subr.bf16.mxu0 %v5211_v61  ;;  %4524 = vmatpush3.bf16.msra.mxu1 %v4748_v33  ;;  %v1888_v33 = vadd.f32 %v5296_v1, %v399_v11  ;;  %v5438_v1 = vld [vmem:[#allocation9 + $0x10] ss:$8 sps:$4 sm:$0xff]  }
 0x3b1   :  { %4525 = vmatprep.subr.bf16.mxu1 %v4749_v15 }
 0x3b3   :  { %2731 = vmatpush1.bf16.msra.mxu0 %v5216_v6 }
 0x3b4   :  { %2732 = vmatprep.subr.bf16.mxu0 %v5219_v8  ;;  %4526 = vmatpush3.bf16.msra.mxu1 %v4750_v22 }
 0x3b5   :  { %4527 = vmatprep.subr.bf16.mxu1 %v4751_v12 }
 0x3b7   :  { %2733 = vmatpush1.bf16.msra.mxu0 %v5221_v14 }
 0x3b8   :  { %2734 = vmatprep.subr.bf16.mxu0 %v5225_v20  ;;  %4528 = vmatpush3.bf16.msra.mxu1 %v4752_v24 }
 0x3b9   :  { %4529 = vmatprep.subr.bf16.mxu1 %v4753_v16 }
 0x3bb   :  { %2735 = vmatpush1.bf16.msra.mxu0 %v5228_v27 }
 0x3bc   :  { %2736 = vmatprep.subr.bf16.mxu0 %v5231_v32  ;;  %4530 = vmatpush3.bf16.msra.mxu1 %v4754_v21 }
 0x3bd   :  { %4531 = vmatprep.subr.bf16.mxu1 %v4755_v25  ;;  %v2063_v25 = vmax.f32 %v1888_v33, 0.0 }
 0x3bf   :  { %2737 = vmatpush1.bf16.msra.mxu0 %v5234_v36  ;;  %v2933_v2 = vpack.c.bf16 %v2063_v25, %v2063_v25 }
 0x3c0   :  { %2738 = vmatprep.subr.bf16.mxu0 %v5237_v41  ;;  %4532 = vmatpush3.bf16.msra.mxu1 %v4756_v35 }
 0x3c1   :  { %4533 = vmatprep.subr.bf16.mxu1 %v4757_v52 }
 0x3c3   :  { %2739 = vmatpush1.bf16.msra.mxu0 %v5240_v45 }
 0x3c4   :  { %2740 = vmatprep.subr.bf16.mxu0 %v5243_v50  ;;  %4534 = vmatpush3.bf16.msra.mxu1 %v4758_v9 }
 0x3c5   :  { %2934 = vmatprep.subr.bf16.mxu1 %v5417_v59 }
 0x3c7   :  { %2741 = vmatpush1.bf16.msra.mxu0 %v5246_v58 }
 0x3c8   :  { %2742 = vmatprep.subr.bf16.mxu0 %v5249_v63 }
 0x3cb   :  { %2743 = vmatpush1.bf16.msra.mxu0 %v5252_v3 }
 0x3cc   :  { %2744 = vmatprep.subr.bf16.mxu0 %v5258_v10 }
 0x3cf   :  { %2745 = vmatpush1.bf16.msra.mxu0 %v5261_v13 }
 0x3d0   :  { %2746 = vmatprep.subr.bf16.mxu0 %v5266_v19 }
 0x3d3   :  { %2747 = vmatpush1.bf16.msra.mxu0 %v5269_v23 }
 0x3d4   :  { %2748 = vmatprep.subr.bf16.mxu0 %v5273_v30 }
 0x3d7   :  { %2749 = vmatpush1.bf16.msra.mxu0 %v5276_v38 }
 0x3da   :  { %2751 = vmatmul.mubr.bf16.vlgmr.msra.gmra.mrb[24].mxu0 %v2716_v40 }
 0x46d   :  { %v4513_v31 = vpop.f32.mrb[20].mxu0 }
 0x46e   :  { %v4514_v34 = vpop.f32.mrb[21].mxu0 }
 0x46f   :  { %v4515_v40 = vadd.f32 %v4514_v34, %v4513_v31  ;;  %v4516_v44 = vpop.f32.mrb[22].mxu0  ;;  %v5432_v31 = vld [vmem:[#allocation9] ss:$8 sps:$4 sm:$0xff]   ;;  %v5441_v34 = vld [vmem:[#allocation9 + $0x24] ss:$8 sps:$4 sm:$0xff]  }
 0x470   :  { %v4517_v47 = vpop.f32.mrb[23].mxu0  ;;  %v5450_v44 = vld [vmem:[#allocation9 + $0x30] ss:$8 sps:$4 sm:$0xff]  }
 0x471   :  { %v5424_v39 = vadd.f32 %v4515_v40, %v2499_v37  ;;  %v5444_v37 = vld [vmem:[#allocation9 + $0x20] ss:$8 sps:$4 sm:$0xff]   ;;  %v5447_v40 = vld [vmem:[#allocation9 + $0x34] ss:$8 sps:$4 sm:$0xff]  }
 0x4ad   :  { %v2752_v15 = vpop.f32.mrb[24].mxu0 }
 0x4ae   :  { %v2753_v22 = vadd.f32 %v2752_v15, %v5314_v29  ;;  %v2754_v12 = vpop.f32.mrb[25].mxu0 }
 0x4af   :  { %v2755_v24 = vadd.f32 %v2754_v12, %v5317_v42  ;;  %v2756_v16 = vpop.f32.mrb[26].mxu0  ;;  %v407_v12 = vrot.slane %v5344_v5, %v5198_v55  ;;  %v5496_v55 = vld [vmem:[#allocation9 + $0x44] ss:$8 sps:$4 sm:$0xff]  }
 0x4b0   :  { %v2759_v21 = vmax.f32 %v2753_v22, 0.0  ;;  %v2757_v43 = vpop.f32.mrb[27].mxu0 }
 0x4b1   :  { %v2760_v35 = vmax.f32 %v2755_v24, 0.0  ;;  %v1929_v24 = vadd.f32 %v5291_v46, %v407_v12  ;;  %v5499_v46 = vld [vmem:[#allocation9 + $0x40] ss:$8 sps:$4 sm:$0xff]  }
 0x4b2   :  { %v2761_v9 = vpack.c.bf16 %v2759_v21, %v2759_v21  ;;  %v4777_v12 = vld [vmem:[#allocation11 + $0x248] sm:$0xff]  }
 0x4b3   :  { %v2762_v52 = vpack.c.bf16 %v2760_v35, %v2760_v35 }
 0x4b5   :  { %2923 = vmatprep.mubr.bf16.mxu1 %v2762_v52 }
 0x4b6   :  { %2924 = vmatmul.mubr.bf16.vlgmr.msra.gmra.mrb[24].mxu1 %v2761_v9 }
 0x4b7   :  { %2935 = vmatpush1.bf16.msra.mxu1 %v5432_v31  ;;  %2966 = vmatprep.mubr.bf16.mxu1 %v2933_v2  ;;  %v2065_v2 = vmax.f32 %v1929_v24, 0.0  ;;  %v4778_v24 = vld [vmem:[#allocation11 + $0x208] sm:$0xff]  }
 0x4b8   :  { %2936 = vmatprep.subr.bf16.mxu1 %v5435_v56 }
 0x4bb   :  { %2937 = vmatpush1.bf16.msra.mxu1 %v5438_v1 }
 0x4bc   :  { %2938 = vmatprep.subr.bf16.mxu1 %v5441_v34 }
 0x4bf   :  { %2939 = vmatpush1.bf16.msra.mxu1 %v5444_v37 }
 0x4c0   :  { %2940 = vmatprep.subr.bf16.mxu1 %v5447_v40 }
 0x4c3   :  { %2941 = vmatpush1.bf16.msra.mxu1 %v5450_v44 }
 0x4c4   :  { %2942 = vmatprep.subr.bf16.mxu1 %v5192_v51  ;;  %v4847_v51 = vld [vmem:[#allocation8] sm:$0xff] }
 0x4c7   :  { %2943 = vmatpush1.bf16.msra.mxu1 %v5195_v54  ;;  %v5739_v54 = vsub.s32 6, %v5189_v48 }
 0x4c8   :  { %2944 = vmatprep.subr.bf16.mxu1 %v5203_v57 }
 0x4c9   :  { %v395_v57 = vrot.slane %v4847_v51, %v5739_v54 }
 0x4cb   :  { %2945 = vmatpush1.bf16.msra.mxu1 %v5208_v60  ;;  %v1886_v60 = vadd.f32 %v5294_v62, %v395_v57  ;;  %v4774_v62 = vld [vmem:[#allocation11 + $0x1b8] sm:$0xff]  }
 0x4cc   :  { %2946 = vmatprep.subr.bf16.mxu1 %v5211_v61 }
 0x4cd   :  { %v2062_v61 = vmax.f32 %v1886_v60, 0.0  ;;  %v5502_v60 = vld [vmem:[#allocation9 + $0x54] ss:$8 sps:$4 sm:$0xff]  }
 0x4cf   :  { %2947 = vmatpush1.bf16.msra.mxu1 %v5216_v6  ;;  %v2932_v6 = vpack.c.bf16 %v2062_v61, %v2062_v61  ;;  %v5505_v61 = vld [vmem:[#allocation9 + $0x50] ss:$8 sps:$4 sm:$0xff]  }
 0x4d0   :  { %2948 = vmatprep.subr.bf16.mxu1 %v5219_v8  ;;  %v4759_v8 = vld [vmem:[#allocation11 + $0x1c0] sm:$0xff]  }
 0x4d1   :  { %4541 = vmatprep.subr.bf16.mxu0 %v4759_v8  ;;  %v5511_v8 = vld [vmem:[#allocation9 + $0x60] ss:$8 sps:$4 sm:$0xff]  }
 0x4d3   :  { %2949 = vmatpush1.bf16.msra.mxu1 %v5221_v14  ;;  %v4760_v14 = vld [vmem:[#allocation11 + $0x180] sm:$0xff]  }
 0x4d4   :  { %2950 = vmatprep.subr.bf16.mxu1 %v5225_v20  ;;  %v4761_v20 = vld [vmem:[#allocation11 + $0x1c8] sm:$0xff]   ;;  %4542 = vmatpush3.bf16.msra.mxu0 %v4760_v14  ;;  %v5514_v14 = vld [vmem:[#allocation9 + $0x74] ss:$8 sps:$4 sm:$0xff]  }
 0x4d5   :  { %4543 = vmatprep.subr.bf16.mxu0 %v4761_v20  ;;  %v5517_v20 = vld [vmem:[#allocation9 + $0x70] ss:$8 sps:$4 sm:$0xff]  }
 0x4d7   :  { %2951 = vmatpush1.bf16.msra.mxu1 %v5228_v27  ;;  %v4762_v27 = vld [vmem:[#allocation11 + $0x188] sm:$0xff]  }
 0x4d8   :  { %2952 = vmatprep.subr.bf16.mxu1 %v5231_v32  ;;  %v4763_v32 = vld [vmem:[#allocation11 + $0x1d0] sm:$0xff]   ;;  %4544 = vmatpush3.bf16.msra.mxu0 %v4762_v27  ;;  %v5520_v27 = vld [vmem:[#allocation9 + $0x84] ss:$8 sps:$4 sm:$0xff]  }
 0x4d9   :  { %4545 = vmatprep.subr.bf16.mxu0 %v4763_v32  ;;  %v5523_v32 = vld [vmem:[#allocation9 + $0x80] ss:$8 sps:$4 sm:$0xff]  }
 0x4db   :  { %2953 = vmatpush1.bf16.msra.mxu1 %v5234_v36  ;;  %v4764_v36 = vld [vmem:[#allocation11 + $0x190] sm:$0xff]  }
 0x4dc   :  { %2954 = vmatprep.subr.bf16.mxu1 %v5237_v41  ;;  %v4765_v41 = vld [vmem:[#allocation11 + $0x1d8] sm:$0xff]   ;;  %4546 = vmatpush3.bf16.msra.mxu0 %v4764_v36 }
 0x4dd   :  { %4547 = vmatprep.subr.bf16.mxu0 %v4765_v41  ;;  %v5526_v36 = vld [vmem:[#allocation9 + $0x94] ss:$8 sps:$4 sm:$0xff]   ;;  %v5529_v41 = vld [vmem:[#allocation9 + $0x90] ss:$8 sps:$4 sm:$0xff]  }
 0x4df   :  { %2955 = vmatpush1.bf16.msra.mxu1 %v5240_v45  ;;  %v4766_v45 = vld [vmem:[#allocation11 + $0x198] sm:$0xff]  }
 0x4e0   :  { %2956 = vmatprep.subr.bf16.mxu1 %v5243_v50  ;;  %v4767_v50 = vld [vmem:[#allocation11 + $0x1e0] sm:$0xff]   ;;  %4548 = vmatpush3.bf16.msra.mxu0 %v4766_v45 }
 0x4e1   :  { %4549 = vmatprep.subr.bf16.mxu0 %v4767_v50  ;;  %v5532_v45 = vld [vmem:[#allocation9 + $0xa4] ss:$8 sps:$4 sm:$0xff]   ;;  %v5535_v50 = vld [vmem:[#allocation9 + $0xa0] ss:$8 sps:$4 sm:$0xff]  }
 0x4e3   :  { %2957 = vmatpush1.bf16.msra.mxu1 %v5246_v58  ;;  %v4768_v58 = vld [vmem:[#allocation11 + $0x1a0] sm:$0xff]  }
 0x4e4   :  { %2958 = vmatprep.subr.bf16.mxu1 %v5249_v63  ;;  %v4769_v63 = vld [vmem:[#allocation11 + $0x1e8] sm:$0xff]   ;;  %4550 = vmatpush3.bf16.msra.mxu0 %v4768_v58  ;;  %v5538_v58 = vld [vmem:[#allocation9 + $0xb4] ss:$8 sps:$4 sm:$0xff]  }
 0x4e5   :  { %4551 = vmatprep.subr.bf16.mxu0 %v4769_v63  ;;  %v5541_v63 = vld [vmem:[#allocation9 + $0xb0] ss:$8 sps:$4 sm:$0xff]  }
 0x4e7   :  { %2959 = vmatpush1.bf16.msra.mxu1 %v5252_v3  ;;  %v4770_v3 = vld [vmem:[#allocation11 + $0x1a8] sm:$0xff]  }
 0x4e8   :  { %2960 = vmatprep.subr.bf16.mxu1 %v5258_v10  ;;  %4552 = vmatpush3.bf16.msra.mxu0 %v4770_v3  ;;  %v4771_v10 = vld [vmem:[#allocation11 + $0x1f0] sm:$0xff]   ;;  %v5544_v3 = vld [vmem:[#allocation9 + $0xc4] ss:$8 sps:$4 sm:$0xff]  }
 0x4e9   :  { %4553 = vmatprep.subr.bf16.mxu0 %v4771_v10  ;;  %v5547_v10 = vld [vmem:[#allocation9 + $0xc0] ss:$8 sps:$4 sm:$0xff]  }
 0x4eb   :  { %2961 = vmatpush1.bf16.msra.mxu1 %v5261_v13  ;;  %v4772_v13 = vld [vmem:[#allocation11 + $0x1b0] sm:$0xff]  }
 0x4ec   :  { %2962 = vmatprep.subr.bf16.mxu1 %v5266_v19  ;;  %4554 = vmatpush3.bf16.msra.mxu0 %v4772_v13  ;;  %v4773_v19 = vld [vmem:[#allocation11 + $0x1f8] sm:$0xff]   ;;  %v403_v13 = vrot.slane %v5344_v5, %v5255_v7 }
 0x4ed   :  { %4555 = vmatprep.subr.bf16.mxu0 %v4773_v19  ;;  %v5552_v19 = vld [vmem:[#allocation9 + $0xd4] ss:$8 sps:$4 sm:$0xff]  }
 0x4ef   :  { %2963 = vmatpush1.bf16.msra.mxu1 %v5269_v23 }
 0x4f0   :  { %2964 = vmatprep.subr.bf16.mxu1 %v5273_v30  ;;  %4556 = vmatpush3.bf16.msra.mxu0 %v4774_v62  ;;  %v5555_v62 = vld [vmem:[#allocation9 + $0xd0] ss:$8 sps:$4 sm:$0xff]  }
 0x4f1   :  { %3150 = vmatprep.subr.bf16.mxu0 %v5417_v59 }
 0x4f3   :  { %2965 = vmatpush1.bf16.msra.mxu1 %v5276_v38 }
 0x4f6   :  { %2967 = vmatmul.mubr.bf16.vlgmr.msra.gmra.mrb[28].mxu1 %v2932_v6  ;;  %v5508_v6 = vld [vmem:[#allocation9 + $0x64] ss:$8 sps:$4 sm:$0xff]  }
 0x589   :  { %v4535_v47 = vpop.f32.mrb[24].mxu1 }
 0x58a   :  { %v4536_v26 = vpop.f32.mrb[25].mxu1 }
 0x58b   :  { %v4537_v11 = vadd.f32 %v4536_v26, %v4535_v47  ;;  %v4538_v33 = vpop.f32.mrb[26].mxu1  ;;  %v1927_v47 = vadd.f32 %v5289_v0, %v403_v13  ;;  %v5559_v26 = vld [vmem:[#allocation9 + $0xe4] ss:$8 sps:$4 sm:$0xff]   ;;  %v4779_v0 = vld [vmem:[#allocation11 + $0x250] sm:$0xff]  }
 0x58c   :  { %v4539_v15 = vpop.f32.mrb[27].mxu1  ;;  %v4775_v33 = vld [vmem:[#allocation11 + $0x240] sm:$0xff]  }
 0x58d   :  { %v5482_v22 = vadd.f32 %v4537_v11, %v5424_v39  ;;  %v3149_v39 = vpack.c.bf16 %v2065_v2, %v2065_v2  ;;  %v2064_v11 = vmax.f32 %v1927_v47, 0.0  ;;  %v4776_v15 = vld [vmem:[#allocation11 + $0x200] sm:$0xff]   ;;  %4563 = vmatprep.subr.bf16.mxu1 %v4775_v33  ;;  %v4790_v2 = vld [vmem:[#allocation11 + $0x238] sm:$0xff]  }
 0x58e   :  { %4564 = vmatpush3.bf16.msra.mxu1 %v4776_v15 }
 0x58f   :  { %v3148_v7 = vpack.c.bf16 %v2064_v11, %v2064_v11  ;;  %4565 = vmatprep.subr.bf16.mxu1 %v4777_v12  ;;  %v5740_v11 = vsub.s32 3, %v5189_v48 }
 0x592   :  { %4566 = vmatpush3.bf16.msra.mxu1 %v4778_v24 }
 0x593   :  { %4567 = vmatprep.subr.bf16.mxu1 %v4779_v0 }
 0x5c9   :  { %v2968_v16 = vpop.f32.mrb[28].mxu1 }
 0x5ca   :  { %v2969_v21 = vadd.f32 %v2968_v16, %v5314_v29  ;;  %v2970_v43 = vpop.f32.mrb[29].mxu1  ;;  %v4780_v16 = vld [vmem:[#allocation11 + $0x210] sm:$0xff]  }
 0x5cb   :  { %v2971_v25 = vadd.f32 %v2970_v43, %v5317_v42  ;;  %v2972_v35 = vpop.f32.mrb[30].mxu1  ;;  %4568 = vmatpush3.bf16.msra.mxu1 %v4780_v16  ;;  %v4785_v43 = vld [vmem:[#allocation11 + $0x268] sm:$0xff]  }
 0x5cc   :  { %v2975_v52 = vmax.f32 %v2969_v21, 0.0  ;;  %v2973_v9 = vpop.f32.mrb[31].mxu1  ;;  %v4781_v21 = vld [vmem:[#allocation11 + $0x258] sm:$0xff]   ;;  %v4787_v35 = vld [vmem:[#allocation11 + $0x270] sm:$0xff]  }
 0x5cd   :  { %v2976_v51 = vmax.f32 %v2971_v25, 0.0  ;;  %4569 = vmatprep.subr.bf16.mxu1 %v4781_v21  ;;  %v4786_v25 = vld [vmem:[#allocation11 + $0x228] sm:$0xff]   ;;  %v4789_v9 = vld [vmem:[#allocation11 + $0x278] sm:$0xff]  }
 0x5ce   :  { %v2977_v57 = vpack.c.bf16 %v2975_v52, %v2975_v52  ;;  %v4788_v52 = vld [vmem:[#allocation11 + $0x230] sm:$0xff]  }
 0x5cf   :  { %v2978_v54 = vpack.c.bf16 %v2976_v51, %v2976_v51 }
 0x5d1   :  { %3139 = vmatprep.mubr.bf16.mxu0 %v2978_v54 }
 0x5d2   :  { %3140 = vmatmul.mubr.bf16.vlgmr.msra.gmra.mrb[28].mxu0 %v2977_v57 }
 0x5d3   :  { %3151 = vmatpush1.bf16.msra.mxu0 %v5432_v31  ;;  %3182 = vmatprep.mubr.bf16.mxu0 %v3149_v39 }
 0x5d4   :  { %3152 = vmatprep.subr.bf16.mxu0 %v5435_v56 }
 0x5d7   :  { %3153 = vmatpush1.bf16.msra.mxu0 %v5438_v1 }
 0x5d8   :  { %3154 = vmatprep.subr.bf16.mxu0 %v5441_v34 }
 0x5db   :  { %3155 = vmatpush1.bf16.msra.mxu0 %v5444_v37 }
 0x5dc   :  { %3156 = vmatprep.subr.bf16.mxu0 %v5447_v40 }
 0x5df   :  { %3157 = vmatpush1.bf16.msra.mxu0 %v5450_v44 }
 0x5e0   :  { %3158 = vmatprep.subr.bf16.mxu0 %v5496_v55 }
 0x5e3   :  { %3159 = vmatpush1.bf16.msra.mxu0 %v5499_v46 }
 0x5e4   :  { %3160 = vmatprep.subr.bf16.mxu0 %v5502_v60 }
 0x5e7   :  { %3161 = vmatpush1.bf16.msra.mxu0 %v5505_v61 }
 0x5e8   :  { %3162 = vmatprep.subr.bf16.mxu0 %v5508_v6 }
 0x5eb   :  { %3163 = vmatpush1.bf16.msra.mxu0 %v5511_v8 }
 0x5ec   :  { %3164 = vmatprep.subr.bf16.mxu0 %v5514_v14 }
 0x5ef   :  { %3165 = vmatpush1.bf16.msra.mxu0 %v5517_v20 }
 0x5f0   :  { %3166 = vmatprep.subr.bf16.mxu0 %v5520_v27 }
 0x5f3   :  { %3167 = vmatpush1.bf16.msra.mxu0 %v5523_v32 }
 0x5f4   :  { %3168 = vmatprep.subr.bf16.mxu0 %v5526_v36 }
 0x5f7   :  { %3169 = vmatpush1.bf16.msra.mxu0 %v5529_v41 }
 0x5f8   :  { %3170 = vmatprep.subr.bf16.mxu0 %v5532_v45 }
 0x5fb   :  { %3171 = vmatpush1.bf16.msra.mxu0 %v5535_v50 }
 0x5fc   :  { %3172 = vmatprep.subr.bf16.mxu0 %v5538_v58 }
 0x5ff   :  { %3173 = vmatpush1.bf16.msra.mxu0 %v5541_v63 }
 0x600   :  { %3174 = vmatprep.subr.bf16.mxu0 %v5544_v3 }
 0x603   :  { %3175 = vmatpush1.bf16.msra.mxu0 %v5547_v10 }
 0x604   :  { %3176 = vmatprep.subr.bf16.mxu0 %v5552_v19 }
 0x607   :  { %3177 = vmatpush1.bf16.msra.mxu0 %v5555_v62 }
 0x608   :  { %3178 = vmatprep.subr.bf16.mxu0 %v5559_v26 }
 0x60b   :  { %3179 = vmatpush1.bf16.msra.mxu0 %v5269_v23  ;;  %v4782_v23 = vld [vmem:[#allocation11 + $0x218] sm:$0xff]  }
 0x60c   :  { %3180 = vmatprep.subr.bf16.mxu0 %v5273_v30  ;;  %v4783_v30 = vld [vmem:[#allocation11 + $0x260] sm:$0xff]   ;;  %4570 = vmatpush3.bf16.msra.mxu1 %v4782_v23 }
 0x60d   :  { %4571 = vmatprep.subr.bf16.mxu1 %v4783_v30 }
 0x60f   :  { %3181 = vmatpush1.bf16.msra.mxu0 %v5276_v38  ;;  %v4784_v38 = vld [vmem:[#allocation11 + $0x220] sm:$0xff]  }
 0x610   :  { %4572 = vmatpush3.bf16.msra.mxu1 %v4784_v38 }
 0x611   :  { %4573 = vmatprep.subr.bf16.mxu1 %v4785_v43 }
 0x612   :  { %3183 = vmatmul.mubr.bf16.vlgmr.msra.gmra.mrb[32].mxu0 %v3148_v7  ;;  %v415_v7 = vrot.slane %v5344_v5, %v5740_v11  ;;  %v4794_v11 = vld [vmem:[#allocation11 + $0x288] sm:$0xff]  }
 0x614   :  { %4574 = vmatpush3.bf16.msra.mxu1 %v4786_v25  ;;  %v1970_v33 = vadd.f32 %v5308_v18, %v415_v7  ;;  %v5741_v18 = vsub.s32 2, %v5189_v48  ;;  %v4795_v7 = vld [vmem:[#allocation11 + $0x2d0] sm:$0xff]   ;;  %v4807_v48 = vld [vmem:[#allocation11 + $0x340] sm:$0xff]  }
 0x615   :  { %4575 = vmatprep.subr.bf16.mxu1 %v4787_v35 }
 0x616   :  { %v2067_v30 = vmax.f32 %v1970_v33, 0.0  ;;  %v411_v35 = vrot.slane %v5344_v5, %v5741_v18  ;;  %v4796_v33 = vld [vmem:[#allocation11 + $0x290] sm:$0xff]  }
 0x618   :  { %4576 = vmatpush3.bf16.msra.mxu1 %v4788_v52  ;;  %v3365_v25 = vpack.c.bf16 %v2067_v30, %v2067_v30  ;;  %v1968_v52 = vadd.f32 %v5306_v17, %v411_v35  ;;  %v4793_v17 = vld [vmem:[#allocation11 + $0x2c8] sm:$0xff]   ;;  %v4804_v30 = vld [vmem:[#allocation11 + $0x2b0] sm:$0xff]  }
 0x619   :  { %4577 = vmatprep.subr.bf16.mxu1 %v4789_v9  ;;  %v5607_v9 = vld [vmem:[#allocation9 + $0xe0] ss:$8 sps:$4 sm:$0xff]  }
 0x61c   :  { %4578 = vmatpush3.bf16.msra.mxu1 %v4790_v2  ;;  %v2066_v2 = vmax.f32 %v1968_v52, 0.0 }
 0x61d   :  { %3366 = vmatprep.subr.bf16.mxu1 %v5417_v59 }
 0x6a5   :  { %v4557_v51 = vpop.f32.mrb[28].mxu0 }
 0x6a6   :  { %v4558_v54 = vpop.f32.mrb[29].mxu0 }
 0x6a7   :  { %v4559_v57 = vadd.f32 %v4558_v54, %v4557_v51  ;;  %v4560_v39 = vpop.f32.mrb[30].mxu0  ;;  %v5610_v51 = vld [vmem:[#allocation9 + $0xf4] ss:$8 sps:$4 sm:$0xff]   ;;  %v5613_v54 = vld [vmem:[#allocation9 + $0xf0] ss:$8 sps:$4 sm:$0xff]  }
 0x6a8   :  { %v4561_v13 = vpop.f32.mrb[31].mxu0  ;;  %v4791_v39 = vld [vmem:[#allocation11 + $0x2c0] sm:$0xff]  }
 0x6a9   :  { %v5567_v47 = vadd.f32 %v4559_v57, %v5482_v22  ;;  %v3364_v57 = vpack.c.bf16 %v2066_v2, %v2066_v2  ;;  %v4792_v13 = vld [vmem:[#allocation11 + $0x280] sm:$0xff]   ;;  %4585 = vmatprep.subr.bf16.mxu0 %v4791_v39  ;;  %v5742_v39 = vld [vmem:[#allocation18_spill] sm:$0xff] }
 0x6aa   :  { %4586 = vmatpush3.bf16.msra.mxu0 %v4792_v13 }
 0x6ab   :  { %4587 = vmatprep.subr.bf16.mxu0 %v4793_v17 }
 0x6ae   :  { %4588 = vmatpush3.bf16.msra.mxu0 %v4794_v11 }
 0x6af   :  { %4589 = vmatprep.subr.bf16.mxu0 %v4795_v7 }
 0x6b2   :  { %4590 = vmatpush3.bf16.msra.mxu0 %v4796_v33 }
 0x6e5   :  { %v3184_v15 = vpop.f32.mrb[32].mxu0 }
 0x6e6   :  { %v3185_v12 = vadd.f32 %v3184_v15, %v5314_v29  ;;  %v3186_v24 = vpop.f32.mrb[33].mxu0  ;;  %v4797_v15 = vld [vmem:[#allocation11 + $0x2d8] sm:$0xff]  }
 0x6e7   :  { %v3187_v0 = vadd.f32 %v3186_v24, %v5317_v42  ;;  %v3188_v16 = vpop.f32.mrb[34].mxu0  ;;  %4591 = vmatprep.subr.bf16.mxu0 %v4797_v15  ;;  %v4799_v24 = vld [vmem:[#allocation11 + $0x2e0] sm:$0xff]  }
 0x6e8   :  { %v3191_v21 = vmax.f32 %v3185_v12, 0.0  ;;  %v3189_v23 = vpop.f32.mrb[35].mxu0  ;;  %v4798_v12 = vld [vmem:[#allocation11 + $0x298] sm:$0xff]   ;;  %v4801_v16 = vld [vmem:[#allocation11 + $0x2e8] sm:$0xff]  }
 0x6e9   :  { %v3192_v38 = vmax.f32 %v3187_v0, 0.0  ;;  %4592 = vmatpush3.bf16.msra.mxu0 %v4798_v12  ;;  %v4800_v0 = vld [vmem:[#allocation11 + $0x2a0] sm:$0xff]   ;;  %v4803_v23 = vld [vmem:[#allocation11 + $0x2f0] sm:$0xff]  }
 0x6ea   :  { %v3193_v22 = vpack.c.bf16 %v3191_v21, %v3191_v21  ;;  %4593 = vmatprep.subr.bf16.mxu0 %v4799_v24  ;;  %v4802_v21 = vld [vmem:[#allocation11 + $0x2a8] sm:$0xff]  }
 0x6eb   :  { %v3194_v43 = vpack.c.bf16 %v3192_v38, %v3192_v38  ;;  %v4805_v38 = vld [vmem:[#allocation11 + $0x2f8] sm:$0xff]  }
 0x6ed   :  { %3355 = vmatprep.mubr.bf16.mxu1 %v3194_v43  ;;  %4594 = vmatpush3.bf16.msra.mxu0 %v4800_v0  ;;  %v4806_v43 = vld [vmem:[#allocation11 + $0x2b8] sm:$0xff]  }
 0x6ee   :  { %3356 = vmatmul.mubr.bf16.vlgmr.msra.gmra.mrb[32].mxu1 %v3193_v22  ;;  %4595 = vmatprep.subr.bf16.mxu0 %v4801_v16 }
 0x6ef   :  { %3367 = vmatpush1.bf16.msra.mxu1 %v5432_v31  ;;  %3398 = vmatprep.mubr.bf16.mxu1 %v3365_v25 }
 0x6f0   :  { %3368 = vmatprep.subr.bf16.mxu1 %v5435_v56 }
 0x6f1   :  { %4596 = vmatpush3.bf16.msra.mxu0 %v4802_v21 }
 0x6f2   :  { %4597 = vmatprep.subr.bf16.mxu0 %v4803_v23 }
 0x6f3   :  { %3369 = vmatpush1.bf16.msra.mxu1 %v5438_v1 }
 0x6f4   :  { %3370 = vmatprep.subr.bf16.mxu1 %v5441_v34 }
 0x6f5   :  { %4598 = vmatpush3.bf16.msra.mxu0 %v4804_v30  ;;  %v5743_v30 = vld [vmem:[#allocation17_spill] sm:$0xff] }
 0x6f6   :  { %4599 = vmatprep.subr.bf16.mxu0 %v4805_v38 }
 0x6f7   :  { %3371 = vmatpush1.bf16.msra.mxu1 %v5444_v37 }
 0x6f8   :  { %3372 = vmatprep.subr.bf16.mxu1 %v5447_v40 }
 0x6f9   :  { %4600 = vmatpush3.bf16.msra.mxu0 %v4806_v43 }
 0x6fa   :  { %3582 = vmatprep.subr.bf16.mxu0 %v5417_v59 }
 0x6fb   :  { %3373 = vmatpush1.bf16.msra.mxu1 %v5450_v44 }
 0x6fc   :  { %3374 = vmatprep.subr.bf16.mxu1 %v5496_v55 }
 0x6ff   :  { %3375 = vmatpush1.bf16.msra.mxu1 %v5499_v46 }
 0x700   :  { %3376 = vmatprep.subr.bf16.mxu1 %v5502_v60 }
 0x703   :  { %3377 = vmatpush1.bf16.msra.mxu1 %v5505_v61 }
 0x704   :  { %3378 = vmatprep.subr.bf16.mxu1 %v5508_v6 }
 0x707   :  { %3379 = vmatpush1.bf16.msra.mxu1 %v5511_v8 }
 0x708   :  { %3380 = vmatprep.subr.bf16.mxu1 %v5514_v14 }
 0x70b   :  { %3381 = vmatpush1.bf16.msra.mxu1 %v5517_v20 }
 0x70c   :  { %3382 = vmatprep.subr.bf16.mxu1 %v5520_v27 }
 0x70f   :  { %3383 = vmatpush1.bf16.msra.mxu1 %v5523_v32 }
 0x710   :  { %3384 = vmatprep.subr.bf16.mxu1 %v5526_v36 }
 0x713   :  { %3385 = vmatpush1.bf16.msra.mxu1 %v5529_v41 }
 0x714   :  { %3386 = vmatprep.subr.bf16.mxu1 %v5532_v45 }
 0x717   :  { %3387 = vmatpush1.bf16.msra.mxu1 %v5535_v50 }
 0x718   :  { %3388 = vmatprep.subr.bf16.mxu1 %v5538_v58 }
 0x71b   :  { %3389 = vmatpush1.bf16.msra.mxu1 %v5541_v63 }
 0x71c   :  { %3390 = vmatprep.subr.bf16.mxu1 %v5544_v3 }
 0x71f   :  { %3391 = vmatpush1.bf16.msra.mxu1 %v5547_v10 }
 0x720   :  { %3392 = vmatprep.subr.bf16.mxu1 %v5552_v19 }
 0x723   :  { %3393 = vmatpush1.bf16.msra.mxu1 %v5555_v62 }
 0x724   :  { %3394 = vmatprep.subr.bf16.mxu1 %v5559_v26 }
 0x727   :  { %3395 = vmatpush1.bf16.msra.mxu1 %v5607_v9 }
 0x728   :  { %3396 = vmatprep.subr.bf16.mxu1 %v5610_v51 }
 0x72b   :  { %3397 = vmatpush1.bf16.msra.mxu1 %v5613_v54 }
 0x72c   :  { %4607 = vmatprep.subr.bf16.mxu1 %v4807_v48 }
 0x72e   :  { %3399 = vmatmul.mubr.bf16.vlgmr.msra.gmra.mrb[36].mxu1 %v3364_v57  ;;  %v423_v57 = vrot.slane %v5344_v5, %v390_v4  ;;  %v419_v4 = vrot.slane %v5344_v5, %v386_v28  ;;  %v4809_v5 = vld [vmem:[#allocation11 + $0x348] sm:$0xff]  }
 0x72f   :  { %v4810_v28 = vld [vmem:[#allocation11 + $0x308] sm:$0xff]  }
 0x730   :  { %v2011_v13 = vadd.f32 %v5742_v39, %v423_v57  ;;  %v2009_v38 = vadd.f32 %v5743_v30, %v419_v4  ;;  %v4814_v57 = vld [vmem:[#allocation11 + $0x318] sm:$0xff]   ;;  %v4815_v39 = vld [vmem:[#allocation11 + $0x360] sm:$0xff]  }
 0x732   :  { %v2069_v0 = vmax.f32 %v2011_v13, 0.0  ;;  %v2068_v43 = vmax.f32 %v2009_v38, 0.0  ;;  %v4816_v13 = vld [vmem:[#allocation11 + $0x320] sm:$0xff]  }
 0x734   :  { %v3581_v23 = vpack.c.bf16 %v2069_v0, %v2069_v0 }
 0x7c1   :  { %v4579_v22 = vpop.f32.mrb[32].mxu1 }
 0x7c2   :  { %v4580_v25 = vpop.f32.mrb[33].mxu1 }
 0x7c3   :  { %v4581_v18 = vadd.f32 %v4580_v25, %v4579_v22  ;;  %v4582_v35 = vpop.f32.mrb[34].mxu1  ;;  %v3580_v22 = vpack.c.bf16 %v2068_v43, %v2068_v43  ;;  %v4808_v25 = vld [vmem:[#allocation11 + $0x300] sm:$0xff]  }
 0x7c4   :  { %v4583_v52 = vpop.f32.mrb[35].mxu1  ;;  %4608 = vmatpush3.bf16.msra.mxu1 %v4808_v25  ;;  %v4812_v35 = vld [vmem:[#allocation11 + $0x310] sm:$0xff]  }
 0x7c5   :  { %v5618_v2 = vadd.f32 %v4581_v18, %v5567_v47  ;;  %4609 = vmatprep.subr.bf16.mxu1 %v4809_v5  ;;  %v4811_v18 = vld [vmem:[#allocation11 + $0x350] sm:$0xff]   ;;  %v4813_v52 = vld [vmem:[#allocation11 + $0x358] sm:$0xff]   ;;  %v2071_v5 = vmax.f32 %v5363_v53, 0.0  ;;  %v2070_v53 = vmax.f32 %v5361_v49, 0.0 }
 0x7c6   :  { %v4830_v49 = vld [vmem:[#allocation11 + $0x398] sm:$0xff]  }
 0x7c8   :  { %4610 = vmatpush3.bf16.msra.mxu1 %v4810_v28 }
 0x7c9   :  { %4611 = vmatprep.subr.bf16.mxu1 %v4811_v18 }
 0x7cc   :  { %4612 = vmatpush3.bf16.msra.mxu1 %v4812_v35  ;;  %v3797_v35 = vpack.c.bf16 %v2071_v5, %v2071_v5 }
 0x7cd   :  { %4613 = vmatprep.subr.bf16.mxu1 %v4813_v52 }
 0x7d0   :  { %4614 = vmatpush3.bf16.msra.mxu1 %v4814_v57 }
 0x7d1   :  { %4615 = vmatprep.subr.bf16.mxu1 %v4815_v39 }
 0x7d4   :  { %4616 = vmatpush3.bf16.msra.mxu1 %v4816_v13 }
 0x801   :  { %v3400_v17 = vpop.f32.mrb[36].mxu1 }
 0x802   :  { %v3401_v11 = vadd.f32 %v3400_v17, %v5314_v29  ;;  %v3402_v7 = vpop.f32.mrb[37].mxu1  ;;  %v4817_v17 = vld [vmem:[#allocation11 + $0x368] sm:$0xff]  }
 0x803   :  { %v3403_v33 = vadd.f32 %v3402_v7, %v5317_v42  ;;  %v3404_v15 = vpop.f32.mrb[38].mxu1  ;;  %4617 = vmatprep.subr.bf16.mxu1 %v4817_v17  ;;  %v4819_v7 = vld [vmem:[#allocation11 + $0x370] sm:$0xff]  }
 0x804   :  { %v3407_v12 = vmax.f32 %v3401_v11, 0.0  ;;  %v3405_v24 = vpop.f32.mrb[39].mxu1  ;;  %v4818_v11 = vld [vmem:[#allocation11 + $0x328] sm:$0xff]   ;;  %v4821_v15 = vld [vmem:[#allocation11 + $0x378] sm:$0xff]  }
 0x805   :  { %v3408_v16 = vmax.f32 %v3403_v33, 0.0  ;;  %4618 = vmatpush3.bf16.msra.mxu1 %v4818_v11  ;;  %v4820_v33 = vld [vmem:[#allocation11 + $0x330] sm:$0xff]  }
 0x806   :  { %v3409_v47 = vpack.c.bf16 %v3407_v12, %v3407_v12  ;;  %4619 = vmatprep.subr.bf16.mxu1 %v4819_v7  ;;  %v4822_v12 = vld [vmem:[#allocation11 + $0x338] sm:$0xff]  }
 0x807   :  { %v3410_v21 = vpack.c.bf16 %v3408_v16, %v3408_v16 }
 0x809   :  { %3571 = vmatprep.mubr.bf16.mxu0 %v3410_v21  ;;  %4620 = vmatpush3.bf16.msra.mxu1 %v4820_v33 }
 0x80a   :  { %3572 = vmatmul.mubr.bf16.vlgmr.msra.gmra.mrb[36].mxu0 %v3409_v47  ;;  %4621 = vmatprep.subr.bf16.mxu1 %v4821_v15 }
 0x80b   :  { %3583 = vmatpush1.bf16.msra.mxu0 %v5432_v31  ;;  %3614 = vmatprep.mubr.bf16.mxu0 %v3581_v23 }
 0x80c   :  { %3584 = vmatprep.subr.bf16.mxu0 %v5435_v56 }
 0x80d   :  { %4622 = vmatpush3.bf16.msra.mxu1 %v4822_v12 }
 0x80e   :  { %3798 = vmatprep.subr.bf16.mxu1 %v5417_v59 }
 0x80f   :  { %3585 = vmatpush1.bf16.msra.mxu0 %v5438_v1 }
 0x810   :  { %3586 = vmatprep.subr.bf16.mxu0 %v5441_v34 }
 0x813   :  { %3587 = vmatpush1.bf16.msra.mxu0 %v5444_v37 }
 0x814   :  { %3588 = vmatprep.subr.bf16.mxu0 %v5447_v40 }
 0x817   :  { %3589 = vmatpush1.bf16.msra.mxu0 %v5450_v44 }
 0x818   :  { %3590 = vmatprep.subr.bf16.mxu0 %v5496_v55 }
 0x81b   :  { %3591 = vmatpush1.bf16.msra.mxu0 %v5499_v46 }
 0x81c   :  { %3592 = vmatprep.subr.bf16.mxu0 %v5502_v60 }
 0x81f   :  { %3593 = vmatpush1.bf16.msra.mxu0 %v5505_v61 }
 0x820   :  { %3594 = vmatprep.subr.bf16.mxu0 %v5508_v6 }
 0x823   :  { %3595 = vmatpush1.bf16.msra.mxu0 %v5511_v8 }
 0x824   :  { %3596 = vmatprep.subr.bf16.mxu0 %v5514_v14 }
 0x827   :  { %3597 = vmatpush1.bf16.msra.mxu0 %v5517_v20 }
 0x828   :  { %3598 = vmatprep.subr.bf16.mxu0 %v5520_v27 }
 0x82b   :  { %3599 = vmatpush1.bf16.msra.mxu0 %v5523_v32 }
 0x82c   :  { %3600 = vmatprep.subr.bf16.mxu0 %v5526_v36 }
 0x82f   :  { %3601 = vmatpush1.bf16.msra.mxu0 %v5529_v41 }
 0x830   :  { %3602 = vmatprep.subr.bf16.mxu0 %v5532_v45 }
 0x833   :  { %3603 = vmatpush1.bf16.msra.mxu0 %v5535_v50 }
 0x834   :  { %3604 = vmatprep.subr.bf16.mxu0 %v5538_v58 }
 0x837   :  { %3605 = vmatpush1.bf16.msra.mxu0 %v5541_v63 }
 0x838   :  { %3606 = vmatprep.subr.bf16.mxu0 %v5544_v3 }
 0x83b   :  { %3607 = vmatpush1.bf16.msra.mxu0 %v5547_v10 }
 0x83c   :  { %3608 = vmatprep.subr.bf16.mxu0 %v5552_v19 }
 0x83f   :  { %3609 = vmatpush1.bf16.msra.mxu0 %v5555_v62 }
 0x840   :  { %3610 = vmatprep.subr.bf16.mxu0 %v5559_v26 }
 0x843   :  { %3611 = vmatpush1.bf16.msra.mxu0 %v5607_v9 }
 0x844   :  { %3612 = vmatprep.subr.bf16.mxu0 %v5610_v51 }
 0x847   :  { %3613 = vmatpush1.bf16.msra.mxu0 %v5613_v54 }
 0x84a   :  { %3615 = vmatmul.mubr.bf16.vlgmr.msra.gmra.mrb[40].mxu0 %v3580_v22 }
 0x8dd   :  { %v4601_v24 = vpop.f32.mrb[36].mxu0 }
 0x8de   :  { %v4602_v0 = vpop.f32.mrb[37].mxu0 }
 0x8df   :  { %v4603_v16 = vadd.f32 %v4602_v0, %v4601_v24  ;;  %v4604_v21 = vpop.f32.mrb[38].mxu0 }
 0x8e0   :  { %v4605_v47 = vpop.f32.mrb[39].mxu0 }
 0x8e1   :  { %v5663_v23 = vadd.f32 %v4603_v16, %v5618_v2 }
 0x91d   :  { %v3616_v4 = vpop.f32.mrb[40].mxu0 }
 0x91e   :  { %v3617_v30 = vadd.f32 %v3616_v4, %v5314_v29  ;;  %v3618_v38 = vpop.f32.mrb[41].mxu0 }
 0x91f   :  { %v3619_v43 = vadd.f32 %v3618_v38, %v5317_v42  ;;  %v3620_v22 = vpop.f32.mrb[42].mxu0 }
 0x920   :  { %v3623_v48 = vmax.f32 %v3617_v30, 0.0  ;;  %v3621_v25 = vpop.f32.mrb[43].mxu0 }
 0x921   :  { %v3624_v59 = vmax.f32 %v3619_v43, 0.0 }
 0x922   :  { %v3625_v18 = vpack.c.bf16 %v3623_v48, %v3623_v48 }
 0x923   :  { %v3626_v28 = vpack.c.bf16 %v3624_v59, %v3624_v59 }
 0x925   :  { %3787 = vmatprep.mubr.bf16.mxu1 %v3626_v28 }
 0x926   :  { %3788 = vmatmul.mubr.bf16.vlgmr.msra.gmra.mrb[40].mxu1 %v3625_v18 }
 0x927   :  { %3799 = vmatpush1.bf16.msra.mxu1 %v5432_v31  ;;  %3830 = vmatprep.mubr.bf16.mxu1 %v3797_v35  ;;  %v3796_v31 = vpack.c.bf16 %v2070_v53, %v2070_v53 }
 0x928   :  { %3800 = vmatprep.subr.bf16.mxu1 %v5435_v56  ;;  %v4823_v56 = vld [vmem:[#allocation11 + $0x3c0] sm:$0xff]  }
 0x929   :  { %4629 = vmatprep.subr.bf16.mxu0 %v4823_v56 }
 0x92b   :  { %3801 = vmatpush1.bf16.msra.mxu1 %v5438_v1  ;;  %v4824_v1 = vld [vmem:[#allocation11 + $0x380] sm:$0xff]  }
 0x92c   :  { %3802 = vmatprep.subr.bf16.mxu1 %v5441_v34  ;;  %v4825_v34 = vld [vmem:[#allocation11 + $0x3c8] sm:$0xff]   ;;  %4630 = vmatpush3.bf16.msra.mxu0 %v4824_v1 }
 0x92d   :  { %4631 = vmatprep.subr.bf16.mxu0 %v4825_v34 }
 0x92f   :  { %3803 = vmatpush1.bf16.msra.mxu1 %v5444_v37  ;;  %v4826_v37 = vld [vmem:[#allocation11 + $0x388] sm:$0xff]  }
 0x930   :  { %3804 = vmatprep.subr.bf16.mxu1 %v5447_v40  ;;  %v4827_v40 = vld [vmem:[#allocation11 + $0x3d0] sm:$0xff]   ;;  %4632 = vmatpush3.bf16.msra.mxu0 %v4826_v37 }
 0x931   :  { %4633 = vmatprep.subr.bf16.mxu0 %v4827_v40 }
 0x933   :  { %3805 = vmatpush1.bf16.msra.mxu1 %v5450_v44  ;;  %v4828_v44 = vld [vmem:[#allocation11 + $0x390] sm:$0xff]  }
 0x934   :  { %3806 = vmatprep.subr.bf16.mxu1 %v5496_v55  ;;  %v4829_v55 = vld [vmem:[#allocation11 + $0x3d8] sm:$0xff]   ;;  %4634 = vmatpush3.bf16.msra.mxu0 %v4828_v44 }
 0x935   :  { %4635 = vmatprep.subr.bf16.mxu0 %v4829_v55 }
 0x937   :  { %3807 = vmatpush1.bf16.msra.mxu1 %v5499_v46  ;;  %v4831_v46 = vld [vmem:[#allocation11 + $0x3e0] sm:$0xff]  }
 0x938   :  { %3808 = vmatprep.subr.bf16.mxu1 %v5502_v60  ;;  %4636 = vmatpush3.bf16.msra.mxu0 %v4830_v49  ;;  %v4832_v60 = vld [vmem:[#allocation11 + $0x3a0] sm:$0xff]  }
 0x939   :  { %4637 = vmatprep.subr.bf16.mxu0 %v4831_v46 }
 0x93b   :  { %3809 = vmatpush1.bf16.msra.mxu1 %v5505_v61  ;;  %v4833_v61 = vld [vmem:[#allocation11 + $0x3e8] sm:$0xff]  }
 0x93c   :  { %3810 = vmatprep.subr.bf16.mxu1 %v5508_v6  ;;  %4638 = vmatpush3.bf16.msra.mxu0 %v4832_v60  ;;  %v4834_v6 = vld [vmem:[#allocation11 + $0x3a8] sm:$0xff]  }
 0x93d   :  { %4639 = vmatprep.subr.bf16.mxu0 %v4833_v61 }
 0x93f   :  { %3811 = vmatpush1.bf16.msra.mxu1 %v5511_v8  ;;  %v4835_v8 = vld [vmem:[#allocation11 + $0x3f0] sm:$0xff]  }
 0x940   :  { %3812 = vmatprep.subr.bf16.mxu1 %v5514_v14  ;;  %4640 = vmatpush3.bf16.msra.mxu0 %v4834_v6  ;;  %v4836_v14 = vld [vmem:[#allocation11 + $0x3b0] sm:$0xff]  }
 0x941   :  { %4641 = vmatprep.subr.bf16.mxu0 %v4835_v8 }
 0x943   :  { %3813 = vmatpush1.bf16.msra.mxu1 %v5517_v20  ;;  %v4837_v20 = vld [vmem:[#allocation11 + $0x3f8] sm:$0xff]  }
 0x944   :  { %3814 = vmatprep.subr.bf16.mxu1 %v5520_v27  ;;  %4642 = vmatpush3.bf16.msra.mxu0 %v4836_v14  ;;  %v4838_v27 = vld [vmem:[#allocation11 + $0x3b8] sm:$0xff]  }
 0x945   :  { %4643 = vmatprep.subr.bf16.mxu0 %v4837_v20 }
 0x947   :  { %3815 = vmatpush1.bf16.msra.mxu1 %v5523_v32 }
 0x948   :  { %3816 = vmatprep.subr.bf16.mxu1 %v5526_v36  ;;  %4644 = vmatpush3.bf16.msra.mxu0 %v4838_v27 }
 0x94b   :  { %3817 = vmatpush1.bf16.msra.mxu1 %v5529_v41 }
 0x94c   :  { %3818 = vmatprep.subr.bf16.mxu1 %v5532_v45 }
 0x94f   :  { %3819 = vmatpush1.bf16.msra.mxu1 %v5535_v50 }
 0x950   :  { %3820 = vmatprep.subr.bf16.mxu1 %v5538_v58 }
 0x953   :  { %3821 = vmatpush1.bf16.msra.mxu1 %v5541_v63 }
 0x954   :  { %3822 = vmatprep.subr.bf16.mxu1 %v5544_v3 }
 0x957   :  { %3823 = vmatpush1.bf16.msra.mxu1 %v5547_v10 }
 0x958   :  { %3824 = vmatprep.subr.bf16.mxu1 %v5552_v19 }
 0x95b   :  { %3825 = vmatpush1.bf16.msra.mxu1 %v5555_v62 }
 0x95c   :  { %3826 = vmatprep.subr.bf16.mxu1 %v5559_v26 }
 0x95f   :  { %3827 = vmatpush1.bf16.msra.mxu1 %v5607_v9 }
 0x960   :  { %3828 = vmatprep.subr.bf16.mxu1 %v5610_v51 }
 0x963   :  { %3829 = vmatpush1.bf16.msra.mxu1 %v5613_v54 }
 0x966   :  { %3831 = vmatmul.mubr.bf16.vlgmr.msra.gmra.mrb[44].mxu1 %v3796_v31 }
 0x9f9   :  { %v4623_v32 = vpop.f32.mrb[40].mxu1 }
 0x9fa   :  { %v4624_v36 = vpop.f32.mrb[41].mxu1 }
 0x9fb   :  { %v4625_v41 = vadd.f32 %v4624_v36, %v4623_v32  ;;  %v4626_v45 = vpop.f32.mrb[42].mxu1 }
 0x9fc   :  { %v4627_v50 = vpop.f32.mrb[43].mxu1 }
 0x9fd   :  { %v3795_v58 = vadd.f32 %v4625_v41, %v5663_v23 }
 0xa39   :  { %v3832_v63 = vpop.f32.mrb[44].mxu1 }
 0xa3a   :  { %v3833_v3 = vadd.f32 %v3832_v63, %v5314_v29  ;;  %v3834_v10 = vpop.f32.mrb[45].mxu1  ;;  %v4473_v29 = vld [vmem:[%s5728_s7] ss:$0 sm:$0xff] }
 0xa3b   :  { %v3835_v19 = vadd.f32 %v3834_v10, %v5317_v42  ;;  %v3836_v62 = vpop.f32.mrb[46].mxu1 }
 0xa3c   :  { %v3839_v26 = vmax.f32 %v3833_v3, 0.0  ;;  %v3837_v9 = vpop.f32.mrb[47].mxu1 }
 0xa3d   :  { %v3840_v51 = vmax.f32 %v3835_v19, 0.0 }
 0xa3e   :  { %v3841_v2 = vpack.c.bf16 %v3839_v26, %v3839_v26 }
 0xa3f   :  { %v3842_v54 = vpack.c.bf16 %v3840_v51, %v3840_v51 }
 0xa41   :  { %4003 = vmatprep.mubr.bf16.mxu0 %v3842_v54 }
 0xa42   :  { %4004 = vmatmul.mubr.bf16.vlgmr.msra.gmra.mrb[44].mxu0 %v3841_v2 }
 0xb15   :  { %v4645_v52 = vpop.f32.mrb[44].mxu0 }
 0xb16   :  { %v4646_v57 = vpop.f32.mrb[45].mxu0 }
 0xb17   :  { %v4647_v39 = vadd.f32 %v4646_v57, %v4645_v52  ;;  %v4648_v13 = vpop.f32.mrb[46].mxu0 }
 0xb18   :  { %v4649_v17 = vpop.f32.mrb[47].mxu0 }
 0xb19   :  { %v4011_v11 = vadd.f32 %v4647_v39, %v3795_v58 }
 0xb1b   :  { %4012 = vst [vmem:[#allocation12] sm:$0xf] %v4011_v11  ;;  %v4020_v42 = vmul.f32 %v4473_v29, %v4011_v11 }
 0xb1d   :  { %v4022_v7 = vsel %vm4021_vm0, %v4020_v42, 0.0 }
 0xb1e   :  { %4023 = vadd.xlane.f32.xlu0 %v4022_v7 }
 0xb1f   :  { %4993 = shalt.err (!%p4990_p2)
}
 0xb20   :  { %s4994_s7 = scalar_lea.hbm %s5730_s9, 64 }
 0xb21   :  { %p4995_p3 = scmp.ne.s32.totalorder %s5730_s9, %s4994_s7  ;;  %p4998_p4 = scmp.lt.u32.totalorder %s4994_s7, %s5730_s9 }
 0xb23   :  { %p5000_p5 = pnand %p4998_p4, %p4995_p3 }
 0xb25   :  { %5003 = shalt.err (!%p5000_p5)
}
 0xb26   :  { %4044 = dma.vmem_to_hbm [thread:$0]  %s4042_s17, 64, %s5730_s9, [#allocation5]   ;;  %v4474_v33 = vld [vmem:[#allocation2] ss:$0 sm:$0xff]  ;;  %vm4033_vm1 = vcmask 3072  }
 0xbab   :  { %v4024_v15 = vpop.xlane.xlu0 %4023 }
 0xbac   :  { %v4032_v12 = vadd.f32 %v4474_v33, %v4024_v15 }
 0xbae   :  { %4034 = vst.msk [vmem:[%s5731_s10] sm:$0xf] %vm4033_vm1, %v4032_v12 }
 0xbaf   :  { %5010 = dma.done.wait [#allocation5], 64  }
 0xbb0   :  { %5011 = vsyncadd [#allocation5], 4294967232 }
 0xbb1   :  { %4052 = vsyncpa [#allocation4], 1 }
 0xbb2   :  { %4053 = vsyncpa [#allocation7], 1 }
 0xbb3   :  { %4054 = vsyncpa [#allocation10], 1 }
 0xbb4   :  { %4055 = vsyncpa [#allocation5], 1 }

</bundles_post_ra>
